<compile_context>
chip_gen: v5e
topology: v5e:2x2
jax: 0.10.0
libtpu: 0.0.40
codegen_flags: <defaults>
</compile_context>

<pallas_src>
import functools
import numpy as np
import jax
import jax.numpy as jnp
from jax.experimental import pallas as pl
from jax.experimental.pallas import tpu as pltpu

BN_EPS = 1e-5
ROW_TILE = 256            # output-row tile (N*Ho*Wo) for the conv matmul kernel
EW_TILE = 256             # row tile of 128-lane-flattened work (elementwise/pool)
VMEM_LIMIT_BYTES = 32 * 1024 * 1024   # explicit scoped-VMEM cap (safe v5e/v6e/v7x)

# MXU input dtype for the conv matmuls. On v6e/v7x flip to jnp.bfloat16 (halves
# A/B DMA bytes, 2x MXU rate; accumulation stays f32). Kept f32 here so the
# check against the f32 reference stays tight and because v5e's VPU/EUP have no
# bf16 path anyway.
MXU_DTYPE = jnp.float32


def _round_up(x, m):
    return (x + m - 1) // m * m


def _cp(*sems):
    return pltpu.CompilerParams(dimension_semantics=sems,
                                vmem_limit_bytes=VMEM_LIMIT_BYTES)


# ----------------------------- Pallas kernels ------------------------------

def _conv_stats_kernel(a_ref, w_ref, y_ref, s1_ref, s2_ref, acc_ref):
    """(tm, Cin) tap block x (Cin, Cout) tap weight, accumulated over the tap
    grid axis; on the last tap the finished (tm, Cout) tile is written out
    together with its per-channel partial sum / sum-of-squares (fused BN stats)."""
    s = pl.program_id(1)

    @pl.when(s == 0)
    def _():
        acc_ref[...] = jnp.zeros_like(acc_ref)

    acc_ref[...] += jnp.dot(a_ref[...], w_ref[...],
                            preferred_element_type=jnp.float32)

    @pl.when(s == pl.num_programs(1) - 1)
    def _():
        y = acc_ref[...]
        y_ref[...] = y
        s1_ref[...] = jnp.sum(y, axis=0, keepdims=True)
        s2_ref[...] = jnp.sum(y * y, axis=0, keepdims=True)


def _affine_act_kernel(x_ref, scale_ref, shift_ref, o_ref, *, act):
    # fused BatchNorm affine (precomputed scale/shift) + activation
    y = x_ref[...] * scale_ref[...] + shift_ref[...]
    if act == "relu":
        y = jnp.maximum(y, 0.0)
    elif act == "silu":
        y = y * jax.nn.sigmoid(y)
    o_ref[...] = y


def _pool_kernel(*refs, op, n_taps):
    # balanced-tree reduce of n_taps lane-dense window taps
    o_ref = refs[n_taps]
    vals = [refs[i][...] for i in range(n_taps)]
    while len(vals) > 1:
        nxt = [vals[k] + vals[k + 1] if op == "mean"
               else jnp.maximum(vals[k], vals[k + 1])
               for k in range(0, len(vals) - 1, 2)]
        if len(vals) % 2:
            nxt.append(vals[-1])
        vals = nxt
    r = vals[0]
    if op == "mean":
        r = r * (1.0 / n_taps)
    o_ref[...] = r


# ----------------------------- Pallas wrappers ------------------------------

def conv2d_stats(x, w, stride, pad):
    """NHWC conv (bias-free) as a tap-accumulated Pallas matmul.

    Returns (y2d, mean, var, out_shape): y2d is the pre-BN output flattened to
    (N*Ho*Wo, Cout); mean/var are per-channel batch stats (biased variance),
    finalized from per-row-tile partial sums emitted by the kernel."""
    N, H, W, Cin = x.shape
    KH, KW, _, Cout = w.shape
    xp = jnp.pad(x, ((0, 0), (pad, pad), (pad, pad), (0, 0)))
    Ho = (H + 2 * pad - KH) // stride + 1
    Wo = (W + 2 * pad - KW) // stride + 1
    M = N * Ho * Wo
    S = KH * KW

    # One shifted/strided view per kernel tap, streamed through the tap grid
    # axis (no (M, S*Cin) im2col concat).  For the stride-2 convs each tap is
    # 1/4 of the input so the stacked taps stay <= 2.25x the activation tensor.
    taps = [xp[:, kh:kh + stride * (Ho - 1) + 1:stride,
               kw:kw + stride * (Wo - 1) + 1:stride, :].reshape(M, Cin)
            for kh in range(KH) for kw in range(KW)]
    A = jnp.stack(taps, axis=0)                        # (S, M, Cin)
    B = w.reshape(S, Cin, Cout)

    tm = min(ROW_TILE, _round_up(M, 8))
    Mp = _round_up(M, tm)
    if Mp != M:
        A = jnp.pad(A, ((0, 0), (0, Mp - M), (0, 0)))  # zero rows -> exact zeros
    A = A.astype(MXU_DTYPE)
    B = B.astype(MXU_DTYPE)
    nrt = Mp // tm

    y, s1, s2 = pl.pallas_call(
        _conv_stats_kernel,
        grid=(nrt, S),                                  # tap (reduction) axis last
        in_specs=[pl.BlockSpec((None, tm, Cin), lambda i, s: (s, i, 0)),
                  pl.BlockSpec((None, Cin, Cout), lambda i, s: (s, 0, 0))],
        out_specs=[pl.BlockSpec((tm, Cout), lambda i, s: (i, 0)),
                   pl.BlockSpec((None, 1, Cout), lambda i, s: (i, 0, 0)),
                   pl.BlockSpec((None, 1, Cout), lambda i, s: (i, 0, 0))],
        out_shape=[jax.ShapeDtypeStruct((Mp, Cout), jnp.float32),
                   jax.ShapeDtypeStruct((nrt, 1, Cout), jnp.float32),
                   jax.ShapeDtypeStruct((nrt, 1, Cout), jnp.float32)],
        scratch_shapes=[pltpu.VMEM((tm, Cout), jnp.float32)],
        compiler_params=_cp("parallel", "arbitrary"),
    )(A, B)

    total = jnp.sum(s1, axis=(0, 1))                    # tiny glue: (Cout,)
    totsq = jnp.sum(s2, axis=(0, 1))
    mean = total / M                                    # padded rows are exact zeros
    var = jnp.maximum(totsq / M - mean * mean, 0.0)     # biased variance
    return y[:M], mean, var, (N, Ho, Wo, Cout)


def bn_act(y2d, mean, var, gamma, beta, act):
    """(M, C): training-mode BN affine (given batch stats) + activation.

    The operand is flattened to a lane-dense (R, 128) view (C divides 128 for
    every layer here) with the per-channel scale/shift tiled across the 128
    lanes, so all loads/stores are full-width unmasked vregs."""
    M, C = y2d.shape
    scale = gamma / jnp.sqrt(var + BN_EPS)
    shift = beta - mean * scale

    if 128 % C == 0:
        E = M * C
        R = pl.cdiv(E, 128)
        bt = min(EW_TILE, _round_up(R, 8))
        Rp = _round_up(R, bt)
        flat = jnp.pad(y2d.reshape(E), (0, Rp * 128 - E)).reshape(Rp, 128)
        sc = jnp.tile(scale, 128 // C).reshape(1, 128)
        sh = jnp.tile(shift, 128 // C).reshape(1, 128)
        out = pl.pallas_call(
            functools.partial(_affine_act_kernel, act=act),
            grid=(Rp // bt,),
            in_specs=[pl.BlockSpec((bt, 128), lambda i: (i, 0)),
                      pl.BlockSpec((1, 128), lambda i: (0, 0)),
                      pl.BlockSpec((1, 128), lambda i: (0, 0))],
            out_specs=pl.BlockSpec((bt, 128), lambda i: (i, 0)),
            out_shape=jax.ShapeDtypeStruct((Rp, 128), jnp.float32),
            compiler_params=_cp("parallel"),
        )(flat, sc, sh)
        return out.reshape(Rp * 128)[:E].reshape(M, C)

    # Fallback for channel counts that do not divide the 128-lane vreg width.
    tm = min(ROW_TILE, _round_up(M, 8))
    Mp = _round_up(M, tm)
    yp = jnp.pad(y2d, ((0, Mp - M), (0, 0)))
    out = pl.pallas_call(
        functools.partial(_affine_act_kernel, act=act),
        grid=(Mp // tm,),
        in_specs=[pl.BlockSpec((tm, C), lambda i: (i, 0)),
                  pl.BlockSpec((1, C), lambda i: (0, 0)),
                  pl.BlockSpec((1, C), lambda i: (0, 0))],
        out_specs=pl.BlockSpec((tm, C), lambda i: (i, 0)),
        out_shape=jax.ShapeDtypeStruct((Mp, C), jnp.float32),
        compiler_params=_cp("parallel"),
    )(yp, scale.reshape(1, C), shift.reshape(1, C))
    return out[:M]


def pool2d(x, ksize, stride, pad, op):
    """NHWC square-window pooling.  'mean' == avg_pool(count_include_pad=True);
    'max' pads with -inf.  The k*k window taps are passed as separate lane-dense
    (R, 128) operands (no (S, M, C) concat) and reduced tile-by-tile."""
    N, H, W, C = x.shape
    fill = 0.0 if op == "mean" else -jnp.inf
    xp = jnp.pad(x, ((0, 0), (pad, pad), (pad, pad), (0, 0)),
                 constant_values=fill)
    Ho = (H + 2 * pad - ksize) // stride + 1
    Wo = (W + 2 * pad - ksize) // stride + 1
    E = N * Ho * Wo * C
    R = pl.cdiv(E, 128)
    bt = min(EW_TILE, _round_up(R, 8))
    Rp = _round_up(R, bt)
    taps = [jnp.pad(
        xp[:, di:di + stride * (Ho - 1) + 1:stride,
           dj:dj + stride * (Wo - 1) + 1:stride, :].reshape(E),
        (0, Rp * 128 - E)).reshape(Rp, 128)
        for di in range(ksize) for dj in range(ksize)]
    S = len(taps)
    out = pl.pallas_call(
        functools.partial(_pool_kernel, op=op, n_taps=S),
        grid=(Rp // bt,),
        in_specs=[pl.BlockSpec((bt, 128), lambda i: (i, 0)) for _ in range(S)],
        out_specs=pl.BlockSpec((bt, 128), lambda i: (i, 0)),
        out_shape=jax.ShapeDtypeStruct((Rp, 128), jnp.float32),
        compiler_params=_cp("parallel"),
    )(*taps)
    return out.reshape(Rp * 128)[:E].reshape(N, Ho, Wo, C)


# --------------------------- layer-level building blocks --------------------

def conv_bn_act(x, params, stride, pad, act):
    """conv (bias ignored: training-mode BN subtracts the batch mean, so a
    per-channel conv bias cancels exactly) -> BN(batch stats) -> activation."""
    w, _bias, gamma, beta = params
    y, mean, var, oshape = conv2d_stats(x, w, stride, pad)
    return bn_act(y, mean, var, gamma, beta, act).reshape(oshape)


# ------------------------------- DCMConv2 -----------------------------------

def dcmconv2_forward(x_nchw, params):
    x = jnp.transpose(x_nchw, (0, 2, 3, 1))                  # NCHW -> NHWC
    xp = pool2d(x, 2, 1, 1, "mean")        # F.avg_pool2d(x, 2, 1, 1, False, True)

    # ---- inception branch ----
    t = conv_bn_act(xp, params["one_one"], 1, 0, "relu")     # Conv1(c, c/4, 1, 1)

    # Fused {one_one4: 1x1/s2, two: 3x3/s2}: both read xp and share the same
    # output grid, so one_one4 becomes the (otherwise-zero) centre tap of one
    # wider 3x3/s2 conv with Cout = c/4 + c.  One matmul launch instead of two,
    # one read of the xp taps, and the in-kernel BN stats are valid for both
    # column groups (identical row set).
    w4 = params["one_one4"][0]                               # (1, 1, c, c/4)
    w2 = params["two"][0]                                    # (3, 3, c, c)
    c4 = w4.shape[-1]
    wf = jnp.zeros(w2.shape[:3] + (c4 + w2.shape[-1],), jnp.float32)
    wf = wf.at[1, 1, :, :c4].set(w4[0, 0])
    wf = wf.at[:, :, :, c4:].set(w2)
    yf, mf, vf, (n_, ho, wo, _) = conv2d_stats(xp, wf, 2, 1)
    _, _, g14, be14 = params["one_one4"]
    _, _, gtwo, betwo = params["two"]
    b1 = bn_act(yf[:, :c4], mf[:c4], vf[:c4], g14, be14,
                "relu").reshape(n_, ho, wo, c4)              # inception branch1x1
    x2 = bn_act(yf[:, c4:], mf[c4:], vf[c4:], gtwo, betwo,
                "silu").reshape(n_, ho, wo, -1)              # DCMConv2.two

    b2 = conv_bn_act(t, params["one_one1"], 2, 1, "relu")    # Conv1(c/4, c/4, 3, 2)
    b3 = conv_bn_act(conv_bn_act(t, params["one_one2_0"], 1, 1, "relu"),
                     params["one_one2_1"], 2, 1, "relu")     # 3x3/s1 -> 3x3/s2
    mp = pool2d(xp, 3, 2, 1, "max")                          # MaxPool2d(3, 2, 1)
    b4 = conv_bn_act(mp, params["one_one31"], 1, 0, "relu")  # Conv1(c, c/4, 1, 1)
    x1 = jnp.concatenate([b1, b2, b3, b4], axis=-1)

    # "three": Conv(2c, c_out, 1, 1) = conv(no bias) + BN + SiLU
    x3 = conv_bn_act(jnp.concatenate([x1, x2], axis=-1),
                     params["three"], 1, 0, "silu")
    return jnp.transpose(x3, (0, 3, 1, 2))                   # NHWC -> NCHW


def init_params(key, c_in, c_out):
    inter = c_in // 4

    def cba(k, ks, cin, cout, bias=True):
        k1, k2, k3, k4 = jax.random.split(k, 4)
        w = jax.random.normal(k1, (ks, ks, cin, cout), jnp.float32) / np.sqrt(ks * ks * cin)
        b = (0.1 * jax.random.normal(k2, (cout,), jnp.float32)
             if bias else jnp.zeros((cout,), jnp.float32))
        gamma = 1.0 + 0.1 * jax.random.normal(k3, (cout,), jnp.float32)
        beta = 0.1 * jax.random.normal(k4, (cout,), jnp.float32)
        return (w, b, gamma, beta)

    ks = jax.random.split(key, 8)
    return {
        "one_one":    cba(ks[0], 1, c_in, inter),
        "one_one4":   cba(ks[1], 1, c_in, inter),
        "one_one1":   cba(ks[2], 3, inter, inter),
        "one_one2_0": cba(ks[3], 3, inter, inter),
        "one_one2_1": cba(ks[4], 3, inter, inter),
        "one_one31":  cba(ks[5], 1, c_in, inter),
        "two":        cba(ks[6], 3, c_in, c_in, bias=False),
        "three":      cba(ks[7], 1, 2 * c_in, c_out, bias=False),
    }


# ----------------------------- pure-JAX reference ---------------------------

def _ref_conv_bn_act(x, p, stride, pad, act):
    w, b, gamma, beta = p
    y = jax.lax.conv_general_dilated(
        x, w, (stride, stride), [(pad, pad), (pad, pad)],
        dimension_numbers=("NHWC", "HWIO", "NHWC"),
        precision=jax.lax.Precision.HIGHEST)
    y = y + b.reshape(1, 1, 1, -1)
    mean = jnp.mean(y, axis=(0, 1, 2))
    var = jnp.mean((y - mean) ** 2, axis=(0, 1, 2))
    y = (y - mean) / jnp.sqrt(var + BN_EPS) * gamma + beta
    return jnp.maximum(y, 0.0) if act == "relu" else y * jax.nn.sigmoid(y)


def ref_forward(x_nchw, params):
    x = jnp.transpose(x_nchw, (0, 2, 3, 1))
    xp = jax.lax.reduce_window(x, 0.0, jax.lax.add, (1, 2, 2, 1), (1, 1, 1, 1),
                               [(0, 0), (1, 1), (1, 1), (0, 0)]) / 4.0
    t = _ref_conv_bn_act(xp, params["one_one"], 1, 0, "relu")
    b1 = _ref_conv_bn_act(xp, params["one_one4"], 2, 0, "relu")
    b2 = _ref_conv_bn_act(t, params["one_one1"], 2, 1, "relu")
    b3 = _ref_conv_bn_act(_ref_conv_bn_act(t, params["one_one2_0"], 1, 1, "relu"),
                          params["one_one2_1"], 2, 1, "relu")
    mp = jax.lax.reduce_window(xp, -jnp.inf, jax.lax.max, (1, 3, 3, 1), (1, 2, 2, 1),
                               [(0, 0), (1, 1), (1, 1), (0, 0)])
    b4 = _ref_conv_bn_act(mp, params["one_one31"], 1, 0, "relu")
    x1 = jnp.concatenate([b1, b2, b3, b4], axis=-1)
    x2 = _ref_conv_bn_act(xp, params["two"], 2, 1, "silu")
    x3 = _ref_conv_bn_act(jnp.concatenate([x1, x2], axis=-1),
                          params["three"], 1, 0, "silu")
    return jnp.transpose(x3, (0, 3, 1, 2))


# --------------------------------- main --------------------------------------

if __name__ == "__main__":
    N, C_IN, C_OUT, H, W = 2, 8, 16, 16, 16
    key = jax.random.PRNGKey(0)
    k_x, k_p = jax.random.split(key)
    x = jax.random.normal(k_x, (N, C_IN, H, W), jnp.float32)
    params = init_params(k_p, C_IN, C_OUT)

    fwd = jax.jit(dcmconv2_forward)
    out = fwd(x, params)
    out = jax.block_until_ready(out)

    expected_shape = (N, C_OUT, H // 2 + 1, W // 2 + 1)   # (2, 16, 9, 9)
    assert out.shape == expected_shape, (out.shape, expected_shape)

    ref = jax.block_until_ready(ref_forward(x, params))
    np.testing.assert_allclose(np.asarray(out), np.asarray(ref),
                               rtol=3e-3, atol=3e-3)
    print("KERNEL_OK")
</pallas_src>

<mosaic_0001>
module attributes {stable_mosaic.version = 11 : i64} {
  func.func @_pool_kernel(%arg0: i32, %arg1: memref<40x128xf32, #tpu.memory_space<vmem>>, %arg2: memref<40x128xf32, #tpu.memory_space<vmem>>, %arg3: memref<40x128xf32, #tpu.memory_space<vmem>>, %arg4: memref<40x128xf32, #tpu.memory_space<vmem>>, %arg5: memref<40x128xf32, #tpu.memory_space<vmem>>) attributes {dimension_semantics = [#tpu.dimension_semantics<parallel>], iteration_bounds = array<i64: 1>, scalar_prefetch = 0 : i64, scratch_operands = 0 : i64, tpu.core_type = #tpu.core_type<tc>, window_params = [{transform_indices = @transform_0, window_bounds = array<i64: 40, 128>}, {transform_indices = @transform_1, window_bounds = array<i64: 40, 128>}, {transform_indices = @transform_2, window_bounds = array<i64: 40, 128>}, {transform_indices = @transform_3, window_bounds = array<i64: 40, 128>}, {transform_indices = @transform_4, window_bounds = array<i64: 40, 128>}]} {
    %c0 = arith.constant 0 : index
    %c0_0 = arith.constant 0 : index
    %0 = vector.load %arg1[%c0, %c0_0] : memref<40x128xf32, #tpu.memory_space<vmem>>, vector<40x128xf32>
    %c0_1 = arith.constant 0 : index
    %c0_2 = arith.constant 0 : index
    %1 = vector.load %arg2[%c0_1, %c0_2] : memref<40x128xf32, #tpu.memory_space<vmem>>, vector<40x128xf32>
    %c0_3 = arith.constant 0 : index
    %c0_4 = arith.constant 0 : index
    %2 = vector.load %arg3[%c0_3, %c0_4] : memref<40x128xf32, #tpu.memory_space<vmem>>, vector<40x128xf32>
    %c0_5 = arith.constant 0 : index
    %c0_6 = arith.constant 0 : index
    %3 = vector.load %arg4[%c0_5, %c0_6] : memref<40x128xf32, #tpu.memory_space<vmem>>, vector<40x128xf32>
    %4 = arith.addf %0, %1 : vector<40x128xf32>
    %5 = arith.addf %2, %3 : vector<40x128xf32>
    %6 = arith.addf %4, %5 : vector<40x128xf32>
    %cst = arith.constant 2.500000e-01 : f32
    %7 = vector.broadcast %cst : f32 to vector<40x128xf32>
    %8 = arith.mulf %6, %7 : vector<40x128xf32>
    %c0_7 = arith.constant 0 : index
    %c0_8 = arith.constant 0 : index
    %9 = vector.load %arg5[%c0_7, %c0_8] : memref<40x128xf32, #tpu.memory_space<vmem>>, vector<40x128xf32>
    tpu.vector_store %arg5[%c0_7, %c0_8], %8 {strides = array<i32>} : memref<40x128xf32, #tpu.memory_space<vmem>>, vector<40x128xf32>,
    return
  }
  func.func @transform_0(%arg0: i32) -> (i32, i32) {
    %c0_i32 = arith.constant 0 : i32
    %c0_i32_0 = arith.constant 0 : i32
    return %arg0, %c0_i32 : i32, i32
  }
  func.func @transform_1(%arg0: i32) -> (i32, i32) {
    %c0_i32 = arith.constant 0 : i32
    %c0_i32_0 = arith.constant 0 : i32
    return %arg0, %c0_i32 : i32, i32
  }
  func.func @transform_2(%arg0: i32) -> (i32, i32) {
    %c0_i32 = arith.constant 0 : i32
    %c0_i32_0 = arith.constant 0 : i32
    return %arg0, %c0_i32 : i32, i32
  }
  func.func @transform_3(%arg0: i32) -> (i32, i32) {
    %c0_i32 = arith.constant 0 : i32
    %c0_i32_0 = arith.constant 0 : i32
    return %arg0, %c0_i32 : i32, i32
  }
  func.func @transform_4(%arg0: i32) -> (i32, i32) {
    %c0_i32 = arith.constant 0 : i32
    %c0_i32_0 = arith.constant 0 : i32
    return %arg0, %c0_i32 : i32, i32
  }
}

module attributes {stable_mosaic.version = 11 : i64} {
  func.func @_conv_stats_kernel(%arg0: i32, %arg1: i32, %arg2: memref<1x256x8xf32, #tpu.memory_space<vmem>>, %arg3: memref<1x8x2xf32, #tpu.memory_space<vmem>>, %arg4: memref<256x2xf32, #tpu.memory_space<vmem>>, %arg5: memref<1x1x2xf32, #tpu.memory_space<vmem>>, %arg6: memref<1x1x2xf32, #tpu.memory_space<vmem>>, %arg7: memref<256x2xf32, #tpu.memory_space<vmem>>) attributes {dimension_semantics = [#tpu.dimension_semantics<parallel>, #tpu.dimension_semantics<arbitrary>], iteration_bounds = array<i64: 3, 1>, scalar_prefetch = 0 : i64, scratch_operands = 1 : i64, tpu.core_type = #tpu.core_type<tc>, window_params = [{transform_indices = @transform_0, window_bounds = array<i64: 1, 256, 8>}, {transform_indices = @transform_1, window_bounds = array<i64: 1, 8, 2>}, {transform_indices = @transform_2, window_bounds = array<i64: 256, 2>}, {transform_indices = @transform_3, window_bounds = array<i64: 1, 1, 2>}, {transform_indices = @transform_4, window_bounds = array<i64: 1, 1, 2>}]} {
    %c0_i32 = arith.constant 0 : i32
    %0 = arith.cmpi eq, %arg1, %c0_i32 : i32
    %1 = arith.extui %0 : i1 to i32
    %c0_i32_0 = arith.constant 0 : i32
    %2 = arith.cmpi ne, %1, %c0_i32_0 : i32
    scf.if %2 {
      %cst_12 = arith.constant 0.000000e+00 : f32
      %14 = vector.broadcast %cst_12 : f32 to vector<256x2xf32>
      %c0_13 = arith.constant 0 : index
      %c0_14 = arith.constant 0 : index
      %15 = vector.load %arg7[%c0_13, %c0_14] : memref<256x2xf32, #tpu.memory_space<vmem>>, vector<256x2xf32>
      tpu.vector_store %arg7[%c0_13, %c0_14], %14 {strides = array<i32>} : memref<256x2xf32, #tpu.memory_space<vmem>>, vector<256x2xf32>,
    } else {
    }
    %c0 = arith.constant 0 : index
    %c0_1 = arith.constant 0 : index
    %3 = vector.load %arg7[%c0, %c0_1] : memref<256x2xf32, #tpu.memory_space<vmem>>, vector<256x2xf32>
    %c0_2 = arith.constant 0 : index
    %c0_3 = arith.constant 0 : index
    %c0_4 = arith.constant 0 : index
    %4 = vector.load %arg2[%c0_2, %c0_3, %c0_4] : memref<1x256x8xf32, #tpu.memory_space<vmem>>, vector<1x256x8xf32>
    %5 = vector.shape_cast %4 : vector<1x256x8xf32> to vector<256x8xf32>
    %c0_5 = arith.constant 0 : index
    %c0_6 = arith.constant 0 : index
    %c0_7 = arith.constant 0 : index
    %6 = vector.load %arg3[%c0_5, %c0_6, %c0_7] : memref<1x8x2xf32, #tpu.memory_space<vmem>>, vector<1x8x2xf32>
    %7 = vector.shape_cast %6 : vector<1x8x2xf32> to vector<8x2xf32>
    %cst = arith.constant dense<0.000000e+00> : vector<256x2xf32>
    %8 = tpu.matmul %5, %7, %cst {dimension_numbers = #tpu.dot_dimension_numbers<[1], [0], [0], [1], [0, 0, 1, 1], [], []>} : vector<256x8xf32>, vector<8x2xf32>, vector<256x2xf32> -> vector<256x2xf32>
    %9 = arith.addf %3, %8 : vector<256x2xf32>
    %c0_8 = arith.constant 0 : index
    %c0_9 = arith.constant 0 : index
    %10 = vector.load %arg7[%c0_8, %c0_9] : memref<256x2xf32, #tpu.memory_space<vmem>>, vector<256x2xf32>
    tpu.vector_store %arg7[%c0_8, %c0_9], %9 {strides = array<i32>} : memref<256x2xf32, #tpu.memory_space<vmem>>, vector<256x2xf32>,
    %c0_i32_10 = arith.constant 0 : i32
    %11 = arith.cmpi eq, %arg1, %c0_i32_10 : i32
    %12 = arith.extui %11 : i1 to i32
    %c0_i32_11 = arith.constant 0 : i32
    %13 = arith.cmpi ne, %12, %c0_i32_11 : i32
    scf.if %13 {
      %c0_12 = arith.constant 0 : index
      %c0_13 = arith.constant 0 : index
      %14 = vector.load %arg7[%c0_12, %c0_13] : memref<256x2xf32, #tpu.memory_space<vmem>>, vector<256x2xf32>
      %c0_14 = arith.constant 0 : index
      %c0_15 = arith.constant 0 : index
      %15 = vector.load %arg4[%c0_14, %c0_15] : memref<256x2xf32, #tpu.memory_space<vmem>>, vector<256x2xf32>
      tpu.vector_store %arg4[%c0_14, %c0_15], %14 {strides = array<i32>} : memref<256x2xf32, #tpu.memory_space<vmem>>, vector<256x2xf32>,
      %cst_16 = arith.constant dense<0.000000e+00> : vector<2xf32>
      %16 = vector.multi_reduction <add>, %14, %cst_16 [0] : vector<256x2xf32> to vector<2xf32>
      %17 = vector.shape_cast %16 : vector<2xf32> to vector<1x2xf32>
      %c0_17 = arith.constant 0 : index
      %c0_18 = arith.constant 0 : index
      %c0_19 = arith.constant 0 : index
      %18 = vector.load %arg5[%c0_17, %c0_18, %c0_19] : memref<1x1x2xf32, #tpu.memory_space<vmem>>, vector<1x1x2xf32>
      %19 = vector.shape_cast %18 : vector<1x1x2xf32> to vector<1x2xf32>
      %20 = vector.shape_cast %17 : vector<1x2xf32> to vector<1x1x2xf32>
      tpu.vector_store %arg5[%c0_17, %c0_18, %c0_19], %20 {strides = array<i32>} : memref<1x1x2xf32, #tpu.memory_space<vmem>>, vector<1x1x2xf32>,
      %21 = arith.mulf %14, %14 : vector<256x2xf32>
      %cst_20 = arith.constant dense<0.000000e+00> : vector<2xf32>
      %22 = vector.multi_reduction <add>, %21, %cst_20 [0] : vector<256x2xf32> to vector<2xf32>
      %23 = vector.shape_cast %22 : vector<2xf32> to vector<1x2xf32>
      %c0_21 = arith.constant 0 : index
      %c0_22 = arith.constant 0 : index
      %c0_23 = arith.constant 0 : index
      %24 = vector.load %arg6[%c0_21, %c0_22, %c0_23] : memref<1x1x2xf32, #tpu.memory_space<vmem>>, vector<1x1x2xf32>
      %25 = vector.shape_cast %24 : vector<1x1x2xf32> to vector<1x2xf32>
      %26 = vector.shape_cast %23 : vector<1x2xf32> to vector<1x1x2xf32>
      tpu.vector_store %arg6[%c0_21, %c0_22, %c0_23], %26 {strides = array<i32>} : memref<1x1x2xf32, #tpu.memory_space<vmem>>, vector<1x1x2xf32>,
    } else {
    }
    return
  }
  func.func @transform_0(%arg0: i32, %arg1: i32) -> (i32, i32, i32) {
    %c0_i32 = arith.constant 0 : i32
    %c0_i32_0 = arith.constant 0 : i32
    return %arg1, %arg0, %c0_i32 : i32, i32, i32
  }
  func.func @transform_1(%arg0: i32, %arg1: i32) -> (i32, i32, i32) {
    %c0_i32 = arith.constant 0 : i32
    %c0_i32_0 = arith.constant 0 : i32
    %c0_i32_1 = arith.constant 0 : i32
    return %arg1, %c0_i32, %c0_i32_0 : i32, i32, i32
  }
  func.func @transform_2(%arg0: i32, %arg1: i32) -> (i32, i32) {
    %c0_i32 = arith.constant 0 : i32
    %c0_i32_0 = arith.constant 0 : i32
    return %arg0, %c0_i32 : i32, i32
  }
  func.func @transform_3(%arg0: i32, %arg1: i32) -> (i32, i32, i32) {
    %c0_i32 = arith.constant 0 : i32
    %c0_i32_0 = arith.constant 0 : i32
    %c0_i32_1 = arith.constant 0 : i32
    return %arg0, %c0_i32, %c0_i32_0 : i32, i32, i32
  }
  func.func @transform_4(%arg0: i32, %arg1: i32) -> (i32, i32, i32) {
    %c0_i32 = arith.constant 0 : i32
    %c0_i32_0 = arith.constant 0 : i32
    %c0_i32_1 = arith.constant 0 : i32
    return %arg0, %c0_i32, %c0_i32_0 : i32, i32, i32
  }
}

module attributes {stable_mosaic.version = 11 : i64} {
  func.func @_affine_act_kernel(%arg0: i32, %arg1: memref<16x128xf32, #tpu.memory_space<vmem>>, %arg2: memref<1x128xf32, #tpu.memory_space<vmem>>, %arg3: memref<1x128xf32, #tpu.memory_space<vmem>>, %arg4: memref<16x128xf32, #tpu.memory_space<vmem>>) attributes {dimension_semantics = [#tpu.dimension_semantics<parallel>], iteration_bounds = array<i64: 1>, scalar_prefetch = 0 : i64, scratch_operands = 0 : i64, tpu.core_type = #tpu.core_type<tc>, window_params = [{transform_indices = @transform_0, window_bounds = array<i64: 16, 128>}, {pipeline_mode = #tpu.pipeline_mode<synchronous>, transform_indices = @transform_1, window_bounds = array<i64: 1, 128>}, {pipeline_mode = #tpu.pipeline_mode<synchronous>, transform_indices = @transform_2, window_bounds = array<i64: 1, 128>}, {transform_indices = @transform_3, window_bounds = array<i64: 16, 128>}]} {
    %c0 = arith.constant 0 : index
    %c0_0 = arith.constant 0 : index
    %0 = vector.load %arg1[%c0, %c0_0] : memref<16x128xf32, #tpu.memory_space<vmem>>, vector<16x128xf32>
    %c0_1 = arith.constant 0 : index
    %c0_2 = arith.constant 0 : index
    %1 = vector.load %arg2[%c0_1, %c0_2] : memref<1x128xf32, #tpu.memory_space<vmem>>, vector<1x128xf32>
    %2 = vector.broadcast %1 : vector<1x128xf32> to vector<16x128xf32>
    %3 = arith.mulf %0, %2 : vector<16x128xf32>
    %c0_3 = arith.constant 0 : index
    %c0_4 = arith.constant 0 : index
    %4 = vector.load %arg3[%c0_3, %c0_4] : memref<1x128xf32, #tpu.memory_space<vmem>>, vector<1x128xf32>
    %5 = vector.broadcast %4 : vector<1x128xf32> to vector<16x128xf32>
    %6 = arith.addf %3, %5 : vector<16x128xf32>
    %cst = arith.constant 0.000000e+00 : f32
    %7 = vector.broadcast %cst : f32 to vector<16x128xf32>
    %8 = arith.maximumf %6, %7 : vector<16x128xf32>
    %c0_5 = arith.constant 0 : index
    %c0_6 = arith.constant 0 : index
    %9 = vector.load %arg4[%c0_5, %c0_6] : memref<16x128xf32, #tpu.memory_space<vmem>>, vector<16x128xf32>
    tpu.vector_store %arg4[%c0_5, %c0_6], %8 {strides = array<i32>} : memref<16x128xf32, #tpu.memory_space<vmem>>, vector<16x128xf32>,
    return
  }
  func.func @transform_0(%arg0: i32) -> (i32, i32) {
    %c0_i32 = arith.constant 0 : i32
    %c0_i32_0 = arith.constant 0 : i32
    return %arg0, %c0_i32 : i32, i32
  }
  func.func @transform_1(%arg0: i32) -> (i32, i32) {
    %c0_i32 = arith.constant 0 : i32
    %c0_i32_0 = arith.constant 0 : i32
    %c0_i32_1 = arith.constant 0 : i32
    return %c0_i32, %c0_i32_0 : i32, i32
  }
  func.func @transform_2(%arg0: i32) -> (i32, i32) {
    %c0_i32 = arith.constant 0 : i32
    %c0_i32_0 = arith.constant 0 : i32
    %c0_i32_1 = arith.constant 0 : i32
    return %c0_i32, %c0_i32_0 : i32, i32
  }
  func.func @transform_3(%arg0: i32) -> (i32, i32) {
    %c0_i32 = arith.constant 0 : i32
    %c0_i32_0 = arith.constant 0 : i32
    return %arg0, %c0_i32 : i32, i32
  }
}

module attributes {stable_mosaic.version = 11 : i64} {
  func.func @_pool_kernel(%arg0: i32, %arg1: memref<16x128xf32, #tpu.memory_space<vmem>>, %arg2: memref<16x128xf32, #tpu.memory_space<vmem>>, %arg3: memref<16x128xf32, #tpu.memory_space<vmem>>, %arg4: memref<16x128xf32, #tpu.memory_space<vmem>>, %arg5: memref<16x128xf32, #tpu.memory_space<vmem>>, %arg6: memref<16x128xf32, #tpu.memory_space<vmem>>, %arg7: memref<16x128xf32, #tpu.memory_space<vmem>>, %arg8: memref<16x128xf32, #tpu.memory_space<vmem>>, %arg9: memref<16x128xf32, #tpu.memory_space<vmem>>, %arg10: memref<16x128xf32, #tpu.memory_space<vmem>>) attributes {dimension_semantics = [#tpu.dimension_semantics<parallel>], iteration_bounds = array<i64: 1>, scalar_prefetch = 0 : i64, scratch_operands = 0 : i64, tpu.core_type = #tpu.core_type<tc>, window_params = [{transform_indices = @transform_0, window_bounds = array<i64: 16, 128>}, {transform_indices = @transform_1, window_bounds = array<i64: 16, 128>}, {transform_indices = @transform_2, window_bounds = array<i64: 16, 128>}, {transform_indices = @transform_3, window_bounds = array<i64: 16, 128>}, {transform_indices = @transform_4, window_bounds = array<i64: 16, 128>}, {transform_indices = @transform_5, window_bounds = array<i64: 16, 128>}, {transform_indices = @transform_6, window_bounds = array<i64: 16, 128>}, {transform_indices = @transform_7, window_bounds = array<i64: 16, 128>}, {transform_indices = @transform_8, window_bounds = array<i64: 16, 128>}, {transform_indices = @transform_9, window_bounds = array<i64: 16, 128>}]} {
    %c0 = arith.constant 0 : index
    %c0_0 = arith.constant 0 : index
    %0 = vector.load %arg1[%c0, %c0_0] : memref<16x128xf32, #tpu.memory_space<vmem>>, vector<16x128xf32>
    %c0_1 = arith.constant 0 : index
    %c0_2 = arith.constant 0 : index
    %1 = vector.load %arg2[%c0_1, %c0_2] : memref<16x128xf32, #tpu.memory_space<vmem>>, vector<16x128xf32>
    %c0_3 = arith.constant 0 : index
    %c0_4 = arith.constant 0 : index
    %2 = vector.load %arg3[%c0_3, %c0_4] : memref<16x128xf32, #tpu.memory_space<vmem>>, vector<16x128xf32>
    %c0_5 = arith.constant 0 : index
    %c0_6 = arith.constant 0 : index
    %3 = vector.load %arg4[%c0_5, %c0_6] : memref<16x128xf32, #tpu.memory_space<vmem>>, vector<16x128xf32>
    %c0_7 = arith.constant 0 : index
    %c0_8 = arith.constant 0 : index
    %4 = vector.load %arg5[%c0_7, %c0_8] : memref<16x128xf32, #tpu.memory_space<vmem>>, vector<16x128xf32>
    %c0_9 = arith.constant 0 : index
    %c0_10 = arith.constant 0 : index
    %5 = vector.load %arg6[%c0_9, %c0_10] : memref<16x128xf32, #tpu.memory_space<vmem>>, vector<16x128xf32>
    %c0_11 = arith.constant 0 : index
    %c0_12 = arith.constant 0 : index
    %6 = vector.load %arg7[%c0_11, %c0_12] : memref<16x128xf32, #tpu.memory_space<vmem>>, vector<16x128xf32>
    %c0_13 = arith.constant 0 : index
    %c0_14 = arith.constant 0 : index
    %7 = vector.load %arg8[%c0_13, %c0_14] : memref<16x128xf32, #tpu.memory_space<vmem>>, vector<16x128xf32>
    %c0_15 = arith.constant 0 : index
    %c0_16 = arith.constant 0 : index
    %8 = vector.load %arg9[%c0_15, %c0_16] : memref<16x128xf32, #tpu.memory_space<vmem>>, vector<16x128xf32>
    %9 = arith.maximumf %0, %1 : vector<16x128xf32>
    %10 = arith.maximumf %2, %3 : vector<16x128xf32>
    %11 = arith.maximumf %4, %5 : vector<16x128xf32>
    %12 = arith.maximumf %6, %7 : vector<16x128xf32>
    %13 = arith.maximumf %9, %10 : vector<16x128xf32>
    %14 = arith.maximumf %11, %12 : vector<16x128xf32>
    %15 = arith.maximumf %13, %14 : vector<16x128xf32>
    %16 = arith.maximumf %15, %8 : vector<16x128xf32>
    %c0_17 = arith.constant 0 : index
    %c0_18 = arith.constant 0 : index
    %17 = vector.load %arg10[%c0_17, %c0_18] : memref<16x128xf32, #tpu.memory_space<vmem>>, vector<16x128xf32>
    tpu.vector_store %arg10[%c0_17, %c0_18], %16 {strides = array<i32>} : memref<16x128xf32, #tpu.memory_space<vmem>>, vector<16x128xf32>,
    return
  }
  func.func @transform_0(%arg0: i32) -> (i32, i32) {
    %c0_i32 = arith.constant 0 : i32
    %c0_i32_0 = arith.constant 0 : i32
    return %arg0, %c0_i32 : i32, i32
  }
  func.func @transform_1(%arg0: i32) -> (i32, i32) {
    %c0_i32 = arith.constant 0 : i32
    %c0_i32_0 = arith.constant 0 : i32
    return %arg0, %c0_i32 : i32, i32
  }
  func.func @transform_2(%arg0: i32) -> (i32, i32) {
    %c0_i32 = arith.constant 0 : i32
    %c0_i32_0 = arith.constant 0 : i32
    return %arg0, %c0_i32 : i32, i32
  }
  func.func @transform_3(%arg0: i32) -> (i32, i32) {
    %c0_i32 = arith.constant 0 : i32
    %c0_i32_0 = arith.constant 0 : i32
    return %arg0, %c0_i32 : i32, i32
  }
  func.func @transform_4(%arg0: i32) -> (i32, i32) {
    %c0_i32 = arith.constant 0 : i32
    %c0_i32_0 = arith.constant 0 : i32
    return %arg0, %c0_i32 : i32, i32
  }
  func.func @transform_5(%arg0: i32) -> (i32, i32) {
    %c0_i32 = arith.constant 0 : i32
    %c0_i32_0 = arith.constant 0 : i32
    return %arg0, %c0_i32 : i32, i32
  }
  func.func @transform_6(%arg0: i32) -> (i32, i32) {
    %c0_i32 = arith.constant 0 : i32
    %c0_i32_0 = arith.constant 0 : i32
    return %arg0, %c0_i32 : i32, i32
  }
  func.func @transform_7(%arg0: i32) -> (i32, i32) {
    %c0_i32 = arith.constant 0 : i32
    %c0_i32_0 = arith.constant 0 : i32
    return %arg0, %c0_i32 : i32, i32
  }
  func.func @transform_8(%arg0: i32) -> (i32, i32) {
    %c0_i32 = arith.constant 0 : i32
    %c0_i32_0 = arith.constant 0 : i32
    return %arg0, %c0_i32 : i32, i32
  }
  func.func @transform_9(%arg0: i32) -> (i32, i32) {
    %c0_i32 = arith.constant 0 : i32
    %c0_i32_0 = arith.constant 0 : i32
    return %arg0, %c0_i32 : i32, i32
  }
}

module attributes {stable_mosaic.version = 11 : i64} {
  func.func @_conv_stats_kernel(%arg0: i32, %arg1: i32, %arg2: memref<1x168x8xf32, #tpu.memory_space<vmem>>, %arg3: memref<1x8x2xf32, #tpu.memory_space<vmem>>, %arg4: memref<168x2xf32, #tpu.memory_space<vmem>>, %arg5: memref<1x1x2xf32, #tpu.memory_space<vmem>>, %arg6: memref<1x1x2xf32, #tpu.memory_space<vmem>>, %arg7: memref<168x2xf32, #tpu.memory_space<vmem>>) attributes {dimension_semantics = [#tpu.dimension_semantics<parallel>, #tpu.dimension_semantics<arbitrary>], iteration_bounds = array<i64: 1, 1>, scalar_prefetch = 0 : i64, scratch_operands = 1 : i64, tpu.core_type = #tpu.core_type<tc>, window_params = [{transform_indices = @transform_0, window_bounds = array<i64: 1, 168, 8>}, {transform_indices = @transform_1, window_bounds = array<i64: 1, 8, 2>}, {transform_indices = @transform_2, window_bounds = array<i64: 168, 2>}, {transform_indices = @transform_3, window_bounds = array<i64: 1, 1, 2>}, {transform_indices = @transform_4, window_bounds = array<i64: 1, 1, 2>}]} {
    %c0_i32 = arith.constant 0 : i32
    %0 = arith.cmpi eq, %arg1, %c0_i32 : i32
    %1 = arith.extui %0 : i1 to i32
    %c0_i32_0 = arith.constant 0 : i32
    %2 = arith.cmpi ne, %1, %c0_i32_0 : i32
    scf.if %2 {
      %cst_12 = arith.constant 0.000000e+00 : f32
      %14 = vector.broadcast %cst_12 : f32 to vector<168x2xf32>
      %c0_13 = arith.constant 0 : index
      %c0_14 = arith.constant 0 : index
      %15 = vector.load %arg7[%c0_13, %c0_14] : memref<168x2xf32, #tpu.memory_space<vmem>>, vector<168x2xf32>
      tpu.vector_store %arg7[%c0_13, %c0_14], %14 {strides = array<i32>} : memref<168x2xf32, #tpu.memory_space<vmem>>, vector<168x2xf32>,
    } else {
    }
    %c0 = arith.constant 0 : index
    %c0_1 = arith.constant 0 : index
    %3 = vector.load %arg7[%c0, %c0_1] : memref<168x2xf32, #tpu.memory_space<vmem>>, vector<168x2xf32>
    %c0_2 = arith.constant 0 : index
    %c0_3 = arith.constant 0 : index
    %c0_4 = arith.constant 0 : index
    %4 = vector.load %arg2[%c0_2, %c0_3, %c0_4] : memref<1x168x8xf32, #tpu.memory_space<vmem>>, vector<1x168x8xf32>
    %5 = vector.shape_cast %4 : vector<1x168x8xf32> to vector<168x8xf32>
    %c0_5 = arith.constant 0 : index
    %c0_6 = arith.constant 0 : index
    %c0_7 = arith.constant 0 : index
    %6 = vector.load %arg3[%c0_5, %c0_6, %c0_7] : memref<1x8x2xf32, #tpu.memory_space<vmem>>, vector<1x8x2xf32>
    %7 = vector.shape_cast %6 : vector<1x8x2xf32> to vector<8x2xf32>
    %cst = arith.constant dense<0.000000e+00> : vector<168x2xf32>
    %8 = tpu.matmul %5, %7, %cst {dimension_numbers = #tpu.dot_dimension_numbers<[1], [0], [0], [1], [0, 0, 1, 1], [], []>} : vector<168x8xf32>, vector<8x2xf32>, vector<168x2xf32> -> vector<168x2xf32>
    %9 = arith.addf %3, %8 : vector<168x2xf32>
    %c0_8 = arith.constant 0 : index
    %c0_9 = arith.constant 0 : index
    %10 = vector.load %arg7[%c0_8, %c0_9] : memref<168x2xf32, #tpu.memory_space<vmem>>, vector<168x2xf32>
    tpu.vector_store %arg7[%c0_8, %c0_9], %9 {strides = array<i32>} : memref<168x2xf32, #tpu.memory_space<vmem>>, vector<168x2xf32>,
    %c0_i32_10 = arith.constant 0 : i32
    %11 = arith.cmpi eq, %arg1, %c0_i32_10 : i32
    %12 = arith.extui %11 : i1 to i32
    %c0_i32_11 = arith.constant 0 : i32
    %13 = arith.cmpi ne, %12, %c0_i32_11 : i32
    scf.if %13 {
      %c0_12 = arith.constant 0 : index
      %c0_13 = arith.constant 0 : index
      %14 = vector.load %arg7[%c0_12, %c0_13] : memref<168x2xf32, #tpu.memory_space<vmem>>, vector<168x2xf32>
      %c0_14 = arith.constant 0 : index
      %c0_15 = arith.constant 0 : index
      %15 = vector.load %arg4[%c0_14, %c0_15] : memref<168x2xf32, #tpu.memory_space<vmem>>, vector<168x2xf32>
      tpu.vector_store %arg4[%c0_14, %c0_15], %14 {strides = array<i32>} : memref<168x2xf32, #tpu.memory_space<vmem>>, vector<168x2xf32>,
      %cst_16 = arith.constant dense<0.000000e+00> : vector<2xf32>
      %16 = vector.multi_reduction <add>, %14, %cst_16 [0] : vector<168x2xf32> to vector<2xf32>
      %17 = vector.shape_cast %16 : vector<2xf32> to vector<1x2xf32>
      %c0_17 = arith.constant 0 : index
      %c0_18 = arith.constant 0 : index
      %c0_19 = arith.constant 0 : index
      %18 = vector.load %arg5[%c0_17, %c0_18, %c0_19] : memref<1x1x2xf32, #tpu.memory_space<vmem>>, vector<1x1x2xf32>
      %19 = vector.shape_cast %18 : vector<1x1x2xf32> to vector<1x2xf32>
      %20 = vector.shape_cast %17 : vector<1x2xf32> to vector<1x1x2xf32>
      tpu.vector_store %arg5[%c0_17, %c0_18, %c0_19], %20 {strides = array<i32>} : memref<1x1x2xf32, #tpu.memory_space<vmem>>, vector<1x1x2xf32>,
      %21 = arith.mulf %14, %14 : vector<168x2xf32>
      %cst_20 = arith.constant dense<0.000000e+00> : vector<2xf32>
      %22 = vector.multi_reduction <add>, %21, %cst_20 [0] : vector<168x2xf32> to vector<2xf32>
      %23 = vector.shape_cast %22 : vector<2xf32> to vector<1x2xf32>
      %c0_21 = arith.constant 0 : index
      %c0_22 = arith.constant 0 : index
      %c0_23 = arith.constant 0 : index
      %24 = vector.load %arg6[%c0_21, %c0_22, %c0_23] : memref<1x1x2xf32, #tpu.memory_space<vmem>>, vector<1x1x2xf32>
      %25 = vector.shape_cast %24 : vector<1x1x2xf32> to vector<1x2xf32>
      %26 = vector.shape_cast %23 : vector<1x2xf32> to vector<1x1x2xf32>
      tpu.vector_store %arg6[%c0_21, %c0_22, %c0_23], %26 {strides = array<i32>} : memref<1x1x2xf32, #tpu.memory_space<vmem>>, vector<1x1x2xf32>,
    } else {
    }
    return
  }
  func.func @transform_0(%arg0: i32, %arg1: i32) -> (i32, i32, i32) {
    %c0_i32 = arith.constant 0 : i32
    %c0_i32_0 = arith.constant 0 : i32
    return %arg1, %arg0, %c0_i32 : i32, i32, i32
  }
  func.func @transform_1(%arg0: i32, %arg1: i32) -> (i32, i32, i32) {
    %c0_i32 = arith.constant 0 : i32
    %c0_i32_0 = arith.constant 0 : i32
    %c0_i32_1 = arith.constant 0 : i32
    return %arg1, %c0_i32, %c0_i32_0 : i32, i32, i32
  }
  func.func @transform_2(%arg0: i32, %arg1: i32) -> (i32, i32) {
    %c0_i32 = arith.constant 0 : i32
    %c0_i32_0 = arith.constant 0 : i32
    return %arg0, %c0_i32 : i32, i32
  }
  func.func @transform_3(%arg0: i32, %arg1: i32) -> (i32, i32, i32) {
    %c0_i32 = arith.constant 0 : i32
    %c0_i32_0 = arith.constant 0 : i32
    %c0_i32_1 = arith.constant 0 : i32
    return %arg0, %c0_i32, %c0_i32_0 : i32, i32, i32
  }
  func.func @transform_4(%arg0: i32, %arg1: i32) -> (i32, i32, i32) {
    %c0_i32 = arith.constant 0 : i32
    %c0_i32_0 = arith.constant 0 : i32
    %c0_i32_1 = arith.constant 0 : i32
    return %arg0, %c0_i32, %c0_i32_0 : i32, i32, i32
  }
}

module attributes {stable_mosaic.version = 11 : i64} {
  func.func @_affine_act_kernel(%arg0: i32, %arg1: memref<8x128xf32, #tpu.memory_space<vmem>>, %arg2: memref<1x128xf32, #tpu.memory_space<vmem>>, %arg3: memref<1x128xf32, #tpu.memory_space<vmem>>, %arg4: memref<8x128xf32, #tpu.memory_space<vmem>>) attributes {dimension_semantics = [#tpu.dimension_semantics<parallel>], iteration_bounds = array<i64: 1>, scalar_prefetch = 0 : i64, scratch_operands = 0 : i64, tpu.core_type = #tpu.core_type<tc>, window_params = [{transform_indices = @transform_0, window_bounds = array<i64: 8, 128>}, {pipeline_mode = #tpu.pipeline_mode<synchronous>, transform_indices = @transform_1, window_bounds = array<i64: 1, 128>}, {pipeline_mode = #tpu.pipeline_mode<synchronous>, transform_indices = @transform_2, window_bounds = array<i64: 1, 128>}, {transform_indices = @transform_3, window_bounds = array<i64: 8, 128>}]} {
    %c0 = arith.constant 0 : index
    %c0_0 = arith.constant 0 : index
    %0 = vector.load %arg1[%c0, %c0_0] : memref<8x128xf32, #tpu.memory_space<vmem>>, vector<8x128xf32>
    %c0_1 = arith.constant 0 : index
    %c0_2 = arith.constant 0 : index
    %1 = vector.load %arg2[%c0_1, %c0_2] : memref<1x128xf32, #tpu.memory_space<vmem>>, vector<1x128xf32>
    %2 = vector.broadcast %1 : vector<1x128xf32> to vector<8x128xf32>
    %3 = arith.mulf %0, %2 : vector<8x128xf32>
    %c0_3 = arith.constant 0 : index
    %c0_4 = arith.constant 0 : index
    %4 = vector.load %arg3[%c0_3, %c0_4] : memref<1x128xf32, #tpu.memory_space<vmem>>, vector<1x128xf32>
    %5 = vector.broadcast %4 : vector<1x128xf32> to vector<8x128xf32>
    %6 = arith.addf %3, %5 : vector<8x128xf32>
    %cst = arith.constant 0.000000e+00 : f32
    %7 = vector.broadcast %cst : f32 to vector<8x128xf32>
    %8 = arith.maximumf %6, %7 : vector<8x128xf32>
    %c0_5 = arith.constant 0 : index
    %c0_6 = arith.constant 0 : index
    %9 = vector.load %arg4[%c0_5, %c0_6] : memref<8x128xf32, #tpu.memory_space<vmem>>, vector<8x128xf32>
    tpu.vector_store %arg4[%c0_5, %c0_6], %8 {strides = array<i32>} : memref<8x128xf32, #tpu.memory_space<vmem>>, vector<8x128xf32>,
    return
  }
  func.func @transform_0(%arg0: i32) -> (i32, i32) {
    %c0_i32 = arith.constant 0 : i32
    %c0_i32_0 = arith.constant 0 : i32
    return %arg0, %c0_i32 : i32, i32
  }
  func.func @transform_1(%arg0: i32) -> (i32, i32) {
    %c0_i32 = arith.constant 0 : i32
    %c0_i32_0 = arith.constant 0 : i32
    %c0_i32_1 = arith.constant 0 : i32
    return %c0_i32, %c0_i32_0 : i32, i32
  }
  func.func @transform_2(%arg0: i32) -> (i32, i32) {
    %c0_i32 = arith.constant 0 : i32
    %c0_i32_0 = arith.constant 0 : i32
    %c0_i32_1 = arith.constant 0 : i32
    return %c0_i32, %c0_i32_0 : i32, i32
  }
  func.func @transform_3(%arg0: i32) -> (i32, i32) {
    %c0_i32 = arith.constant 0 : i32
    %c0_i32_0 = arith.constant 0 : i32
    return %arg0, %c0_i32 : i32, i32
  }
}

module attributes {stable_mosaic.version = 11 : i64} {
  func.func @_conv_stats_kernel(%arg0: i32, %arg1: i32, %arg2: memref<1x168x8xf32, #tpu.memory_space<vmem>>, %arg3: memref<1x8x10xf32, #tpu.memory_space<vmem>>, %arg4: memref<168x10xf32, #tpu.memory_space<vmem>>, %arg5: memref<1x1x10xf32, #tpu.memory_space<vmem>>, %arg6: memref<1x1x10xf32, #tpu.memory_space<vmem>>, %arg7: memref<168x10xf32, #tpu.memory_space<vmem>>) attributes {dimension_semantics = [#tpu.dimension_semantics<parallel>, #tpu.dimension_semantics<arbitrary>], iteration_bounds = array<i64: 1, 9>, scalar_prefetch = 0 : i64, scratch_operands = 1 : i64, tpu.core_type = #tpu.core_type<tc>, window_params = [{transform_indices = @transform_0, window_bounds = array<i64: 1, 168, 8>}, {transform_indices = @transform_1, window_bounds = array<i64: 1, 8, 10>}, {transform_indices = @transform_2, window_bounds = array<i64: 168, 10>}, {transform_indices = @transform_3, window_bounds = array<i64: 1, 1, 10>}, {transform_indices = @transform_4, window_bounds = array<i64: 1, 1, 10>}]} {
    %c0_i32 = arith.constant 0 : i32
    %0 = arith.cmpi eq, %arg1, %c0_i32 : i32
    %1 = arith.extui %0 : i1 to i32
    %c0_i32_0 = arith.constant 0 : i32
    %2 = arith.cmpi ne, %1, %c0_i32_0 : i32
    scf.if %2 {
      %cst_11 = arith.constant 0.000000e+00 : f32
      %14 = vector.broadcast %cst_11 : f32 to vector<168x10xf32>
      %c0_12 = arith.constant 0 : index
      %c0_13 = arith.constant 0 : index
      %15 = vector.load %arg7[%c0_12, %c0_13] : memref<168x10xf32, #tpu.memory_space<vmem>>, vector<168x10xf32>
      tpu.vector_store %arg7[%c0_12, %c0_13], %14 {strides = array<i32>} : memref<168x10xf32, #tpu.memory_space<vmem>>, vector<168x10xf32>,
    } else {
    }
    %c0 = arith.constant 0 : index
    %c0_1 = arith.constant 0 : index
    %3 = vector.load %arg7[%c0, %c0_1] : memref<168x10xf32, #tpu.memory_space<vmem>>, vector<168x10xf32>
    %c0_2 = arith.constant 0 : index
    %c0_3 = arith.constant 0 : index
    %c0_4 = arith.constant 0 : index
    %4 = vector.load %arg2[%c0_2, %c0_3, %c0_4] : memref<1x168x8xf32, #tpu.memory_space<vmem>>, vector<1x168x8xf32>
    %5 = vector.shape_cast %4 : vector<1x168x8xf32> to vector<168x8xf32>
    %c0_5 = arith.constant 0 : index
    %c0_6 = arith.constant 0 : index
    %c0_7 = arith.constant 0 : index
    %6 = vector.load %arg3[%c0_5, %c0_6, %c0_7] : memref<1x8x10xf32, #tpu.memory_space<vmem>>, vector<1x8x10xf32>
    %7 = vector.shape_cast %6 : vector<1x8x10xf32> to vector<8x10xf32>
    %cst = arith.constant dense<0.000000e+00> : vector<168x10xf32>
    %8 = tpu.matmul %5, %7, %cst {dimension_numbers = #tpu.dot_dimension_numbers<[1], [0], [0], [1], [0, 0, 1, 1], [], []>} : vector<168x8xf32>, vector<8x10xf32>, vector<168x10xf32> -> vector<168x10xf32>
    %9 = arith.addf %3, %8 : vector<168x10xf32>
    %c0_8 = arith.constant 0 : index
    %c0_9 = arith.constant 0 : index
    %10 = vector.load %arg7[%c0_8, %c0_9] : memref<168x10xf32, #tpu.memory_space<vmem>>, vector<168x10xf32>
    tpu.vector_store %arg7[%c0_8, %c0_9], %9 {strides = array<i32>} : memref<168x10xf32, #tpu.memory_space<vmem>>, vector<168x10xf32>,
    %c8_i32 = arith.constant 8 : i32
    %11 = arith.cmpi eq, %arg1, %c8_i32 : i32
    %12 = arith.extui %11 : i1 to i32
    %c0_i32_10 = arith.constant 0 : i32
    %13 = arith.cmpi ne, %12, %c0_i32_10 : i32
    scf.if %13 {
      %c0_11 = arith.constant 0 : index
      %c0_12 = arith.constant 0 : index
      %14 = vector.load %arg7[%c0_11, %c0_12] : memref<168x10xf32, #tpu.memory_space<vmem>>, vector<168x10xf32>
      %c0_13 = arith.constant 0 : index
      %c0_14 = arith.constant 0 : index
      %15 = vector.load %arg4[%c0_13, %c0_14] : memref<168x10xf32, #tpu.memory_space<vmem>>, vector<168x10xf32>
      tpu.vector_store %arg4[%c0_13, %c0_14], %14 {strides = array<i32>} : memref<168x10xf32, #tpu.memory_space<vmem>>, vector<168x10xf32>,
      %cst_15 = arith.constant dense<0.000000e+00> : vector<10xf32>
      %16 = vector.multi_reduction <add>, %14, %cst_15 [0] : vector<168x10xf32> to vector<10xf32>
      %17 = vector.shape_cast %16 : vector<10xf32> to vector<1x10xf32>
      %c0_16 = arith.constant 0 : index
      %c0_17 = arith.constant 0 : index
      %c0_18 = arith.constant 0 : index
      %18 = vector.load %arg5[%c0_16, %c0_17, %c0_18] : memref<1x1x10xf32, #tpu.memory_space<vmem>>, vector<1x1x10xf32>
      %19 = vector.shape_cast %18 : vector<1x1x10xf32> to vector<1x10xf32>
      %20 = vector.shape_cast %17 : vector<1x10xf32> to vector<1x1x10xf32>
      tpu.vector_store %arg5[%c0_16, %c0_17, %c0_18], %20 {strides = array<i32>} : memref<1x1x10xf32, #tpu.memory_space<vmem>>, vector<1x1x10xf32>,
      %21 = arith.mulf %14, %14 : vector<168x10xf32>
      %cst_19 = arith.constant dense<0.000000e+00> : vector<10xf32>
      %22 = vector.multi_reduction <add>, %21, %cst_19 [0] : vector<168x10xf32> to vector<10xf32>
      %23 = vector.shape_cast %22 : vector<10xf32> to vector<1x10xf32>
      %c0_20 = arith.constant 0 : index
      %c0_21 = arith.constant 0 : index
      %c0_22 = arith.constant 0 : index
      %24 = vector.load %arg6[%c0_20, %c0_21, %c0_22] : memref<1x1x10xf32, #tpu.memory_space<vmem>>, vector<1x1x10xf32>
      %25 = vector.shape_cast %24 : vector<1x1x10xf32> to vector<1x10xf32>
      %26 = vector.shape_cast %23 : vector<1x10xf32> to vector<1x1x10xf32>
      tpu.vector_store %arg6[%c0_20, %c0_21, %c0_22], %26 {strides = array<i32>} : memref<1x1x10xf32, #tpu.memory_space<vmem>>, vector<1x1x10xf32>,
    } else {
    }
    return
  }
  func.func @transform_0(%arg0: i32, %arg1: i32) -> (i32, i32, i32) {
    %c0_i32 = arith.constant 0 : i32
    %c0_i32_0 = arith.constant 0 : i32
    return %arg1, %arg0, %c0_i32 : i32, i32, i32
  }
  func.func @transform_1(%arg0: i32, %arg1: i32) -> (i32, i32, i32) {
    %c0_i32 = arith.constant 0 : i32
    %c0_i32_0 = arith.constant 0 : i32
    %c0_i32_1 = arith.constant 0 : i32
    return %arg1, %c0_i32, %c0_i32_0 : i32, i32, i32
  }
  func.func @transform_2(%arg0: i32, %arg1: i32) -> (i32, i32) {
    %c0_i32 = arith.constant 0 : i32
    %c0_i32_0 = arith.constant 0 : i32
    return %arg0, %c0_i32 : i32, i32
  }
  func.func @transform_3(%arg0: i32, %arg1: i32) -> (i32, i32, i32) {
    %c0_i32 = arith.constant 0 : i32
    %c0_i32_0 = arith.constant 0 : i32
    %c0_i32_1 = arith.constant 0 : i32
    return %arg0, %c0_i32, %c0_i32_0 : i32, i32, i32
  }
  func.func @transform_4(%arg0: i32, %arg1: i32) -> (i32, i32, i32) {
    %c0_i32 = arith.constant 0 : i32
    %c0_i32_0 = arith.constant 0 : i32
    %c0_i32_1 = arith.constant 0 : i32
    return %arg0, %c0_i32, %c0_i32_0 : i32, i32, i32
  }
}

module attributes {stable_mosaic.version = 11 : i64} {
  func.func @_affine_act_kernel(%arg0: i32, %arg1: memref<16x128xf32, #tpu.memory_space<vmem>>, %arg2: memref<1x128xf32, #tpu.memory_space<vmem>>, %arg3: memref<1x128xf32, #tpu.memory_space<vmem>>, %arg4: memref<16x128xf32, #tpu.memory_space<vmem>>) attributes {dimension_semantics = [#tpu.dimension_semantics<parallel>], iteration_bounds = array<i64: 1>, scalar_prefetch = 0 : i64, scratch_operands = 0 : i64, tpu.core_type = #tpu.core_type<tc>, window_params = [{transform_indices = @transform_0, window_bounds = array<i64: 16, 128>}, {pipeline_mode = #tpu.pipeline_mode<synchronous>, transform_indices = @transform_1, window_bounds = array<i64: 1, 128>}, {pipeline_mode = #tpu.pipeline_mode<synchronous>, transform_indices = @transform_2, window_bounds = array<i64: 1, 128>}, {transform_indices = @transform_3, window_bounds = array<i64: 16, 128>}]} {
    %c0 = arith.constant 0 : index
    %c0_0 = arith.constant 0 : index
    %0 = vector.load %arg1[%c0, %c0_0] : memref<16x128xf32, #tpu.memory_space<vmem>>, vector<16x128xf32>
    %c0_1 = arith.constant 0 : index
    %c0_2 = arith.constant 0 : index
    %1 = vector.load %arg2[%c0_1, %c0_2] : memref<1x128xf32, #tpu.memory_space<vmem>>, vector<1x128xf32>
    %2 = vector.broadcast %1 : vector<1x128xf32> to vector<16x128xf32>
    %3 = arith.mulf %0, %2 : vector<16x128xf32>
    %c0_3 = arith.constant 0 : index
    %c0_4 = arith.constant 0 : index
    %4 = vector.load %arg3[%c0_3, %c0_4] : memref<1x128xf32, #tpu.memory_space<vmem>>, vector<1x128xf32>
    %5 = vector.broadcast %4 : vector<1x128xf32> to vector<16x128xf32>
    %6 = arith.addf %3, %5 : vector<16x128xf32>
    %7 = arith.negf %6 : vector<16x128xf32>
    %8 = math.exp %7 : vector<16x128xf32>
    %cst = arith.constant 1.000000e+00 : f32
    %9 = vector.broadcast %cst : f32 to vector<16x128xf32>
    %10 = arith.addf %9, %8 : vector<16x128xf32>
    %11 = arith.divf %9, %10 : vector<16x128xf32>
    %12 = arith.mulf %6, %11 : vector<16x128xf32>
    %c0_5 = arith.constant 0 : index
    %c0_6 = arith.constant 0 : index
    %13 = vector.load %arg4[%c0_5, %c0_6] : memref<16x128xf32, #tpu.memory_space<vmem>>, vector<16x128xf32>
    tpu.vector_store %arg4[%c0_5, %c0_6], %12 {strides = array<i32>} : memref<16x128xf32, #tpu.memory_space<vmem>>, vector<16x128xf32>,
    return
  }
  func.func @transform_0(%arg0: i32) -> (i32, i32) {
    %c0_i32 = arith.constant 0 : i32
    %c0_i32_0 = arith.constant 0 : i32
    return %arg0, %c0_i32 : i32, i32
  }
  func.func @transform_1(%arg0: i32) -> (i32, i32) {
    %c0_i32 = arith.constant 0 : i32
    %c0_i32_0 = arith.constant 0 : i32
    %c0_i32_1 = arith.constant 0 : i32
    return %c0_i32, %c0_i32_0 : i32, i32
  }
  func.func @transform_2(%arg0: i32) -> (i32, i32) {
    %c0_i32 = arith.constant 0 : i32
    %c0_i32_0 = arith.constant 0 : i32
    %c0_i32_1 = arith.constant 0 : i32
    return %c0_i32, %c0_i32_0 : i32, i32
  }
  func.func @transform_3(%arg0: i32) -> (i32, i32) {
    %c0_i32 = arith.constant 0 : i32
    %c0_i32_0 = arith.constant 0 : i32
    return %arg0, %c0_i32 : i32, i32
  }
}

module attributes {stable_mosaic.version = 11 : i64} {
  func.func @_conv_stats_kernel(%arg0: i32, %arg1: i32, %arg2: memref<1x168x2xf32, #tpu.memory_space<vmem>>, %arg3: memref<1x2x2xf32, #tpu.memory_space<vmem>>, %arg4: memref<168x2xf32, #tpu.memory_space<vmem>>, %arg5: memref<1x1x2xf32, #tpu.memory_space<vmem>>, %arg6: memref<1x1x2xf32, #tpu.memory_space<vmem>>, %arg7: memref<168x2xf32, #tpu.memory_space<vmem>>) attributes {dimension_semantics = [#tpu.dimension_semantics<parallel>, #tpu.dimension_semantics<arbitrary>], iteration_bounds = array<i64: 1, 9>, scalar_prefetch = 0 : i64, scratch_operands = 1 : i64, tpu.core_type = #tpu.core_type<tc>, window_params = [{transform_indices = @transform_0, window_bounds = array<i64: 1, 168, 2>}, {transform_indices = @transform_1, window_bounds = array<i64: 1, 2, 2>}, {transform_indices = @transform_2, window_bounds = array<i64: 168, 2>}, {transform_indices = @transform_3, window_bounds = array<i64: 1, 1, 2>}, {transform_indices = @transform_4, window_bounds = array<i64: 1, 1, 2>}]} {
    %c0_i32 = arith.constant 0 : i32
    %0 = arith.cmpi eq, %arg1, %c0_i32 : i32
    %1 = arith.extui %0 : i1 to i32
    %c0_i32_0 = arith.constant 0 : i32
    %2 = arith.cmpi ne, %1, %c0_i32_0 : i32
    scf.if %2 {
      %cst_11 = arith.constant 0.000000e+00 : f32
      %14 = vector.broadcast %cst_11 : f32 to vector<168x2xf32>
      %c0_12 = arith.constant 0 : index
      %c0_13 = arith.constant 0 : index
      %15 = vector.load %arg7[%c0_12, %c0_13] : memref<168x2xf32, #tpu.memory_space<vmem>>, vector<168x2xf32>
      tpu.vector_store %arg7[%c0_12, %c0_13], %14 {strides = array<i32>} : memref<168x2xf32, #tpu.memory_space<vmem>>, vector<168x2xf32>,
    } else {
    }
    %c0 = arith.constant 0 : index
    %c0_1 = arith.constant 0 : index
    %3 = vector.load %arg7[%c0, %c0_1] : memref<168x2xf32, #tpu.memory_space<vmem>>, vector<168x2xf32>
    %c0_2 = arith.constant 0 : index
    %c0_3 = arith.constant 0 : index
    %c0_4 = arith.constant 0 : index
    %4 = vector.load %arg2[%c0_2, %c0_3, %c0_4] : memref<1x168x2xf32, #tpu.memory_space<vmem>>, vector<1x168x2xf32>
    %5 = vector.shape_cast %4 : vector<1x168x2xf32> to vector<168x2xf32>
    %c0_5 = arith.constant 0 : index
    %c0_6 = arith.constant 0 : index
    %c0_7 = arith.constant 0 : index
    %6 = vector.load %arg3[%c0_5, %c0_6, %c0_7] : memref<1x2x2xf32, #tpu.memory_space<vmem>>, vector<1x2x2xf32>
    %7 = vector.shape_cast %6 : vector<1x2x2xf32> to vector<2x2xf32>
    %cst = arith.constant dense<0.000000e+00> : vector<168x2xf32>
    %8 = tpu.matmul %5, %7, %cst {dimension_numbers = #tpu.dot_dimension_numbers<[1], [0], [0], [1], [0, 0, 1, 1], [], []>} : vector<168x2xf32>, vector<2x2xf32>, vector<168x2xf32> -> vector<168x2xf32>
    %9 = arith.addf %3, %8 : vector<168x2xf32>
    %c0_8 = arith.constant 0 : index
    %c0_9 = arith.constant 0 : index
    %10 = vector.load %arg7[%c0_8, %c0_9] : memref<168x2xf32, #tpu.memory_space<vmem>>, vector<168x2xf32>
    tpu.vector_store %arg7[%c0_8, %c0_9], %9 {strides = array<i32>} : memref<168x2xf32, #tpu.memory_space<vmem>>, vector<168x2xf32>,
    %c8_i32 = arith.constant 8 : i32
    %11 = arith.cmpi eq, %arg1, %c8_i32 : i32
    %12 = arith.extui %11 : i1 to i32
    %c0_i32_10 = arith.constant 0 : i32
    %13 = arith.cmpi ne, %12, %c0_i32_10 : i32
    scf.if %13 {
      %c0_11 = arith.constant 0 : index
      %c0_12 = arith.constant 0 : index
      %14 = vector.load %arg7[%c0_11, %c0_12] : memref<168x2xf32, #tpu.memory_space<vmem>>, vector<168x2xf32>
      %c0_13 = arith.constant 0 : index
      %c0_14 = arith.constant 0 : index
      %15 = vector.load %arg4[%c0_13, %c0_14] : memref<168x2xf32, #tpu.memory_space<vmem>>, vector<168x2xf32>
      tpu.vector_store %arg4[%c0_13, %c0_14], %14 {strides = array<i32>} : memref<168x2xf32, #tpu.memory_space<vmem>>, vector<168x2xf32>,
      %cst_15 = arith.constant dense<0.000000e+00> : vector<2xf32>
      %16 = vector.multi_reduction <add>, %14, %cst_15 [0] : vector<168x2xf32> to vector<2xf32>
      %17 = vector.shape_cast %16 : vector<2xf32> to vector<1x2xf32>
      %c0_16 = arith.constant 0 : index
      %c0_17 = arith.constant 0 : index
      %c0_18 = arith.constant 0 : index
      %18 = vector.load %arg5[%c0_16, %c0_17, %c0_18] : memref<1x1x2xf32, #tpu.memory_space<vmem>>, vector<1x1x2xf32>
      %19 = vector.shape_cast %18 : vector<1x1x2xf32> to vector<1x2xf32>
      %20 = vector.shape_cast %17 : vector<1x2xf32> to vector<1x1x2xf32>
      tpu.vector_store %arg5[%c0_16, %c0_17, %c0_18], %20 {strides = array<i32>} : memref<1x1x2xf32, #tpu.memory_space<vmem>>, vector<1x1x2xf32>,
      %21 = arith.mulf %14, %14 : vector<168x2xf32>
      %cst_19 = arith.constant dense<0.000000e+00> : vector<2xf32>
      %22 = vector.multi_reduction <add>, %21, %cst_19 [0] : vector<168x2xf32> to vector<2xf32>
      %23 = vector.shape_cast %22 : vector<2xf32> to vector<1x2xf32>
      %c0_20 = arith.constant 0 : index
      %c0_21 = arith.constant 0 : index
      %c0_22 = arith.constant 0 : index
      %24 = vector.load %arg6[%c0_20, %c0_21, %c0_22] : memref<1x1x2xf32, #tpu.memory_space<vmem>>, vector<1x1x2xf32>
      %25 = vector.shape_cast %24 : vector<1x1x2xf32> to vector<1x2xf32>
      %26 = vector.shape_cast %23 : vector<1x2xf32> to vector<1x1x2xf32>
      tpu.vector_store %arg6[%c0_20, %c0_21, %c0_22], %26 {strides = array<i32>} : memref<1x1x2xf32, #tpu.memory_space<vmem>>, vector<1x1x2xf32>,
    } else {
    }
    return
  }
  func.func @transform_0(%arg0: i32, %arg1: i32) -> (i32, i32, i32) {
    %c0_i32 = arith.constant 0 : i32
    %c0_i32_0 = arith.constant 0 : i32
    return %arg1, %arg0, %c0_i32 : i32, i32, i32
  }
  func.func @transform_1(%arg0: i32, %arg1: i32) -> (i32, i32, i32) {
    %c0_i32 = arith.constant 0 : i32
    %c0_i32_0 = arith.constant 0 : i32
    %c0_i32_1 = arith.constant 0 : i32
    return %arg1, %c0_i32, %c0_i32_0 : i32, i32, i32
  }
  func.func @transform_2(%arg0: i32, %arg1: i32) -> (i32, i32) {
    %c0_i32 = arith.constant 0 : i32
    %c0_i32_0 = arith.constant 0 : i32
    return %arg0, %c0_i32 : i32, i32
  }
  func.func @transform_3(%arg0: i32, %arg1: i32) -> (i32, i32, i32) {
    %c0_i32 = arith.constant 0 : i32
    %c0_i32_0 = arith.constant 0 : i32
    %c0_i32_1 = arith.constant 0 : i32
    return %arg0, %c0_i32, %c0_i32_0 : i32, i32, i32
  }
  func.func @transform_4(%arg0: i32, %arg1: i32) -> (i32, i32, i32) {
    %c0_i32 = arith.constant 0 : i32
    %c0_i32_0 = arith.constant 0 : i32
    %c0_i32_1 = arith.constant 0 : i32
    return %arg0, %c0_i32, %c0_i32_0 : i32, i32, i32
  }
}

module attributes {stable_mosaic.version = 11 : i64} {
  func.func @_conv_stats_kernel(%arg0: i32, %arg1: i32, %arg2: memref<1x256x2xf32, #tpu.memory_space<vmem>>, %arg3: memref<1x2x2xf32, #tpu.memory_space<vmem>>, %arg4: memref<256x2xf32, #tpu.memory_space<vmem>>, %arg5: memref<1x1x2xf32, #tpu.memory_space<vmem>>, %arg6: memref<1x1x2xf32, #tpu.memory_space<vmem>>, %arg7: memref<256x2xf32, #tpu.memory_space<vmem>>) attributes {dimension_semantics = [#tpu.dimension_semantics<parallel>, #tpu.dimension_semantics<arbitrary>], iteration_bounds = array<i64: 3, 9>, scalar_prefetch = 0 : i64, scratch_operands = 1 : i64, tpu.core_type = #tpu.core_type<tc>, window_params = [{transform_indices = @transform_0, window_bounds = array<i64: 1, 256, 2>}, {transform_indices = @transform_1, window_bounds = array<i64: 1, 2, 2>}, {transform_indices = @transform_2, window_bounds = array<i64: 256, 2>}, {transform_indices = @transform_3, window_bounds = array<i64: 1, 1, 2>}, {transform_indices = @transform_4, window_bounds = array<i64: 1, 1, 2>}]} {
    %c0_i32 = arith.constant 0 : i32
    %0 = arith.cmpi eq, %arg1, %c0_i32 : i32
    %1 = arith.extui %0 : i1 to i32
    %c0_i32_0 = arith.constant 0 : i32
    %2 = arith.cmpi ne, %1, %c0_i32_0 : i32
    scf.if %2 {
      %cst_11 = arith.constant 0.000000e+00 : f32
      %14 = vector.broadcast %cst_11 : f32 to vector<256x2xf32>
      %c0_12 = arith.constant 0 : index
      %c0_13 = arith.constant 0 : index
      %15 = vector.load %arg7[%c0_12, %c0_13] : memref<256x2xf32, #tpu.memory_space<vmem>>, vector<256x2xf32>
      tpu.vector_store %arg7[%c0_12, %c0_13], %14 {strides = array<i32>} : memref<256x2xf32, #tpu.memory_space<vmem>>, vector<256x2xf32>,
    } else {
    }
    %c0 = arith.constant 0 : index
    %c0_1 = arith.constant 0 : index
    %3 = vector.load %arg7[%c0, %c0_1] : memref<256x2xf32, #tpu.memory_space<vmem>>, vector<256x2xf32>
    %c0_2 = arith.constant 0 : index
    %c0_3 = arith.constant 0 : index
    %c0_4 = arith.constant 0 : index
    %4 = vector.load %arg2[%c0_2, %c0_3, %c0_4] : memref<1x256x2xf32, #tpu.memory_space<vmem>>, vector<1x256x2xf32>
    %5 = vector.shape_cast %4 : vector<1x256x2xf32> to vector<256x2xf32>
    %c0_5 = arith.constant 0 : index
    %c0_6 = arith.constant 0 : index
    %c0_7 = arith.constant 0 : index
    %6 = vector.load %arg3[%c0_5, %c0_6, %c0_7] : memref<1x2x2xf32, #tpu.memory_space<vmem>>, vector<1x2x2xf32>
    %7 = vector.shape_cast %6 : vector<1x2x2xf32> to vector<2x2xf32>
    %cst = arith.constant dense<0.000000e+00> : vector<256x2xf32>
    %8 = tpu.matmul %5, %7, %cst {dimension_numbers = #tpu.dot_dimension_numbers<[1], [0], [0], [1], [0, 0, 1, 1], [], []>} : vector<256x2xf32>, vector<2x2xf32>, vector<256x2xf32> -> vector<256x2xf32>
    %9 = arith.addf %3, %8 : vector<256x2xf32>
    %c0_8 = arith.constant 0 : index
    %c0_9 = arith.constant 0 : index
    %10 = vector.load %arg7[%c0_8, %c0_9] : memref<256x2xf32, #tpu.memory_space<vmem>>, vector<256x2xf32>
    tpu.vector_store %arg7[%c0_8, %c0_9], %9 {strides = array<i32>} : memref<256x2xf32, #tpu.memory_space<vmem>>, vector<256x2xf32>,
    %c8_i32 = arith.constant 8 : i32
    %11 = arith.cmpi eq, %arg1, %c8_i32 : i32
    %12 = arith.extui %11 : i1 to i32
    %c0_i32_10 = arith.constant 0 : i32
    %13 = arith.cmpi ne, %12, %c0_i32_10 : i32
    scf.if %13 {
      %c0_11 = arith.constant 0 : index
      %c0_12 = arith.constant 0 : index
      %14 = vector.load %arg7[%c0_11, %c0_12] : memref<256x2xf32, #tpu.memory_space<vmem>>, vector<256x2xf32>
      %c0_13 = arith.constant 0 : index
      %c0_14 = arith.constant 0 : index
      %15 = vector.load %arg4[%c0_13, %c0_14] : memref<256x2xf32, #tpu.memory_space<vmem>>, vector<256x2xf32>
      tpu.vector_store %arg4[%c0_13, %c0_14], %14 {strides = array<i32>} : memref<256x2xf32, #tpu.memory_space<vmem>>, vector<256x2xf32>,
      %cst_15 = arith.constant dense<0.000000e+00> : vector<2xf32>
      %16 = vector.multi_reduction <add>, %14, %cst_15 [0] : vector<256x2xf32> to vector<2xf32>
      %17 = vector.shape_cast %16 : vector<2xf32> to vector<1x2xf32>
      %c0_16 = arith.constant 0 : index
      %c0_17 = arith.constant 0 : index
      %c0_18 = arith.constant 0 : index
      %18 = vector.load %arg5[%c0_16, %c0_17, %c0_18] : memref<1x1x2xf32, #tpu.memory_space<vmem>>, vector<1x1x2xf32>
      %19 = vector.shape_cast %18 : vector<1x1x2xf32> to vector<1x2xf32>
      %20 = vector.shape_cast %17 : vector<1x2xf32> to vector<1x1x2xf32>
      tpu.vector_store %arg5[%c0_16, %c0_17, %c0_18], %20 {strides = array<i32>} : memref<1x1x2xf32, #tpu.memory_space<vmem>>, vector<1x1x2xf32>,
      %21 = arith.mulf %14, %14 : vector<256x2xf32>
      %cst_19 = arith.constant dense<0.000000e+00> : vector<2xf32>
      %22 = vector.multi_reduction <add>, %21, %cst_19 [0] : vector<256x2xf32> to vector<2xf32>
      %23 = vector.shape_cast %22 : vector<2xf32> to vector<1x2xf32>
      %c0_20 = arith.constant 0 : index
      %c0_21 = arith.constant 0 : index
      %c0_22 = arith.constant 0 : index
      %24 = vector.load %arg6[%c0_20, %c0_21, %c0_22] : memref<1x1x2xf32, #tpu.memory_space<vmem>>, vector<1x1x2xf32>
      %25 = vector.shape_cast %24 : vector<1x1x2xf32> to vector<1x2xf32>
      %26 = vector.shape_cast %23 : vector<1x2xf32> to vector<1x1x2xf32>
      tpu.vector_store %arg6[%c0_20, %c0_21, %c0_22], %26 {strides = array<i32>} : memref<1x1x2xf32, #tpu.memory_space<vmem>>, vector<1x1x2xf32>,
    } else {
    }
    return
  }
  func.func @transform_0(%arg0: i32, %arg1: i32) -> (i32, i32, i32) {
    %c0_i32 = arith.constant 0 : i32
    %c0_i32_0 = arith.constant 0 : i32
    return %arg1, %arg0, %c0_i32 : i32, i32, i32
  }
  func.func @transform_1(%arg0: i32, %arg1: i32) -> (i32, i32, i32) {
    %c0_i32 = arith.constant 0 : i32
    %c0_i32_0 = arith.constant 0 : i32
    %c0_i32_1 = arith.constant 0 : i32
    return %arg1, %c0_i32, %c0_i32_0 : i32, i32, i32
  }
  func.func @transform_2(%arg0: i32, %arg1: i32) -> (i32, i32) {
    %c0_i32 = arith.constant 0 : i32
    %c0_i32_0 = arith.constant 0 : i32
    return %arg0, %c0_i32 : i32, i32
  }
  func.func @transform_3(%arg0: i32, %arg1: i32) -> (i32, i32, i32) {
    %c0_i32 = arith.constant 0 : i32
    %c0_i32_0 = arith.constant 0 : i32
    %c0_i32_1 = arith.constant 0 : i32
    return %arg0, %c0_i32, %c0_i32_0 : i32, i32, i32
  }
  func.func @transform_4(%arg0: i32, %arg1: i32) -> (i32, i32, i32) {
    %c0_i32 = arith.constant 0 : i32
    %c0_i32_0 = arith.constant 0 : i32
    %c0_i32_1 = arith.constant 0 : i32
    return %arg0, %c0_i32, %c0_i32_0 : i32, i32, i32
  }
}

module attributes {stable_mosaic.version = 11 : i64} {
  func.func @_conv_stats_kernel(%arg0: i32, %arg1: i32, %arg2: memref<1x168x16xf32, #tpu.memory_space<vmem>>, %arg3: memref<1x16x16xf32, #tpu.memory_space<vmem>>, %arg4: memref<168x16xf32, #tpu.memory_space<vmem>>, %arg5: memref<1x1x16xf32, #tpu.memory_space<vmem>>, %arg6: memref<1x1x16xf32, #tpu.memory_space<vmem>>, %arg7: memref<168x16xf32, #tpu.memory_space<vmem>>) attributes {dimension_semantics = [#tpu.dimension_semantics<parallel>, #tpu.dimension_semantics<arbitrary>], iteration_bounds = array<i64: 1, 1>, scalar_prefetch = 0 : i64, scratch_operands = 1 : i64, tpu.core_type = #tpu.core_type<tc>, window_params = [{transform_indices = @transform_0, window_bounds = array<i64: 1, 168, 16>}, {transform_indices = @transform_1, window_bounds = array<i64: 1, 16, 16>}, {transform_indices = @transform_2, window_bounds = array<i64: 168, 16>}, {transform_indices = @transform_3, window_bounds = array<i64: 1, 1, 16>}, {transform_indices = @transform_4, window_bounds = array<i64: 1, 1, 16>}]} {
    %c0_i32 = arith.constant 0 : i32
    %0 = arith.cmpi eq, %arg1, %c0_i32 : i32
    %1 = arith.extui %0 : i1 to i32
    %c0_i32_0 = arith.constant 0 : i32
    %2 = arith.cmpi ne, %1, %c0_i32_0 : i32
    scf.if %2 {
      %cst_12 = arith.constant 0.000000e+00 : f32
      %14 = vector.broadcast %cst_12 : f32 to vector<168x16xf32>
      %c0_13 = arith.constant 0 : index
      %c0_14 = arith.constant 0 : index
      %15 = vector.load %arg7[%c0_13, %c0_14] : memref<168x16xf32, #tpu.memory_space<vmem>>, vector<168x16xf32>
      tpu.vector_store %arg7[%c0_13, %c0_14], %14 {strides = array<i32>} : memref<168x16xf32, #tpu.memory_space<vmem>>, vector<168x16xf32>,
    } else {
    }
    %c0 = arith.constant 0 : index
    %c0_1 = arith.constant 0 : index
    %3 = vector.load %arg7[%c0, %c0_1] : memref<168x16xf32, #tpu.memory_space<vmem>>, vector<168x16xf32>
    %c0_2 = arith.constant 0 : index
    %c0_3 = arith.constant 0 : index
    %c0_4 = arith.constant 0 : index
    %4 = vector.load %arg2[%c0_2, %c0_3, %c0_4] : memref<1x168x16xf32, #tpu.memory_space<vmem>>, vector<1x168x16xf32>
    %5 = vector.shape_cast %4 : vector<1x168x16xf32> to vector<168x16xf32>
    %c0_5 = arith.constant 0 : index
    %c0_6 = arith.constant 0 : index
    %c0_7 = arith.constant 0 : index
    %6 = vector.load %arg3[%c0_5, %c0_6, %c0_7] : memref<1x16x16xf32, #tpu.memory_space<vmem>>, vector<1x16x16xf32>
    %7 = vector.shape_cast %6 : vector<1x16x16xf32> to vector<16x16xf32>
    %cst = arith.constant dense<0.000000e+00> : vector<168x16xf32>
    %8 = tpu.matmul %5, %7, %cst {dimension_numbers = #tpu.dot_dimension_numbers<[1], [0], [0], [1], [0, 0, 1, 1], [], []>} : vector<168x16xf32>, vector<16x16xf32>, vector<168x16xf32> -> vector<168x16xf32>
    %9 = arith.addf %3, %8 : vector<168x16xf32>
    %c0_8 = arith.constant 0 : index
    %c0_9 = arith.constant 0 : index
    %10 = vector.load %arg7[%c0_8, %c0_9] : memref<168x16xf32, #tpu.memory_space<vmem>>, vector<168x16xf32>
    tpu.vector_store %arg7[%c0_8, %c0_9], %9 {strides = array<i32>} : memref<168x16xf32, #tpu.memory_space<vmem>>, vector<168x16xf32>,
    %c0_i32_10 = arith.constant 0 : i32
    %11 = arith.cmpi eq, %arg1, %c0_i32_10 : i32
    %12 = arith.extui %11 : i1 to i32
    %c0_i32_11 = arith.constant 0 : i32
    %13 = arith.cmpi ne, %12, %c0_i32_11 : i32
    scf.if %13 {
      %c0_12 = arith.constant 0 : index
      %c0_13 = arith.constant 0 : index
      %14 = vector.load %arg7[%c0_12, %c0_13] : memref<168x16xf32, #tpu.memory_space<vmem>>, vector<168x16xf32>
      %c0_14 = arith.constant 0 : index
      %c0_15 = arith.constant 0 : index
      %15 = vector.load %arg4[%c0_14, %c0_15] : memref<168x16xf32, #tpu.memory_space<vmem>>, vector<168x16xf32>
      tpu.vector_store %arg4[%c0_14, %c0_15], %14 {strides = array<i32>} : memref<168x16xf32, #tpu.memory_space<vmem>>, vector<168x16xf32>,
      %cst_16 = arith.constant dense<0.000000e+00> : vector<16xf32>
      %16 = vector.multi_reduction <add>, %14, %cst_16 [0] : vector<168x16xf32> to vector<16xf32>
      %17 = vector.shape_cast %16 : vector<16xf32> to vector<1x16xf32>
      %c0_17 = arith.constant 0 : index
      %c0_18 = arith.constant 0 : index
      %c0_19 = arith.constant 0 : index
      %18 = vector.load %arg5[%c0_17, %c0_18, %c0_19] : memref<1x1x16xf32, #tpu.memory_space<vmem>>, vector<1x1x16xf32>
      %19 = vector.shape_cast %18 : vector<1x1x16xf32> to vector<1x16xf32>
      %20 = vector.shape_cast %17 : vector<1x16xf32> to vector<1x1x16xf32>
      tpu.vector_store %arg5[%c0_17, %c0_18, %c0_19], %20 {strides = array<i32>} : memref<1x1x16xf32, #tpu.memory_space<vmem>>, vector<1x1x16xf32>,
      %21 = arith.mulf %14, %14 : vector<168x16xf32>
      %cst_20 = arith.constant dense<0.000000e+00> : vector<16xf32>
      %22 = vector.multi_reduction <add>, %21, %cst_20 [0] : vector<168x16xf32> to vector<16xf32>
      %23 = vector.shape_cast %22 : vector<16xf32> to vector<1x16xf32>
      %c0_21 = arith.constant 0 : index
      %c0_22 = arith.constant 0 : index
      %c0_23 = arith.constant 0 : index
      %24 = vector.load %arg6[%c0_21, %c0_22, %c0_23] : memref<1x1x16xf32, #tpu.memory_space<vmem>>, vector<1x1x16xf32>
      %25 = vector.shape_cast %24 : vector<1x1x16xf32> to vector<1x16xf32>
      %26 = vector.shape_cast %23 : vector<1x16xf32> to vector<1x1x16xf32>
      tpu.vector_store %arg6[%c0_21, %c0_22, %c0_23], %26 {strides = array<i32>} : memref<1x1x16xf32, #tpu.memory_space<vmem>>, vector<1x1x16xf32>,
    } else {
    }
    return
  }
  func.func @transform_0(%arg0: i32, %arg1: i32) -> (i32, i32, i32) {
    %c0_i32 = arith.constant 0 : i32
    %c0_i32_0 = arith.constant 0 : i32
    return %arg1, %arg0, %c0_i32 : i32, i32, i32
  }
  func.func @transform_1(%arg0: i32, %arg1: i32) -> (i32, i32, i32) {
    %c0_i32 = arith.constant 0 : i32
    %c0_i32_0 = arith.constant 0 : i32
    %c0_i32_1 = arith.constant 0 : i32
    return %arg1, %c0_i32, %c0_i32_0 : i32, i32, i32
  }
  func.func @transform_2(%arg0: i32, %arg1: i32) -> (i32, i32) {
    %c0_i32 = arith.constant 0 : i32
    %c0_i32_0 = arith.constant 0 : i32
    return %arg0, %c0_i32 : i32, i32
  }
  func.func @transform_3(%arg0: i32, %arg1: i32) -> (i32, i32, i32) {
    %c0_i32 = arith.constant 0 : i32
    %c0_i32_0 = arith.constant 0 : i32
    %c0_i32_1 = arith.constant 0 : i32
    return %arg0, %c0_i32, %c0_i32_0 : i32, i32, i32
  }
  func.func @transform_4(%arg0: i32, %arg1: i32) -> (i32, i32, i32) {
    %c0_i32 = arith.constant 0 : i32
    %c0_i32_0 = arith.constant 0 : i32
    %c0_i32_1 = arith.constant 0 : i32
    return %arg0, %c0_i32, %c0_i32_0 : i32, i32, i32
  }
}

module attributes {stable_mosaic.version = 11 : i64} {
  func.func @_affine_act_kernel(%arg0: i32, %arg1: memref<24x128xf32, #tpu.memory_space<vmem>>, %arg2: memref<1x128xf32, #tpu.memory_space<vmem>>, %arg3: memref<1x128xf32, #tpu.memory_space<vmem>>, %arg4: memref<24x128xf32, #tpu.memory_space<vmem>>) attributes {dimension_semantics = [#tpu.dimension_semantics<parallel>], iteration_bounds = array<i64: 1>, scalar_prefetch = 0 : i64, scratch_operands = 0 : i64, tpu.core_type = #tpu.core_type<tc>, window_params = [{transform_indices = @transform_0, window_bounds = array<i64: 24, 128>}, {pipeline_mode = #tpu.pipeline_mode<synchronous>, transform_indices = @transform_1, window_bounds = array<i64: 1, 128>}, {pipeline_mode = #tpu.pipeline_mode<synchronous>, transform_indices = @transform_2, window_bounds = array<i64: 1, 128>}, {transform_indices = @transform_3, window_bounds = array<i64: 24, 128>}]} {
    %c0 = arith.constant 0 : index
    %c0_0 = arith.constant 0 : index
    %0 = vector.load %arg1[%c0, %c0_0] : memref<24x128xf32, #tpu.memory_space<vmem>>, vector<24x128xf32>
    %c0_1 = arith.constant 0 : index
    %c0_2 = arith.constant 0 : index
    %1 = vector.load %arg2[%c0_1, %c0_2] : memref<1x128xf32, #tpu.memory_space<vmem>>, vector<1x128xf32>
    %2 = vector.broadcast %1 : vector<1x128xf32> to vector<24x128xf32>
    %3 = arith.mulf %0, %2 : vector<24x128xf32>
    %c0_3 = arith.constant 0 : index
    %c0_4 = arith.constant 0 : index
    %4 = vector.load %arg3[%c0_3, %c0_4] : memref<1x128xf32, #tpu.memory_space<vmem>>, vector<1x128xf32>
    %5 = vector.broadcast %4 : vector<1x128xf32> to vector<24x128xf32>
    %6 = arith.addf %3, %5 : vector<24x128xf32>
    %7 = arith.negf %6 : vector<24x128xf32>
    %8 = math.exp %7 : vector<24x128xf32>
    %cst = arith.constant 1.000000e+00 : f32
    %9 = vector.broadcast %cst : f32 to vector<24x128xf32>
    %10 = arith.addf %9, %8 : vector<24x128xf32>
    %11 = arith.divf %9, %10 : vector<24x128xf32>
    %12 = arith.mulf %6, %11 : vector<24x128xf32>
    %c0_5 = arith.constant 0 : index
    %c0_6 = arith.constant 0 : index
    %13 = vector.load %arg4[%c0_5, %c0_6] : memref<24x128xf32, #tpu.memory_space<vmem>>, vector<24x128xf32>
    tpu.vector_store %arg4[%c0_5, %c0_6], %12 {strides = array<i32>} : memref<24x128xf32, #tpu.memory_space<vmem>>, vector<24x128xf32>,
    return
  }
  func.func @transform_0(%arg0: i32) -> (i32, i32) {
    %c0_i32 = arith.constant 0 : i32
    %c0_i32_0 = arith.constant 0 : i32
    return %arg0, %c0_i32 : i32, i32
  }
  func.func @transform_1(%arg0: i32) -> (i32, i32) {
    %c0_i32 = arith.constant 0 : i32
    %c0_i32_0 = arith.constant 0 : i32
    %c0_i32_1 = arith.constant 0 : i32
    return %c0_i32, %c0_i32_0 : i32, i32
  }
  func.func @transform_2(%arg0: i32) -> (i32, i32) {
    %c0_i32 = arith.constant 0 : i32
    %c0_i32_0 = arith.constant 0 : i32
    %c0_i32_1 = arith.constant 0 : i32
    return %c0_i32, %c0_i32_0 : i32, i32
  }
  func.func @transform_3(%arg0: i32) -> (i32, i32) {
    %c0_i32 = arith.constant 0 : i32
    %c0_i32_0 = arith.constant 0 : i32
    return %arg0, %c0_i32 : i32, i32
  }
}

</mosaic_0001>

<bundles_post_ra>
// kernel: tile.88
= control target key start
LH: loop header
LB: loop body
LE: loop exit
PB: predicated region body
PF: predicated region fallthrough
CT: control target
= control target key end

     0   :  { %s64_s0 = inlined_call_operand.vmem [shape: f32[2], index: 0, kind: input, shape index: {}]   ;;  %s65_s1 = inlined_call_operand.vmem [shape: f32[64,2], index: 1, kind: output, shape index: {}]  }
   0x1   :  { %v4_v0 = vld [vmem:[%s64_s0] ss:$0 sm:$0xff] }
   0x2   :  { %5 = vst [vmem:[%s65_s1] sm:$0xff] %v4_v0 }
   0x3   :  { %20 = vst [vmem:[%s65_s1 + $0x8] sm:$0xff] %v4_v0 }
   0x4   :  { %21 = vst [vmem:[%s65_s1 + $0x10] sm:$0xff] %v4_v0 }
   0x5   :  { %22 = vst [vmem:[%s65_s1 + $0x18] sm:$0xff] %v4_v0 }
   0x6   :  { %23 = vst [vmem:[%s65_s1 + $0x20] sm:$0xff] %v4_v0 }
   0x7   :  { %24 = vst [vmem:[%s65_s1 + $0x28] sm:$0xff] %v4_v0 }
   0x8   :  { %25 = vst [vmem:[%s65_s1 + $0x30] sm:$0xff] %v4_v0 }
   0x9   :  { %26 = vst [vmem:[%s65_s1 + $0x38] sm:$0xff] %v4_v0 }

// kernel: dcmconv2_forward.17
= control target key start
LH: loop header
LB: loop body
LE: loop exit
PB: predicated region body
PF: predicated region fallthrough
CT: control target
= control target key end

     0   :  { %s166_s0 = inlined_call_operand.vmem [shape: f32[40,128], index: 0, kind: input, shape index: {}]   ;;  %s167_s1 = inlined_call_operand.vmem [shape: f32[40,128], index: 1, kind: input, shape index: {}]   ;;  %s168_s2 = inlined_call_operand.vmem [shape: f32[40,128], index: 2, kind: input, shape index: {}]   ;;  %s169_s3 = inlined_call_operand.vmem [shape: f32[40,128], index: 3, kind: input, shape index: {}]   ;;  %s170_s4 = inlined_call_operand.vmem [shape: f32[40,128], index: 4, kind: output, shape index: {}]  }
   0x1   :  { %v17_v0 = vld [vmem:[%s166_s0] sm:$0xff]  ;;  %v18_v5 = vld [vmem:[%s166_s0 + $0x8] sm:$0xff]  ;;  %v19_v11 = vld [vmem:[%s166_s0 + $0x10] sm:$0xff] }
   0x2   :  { %v22_v1 = vld [vmem:[%s167_s1] sm:$0xff]  ;;  %v23_v6 = vld [vmem:[%s167_s1 + $0x8] sm:$0xff]  ;;  %v24_v13 = vld [vmem:[%s167_s1 + $0x10] sm:$0xff] }
   0x3   :  { %v27_v2 = vld [vmem:[%s168_s2] sm:$0xff]  ;;  %v37_v4 = vadd.f32 %v22_v1, %v17_v0  ;;  %v28_v8 = vld [vmem:[%s168_s2 + $0x8] sm:$0xff]  ;;  %v38_v10 = vadd.f32 %v23_v6, %v18_v5  ;;  %v29_v14 = vld [vmem:[%s168_s2 + $0x10] sm:$0xff]  ;;  %v39_v17 = vadd.f32 %v24_v13, %v19_v11 }
   0x4   :  { %v32_v3 = vld [vmem:[%s169_s3] sm:$0xff]  ;;  %v33_v9 = vld [vmem:[%s169_s3 + $0x8] sm:$0xff]  ;;  %v34_v15 = vld [vmem:[%s169_s3 + $0x10] sm:$0xff] }
   0x5   :  { %v42_v7 = vadd.f32 %v32_v3, %v27_v2  ;;  %v43_v12 = vadd.f32 %v33_v9, %v28_v8  ;;  %v44_v18 = vadd.f32 %v34_v15, %v29_v14  ;;  %v20_v19 = vld [vmem:[%s166_s0 + $0x18] sm:$0xff]  ;;  %v21_v25 = vld [vmem:[%s166_s0 + $0x20] sm:$0xff] }
   0x6   :  { %v25_v20 = vld [vmem:[%s167_s1 + $0x18] sm:$0xff]  ;;  %v26_v26 = vld [vmem:[%s167_s1 + $0x20] sm:$0xff] }
   0x7   :  { %v47_v16 = vadd.f32 %v42_v7, %v37_v4  ;;  %v30_v21 = vld [vmem:[%s168_s2 + $0x18] sm:$0xff]  ;;  %v48_v22 = vadd.f32 %v43_v12, %v38_v10  ;;  %v40_v24 = vadd.f32 %v25_v20, %v20_v19  ;;  %v49_v28 = vadd.f32 %v44_v18, %v39_v17  ;;  %v31_v30 = vld [vmem:[%s168_s2 + $0x20] sm:$0xff] }
   0x8   :  { %v35_v23 = vld [vmem:[%s169_s3 + $0x18] sm:$0xff]  ;;  %v36_v31 = vld [vmem:[%s169_s3 + $0x20] sm:$0xff]  ;;  %v41_v32 = vadd.f32 %v26_v26, %v21_v25 }
   0x9   :  { %v52_v27 = vmul.f32 0.25, %v47_v16  ;;  %v45_v29 = vadd.f32 %v35_v23, %v30_v21  ;;  %v53_v33 = vmul.f32 0.25, %v48_v22  ;;  %v46_v34 = vadd.f32 %v36_v31, %v31_v30 }
   0xa   :  { %v54_v35 = vmul.f32 0.25, %v49_v28 }
   0xb   :  { %57 = vst [vmem:[%s170_s4] sm:$0xff] %v52_v27  ;;  %v50_v36 = vadd.f32 %v45_v29, %v40_v24  ;;  %v51_v37 = vadd.f32 %v46_v34, %v41_v32 }
   0xc   :  { %58 = vst [vmem:[%s170_s4 + $0x8] sm:$0xff] %v53_v33 }
   0xd   :  { %59 = vst [vmem:[%s170_s4 + $0x10] sm:$0xff] %v54_v35  ;;  %v55_v38 = vmul.f32 0.25, %v50_v36  ;;  %v56_v39 = vmul.f32 0.25, %v51_v37 }
   0xf   :  { %60 = vst [vmem:[%s170_s4 + $0x18] sm:$0xff] %v55_v38 }
  0x10   :  { %61 = vst [vmem:[%s170_s4 + $0x20] sm:$0xff] %v56_v39 }

// kernel: tile.89
= control target key start
LH: loop header
LB: loop body
LE: loop exit
PB: predicated region body
PF: predicated region fallthrough
CT: control target
= control target key end

     0   :  { %s515_s10 = smov 126   ;;  %s516_s11 = smov 122   ;;  %vm3_vm0 = vcmask 15360   ;;  %vm9_vm1 = vcmask 1048560   ;;  %vm15_vm2 = vcmask 1032160   ;;  %vm21_vm3 = vcmask 1015760   ;;  %s783_s0 = inlined_call_operand.vmem [shape: f32[64,2], index: 0, kind: input, shape index: {}]   ;;  %s784_s1 = inlined_call_operand.vmem [shape: f32[1,128], index: 1, kind: output, shape index: {}]  }
   0x1   :  { %v389_v0 = vld [vmem:[%s783_s0 + $0x3f] sm:$0x1]   ;;  %v391_v1 = vld [vmem:[%s783_s0 + $0x3d] sm:$0x1]   ;;  %v393_v2 = vld [vmem:[%s783_s0 + $0x3b] sm:$0x1]  }
   0x2   :  { %7 = vrot.lane.b32.xlu0 %v389_v0, %s515_s10  ;;  %19 = vrot.lane.b32.xlu1 %v391_v1, %s516_s11  ;;  %s517_s14 = smov 118   ;;  %v390_v3 = vld [vmem:[%s783_s0 + $0x3e] sm:$0x1]   ;;  %v392_v4 = vld [vmem:[%s783_s0 + $0x3c] sm:$0x1]   ;;  %s518_s19 = smov 124  }
   0x3   :  { %31 = vrot.lane.b32.xlu2 %v393_v2, %s517_s14  ;;  %s519_s20 = smov 120   ;;  %v394_v5 = vld [vmem:[%s783_s0 + $0x3a] sm:$0x1]   ;;  %s520_s23 = smov 116   ;;  %v395_v6 = vld [vmem:[%s783_s0 + $0x39] sm:$0x1]  }
   0x4   :  { %v396_v7 = vld [vmem:[%s783_s0 + $0x38] sm:$0x1]   ;;  %s521_s28 = smov 114   ;;  %s522_s29 = smov 112   ;;  %v397_v8 = vld [vmem:[%s783_s0 + $0x37] sm:$0x1]  }
   0x5   :  { %s523_s3 = smov 110   ;;  %v398_v9 = vld [vmem:[%s783_s0 + $0x36] sm:$0x1]   ;;  %v399_v10 = vld [vmem:[%s783_s0 + $0x35] sm:$0x1]   ;;  %s524_s8 = smov 108  }
   0x6   :  { %s525_s9 = smov 106   ;;  %v400_v11 = vld [vmem:[%s783_s0 + $0x34] sm:$0x1]   ;;  %s526_s12 = smov 104   ;;  %v401_v12 = vld [vmem:[%s783_s0 + $0x33] sm:$0x1]  }
   0x7   :  { %v402_v13 = vld [vmem:[%s783_s0 + $0x32] sm:$0x1]   ;;  %s527_s17 = smov 102   ;;  %s528_s18 = smov 100   ;;  %v403_v14 = vld [vmem:[%s783_s0 + $0x31] sm:$0x1]  }
   0x8   :  { %s529_s21 = smov 98   ;;  %v404_v15 = vld [vmem:[%s783_s0 + $0x30] sm:$0x1]   ;;  %v405_v16 = vld [vmem:[%s783_s0 + $0x2f] sm:$0x1]   ;;  %s530_s26 = smov 96  }
   0x9   :  { %s531_s27 = smov 94   ;;  %v406_v17 = vld [vmem:[%s783_s0 + $0x2e] sm:$0x1]   ;;  %s532_s30 = smov 92   ;;  %v407_v18 = vld [vmem:[%s783_s0 + $0x2d] sm:$0x1]  }
   0xa   :  { %13 = vrot.lane.b32.xlu0 %v390_v3, %s518_s19  ;;  %25 = vrot.lane.b32.xlu1 %v392_v4, %s519_s20  ;;  %v408_v19 = vld [vmem:[%s783_s0 + $0x2c] sm:$0x1]   ;;  %s533_s6 = smov 90   ;;  %s534_s7 = smov 88   ;;  %v409_v20 = vld [vmem:[%s783_s0 + $0x2b] sm:$0x1]  }
   0xb   :  { %37 = vrot.lane.b32.xlu2 %v394_v5, %s520_s23  ;;  %s535_s10 = smov 86   ;;  %v410_v21 = vld [vmem:[%s783_s0 + $0x2a] sm:$0x1]   ;;  %v411_v22 = vld [vmem:[%s783_s0 + $0x29] sm:$0x1]   ;;  %s536_s15 = smov 84  }
   0xc   :  { %s537_s16 = smov 82   ;;  %v412_v23 = vld [vmem:[%s783_s0 + $0x28] sm:$0x1]   ;;  %s538_s19 = smov 80   ;;  %v413_v24 = vld [vmem:[%s783_s0 + $0x27] sm:$0x1]  }
   0xd   :  { %v414_v25 = vld [vmem:[%s783_s0 + $0x26] sm:$0x1]   ;;  %s539_s24 = smov 78   ;;  %s540_s25 = smov 76   ;;  %v415_v26 = vld [vmem:[%s783_s0 + $0x25] sm:$0x1]  }
   0xe   :  { %v416_v27 = vld [vmem:[%s783_s0 + $0x24] sm:$0x1]   ;;  %v417_v28 = vld [vmem:[%s783_s0 + $0x23] sm:$0x1]   ;;  %s542_s4 = smov 72   ;;  %s543_s5 = smov 70  }
   0xf   :  { %v418_v29 = vld [vmem:[%s783_s0 + $0x22] sm:$0x1]   ;;  %v419_v30 = vld [vmem:[%s783_s0 + $0x21] sm:$0x1]   ;;  %v420_v31 = vld [vmem:[%s783_s0 + $0x20] sm:$0x1]  }
  0x10   :  { %s545_s13 = smov 66   ;;  %s546_s14 = smov 64   ;;  %v421_v32 = vld [vmem:[%s783_s0 + $0x1f] sm:$0x1]   ;;  %v2_v33 = vld [vmem:[%s783_s0] sm:$0x1]  }
  0x11   :  { %4 = vst.msk [vmem:[#allocation0] sm:$0x1] %vm3_vm0, %v2_v33   ;;  %v422_v34 = vld [vmem:[%s783_s0 + $0x1e] sm:$0x1]   ;;  %v423_v35 = vld [vmem:[%s783_s0 + $0x1d] sm:$0x1]  }
  0x12   :  { %43 = vrot.lane.b32.xlu0 %v395_v6, %s521_s28  ;;  %49 = vrot.lane.b32.xlu1 %v396_v7, %s522_s29  ;;  %s541_s28 = smov 74   ;;  %v424_v36 = vld [vmem:[%s783_s0 + $0x1c] sm:$0x1]   ;;  %v425_v37 = vld [vmem:[%s783_s0 + $0x1b] sm:$0x1]   ;;  %s557_s22 = smov 42  }
  0x13   :  { %55 = vrot.lane.b32.xlu2 %v397_v8, %s523_s3  ;;  %v426_v38 = vld [vmem:[%s783_s0 + $0x1a] sm:$0x1]   ;;  %v427_v40 = vld [vmem:[%s783_s0 + $0x19] sm:$0x1]   ;;  %v428_v41 = vld [vmem:[%s783_s0 + $0x18] sm:$0x1]  }
  0x14   :  { %v429_v42 = vld [vmem:[%s783_s0 + $0x17] sm:$0x1]   ;;  %v430_v44 = vld [vmem:[%s783_s0 + $0x16] sm:$0x1]   ;;  %v431_v45 = vld [vmem:[%s783_s0 + $0x15] sm:$0x1]  }
  0x15   :  { %v432_v46 = vld [vmem:[%s783_s0 + $0x14] sm:$0x1]   ;;  %s558_s23 = smov 40   ;;  %v433_v48 = vld [vmem:[%s783_s0 + $0x13] sm:$0x1]   ;;  %s560_s2 = smov 36  }
  0x16   :  { %v434_v51 = vld [vmem:[%s783_s0 + $0x12] sm:$0x1]   ;;  %v435_v52 = vld [vmem:[%s783_s0 + $0x11] sm:$0x1]   ;;  %s561_s3 = smov 34   ;;  %vm27_vm4 = vcmask 999360  }
  0x17   :  { %v436_v54 = vld [vmem:[%s783_s0 + $0x10] sm:$0x1]   ;;  %vm33_vm5 = vcmask 982960   ;;  %vm39_vm6 = vcmask 966560   ;;  %v437_v57 = vld [vmem:[%s783_s0 + $0xf] sm:$0x1]  }
  0x18   :  { %v438_v58 = vld [vmem:[%s783_s0 + $0xe] sm:$0x1]   ;;  %s563_s11 = smov 30   ;;  %vm45_vm7 = vcmask 950160   ;;  %vm51_vm8 = vcmask 933760   ;;  %vm57_vm9 = vcmask 917360  }
  0x19   :  { %v439_v60 = vld [vmem:[%s783_s0 + $0xd] sm:$0x1]   ;;  %v440_v63 = vld [vmem:[%s783_s0 + $0xc] sm:$0x1]   ;;  %v441_v0 = vld [vmem:[%s783_s0 + $0xb] sm:$0x1]  }
  0x1a   :  { %61 = vrot.lane.b32.xlu0 %v398_v9, %s524_s8  ;;  %67 = vrot.lane.b32.xlu1 %v399_v10, %s525_s9  ;;  %s544_s8 = smov 68   ;;  %s566_s20 = smov 24   ;;  %vm63_vm10 = vcmask 900960   ;;  %vm69_vm11 = vcmask 884560   ;;  %v442_v2 = vld [vmem:[%s783_s0 + $0xa] sm:$0x1]  }
  0x1b   :  { %73 = vrot.lane.b32.xlu2 %v400_v11, %s526_s12  ;;  %s564_s12 = smov 28   ;;  %vm75_vm12 = vcmask 868160   ;;  %v443_v5 = vld [vmem:[%s783_s0 + $0x9] sm:$0x1]   ;;  %v444_v6 = vld [vmem:[%s783_s0 + $0x8] sm:$0x1]  }
  0x1c   :  { %s569_s29 = smov 18   ;;  %vm81_vm13 = vcmask 851760   ;;  %vm87_vm14 = vcmask 835360   ;;  %v445_v8 = vld [vmem:[%s783_s0 + $0x7] sm:$0x1]   ;;  %vm93_vm15 = vcmask 818960  }
  0x1d   :  { %v446_v11 = vld [vmem:[%s783_s0 + $0x6] sm:$0x1]   ;;  %s572_s9 = smov 12   ;;  %vm99_vm0 = vcmask 802560  }
  0x22   :  { %79 = vrot.lane.b32.xlu0 %v401_v12, %s527_s17  ;;  %85 = vrot.lane.b32.xlu1 %v402_v13, %s528_s18  ;;  %s556_s17 = smov 44   ;;  %v447_v12 = vld [vmem:[%s783_s0 + $0x5] sm:$0x1]   ;;  %s575_s18 = smov 6  }
  0x23   :  { %91 = vrot.lane.b32.xlu2 %v403_v14, %s529_s21  ;;  %s567_s21 = smov 22   ;;  %v448_v14 = vld [vmem:[%s783_s0 + $0x4] sm:$0x1]  }
  0x2a   :  { %97 = vrot.lane.b32.xlu0 %v404_v15, %s530_s26  ;;  %103 = vrot.lane.b32.xlu1 %v405_v16, %s531_s27  ;;  %s559_s26 = smov 38  }
  0x2b   :  { %109 = vrot.lane.b32.xlu2 %v406_v17, %s532_s30  ;;  %s570_s30 = smov 16   ;;  %v449_v17 = vld [vmem:[%s783_s0 + $0x3] sm:$0x1]  }
  0x32   :  { %115 = vrot.lane.b32.xlu0 %v407_v18, %s533_s6  ;;  %121 = vrot.lane.b32.xlu1 %v408_v19, %s534_s7  ;;  %s562_s6 = smov 32   ;;  %v450_v18 = vld [vmem:[%s783_s0 + $0x2] sm:$0x1]  }
  0x33   :  { %127 = vrot.lane.b32.xlu2 %v409_v20, %s535_s10  ;;  %s573_s10 = smov 10   ;;  %v451_v20 = vld [vmem:[%s783_s0 + $0x1] sm:$0x1]   ;;  %s577_s0 = smov 2  }
  0x3a   :  { %133 = vrot.lane.b32.xlu0 %v410_v21, %s536_s15  ;;  %139 = vrot.lane.b32.xlu1 %v411_v22, %s537_s16  ;;  %s565_s15 = smov 26  }
  0x3b   :  { %145 = vrot.lane.b32.xlu2 %v412_v23, %s538_s19  ;;  %s547_s19 = smov 62  }
  0x42   :  { %151 = vrot.lane.b32.xlu0 %v413_v24, %s539_s24  ;;  %157 = vrot.lane.b32.xlu1 %v414_v25, %s540_s25  ;;  %s548_s24 = smov 60   ;;  %s549_s25 = smov 58  }
  0x43   :  { %163 = vrot.lane.b32.xlu2 %v415_v26, %s541_s28  ;;  %s550_s28 = smov 56  }
  0x4a   :  { %169 = vrot.lane.b32.xlu0 %v416_v27, %s542_s4  ;;  %175 = vrot.lane.b32.xlu1 %v417_v28, %s543_s5  ;;  %s551_s4 = smov 54   ;;  %s552_s5 = smov 52  }
  0x4b   :  { %181 = vrot.lane.b32.xlu2 %v418_v29, %s544_s8  ;;  %s553_s8 = smov 50  }
  0x52   :  { %187 = vrot.lane.b32.xlu0 %v419_v30, %s545_s13  ;;  %193 = vrot.lane.b32.xlu1 %v420_v31, %s546_s14  ;;  %s554_s13 = smov 48   ;;  %s555_s14 = smov 46  }
  0x53   :  { %199 = vrot.lane.b32.xlu2 %v421_v32, %s547_s19  ;;  %s576_s19 = smov 4  }
  0x5a   :  { %205 = vrot.lane.b32.xlu0 %v422_v34, %s548_s24  ;;  %211 = vrot.lane.b32.xlu1 %v423_v35, %s549_s25  ;;  %s568_s24 = smov 20  }
  0x5b   :  { %217 = vrot.lane.b32.xlu2 %v424_v36, %s550_s28 }
  0x5d   :  { %v32_v39 = vpop.permute.xlu2 %31  }
  0x62   :  { %223 = vrot.lane.b32.xlu0 %v425_v37, %s551_s4  ;;  %229 = vrot.lane.b32.xlu1 %v426_v38, %s552_s5  ;;  %s571_s4 = smov 14  }
  0x63   :  { %235 = vrot.lane.b32.xlu2 %v427_v40, %s553_s8 }
  0x65   :  { %v38_v43 = vpop.permute.xlu2 %37  }
  0x6a   :  { %241 = vrot.lane.b32.xlu0 %v428_v41, %s554_s13  ;;  %247 = vrot.lane.b32.xlu1 %v429_v42, %s555_s14  ;;  %s574_s13 = smov 8  }
  0x6b   :  { %253 = vrot.lane.b32.xlu2 %v430_v44, %s556_s17 }
  0x6d   :  { %v56_v47 = vpop.permute.xlu2 %55  }
  0x72   :  { %259 = vrot.lane.b32.xlu0 %v431_v45, %s557_s22  ;;  %265 = vrot.lane.b32.xlu1 %v432_v46, %s558_s23 }
  0x73   :  { %271 = vrot.lane.b32.xlu2 %v433_v48, %s559_s26 }
  0x74   :  { %v8_v49 = vpop.permute.xlu0 %7   ;;  %v20_v50 = vpop.permute.xlu1 %19  }
  0x75   :  { %10 = vst.msk [vmem:[#allocation0] sm:$0x1] %vm9_vm1, %v8_v49   ;;  %v74_v53 = vpop.permute.xlu2 %73   ;;  %vm105_vm1 = vcmask 786160  }
  0x7a   :  { %277 = vrot.lane.b32.xlu0 %v434_v51, %s560_s2  ;;  %283 = vrot.lane.b32.xlu1 %v435_v52, %s561_s3 }
  0x7b   :  { %289 = vrot.lane.b32.xlu2 %v436_v54, %s562_s6 }
  0x7c   :  { %v14_v55 = vpop.permute.xlu0 %13   ;;  %v26_v56 = vpop.permute.xlu1 %25  }
  0x7d   :  { %16 = vst.msk [vmem:[#allocation0] sm:$0x1] %vm15_vm2, %v14_v55   ;;  %v92_v59 = vpop.permute.xlu2 %91   ;;  %vm111_vm2 = vcmask 769760  }
  0x7e   :  { %22 = vst.msk [vmem:[#allocation0] sm:$0x1] %vm21_vm3, %v20_v50   ;;  %vm117_vm3 = vcmask 753360  }
  0x7f   :  { %28 = vst.msk [vmem:[#allocation0] sm:$0x1] %vm27_vm4, %v26_v56   ;;  %vm123_vm4 = vcmask 736960  }
  0x80   :  { %34 = vst.msk [vmem:[#allocation0] sm:$0x1] %vm33_vm5, %v32_v39   ;;  %vm129_vm5 = vcmask 720560  }
  0x81   :  { %40 = vst.msk [vmem:[#allocation0] sm:$0x1] %vm39_vm6, %v38_v43   ;;  %vm135_vm6 = vcmask 704160  }
  0x82   :  { %295 = vrot.lane.b32.xlu0 %v437_v57, %s563_s11  ;;  %301 = vrot.lane.b32.xlu1 %v438_v58, %s564_s12 }
  0x83   :  { %307 = vrot.lane.b32.xlu2 %v439_v60, %s565_s15 }
  0x84   :  { %v44_v61 = vpop.permute.xlu0 %43   ;;  %v50_v62 = vpop.permute.xlu1 %49  }
  0x85   :  { %46 = vst.msk [vmem:[#allocation0] sm:$0x1] %vm45_vm7, %v44_v61   ;;  %v110_v1 = vpop.permute.xlu2 %109   ;;  %vm141_vm7 = vcmask 687760  }
  0x86   :  { %52 = vst.msk [vmem:[#allocation0] sm:$0x1] %vm51_vm8, %v50_v62   ;;  %vm147_vm8 = vcmask 671360  }
  0x87   :  { %58 = vst.msk [vmem:[#allocation0] sm:$0x1] %vm57_vm9, %v56_v47   ;;  %vm153_vm9 = vcmask 654960  }
  0x8a   :  { %313 = vrot.lane.b32.xlu0 %v440_v63, %s566_s20  ;;  %319 = vrot.lane.b32.xlu1 %v441_v0, %s567_s21 }
  0x8b   :  { %325 = vrot.lane.b32.xlu2 %v442_v2, %s568_s24 }
  0x8c   :  { %v62_v3 = vpop.permute.xlu0 %61   ;;  %v68_v4 = vpop.permute.xlu1 %67  }
  0x8d   :  { %64 = vst.msk [vmem:[#allocation0] sm:$0x1] %vm63_vm10, %v62_v3   ;;  %v128_v7 = vpop.permute.xlu2 %127   ;;  %vm159_vm10 = vcmask 638560  }
  0x8e   :  { %70 = vst.msk [vmem:[#allocation0] sm:$0x1] %vm69_vm11, %v68_v4   ;;  %vm165_vm11 = vcmask 622160  }
  0x8f   :  { %76 = vst.msk [vmem:[#allocation0] sm:$0x1] %vm75_vm12, %v74_v53   ;;  %vm171_vm12 = vcmask 605760  }
  0x92   :  { %331 = vrot.lane.b32.xlu0 %v443_v5, %s569_s29  ;;  %337 = vrot.lane.b32.xlu1 %v444_v6, %s570_s30 }
  0x93   :  { %343 = vrot.lane.b32.xlu2 %v445_v8, %s571_s4 }
  0x94   :  { %v80_v9 = vpop.permute.xlu0 %79   ;;  %v86_v10 = vpop.permute.xlu1 %85  }
  0x95   :  { %82 = vst.msk [vmem:[#allocation0] sm:$0x1] %vm81_vm13, %v80_v9   ;;  %v146_v13 = vpop.permute.xlu2 %145   ;;  %vm177_vm13 = vcmask 589360  }
  0x96   :  { %88 = vst.msk [vmem:[#allocation0] sm:$0x1] %vm87_vm14, %v86_v10   ;;  %vm183_vm14 = vcmask 572960  }
  0x97   :  { %94 = vst.msk [vmem:[#allocation0] sm:$0x1] %vm93_vm15, %v92_v59   ;;  %vm189_vm15 = vcmask 556560  }
  0x9a   :  { %349 = vrot.lane.b32.xlu0 %v446_v11, %s572_s9  ;;  %355 = vrot.lane.b32.xlu1 %v447_v12, %s573_s10 }
  0x9b   :  { %361 = vrot.lane.b32.xlu2 %v448_v14, %s574_s13 }
  0x9c   :  { %v98_v15 = vpop.permute.xlu0 %97   ;;  %v104_v16 = vpop.permute.xlu1 %103  }
  0x9d   :  { %100 = vst.msk [vmem:[#allocation0] sm:$0x1] %vm99_vm0, %v98_v15   ;;  %v164_v19 = vpop.permute.xlu2 %163   ;;  %vm195_vm0 = vcmask 540160  }
  0x9e   :  { %106 = vst.msk [vmem:[#allocation0] sm:$0x1] %vm105_vm1, %v104_v16   ;;  %vm201_vm1 = vcmask 523760  }
  0x9f   :  { %112 = vst.msk [vmem:[#allocation0] sm:$0x1] %vm111_vm2, %v110_v1   ;;  %vm207_vm2 = vcmask 507360  }
  0xa2   :  { %367 = vrot.lane.b32.xlu0 %v449_v17, %s575_s18  ;;  %373 = vrot.lane.b32.xlu1 %v450_v18, %s576_s19 }
  0xa3   :  { %379 = vrot.lane.b32.xlu2 %v451_v20, %s577_s0 }
  0xa4   :  { %v116_v21 = vpop.permute.xlu0 %115   ;;  %v122_v22 = vpop.permute.xlu1 %121  }
  0xa5   :  { %118 = vst.msk [vmem:[#allocation0] sm:$0x1] %vm117_vm3, %v116_v21   ;;  %v182_v23 = vpop.permute.xlu2 %181   ;;  %vm213_vm3 = vcmask 490960  }
  0xa6   :  { %124 = vst.msk [vmem:[#allocation0] sm:$0x1] %vm123_vm4, %v122_v22   ;;  %vm219_vm4 = vcmask 474560  }
  0xa7   :  { %130 = vst.msk [vmem:[#allocation0] sm:$0x1] %vm129_vm5, %v128_v7   ;;  %vm225_vm5 = vcmask 458160  }
  0xac   :  { %v134_v24 = vpop.permute.xlu0 %133   ;;  %v140_v25 = vpop.permute.xlu1 %139  }
  0xad   :  { %136 = vst.msk [vmem:[#allocation0] sm:$0x1] %vm135_vm6, %v134_v24   ;;  %v200_v26 = vpop.permute.xlu2 %199   ;;  %vm231_vm6 = vcmask 441760  }
  0xae   :  { %142 = vst.msk [vmem:[#allocation0] sm:$0x1] %vm141_vm7, %v140_v25   ;;  %vm237_vm7 = vcmask 425360  }
  0xaf   :  { %148 = vst.msk [vmem:[#allocation0] sm:$0x1] %vm147_vm8, %v146_v13   ;;  %vm243_vm8 = vcmask 408960  }
  0xb4   :  { %v152_v27 = vpop.permute.xlu0 %151   ;;  %v158_v28 = vpop.permute.xlu1 %157  }
  0xb5   :  { %154 = vst.msk [vmem:[#allocation0] sm:$0x1] %vm153_vm9, %v152_v27   ;;  %v218_v29 = vpop.permute.xlu2 %217   ;;  %vm249_vm9 = vcmask 392560  }
  0xb6   :  { %160 = vst.msk [vmem:[#allocation0] sm:$0x1] %vm159_vm10, %v158_v28   ;;  %vm255_vm10 = vcmask 376160  }
  0xb7   :  { %166 = vst.msk [vmem:[#allocation0] sm:$0x1] %vm165_vm11, %v164_v19   ;;  %vm261_vm11 = vcmask 359760  }
  0xbc   :  { %v170_v30 = vpop.permute.xlu0 %169   ;;  %v176_v31 = vpop.permute.xlu1 %175  }
  0xbd   :  { %172 = vst.msk [vmem:[#allocation0] sm:$0x1] %vm171_vm12, %v170_v30   ;;  %v236_v32 = vpop.permute.xlu2 %235   ;;  %vm267_vm12 = vcmask 343360  }
  0xbe   :  { %178 = vst.msk [vmem:[#allocation0] sm:$0x1] %vm177_vm13, %v176_v31   ;;  %vm273_vm13 = vcmask 326960  }
  0xbf   :  { %184 = vst.msk [vmem:[#allocation0] sm:$0x1] %vm183_vm14, %v182_v23   ;;  %vm279_vm14 = vcmask 310560  }
  0xc4   :  { %v188_v33 = vpop.permute.xlu0 %187   ;;  %v194_v34 = vpop.permute.xlu1 %193  }
  0xc5   :  { %190 = vst.msk [vmem:[#allocation0] sm:$0x1] %vm189_vm15, %v188_v33   ;;  %v254_v35 = vpop.permute.xlu2 %253   ;;  %vm285_vm15 = vcmask 294160  }
  0xc6   :  { %196 = vst.msk [vmem:[#allocation0] sm:$0x1] %vm195_vm0, %v194_v34   ;;  %vm291_vm0 = vcmask 277760  }
  0xc7   :  { %202 = vst.msk [vmem:[#allocation0] sm:$0x1] %vm201_vm1, %v200_v26   ;;  %vm297_vm1 = vcmask 261360  }
  0xcc   :  { %v206_v36 = vpop.permute.xlu0 %205   ;;  %v212_v37 = vpop.permute.xlu1 %211  }
  0xcd   :  { %208 = vst.msk [vmem:[#allocation0] sm:$0x1] %vm207_vm2, %v206_v36   ;;  %v272_v38 = vpop.permute.xlu2 %271   ;;  %vm303_vm2 = vcmask 244960  }
  0xce   :  { %214 = vst.msk [vmem:[#allocation0] sm:$0x1] %vm213_vm3, %v212_v37   ;;  %vm309_vm3 = vcmask 228560  }
  0xcf   :  { %220 = vst.msk [vmem:[#allocation0] sm:$0x1] %vm219_vm4, %v218_v29   ;;  %vm315_vm4 = vcmask 212160  }
  0xd4   :  { %v224_v39 = vpop.permute.xlu0 %223   ;;  %v230_v40 = vpop.permute.xlu1 %229  }
  0xd5   :  { %226 = vst.msk [vmem:[#allocation0] sm:$0x1] %vm225_vm5, %v224_v39   ;;  %v290_v41 = vpop.permute.xlu2 %289   ;;  %vm321_vm5 = vcmask 195760  }
  0xd6   :  { %232 = vst.msk [vmem:[#allocation0] sm:$0x1] %vm231_vm6, %v230_v40   ;;  %vm327_vm6 = vcmask 179360  }
  0xd7   :  { %238 = vst.msk [vmem:[#allocation0] sm:$0x1] %vm237_vm7, %v236_v32   ;;  %vm333_vm7 = vcmask 162960  }
  0xdc   :  { %v242_v42 = vpop.permute.xlu0 %241   ;;  %v248_v43 = vpop.permute.xlu1 %247  }
  0xdd   :  { %244 = vst.msk [vmem:[#allocation0] sm:$0x1] %vm243_vm8, %v242_v42   ;;  %v308_v44 = vpop.permute.xlu2 %307   ;;  %vm339_vm8 = vcmask 146560  }
  0xde   :  { %250 = vst.msk [vmem:[#allocation0] sm:$0x1] %vm249_vm9, %v248_v43   ;;  %vm345_vm9 = vcmask 130160  }
  0xdf   :  { %256 = vst.msk [vmem:[#allocation0] sm:$0x1] %vm255_vm10, %v254_v35   ;;  %vm351_vm10 = vcmask 113760  }
  0xe4   :  { %v260_v45 = vpop.permute.xlu0 %259   ;;  %v266_v46 = vpop.permute.xlu1 %265  }
  0xe5   :  { %262 = vst.msk [vmem:[#allocation0] sm:$0x1] %vm261_vm11, %v260_v45   ;;  %v326_v47 = vpop.permute.xlu2 %325   ;;  %vm357_vm11 = vcmask 97360  }
  0xe6   :  { %268 = vst.msk [vmem:[#allocation0] sm:$0x1] %vm267_vm12, %v266_v46   ;;  %vm363_vm12 = vcmask 80960  }
  0xe7   :  { %274 = vst.msk [vmem:[#allocation0] sm:$0x1] %vm273_vm13, %v272_v38   ;;  %vm369_vm13 = vcmask 64560  }
  0xec   :  { %v278_v48 = vpop.permute.xlu0 %277   ;;  %v284_v49 = vpop.permute.xlu1 %283  }
  0xed   :  { %280 = vst.msk [vmem:[#allocation0] sm:$0x1] %vm279_vm14, %v278_v48   ;;  %v344_v50 = vpop.permute.xlu2 %343   ;;  %vm375_vm14 = vcmask 48160  }
  0xee   :  { %286 = vst.msk [vmem:[#allocation0] sm:$0x1] %vm285_vm15, %v284_v49   ;;  %vm381_vm15 = vcmask 31760  }
  0xef   :  { %292 = vst.msk [vmem:[#allocation0] sm:$0x1] %vm291_vm0, %v290_v41  }
  0xf4   :  { %v296_v51 = vpop.permute.xlu0 %295   ;;  %v302_v52 = vpop.permute.xlu1 %301  }
  0xf5   :  { %298 = vst.msk [vmem:[#allocation0] sm:$0x1] %vm297_vm1, %v296_v51   ;;  %v362_v53 = vpop.permute.xlu2 %361  }
  0xf6   :  { %304 = vst.msk [vmem:[#allocation0] sm:$0x1] %vm303_vm2, %v302_v52  }
  0xf7   :  { %310 = vst.msk [vmem:[#allocation0] sm:$0x1] %vm309_vm3, %v308_v44  }
  0xfc   :  { %v314_v54 = vpop.permute.xlu0 %313   ;;  %v320_v55 = vpop.permute.xlu1 %319  }
  0xfd   :  { %316 = vst.msk [vmem:[#allocation0] sm:$0x1] %vm315_vm4, %v314_v54   ;;  %v380_v56 = vpop.permute.xlu2 %379  }
  0xfe   :  { %322 = vst.msk [vmem:[#allocation0] sm:$0x1] %vm321_vm5, %v320_v55  }
  0xff   :  { %328 = vst.msk [vmem:[#allocation0] sm:$0x1] %vm327_vm6, %v326_v47  }
 0x104   :  { %v332_v57 = vpop.permute.xlu0 %331   ;;  %v338_v58 = vpop.permute.xlu1 %337  }
 0x105   :  { %334 = vst.msk [vmem:[#allocation0] sm:$0x1] %vm333_vm7, %v332_v57  }
 0x106   :  { %340 = vst.msk [vmem:[#allocation0] sm:$0x1] %vm339_vm8, %v338_v58  }
 0x107   :  { %346 = vst.msk [vmem:[#allocation0] sm:$0x1] %vm345_vm9, %v344_v50  }
 0x10c   :  { %v350_v59 = vpop.permute.xlu0 %349   ;;  %v356_v60 = vpop.permute.xlu1 %355  }
 0x10d   :  { %352 = vst.msk [vmem:[#allocation0] sm:$0x1] %vm351_vm10, %v350_v59  }
 0x10e   :  { %358 = vst.msk [vmem:[#allocation0] sm:$0x1] %vm357_vm11, %v356_v60  }
 0x10f   :  { %364 = vst.msk [vmem:[#allocation0] sm:$0x1] %vm363_vm12, %v362_v53  }
 0x114   :  { %v368_v61 = vpop.permute.xlu0 %367   ;;  %v374_v62 = vpop.permute.xlu1 %373  }
 0x115   :  { %370 = vst.msk [vmem:[#allocation0] sm:$0x1] %vm369_vm13, %v368_v61  }
 0x116   :  { %376 = vst.msk [vmem:[#allocation0] sm:$0x1] %vm375_vm14, %v374_v62  }
 0x117   :  { %382 = vst.msk [vmem:[#allocation0] sm:$0x1] %vm381_vm15, %v380_v56  }
 0x11e   :  { %v385_v63 = vld [vmem:[#allocation0] sm:$0x1] }
 0x11f   :  { %388 = vst [vmem:[%s784_s1] sm:$0x1] %v385_v63 }

// kernel: dcmconv2_forward.19
= control target key start
LH: loop header
LB: loop body
LE: loop exit
PB: predicated region body
PF: predicated region fallthrough
CT: control target
= control target key end

     0   :  { %s76_s0 = inlined_call_operand.vmem [shape: f32[16,128], index: 0, kind: input, shape index: {}]   ;;  %s77_s1 = inlined_call_operand.vmem [shape: f32[1,128], index: 1, kind: input, shape index: {}]   ;;  %s78_s2 = inlined_call_operand.vmem [shape: f32[1,128], index: 2, kind: input, shape index: {}]   ;;  %s79_s3 = inlined_call_operand.vmem [shape: f32[16,128], index: 3, kind: output, shape index: {}]  }
   0x1   :  { %v14_v0 = vld [vmem:[%s76_s0] sm:$0xff]  ;;  %v15_v3 = vld [vmem:[%s76_s0 + $0x8] sm:$0xff] }
   0x2   :  { %v36_v1 = vld [vmem:[%s77_s1] ss:$0 sm:$0xff] }
   0x3   :  { %v37_v2 = vld [vmem:[%s78_s2] ss:$0 sm:$0xff]  ;;  %v20_v4 = vmul.f32 %v36_v1, %v14_v0  ;;  %v21_v5 = vmul.f32 %v36_v1, %v15_v3 }
   0x5   :  { %v26_v6 = vadd.f32 %v37_v2, %v20_v4  ;;  %v27_v7 = vadd.f32 %v37_v2, %v21_v5 }
   0x7   :  { %v28_v8 = vmax.f32 %v26_v6, 0.0  ;;  %v29_v9 = vmax.f32 %v27_v7, 0.0 }
   0x9   :  { %30 = vst [vmem:[%s79_s3] sm:$0xff] %v28_v8 }
   0xa   :  { %31 = vst [vmem:[%s79_s3 + $0x8] sm:$0xff] %v29_v9 }

// kernel: dcmconv2_forward.18
= control target key start
LH: loop header
LB: loop body
LE: loop exit
PB: predicated region body
PF: predicated region fallthrough
CT: control target
= control target key end

     0   :  { %s1136_s15 = smov 0   ;;  %s1138_s16 = smov 0   ;;  %s1618_s0 = inlined_call_operand.vmem [shape: f32[1,768,8], index: 0, kind: input, shape index: {}]   ;;  %s1619_s1 = inlined_call_operand.vmem [shape: f32[1,8,2], index: 1, kind: input, shape index: {}]   ;;  %s1620_s2 = inlined_call_operand.vmem [shape: f32[768,2], index: 2, kind: output, shape index: {0}]   ;;  %s1621_s3 = inlined_call_operand.vmem [shape: f32[3,1,2], index: 3, kind: output, shape index: {1}]   ;;  %s1622_s4 = inlined_call_operand.vmem [shape: f32[3,1,2], index: 4, kind: output, shape index: {2}]  }
   0x1   :  { %s1140_s17 = smov 0  }
   0x2 LB: > { %s27_s18 = sadd.s32 1, %s1104_s16  ;;  %p1019_p0 = scmp.ge.s32.totalorder %s1108_s17, 1  ;;  %s1108_s17 = sphi %s1140_s17, %s15_s17   ;;  %s1104_s16 = sphi %s1138_s16, %s1624_s16   ;;  %s1100_s15 = sphi %s1136_s15, %s1623_s15  }
   0x3   : > { %p29_p1 = scmp.ge.s32.totalorder %s27_s18, 3  ;;  %p195_p2 = scmp.lt.s32.totalorder %s1108_s17, 4 }
   0x5   : > { %s1626_s18 = smov (%p29_p1, %s27_s18), 0  ;;  %p196_p3 = pnand %p1019_p0, %p195_p2 }
   0x6   : > { %s1020_s21 = sshll.u32 (!%p196_p3), %s1100_s15, 5  ;;  %p255_p5 = scmp.lt.s32.totalorder (!%p196_p3), %s1100_s15, 2 }
   0x7   : > { %199 = sbr.rel (%p196_p3) target bundleno = 275 (0x113), region = 28  ;;  %p238_p4 = scmp.lt.s32.totalorder (!%p196_p3), %s1020_s21, 95 }
   0xc   : > { %v362_v0 = vld [vmem:[%s1619_s1] sm:$0xff]  ;;  %s1628_s21 = smov (!%p238_p4, %s1020_s21), 95  ;;  %vm363_vm0 = vcmask 64512   ;;  %vm265_vm1 = vcmask 15360   ;;  %v1110_v20 = vmov 0.0   ;;  %s1630_s15 = smov (!%p255_p5, %s1100_s15), 2 }
   0xd   : > { %475 = vmatpush.msra.mxu0 %v362_v0  ;;  %1058 = vmatpush.msra.mxu1 %v362_v0  ;;  %s1021_s22 = sshll.u32 %s1628_s21, 3  ;;  %266 = vst.msk [vmem:[#allocation2] sm:$0xff] %vm265_vm1, %v1110_v20  ;;  %s257_s5 = scalar_lea.vmem %s1621_s3, %s1630_s15  ;;  %vm774_vm2 = vcmask 8192  }
   0xe   : > { %1059 = vmatpush.msra.mxu2 %v362_v0  ;;  %1060 = vmatpush.msra.mxu3 %v362_v0  ;;  %s1168_s25 = scalar_lea.vmem %s1618_s0, %s1021_s22  ;;  %267 = vst.msk [vmem:[#allocation2 + $0x8] sm:$0xff] %vm265_vm1, %v1110_v20  ;;  %s1273_s28 = scalar_lea.vmem %s1620_s2, %s1021_s22 }
   0xf   : > { %v330_v1 = vld [vmem:[%s1168_s25] sm:$0xff]  ;;  %v331_v4 = vld [vmem:[%s1168_s25 + $0x8] sm:$0xff]  ;;  %v332_v8 = vld [vmem:[%s1168_s25 + $0x10] sm:$0xff]  ;;  %268 = vst.msk [vmem:[#allocation2 + $0x10] sm:$0xff] %vm265_vm1, %v1110_v20  ;;  %s260_s8 = scalar_lea.vmem %s1622_s4, %s1630_s15 }
  0x10   : > { %1024 = vmatmul.msk.f32.vlgmr.msra.gmra.mxu0 %vm363_vm0, %v330_v1  ;;  %v338_v2 = vld [vmem:[%s1168_s25 + $0x40] sm:$0xff]  ;;  %v339_v5 = vld [vmem:[%s1168_s25 + $0x48] sm:$0xff]  ;;  %v340_v9 = vld [vmem:[%s1168_s25 + $0x50] sm:$0xff]  ;;  %269 = vst.msk [vmem:[#allocation2 + $0x18] sm:$0xff] %vm265_vm1, %v1110_v20 }
  0x11   : > { %1032 = vmatmul.msk.f32.vlgmr.msra.gmra.mxu1 %vm363_vm0, %v338_v2  ;;  %v346_v3 = vld [vmem:[%s1168_s25 + $0x80] sm:$0xff]  ;;  %v347_v6 = vld [vmem:[%s1168_s25 + $0x88] sm:$0xff]  ;;  %v348_v10 = vld [vmem:[%s1168_s25 + $0x90] sm:$0xff]  ;;  %270 = vst.msk [vmem:[#allocation2 + $0x20] sm:$0xff] %vm265_vm1, %v1110_v20 }
  0x12   : > { %1040 = vmatmul.msk.f32.vlgmr.msra.gmra.mxu2 %vm363_vm0, %v346_v3  ;;  %v354_v7 = vld [vmem:[%s1168_s25 + $0xc0] sm:$0xff]  ;;  %v355_v11 = vld [vmem:[%s1168_s25 + $0xc8] sm:$0xff]  ;;  %v333_v12 = vld [vmem:[%s1168_s25 + $0x18] sm:$0xff]  ;;  %271 = vst.msk [vmem:[#allocation2 + $0x28] sm:$0xff] %vm265_vm1, %v1110_v20 }
  0x13   : > { %1048 = vmatmul.msk.f32.vlgmr.msra.gmra.mxu3 %vm363_vm0, %v354_v7  ;;  %v341_v13 = vld [vmem:[%s1168_s25 + $0x58] sm:$0xff]  ;;  %v356_v15 = vld [vmem:[%s1168_s25 + $0xd0] sm:$0xff]  ;;  %v334_v16 = vld [vmem:[%s1168_s25 + $0x20] sm:$0xff]  ;;  %272 = vst.msk [vmem:[#allocation2 + $0x30] sm:$0xff] %vm265_vm1, %v1110_v20 }
  0x14   : > { %v349_v14 = vld [vmem:[%s1168_s25 + $0x98] sm:$0xff]  ;;  %v342_v17 = vld [vmem:[%s1168_s25 + $0x60] sm:$0xff]  ;;  %v335_v21 = vld [vmem:[%s1168_s25 + $0x28] sm:$0xff]  ;;  %273 = vst.msk [vmem:[#allocation2 + $0x38] sm:$0xff] %vm265_vm1, %v1110_v20 }
  0x15   : > { %v357_v18 = vld [vmem:[%s1168_s25 + $0xd8] sm:$0xff]  ;;  %v350_v19 = vld [vmem:[%s1168_s25 + $0xa0] sm:$0xff]  ;;  %v343_v22 = vld [vmem:[%s1168_s25 + $0x68] sm:$0xff]  ;;  %274 = vst.msk [vmem:[#allocation2 + $0x40] sm:$0xff] %vm265_vm1, %v1110_v20 }
  0x16   : > { %v358_v23 = vld [vmem:[%s1168_s25 + $0xe0] sm:$0xff]  ;;  %v351_v24 = vld [vmem:[%s1168_s25 + $0xa8] sm:$0xff]  ;;  %275 = vst.msk [vmem:[#allocation2 + $0x48] sm:$0xff] %vm265_vm1, %v1110_v20  ;;  %v336_v25 = vld [vmem:[%s1168_s25 + $0x30] sm:$0xff] }
  0x17   : > { %276 = vst.msk [vmem:[#allocation2 + $0x50] sm:$0xff] %vm265_vm1, %v1110_v20  ;;  %v344_v26 = vld [vmem:[%s1168_s25 + $0x70] sm:$0xff]  ;;  %v359_v27 = vld [vmem:[%s1168_s25 + $0xe8] sm:$0xff]  ;;  %v337_v29 = vld [vmem:[%s1168_s25 + $0x38] sm:$0xff] }
  0x18   : > { %1025 = vmatmul.msk.f32.gmra.mxu0 %vm363_vm0, %v331_v4  ;;  %277 = vst.msk [vmem:[#allocation2 + $0x58] sm:$0xff] %vm265_vm1, %v1110_v20  ;;  %v352_v28 = vld [vmem:[%s1168_s25 + $0xb0] sm:$0xff]  ;;  %v345_v30 = vld [vmem:[%s1168_s25 + $0x78] sm:$0xff]  ;;  %v298_v34 = vld [vmem:[#allocation2] sm:$0xff] }
  0x19   : > { %1033 = vmatmul.msk.f32.gmra.mxu1 %vm363_vm0, %v339_v5  ;;  %278 = vst.msk [vmem:[#allocation2 + $0x60] sm:$0xff] %vm265_vm1, %v1110_v20  ;;  %v360_v31 = vld [vmem:[%s1168_s25 + $0xf0] sm:$0xff]  ;;  %v353_v32 = vld [vmem:[%s1168_s25 + $0xb8] sm:$0xff]  ;;  %v299_v40 = vld [vmem:[#allocation2 + $0x8] sm:$0xff] }
  0x1a   : > { %1041 = vmatmul.msk.f32.gmra.mxu2 %vm363_vm0, %v347_v6  ;;  %279 = vst.msk [vmem:[#allocation2 + $0x68] sm:$0xff] %vm265_vm1, %v1110_v20  ;;  %v361_v33 = vld [vmem:[%s1168_s25 + $0xf8] sm:$0xff]  ;;  %v300_v51 = vld [vmem:[#allocation2 + $0x10] sm:$0xff] }
  0x1b   : > { %1049 = vmatmul.msk.f32.gmra.mxu3 %vm363_vm0, %v355_v11  ;;  %280 = vst.msk [vmem:[#allocation2 + $0x70] sm:$0xff] %vm265_vm1, %v1110_v20  ;;  %v301_v1 = vld [vmem:[#allocation2 + $0x18] sm:$0xff] }
  0x1c   : > { %281 = vst.msk [vmem:[#allocation2 + $0x78] sm:$0xff] %vm265_vm1, %v1110_v20  ;;  %v306_v35 = vld [vmem:[#allocation2 + $0x40] sm:$0xff] }
  0x1d   : > { %282 = vst.msk [vmem:[#allocation2 + $0x80] sm:$0xff] %vm265_vm1, %v1110_v20  ;;  %v307_v41 = vld [vmem:[#allocation2 + $0x48] sm:$0xff] }
  0x1e   : > { %283 = vst.msk [vmem:[#allocation2 + $0x88] sm:$0xff] %vm265_vm1, %v1110_v20  ;;  %v308_v52 = vld [vmem:[#allocation2 + $0x50] sm:$0xff] }
  0x1f   : > { %284 = vst.msk [vmem:[#allocation2 + $0x90] sm:$0xff] %vm265_vm1, %v1110_v20  ;;  %v309_v3 = vld [vmem:[#allocation2 + $0x58] sm:$0xff] }
  0x20   : > { %1026 = vmatmul.msk.f32.gmra.mxu0 %vm363_vm0, %v332_v8  ;;  %285 = vst.msk [vmem:[#allocation2 + $0x98] sm:$0xff] %vm265_vm1, %v1110_v20 }
  0x21   : > { %1034 = vmatmul.msk.f32.gmra.mxu1 %vm363_vm0, %v340_v9  ;;  %286 = vst.msk [vmem:[#allocation2 + $0xa0] sm:$0xff] %vm265_vm1, %v1110_v20 }
  0x22   : > { %1042 = vmatmul.msk.f32.gmra.mxu2 %vm363_vm0, %v348_v10  ;;  %287 = vst.msk [vmem:[#allocation2 + $0xa8] sm:$0xff] %vm265_vm1, %v1110_v20 }
  0x23   : > { %1050 = vmatmul.msk.f32.gmra.mxu3 %vm363_vm0, %v356_v15  ;;  %288 = vst.msk [vmem:[#allocation2 + $0xb0] sm:$0xff] %vm265_vm1, %v1110_v20  ;;  %v302_v15 = vld [vmem:[#allocation2 + $0x20] sm:$0xff] }
  0x24   : > { %289 = vst.msk [vmem:[#allocation2 + $0xb8] sm:$0xff] %vm265_vm1, %v1110_v20  ;;  %v314_v43 = vld [vmem:[#allocation2 + $0x80] sm:$0xff] }
  0x25   : > { %290 = vst.msk [vmem:[#allocation2 + $0xc0] sm:$0xff] %vm265_vm1, %v1110_v20  ;;  %v315_v57 = vld [vmem:[#allocation2 + $0x88] sm:$0xff] }
  0x26   : > { %291 = vst.msk [vmem:[#allocation2 + $0xc8] sm:$0xff] %vm265_vm1, %v1110_v20  ;;  %v316_v5 = vld [vmem:[#allocation2 + $0x90] sm:$0xff] }
  0x27   : > { %292 = vst.msk [vmem:[#allocation2 + $0xd0] sm:$0xff] %vm265_vm1, %v1110_v20 }
  0x28   : > { %1027 = vmatmul.msk.f32.gmra.mxu0 %vm363_vm0, %v333_v12  ;;  %293 = vst.msk [vmem:[#allocation2 + $0xd8] sm:$0xff] %vm265_vm1, %v1110_v20 }
  0x29   : > { %1035 = vmatmul.msk.f32.gmra.mxu1 %vm363_vm0, %v341_v13  ;;  %294 = vst.msk [vmem:[#allocation2 + $0xe0] sm:$0xff] %vm265_vm1, %v1110_v20 }
  0x2a   : > { %1043 = vmatmul.msk.f32.gmra.mxu2 %vm363_vm0, %v349_v14  ;;  %295 = vst.msk [vmem:[#allocation2 + $0xe8] sm:$0xff] %vm265_vm1, %v1110_v20 }
  0x2b   : > { %1051 = vmatmul.msk.f32.gmra.mxu3 %vm363_vm0, %v357_v18  ;;  %296 = vst.msk [vmem:[#allocation2 + $0xf0] sm:$0xff] %vm265_vm1, %v1110_v20  ;;  %v310_v18 = vld [vmem:[#allocation2 + $0x60] sm:$0xff] }
  0x2c   : > { %297 = vst.msk [vmem:[#allocation2 + $0xf8] sm:$0xff] %vm265_vm1, %v1110_v20  ;;  %v322_v60 = vld [vmem:[#allocation2 + $0xc0] sm:$0xff] }
  0x2d   : > { %v323_v13 = vld [vmem:[#allocation2 + $0xc8] sm:$0xff] }
  0x30   : > { %1028 = vmatmul.msk.f32.gmra.mxu0 %vm363_vm0, %v334_v16 }
  0x31   : > { %1036 = vmatmul.msk.f32.gmra.mxu1 %vm363_vm0, %v342_v17 }
  0x32   : > { %1044 = vmatmul.msk.f32.gmra.mxu2 %vm363_vm0, %v350_v19 }
  0x33   : > { %1052 = vmatmul.msk.f32.gmra.mxu3 %vm363_vm0, %v358_v23 }
  0x38   : > { %1029 = vmatmul.msk.f32.gmra.mxu0 %vm363_vm0, %v335_v21 }
  0x39   : > { %1037 = vmatmul.msk.f32.gmra.mxu1 %vm363_vm0, %v343_v22 }
  0x3a   : > { %1045 = vmatmul.msk.f32.gmra.mxu2 %vm363_vm0, %v351_v24  ;;  %v317_v24 = vld [vmem:[#allocation2 + $0x98] sm:$0xff] }
  0x3b   : > { %1053 = vmatmul.msk.f32.gmra.mxu3 %vm363_vm0, %v359_v27  ;;  %v324_v27 = vld [vmem:[#allocation2 + $0xd0] sm:$0xff] }
  0x40   : > { %1030 = vmatmul.msk.f32.gmra.mxu0 %vm363_vm0, %v336_v25 }
  0x41   : > { %1038 = vmatmul.msk.f32.gmra.mxu1 %vm363_vm0, %v344_v26 }
  0x42   : > { %1046 = vmatmul.msk.f32.gmra.mxu2 %vm363_vm0, %v352_v28 }
  0x43   : > { %1054 = vmatmul.msk.f32.gmra.mxu3 %vm363_vm0, %v360_v31 }
  0x48   : > { %1031 = vmatmul.msk.f32.gmra.mxu0 %vm363_vm0, %v337_v29 }
  0x49   : > { %1039 = vmatmul.msk.f32.gmra.mxu1 %vm363_vm0, %v345_v30 }
  0x4a   : > { %1047 = vmatmul.msk.f32.gmra.mxu2 %vm363_vm0, %v353_v32  ;;  %v303_v32 = vld [vmem:[#allocation2 + $0x28] sm:$0xff] }
  0x4b   : > { %1055 = vmatmul.msk.f32.gmra.mxu3 %vm363_vm0, %v361_v33 }
  0x8d   : > { %v477_v36 = vpop.f32.mrf.mxu0 }
  0x8e   : > { %v573_v37 = vadd.f32 %v477_v36, %v298_v34  ;;  %v501_v38 = vpop.f32.mrf.mxu1  ;;  %v311_v34 = vld [vmem:[#allocation2 + $0x68] sm:$0xff]  ;;  %v318_v36 = vld [vmem:[#allocation2 + $0xa0] sm:$0xff] }
  0x8f   : > { %v581_v39 = vadd.f32 %v501_v38, %v306_v35 }
  0x90   : > { %606 = vst.msk [vmem:[#allocation2] sm:$0xff] %vm265_vm1, %v573_v37 }
  0x91   : > { %614 = vst.msk [vmem:[#allocation2 + $0x40] sm:$0xff] %vm265_vm1, %v581_v39 }
  0x95   : > { %v480_v42 = vpop.f32.mrf.mxu0  ;;  %v525_v44 = vpop.f32.mrf.mxu2 }
  0x96   : > { %v574_v45 = vadd.f32 %v480_v42, %v299_v40  ;;  %v504_v46 = vpop.f32.mrf.mxu1  ;;  %v589_v50 = vadd.f32 %v525_v44, %v314_v43  ;;  %v549_v58 = vpop.f32.mrf.mxu3 }
  0x97   : > { %v1275_v47 = vld [vmem:[#allocation2] sm:$0xff]  ;;  %v582_v48 = vadd.f32 %v504_v46, %v307_v41  ;;  %v597_v0 = vadd.f32 %v549_v58, %v322_v60  ;;  %v319_v58 = vld [vmem:[#allocation2 + $0xa8] sm:$0xff] }
  0x98   : > { %673 = vst.msk [vmem:[%s1273_s28] sm:$0xff] %vm265_vm1, %v1275_v47  ;;  %v1280_v49 = vld [vmem:[#allocation2 + $0x40] sm:$0xff] }
  0x99   : > { %607 = vst.msk [vmem:[#allocation2 + $0x8] sm:$0xff] %vm265_vm1, %v574_v45  ;;  %v325_v45 = vld [vmem:[#allocation2 + $0xd8] sm:$0xff] }
  0x9a   : > { %681 = vst.msk [vmem:[%s1273_s28 + $0x40] sm:$0xff] %vm265_vm1, %v1280_v49 }
  0x9b   : > { %615 = vst.msk [vmem:[#allocation2 + $0x48] sm:$0xff] %vm265_vm1, %v582_v48  ;;  %v304_v48 = vld [vmem:[#allocation2 + $0x30] sm:$0xff] }
  0x9c   : > { %622 = vst.msk [vmem:[#allocation2 + $0x80] sm:$0xff] %vm265_vm1, %v589_v50 }
  0x9d   : > { %v483_v53 = vpop.f32.mrf.mxu0  ;;  %v528_v54 = vpop.f32.mrf.mxu2  ;;  %630 = vst.msk [vmem:[#allocation2 + $0xc0] sm:$0xff] %vm265_vm1, %v597_v0 }
  0x9e   : > { %v575_v55 = vadd.f32 %v483_v53, %v300_v51  ;;  %v507_v56 = vpop.f32.mrf.mxu1  ;;  %v590_v62 = vadd.f32 %v528_v54, %v315_v57  ;;  %v552_v9 = vpop.f32.mrf.mxu3 }
  0x9f   : > { %v583_v59 = vadd.f32 %v507_v56, %v308_v52  ;;  %v598_v16 = vadd.f32 %v552_v9, %v323_v13  ;;  %v312_v52 = vld [vmem:[#allocation2 + $0x70] sm:$0xff]  ;;  %v305_v9 = vld [vmem:[#allocation2 + $0x38] sm:$0xff]  ;;  %v705_v13 = vsel %vm265_vm1, %v1275_v47, 0.0 }
  0xa0   : > { %v1288_v61 = vld [vmem:[#allocation2 + $0x8] sm:$0xff]  ;;  %608 = vst.msk [vmem:[#allocation2 + $0x10] sm:$0xff] %vm265_vm1, %v575_v55 }
  0xa1   : > { %674 = vst.msk [vmem:[%s1273_s28 + $0x8] sm:$0xff] %vm265_vm1, %v1288_v61 }
  0xa2   : > { %v1294_v63 = vld [vmem:[#allocation2 + $0x48] sm:$0xff]  ;;  %616 = vst.msk [vmem:[#allocation2 + $0x50] sm:$0xff] %vm265_vm1, %v583_v59 }
  0xa3   : > { %682 = vst.msk [vmem:[%s1273_s28 + $0x48] sm:$0xff] %vm265_vm1, %v1294_v63  ;;  %v1300_v2 = vld [vmem:[#allocation2 + $0x80] sm:$0xff] }
  0xa4   : > { %689 = vst.msk [vmem:[%s1273_s28 + $0x80] sm:$0xff] %vm265_vm1, %v1300_v2  ;;  %v1325_v20 = vld [vmem:[#allocation2 + $0xc0] sm:$0xff] }
  0xa5   : > { %v486_v4 = vpop.f32.mrf.mxu0  ;;  %623 = vst.msk [vmem:[#allocation2 + $0x88] sm:$0xff] %vm265_vm1, %v590_v62  ;;  %v531_v6 = vpop.f32.mrf.mxu2  ;;  %v326_v62 = vld [vmem:[#allocation2 + $0xe0] sm:$0xff] }
  0xa6   : > { %v576_v7 = vadd.f32 %v486_v4, %v301_v1  ;;  %v510_v8 = vpop.f32.mrf.mxu1  ;;  %v591_v12 = vadd.f32 %v531_v6, %v316_v5  ;;  %697 = vst.msk [vmem:[%s1273_s28 + $0xc0] sm:$0xff] %vm265_vm1, %v1325_v20  ;;  %v555_v25 = vpop.f32.mrf.mxu3  ;;  %v777_v1 = vmul.f32 %v1288_v61, %v1288_v61  ;;  %v776_v4 = vmul.f32 %v1275_v47, %v1275_v47 }
  0xa7   : > { %v1307_v10 = vld [vmem:[#allocation2 + $0x10] sm:$0xff]  ;;  %v584_v11 = vadd.f32 %v510_v8, %v309_v3  ;;  %631 = vst.msk [vmem:[#allocation2 + $0xc8] sm:$0xff] %vm265_vm1, %v598_v16  ;;  %v599_v31 = vadd.f32 %v555_v25, %v324_v27 }
  0xa8   : > { %675 = vst.msk [vmem:[%s1273_s28 + $0x10] sm:$0xff] %vm265_vm1, %v1307_v10  ;;  %v778_v8 = vmul.f32 %v1307_v10, %v1307_v10 }
  0xa9   : > { %609 = vst.msk [vmem:[#allocation2 + $0x18] sm:$0xff] %vm265_vm1, %v576_v7  ;;  %v1313_v14 = vld [vmem:[#allocation2 + $0x50] sm:$0xff]  ;;  %v706_v7 = vsel %vm265_vm1, %v1288_v61, 0.0  ;;  %v708_v61 = vsel %vm265_vm1, %v1307_v10, 0.0 }
  0xaa   : > { %683 = vst.msk [vmem:[%s1273_s28 + $0x50] sm:$0xff] %vm265_vm1, %v1313_v14 }
  0xab   : > { %617 = vst.msk [vmem:[#allocation2 + $0x58] sm:$0xff] %vm265_vm1, %v584_v11 }
  0xac   : > { %v1319_v17 = vld [vmem:[#allocation2 + $0x88] sm:$0xff]  ;;  %624 = vst.msk [vmem:[#allocation2 + $0x90] sm:$0xff] %vm265_vm1, %v591_v12  ;;  %v313_v12 = vld [vmem:[#allocation2 + $0x78] sm:$0xff] }
  0xad   : > { %v489_v19 = vpop.f32.mrf.mxu0  ;;  %690 = vst.msk [vmem:[%s1273_s28 + $0x88] sm:$0xff] %vm265_vm1, %v1319_v17  ;;  %v534_v21 = vpop.f32.mrf.mxu2 }
  0xae   : > { %v577_v22 = vadd.f32 %v489_v19, %v302_v15  ;;  %v513_v23 = vpop.f32.mrf.mxu1  ;;  %v592_v29 = vadd.f32 %v534_v21, %v317_v24  ;;  %v1349_v40 = vld [vmem:[#allocation2 + $0xc8] sm:$0xff]  ;;  %632 = vst.msk [vmem:[#allocation2 + $0xd0] sm:$0xff] %vm265_vm1, %v599_v31  ;;  %v558_v41 = vpop.f32.mrf.mxu3  ;;  %v809_v15 = vsel %vm265_vm1, %v777_v1, 0.0  ;;  %v320_v19 = vld [vmem:[#allocation2 + $0xb0] sm:$0xff] }
  0xaf   : > { %v585_v26 = vadd.f32 %v513_v23, %v310_v18  ;;  %698 = vst.msk [vmem:[%s1273_s28 + $0xc8] sm:$0xff] %vm265_vm1, %v1349_v40  ;;  %v600_v50 = vadd.f32 %v558_v41, %v325_v45  ;;  %v707_v23 = vadd.f32 %v706_v7, %v705_v13  ;;  %v784_v13 = vmul.f32 %v1280_v49, %v1280_v49 }
  0xb0   : > { %v1331_v28 = vld [vmem:[#allocation2 + $0x18] sm:$0xff]  ;;  %610 = vst.msk [vmem:[#allocation2 + $0x20] sm:$0xff] %vm265_vm1, %v577_v22  ;;  %v808_v22 = vsel %vm265_vm1, %v776_v4, 0.0 }
  0xb1   : > { %676 = vst.msk [vmem:[%s1273_s28 + $0x18] sm:$0xff] %vm265_vm1, %v1331_v28  ;;  %v779_v16 = vmul.f32 %v1331_v28, %v1331_v28  ;;  %v710_v27 = vsel %vm265_vm1, %v1331_v28, 0.0 }
  0xb2   : > { %v1337_v30 = vld [vmem:[#allocation2 + $0x58] sm:$0xff]  ;;  %618 = vst.msk [vmem:[#allocation2 + $0x60] sm:$0xff] %vm265_vm1, %v585_v26  ;;  %v811_v26 = vsel %vm265_vm1, %v778_v8, 0.0 }
  0xb3   : > { %684 = vst.msk [vmem:[%s1273_s28 + $0x58] sm:$0xff] %vm265_vm1, %v1337_v30  ;;  %v1343_v33 = vld [vmem:[#allocation2 + $0x90] sm:$0xff] }
  0xb4   : > { %691 = vst.msk [vmem:[%s1273_s28 + $0x90] sm:$0xff] %vm265_vm1, %v1343_v33 }
  0xb5   : > { %v492_v35 = vpop.f32.mrf.mxu0  ;;  %625 = vst.msk [vmem:[#allocation2 + $0x98] sm:$0xff] %vm265_vm1, %v592_v29  ;;  %v537_v37 = vpop.f32.mrf.mxu2  ;;  %v1373_v54 = vld [vmem:[#allocation2 + $0xd0] sm:$0xff] }
  0xb6   : > { %v578_v38 = vadd.f32 %v492_v35, %v303_v32  ;;  %v516_v39 = vpop.f32.mrf.mxu1  ;;  %v593_v44 = vadd.f32 %v537_v37, %v318_v36  ;;  %699 = vst.msk [vmem:[%s1273_s28 + $0xd0] sm:$0xff] %vm265_vm1, %v1373_v54  ;;  %v561_v59 = vpop.f32.mrf.mxu3  ;;  %v709_v35 = vadd.f32 %v708_v61, %v707_v23  ;;  %v327_v37 = vld [vmem:[#allocation2 + $0xe8] sm:$0xff] }
  0xb7   : > { %v1352_v42 = vld [vmem:[#allocation2 + $0x20] sm:$0xff]  ;;  %v586_v43 = vadd.f32 %v516_v39, %v311_v34  ;;  %633 = vst.msk [vmem:[#allocation2 + $0xd8] sm:$0xff] %vm265_vm1, %v600_v50  ;;  %v601_v6 = vadd.f32 %v561_v59, %v326_v62  ;;  %v810_v34 = vadd.f32 %v809_v15, %v808_v22  ;;  %v785_v22 = vmul.f32 %v1294_v63, %v1294_v63 }
  0xb8   : > { %677 = vst.msk [vmem:[%s1273_s28 + $0x20] sm:$0xff] %vm265_vm1, %v1352_v42  ;;  %v780_v29 = vmul.f32 %v1352_v42, %v1352_v42  ;;  %v712_v28 = vsel %vm265_vm1, %v1352_v42, 0.0  ;;  %v321_v42 = vld [vmem:[#allocation2 + $0xb8] sm:$0xff] }
  0xb9   : > { %611 = vst.msk [vmem:[#allocation2 + $0x28] sm:$0xff] %vm265_vm1, %v578_v38  ;;  %v1361_v46 = vld [vmem:[#allocation2 + $0x60] sm:$0xff]  ;;  %v813_v38 = vsel %vm265_vm1, %v779_v16, 0.0 }
  0xba   : > { %685 = vst.msk [vmem:[%s1273_s28 + $0x60] sm:$0xff] %vm265_vm1, %v1361_v46  ;;  %v815_v45 = vsel %vm265_vm1, %v780_v29, 0.0 }
  0xbb   : > { %619 = vst.msk [vmem:[#allocation2 + $0x68] sm:$0xff] %vm265_vm1, %v586_v43  ;;  %v812_v43 = vadd.f32 %v811_v26, %v810_v34  ;;  %v823_v26 = vsel %vm265_vm1, %v784_v13, 0.0  ;;  %v329_v34 = vld [vmem:[#allocation2 + $0xf8] sm:$0xff] }
  0xbc   : > { %v1367_v51 = vld [vmem:[#allocation2 + $0x98] sm:$0xff]  ;;  %626 = vst.msk [vmem:[#allocation2 + $0xa0] sm:$0xff] %vm265_vm1, %v593_v44  ;;  %v711_v44 = vadd.f32 %v710_v27, %v709_v35  ;;  %v786_v27 = vmul.f32 %v1313_v14, %v1313_v14 }
  0xbd   : > { %v495_v53 = vpop.f32.mrf.mxu0  ;;  %692 = vst.msk [vmem:[%s1273_s28 + $0x98] sm:$0xff] %vm265_vm1, %v1367_v51  ;;  %v540_v55 = vpop.f32.mrf.mxu2 }
  0xbe   : > { %v579_v56 = vadd.f32 %v495_v53, %v304_v48  ;;  %v519_v57 = vpop.f32.mrf.mxu1  ;;  %v594_v3 = vadd.f32 %v540_v55, %v319_v58  ;;  %v1410_v25 = vld [vmem:[#allocation2 + $0xd8] sm:$0xff]  ;;  %634 = vst.msk [vmem:[#allocation2 + $0xe0] sm:$0xff] %vm265_vm1, %v601_v6  ;;  %v564_v10 = vpop.f32.mrf.mxu3  ;;  %v814_v53 = vadd.f32 %v813_v38, %v812_v43  ;;  %v713_v55 = vadd.f32 %v712_v28, %v711_v44 }
  0xbf   : > { %v587_v60 = vadd.f32 %v519_v57, %v312_v52  ;;  %700 = vst.msk [vmem:[%s1273_s28 + $0xd8] sm:$0xff] %vm265_vm1, %v1410_v25  ;;  %v602_v52 = vadd.f32 %v564_v10, %v327_v37  ;;  %v724_v37 = vsel %vm265_vm1, %v1313_v14, 0.0  ;;  %v787_v38 = vmul.f32 %v1337_v30, %v1337_v30 }
  0xc0   : > { %v646_v0 = vld [vmem:[#allocation2 + $0x28] sm:$0xff]  ;;  %612 = vst.msk [vmem:[#allocation2 + $0x30] sm:$0xff] %vm265_vm1, %v579_v56  ;;  %v816_v62 = vadd.f32 %v815_v45, %v814_v53  ;;  %v827_v44 = vsel %vm265_vm1, %v786_v27, 0.0  ;;  %v726_v45 = vsel %vm265_vm1, %v1337_v30, 0.0  ;;  %v788_v14 = vmul.f32 %v1361_v46, %v1361_v46 }
  0xc1   : > { %678 = vst.msk [vmem:[%s1273_s28 + $0x28] sm:$0xff] %vm265_vm1, %v646_v0  ;;  %v781_v39 = vmul.f32 %v646_v0, %v646_v0  ;;  %v714_v48 = vsel %vm265_vm1, %v646_v0, 0.0  ;;  %v728_v53 = vsel %vm265_vm1, %v1361_v46, 0.0 }
  0xc2   : > { %v1386_v5 = vld [vmem:[#allocation2 + $0x68] sm:$0xff]  ;;  %620 = vst.msk [vmem:[#allocation2 + $0x70] sm:$0xff] %vm265_vm1, %v587_v60  ;;  %v715_v0 = vadd.f32 %v714_v48, %v713_v55 }
  0xc3   : > { %686 = vst.msk [vmem:[%s1273_s28 + $0x68] sm:$0xff] %vm265_vm1, %v1386_v5  ;;  %v1396_v11 = vld [vmem:[#allocation2 + $0xa0] sm:$0xff]  ;;  %v817_v57 = vsel %vm265_vm1, %v781_v39, 0.0  ;;  %v789_v30 = vmul.f32 %v1386_v5, %v1386_v5 }
  0xc4   : > { %693 = vst.msk [vmem:[%s1273_s28 + $0xa0] sm:$0xff] %vm265_vm1, %v1396_v11  ;;  %v818_v8 = vadd.f32 %v817_v57, %v816_v62 }
  0xc5   : > { %v498_v18 = vpop.f32.mrf.mxu0  ;;  %627 = vst.msk [vmem:[#allocation2 + $0xa8] sm:$0xff] %vm265_vm1, %v594_v3  ;;  %v543_v21 = vpop.f32.mrf.mxu2  ;;  %v1443_v59 = vld [vmem:[#allocation2 + $0xe0] sm:$0xff]  ;;  %v328_v3 = vld [vmem:[#allocation2 + $0xf0] sm:$0xff] }
  0xc6   : > { %v580_v24 = vadd.f32 %v498_v18, %v305_v9  ;;  %v522_v47 = vpop.f32.mrf.mxu1  ;;  %v595_v36 = vadd.f32 %v543_v21, %v320_v19  ;;  %701 = vst.msk [vmem:[%s1273_s28 + $0xe0] sm:$0xff] %vm265_vm1, %v1443_v59  ;;  %v567_v4 = vpop.f32.mrf.mxu3  ;;  %v720_v21 = vsel %vm265_vm1, %v1280_v49, 0.0  ;;  %v722_v49 = vsel %vm265_vm1, %v1294_v63, 0.0 }
  0xc7   : > { %v647_v31 = vld [vmem:[#allocation2 + $0x30] sm:$0xff]  ;;  %v588_v32 = vadd.f32 %v522_v47, %v313_v12  ;;  %635 = vst.msk [vmem:[#allocation2 + $0xe8] sm:$0xff] %vm265_vm1, %v602_v52  ;;  %v603_v7 = vadd.f32 %v567_v4, %v328_v3  ;;  %v829_v52 = vsel %vm265_vm1, %v787_v38, 0.0  ;;  %v833_v4 = vsel %vm265_vm1, %v789_v30, 0.0 }
  0xc8   : > { %679 = vst.msk [vmem:[%s1273_s28 + $0x30] sm:$0xff] %vm265_vm1, %v647_v31  ;;  %v782_v50 = vmul.f32 %v647_v31, %v647_v31  ;;  %v716_v58 = vsel %vm265_vm1, %v647_v31, 0.0 }
  0xc9   : > { %613 = vst.msk [vmem:[#allocation2 + $0x38] sm:$0xff] %vm265_vm1, %v580_v24  ;;  %v1427_v41 = vld [vmem:[#allocation2 + $0x70] sm:$0xff]  ;;  %v717_v9 = vadd.f32 %v716_v58, %v715_v0  ;;  %v831_v58 = vsel %vm265_vm1, %v788_v14, 0.0 }
  0xca   : > { %687 = vst.msk [vmem:[%s1273_s28 + $0x70] sm:$0xff] %vm265_vm1, %v1427_v41  ;;  %v819_v6 = vsel %vm265_vm1, %v782_v50, 0.0  ;;  %v790_v62 = vmul.f32 %v1427_v41, %v1427_v41  ;;  %v732_v46 = vsel %vm265_vm1, %v1427_v41, 0.0  ;;  %v736_v41 = vsel %vm265_vm1, %v1300_v2, 0.0 }
  0xcb   : > { %621 = vst.msk [vmem:[#allocation2 + $0x78] sm:$0xff] %vm265_vm1, %v588_v32  ;;  %v820_v16 = vadd.f32 %v819_v6, %v818_v8 }
  0xcc   : > { %v1435_v56 = vld [vmem:[#allocation2 + $0xa8] sm:$0xff]  ;;  %628 = vst.msk [vmem:[#allocation2 + $0xb0] sm:$0xff] %vm265_vm1, %v595_v36  ;;  %v825_v36 = vsel %vm265_vm1, %v785_v22, 0.0  ;;  %v738_v22 = vsel %vm265_vm1, %v1319_v17, 0.0 }
  0xcd   : > { %694 = vst.msk [vmem:[%s1273_s28 + $0xa8] sm:$0xff] %vm265_vm1, %v1435_v56  ;;  %v546_v60 = vpop.f32.mrf.mxu2  ;;  %v797_v38 = vmul.f32 %v1435_v56, %v1435_v56 }
  0xce   : > { %v596_v1 = vadd.f32 %v546_v60, %v321_v42  ;;  %636 = vst.msk [vmem:[#allocation2 + $0xf0] sm:$0xff] %vm265_vm1, %v603_v7  ;;  %v1474_v32 = vld [vmem:[#allocation2 + $0xe8] sm:$0xff]  ;;  %v570_v35 = vpop.f32.mrf.mxu3  ;;  %v730_v60 = vsel %vm265_vm1, %v1386_v5, 0.0  ;;  %v792_v5 = vmul.f32 %v1300_v2, %v1300_v2  ;;  %v740_v2 = vsel %vm265_vm1, %v1343_v33, 0.0 }
  0xcf   : > { %702 = vst.msk [vmem:[%s1273_s28 + $0xe8] sm:$0xff] %vm265_vm1, %v1474_v32  ;;  %v604_v63 = vadd.f32 %v570_v35, %v329_v34  ;;  %v796_v34 = vmul.f32 %v1396_v11, %v1396_v11 }
  0xd0   : > { %v648_v12 = vld [vmem:[#allocation2 + $0x38] sm:$0xff]  ;;  %629 = vst.msk [vmem:[#allocation2 + $0xb8] sm:$0xff] %vm265_vm1, %v596_v1 }
  0xd1   : > { %680 = vst.msk [vmem:[%s1273_s28 + $0x38] sm:$0xff] %vm265_vm1, %v648_v12  ;;  %v718_v15 = vsel %vm265_vm1, %v648_v12, 0.0  ;;  %v783_v61 = vmul.f32 %v648_v12, %v648_v12  ;;  %v835_v12 = vsel %vm265_vm1, %v790_v62, 0.0  ;;  %v752_v62 = vsel %vm265_vm1, %v1325_v20, 0.0 }
  0xd2   : > { %v719_v18 = vadd.f32 %v718_v15, %v717_v9  ;;  %v656_v19 = vld [vmem:[#allocation2 + $0x78] sm:$0xff]  ;;  %637 = vst.msk [vmem:[#allocation2 + $0xf8] sm:$0xff] %vm265_vm1, %v604_v63 }
  0xd3   : > { %v821_v23 = vsel %vm265_vm1, %v783_v61, 0.0  ;;  %688 = vst.msk [vmem:[%s1273_s28 + $0x78] sm:$0xff] %vm265_vm1, %v656_v19  ;;  %v1464_v24 = vld [vmem:[#allocation2 + $0xb0] sm:$0xff]  ;;  %v791_v0 = vmul.f32 %v656_v19, %v656_v19  ;;  %v734_v6 = vsel %vm265_vm1, %v656_v19, 0.0 }
  0xd4   : > { %v721_v47 = vadd.f32 %v720_v21, %v719_v18  ;;  %v822_v10 = vadd.f32 %v821_v23, %v820_v16  ;;  %695 = vst.msk [vmem:[%s1273_s28 + $0xb0] sm:$0xff] %vm265_vm1, %v1464_v24  ;;  %v793_v16 = vmul.f32 %v1319_v17, %v1319_v17  ;;  %v839_v21 = vsel %vm265_vm1, %v792_v5, 0.0 }
  0xd5   : > { %v1494_v48 = vld [vmem:[#allocation2 + $0xf0] sm:$0xff]  ;;  %v837_v13 = vsel %vm265_vm1, %v791_v0, 0.0  ;;  %v794_v23 = vmul.f32 %v1343_v33, %v1343_v33  ;;  %v742_v17 = vsel %vm265_vm1, %v1367_v51, 0.0  ;;  %v744_v33 = vsel %vm265_vm1, %v1396_v11, 0.0 }
  0xd6   : > { %v723_v29 = vadd.f32 %v722_v49, %v721_v47  ;;  %v824_v31 = vadd.f32 %v823_v26, %v822_v10  ;;  %703 = vst.msk [vmem:[%s1273_s28 + $0xf0] sm:$0xff] %vm265_vm1, %v1494_v48  ;;  %v841_v26 = vsel %vm265_vm1, %v793_v16, 0.0  ;;  %v795_v49 = vmul.f32 %v1367_v51, %v1367_v51 }
  0xd7   : > { %v1481_v28 = vld [vmem:[#allocation2 + $0xb8] sm:$0xff]  ;;  %v746_v51 = vsel %vm265_vm1, %v1435_v56, 0.0  ;;  %v849_v11 = vsel %vm265_vm1, %v797_v38, 0.0  ;;  %v800_v56 = vmul.f32 %v1325_v20, %v1325_v20  ;;  %v756_v20 = vsel %vm265_vm1, %v1373_v54, 0.0 }
  0xd8   : > { %v826_v39 = vadd.f32 %v825_v36, %v824_v31  ;;  %v725_v43 = vadd.f32 %v724_v37, %v723_v29  ;;  %696 = vst.msk [vmem:[%s1273_s28 + $0xb8] sm:$0xff] %vm265_vm1, %v1481_v28  ;;  %v843_v31 = vsel %vm265_vm1, %v794_v23, 0.0  ;;  %v845_v37 = vsel %vm265_vm1, %v795_v49, 0.0 }
  0xd9   : > { %v1514_v9 = vld [vmem:[#allocation2 + $0xf8] sm:$0xff]  ;;  %v806_v23 = vmul.f32 %v1494_v48, %v1494_v48 }
  0xda   : > { %v727_v50 = vadd.f32 %v726_v45, %v725_v43  ;;  %v828_v42 = vadd.f32 %v827_v44, %v826_v39  ;;  %704 = vst.msk [vmem:[%s1273_s28 + $0xf8] sm:$0xff] %vm265_vm1, %v1514_v9  ;;  %v847_v43 = vsel %vm265_vm1, %v796_v34, 0.0  ;;  %v798_v44 = vmul.f32 %v1464_v24, %v1464_v24 }
  0xdb   : > { %v799_v45 = vmul.f32 %v1481_v28, %v1481_v28  ;;  %v766_v49 = vsel %vm265_vm1, %v1514_v9, 0.0 }
  0xdc   : > { %v729_v55 = vadd.f32 %v728_v53, %v727_v50  ;;  %v830_v57 = vadd.f32 %v829_v52, %v828_v42  ;;  %v748_v42 = vsel %vm265_vm1, %v1464_v24, 0.0  ;;  %v750_v52 = vsel %vm265_vm1, %v1481_v28, 0.0 }
  0xdd   : > { %v801_v24 = vmul.f32 %v1349_v40, %v1349_v40  ;;  %v855_v28 = vsel %vm265_vm1, %v800_v56, 0.0 }
  0xde   : > { %v731_v1 = vadd.f32 %v730_v60, %v729_v55  ;;  %v832_v3 = vadd.f32 %v831_v58, %v830_v57  ;;  %v851_v55 = vsel %vm265_vm1, %v798_v44, 0.0  ;;  %v853_v57 = vsel %vm265_vm1, %v799_v45, 0.0 }
  0xe0   : > { %v834_v7 = vadd.f32 %v833_v4, %v832_v3  ;;  %v733_v8 = vadd.f32 %v732_v46, %v731_v1  ;;  %v754_v3 = vsel %vm265_vm1, %v1349_v40, 0.0  ;;  %v802_v4 = vmul.f32 %v1373_v54, %v1373_v54 }
  0xe1   : > { %v758_v40 = vsel %vm265_vm1, %v1410_v25, 0.0  ;;  %v760_v54 = vsel %vm265_vm1, %v1443_v59, 0.0 }
  0xe2   : > { %v836_v15 = vadd.f32 %v835_v12, %v834_v7  ;;  %v735_v61 = vadd.f32 %v734_v6, %v733_v8  ;;  %v857_v7 = vsel %vm265_vm1, %v801_v24, 0.0  ;;  %v803_v8 = vmul.f32 %v1410_v25, %v1410_v25 }
  0xe3   : > { %v762_v25 = vsel %vm265_vm1, %v1474_v32, 0.0 }
  0xe4   : > { %v737_v18 = vadd.f32 %v736_v41, %v735_v61  ;;  %v838_v19 = vadd.f32 %v837_v13, %v836_v15  ;;  %v859_v13 = vsel %vm265_vm1, %v802_v4, 0.0  ;;  %v804_v15 = vmul.f32 %v1443_v59, %v1443_v59 }
  0xe5   : > { %v861_v16 = vsel %vm265_vm1, %v803_v8, 0.0 }
  0xe6   : > { %v739_v47 = vadd.f32 %v738_v22, %v737_v18  ;;  %v840_v10 = vadd.f32 %v839_v21, %v838_v19  ;;  %v805_v18 = vmul.f32 %v1474_v32, %v1474_v32  ;;  %v863_v22 = vsel %vm265_vm1, %v804_v15, 0.0 }
  0xe8   : > { %v842_v27 = vadd.f32 %v841_v26, %v840_v10  ;;  %v741_v29 = vadd.f32 %v740_v2, %v739_v47  ;;  %v807_v47 = vmul.f32 %v1514_v9, %v1514_v9  ;;  %v865_v59 = vsel %vm265_vm1, %v805_v18, 0.0 }
  0xe9   : > { %v764_v2 = vsel %vm265_vm1, %v1494_v48, 0.0 }
  0xea   : > { %v743_v35 = vadd.f32 %v742_v17, %v741_v29  ;;  %v844_v36 = vadd.f32 %v843_v31, %v842_v27  ;;  %v867_v29 = vsel %vm265_vm1, %v806_v23, 0.0  ;;  %v869_v31 = vsel %vm265_vm1, %v807_v47, 0.0 }
  0xec   : > { %v745_v63 = vadd.f32 %v744_v33, %v743_v35  ;;  %v846_v39 = vadd.f32 %v845_v37, %v844_v36 }
  0xee   : > { %v747_v14 = vadd.f32 %v746_v51, %v745_v63  ;;  %v848_v50 = vadd.f32 %v847_v43, %v846_v39 }
  0xf0   : > { %v850_v53 = vadd.f32 %v849_v11, %v848_v50  ;;  %v749_v30 = vadd.f32 %v748_v42, %v747_v14 }
  0xf2   : > { %v852_v58 = vadd.f32 %v851_v55, %v850_v53  ;;  %v751_v60 = vadd.f32 %v750_v52, %v749_v30 }
  0xf4   : > { %v753_v0 = vadd.f32 %v752_v62, %v751_v60  ;;  %v854_v1 = vadd.f32 %v853_v57, %v852_v58 }
  0xf6   : > { %v755_v46 = vadd.f32 %v754_v3, %v753_v0  ;;  %v856_v6 = vadd.f32 %v855_v28, %v854_v1 }
  0xf8   : > { %v858_v5 = vadd.f32 %v857_v7, %v856_v6  ;;  %v757_v12 = vadd.f32 %v756_v20, %v755_v46 }
  0xfa   : > { %v759_v61 = vadd.f32 %v758_v40, %v757_v12  ;;  %v860_v41 = vadd.f32 %v859_v13, %v858_v5 }
  0xfc   : > { %v761_v19 = vadd.f32 %v760_v54, %v759_v61  ;;  %v862_v21 = vadd.f32 %v861_v16, %v860_v41 }
  0xfe   : > { %v763_v10 = vadd.f32 %v762_v25, %v761_v19  ;;  %v864_v26 = vadd.f32 %v863_v22, %v862_v21 }
 0x100   : > { %v866_v27 = vadd.f32 %v865_v59, %v864_v26  ;;  %v765_v32 = vadd.f32 %v764_v2, %v763_v10 }
 0x102   : > { %v868_v17 = vadd.f32 %v867_v29, %v866_v27  ;;  %v767_v34 = vadd.f32 %v766_v49, %v765_v32 }
 0x104   : > { %v768_v35 = vrot.slane %v767_v34, 4  ;;  %v870_v36 = vadd.f32 %v869_v31, %v868_v17 }
 0x106   : > { %v769_v37 = vadd.f32 %v768_v35, %v767_v34  ;;  %v871_v33 = vrot.slane %v870_v36, 4 }
 0x108   : > { %v770_v38 = vrot.slane %v769_v37, 2  ;;  %v872_v63 = vadd.f32 %v871_v33, %v870_v36 }
 0x10a   : > { %v771_v48 = vadd.f32 %v770_v38, %v769_v37  ;;  %v873_v39 = vrot.slane %v872_v63, 2 }
 0x10c   : > { %v772_v43 = vrot.slane %v771_v48, 1  ;;  %v874_v9 = vadd.f32 %v873_v39, %v872_v63 }
 0x10e   : > { %v773_v51 = vadd.f32 %v772_v43, %v771_v48  ;;  %v875_v44 = vrot.slane %v874_v9, 1 }
 0x110   : > { %775 = vst.msk [vmem:[%s257_s5] sm:$0x1] %vm774_vm2, %v773_v51  ;;  %v876_v45 = vadd.f32 %v875_v44, %v874_v9 }
 0x112   : > { %877 = vst.msk [vmem:[%s260_s8] sm:$0x1] %vm774_vm2, %v876_v45 }
 0x113 PF: > { %s15_s17 = sadd.s32 1, %s1108_s17   ;;  %s1623_s15 = smov %s1104_s16 }
 0x114   : > { %p12_p6 = scmp.ge.s32.totalorder %s15_s17, 5   ;;  %s1624_s16 = smov %s1626_s18 }
 0x116   :  { %14 = sbr.rel (!%p12_p6) target bundleno = 2 (0x2), region = 93 }

// kernel: dcmconv2_forward.29
= control target key start
LH: loop header
LB: loop body
LE: loop exit
PB: predicated region body
PF: predicated region fallthrough
CT: control target
= control target key end

     0   :  { %s182_s0 = inlined_call_operand.vmem [shape: f32[16,128], index: 0, kind: input, shape index: {}]   ;;  %s183_s1 = inlined_call_operand.vmem [shape: f32[16,128], index: 1, kind: input, shape index: {}]   ;;  %s184_s2 = inlined_call_operand.vmem [shape: f32[16,128], index: 2, kind: input, shape index: {}]   ;;  %s185_s3 = inlined_call_operand.vmem [shape: f32[16,128], index: 3, kind: input, shape index: {}]   ;;  %s186_s4 = inlined_call_operand.vmem [shape: f32[16,128], index: 4, kind: input, shape index: {}]   ;;  %s187_s5 = inlined_call_operand.vmem [shape: f32[16,128], index: 5, kind: input, shape index: {}]   ;;  %s188_s6 = inlined_call_operand.vmem [shape: f32[16,128], index: 6, kind: input, shape index: {}]   ;;  %s189_s7 = inlined_call_operand.vmem [shape: f32[16,128], index: 7, kind: input, shape index: {}]   ;;  %s190_s8 = inlined_call_operand.vmem [shape: f32[16,128], index: 8, kind: input, shape index: {}]   ;;  %s191_s9 = inlined_call_operand.vmem [shape: f32[16,128], index: 9, kind: output, shape index: {}]  }
   0x1   :  { %v32_v0 = vld [vmem:[%s182_s0] sm:$0xff]  ;;  %v33_v12 = vld [vmem:[%s182_s0 + $0x8] sm:$0xff] }
   0x2   :  { %v34_v1 = vld [vmem:[%s183_s1] sm:$0xff]  ;;  %v35_v13 = vld [vmem:[%s183_s1 + $0x8] sm:$0xff] }
   0x3   :  { %v36_v2 = vld [vmem:[%s184_s2] sm:$0xff]  ;;  %v50_v6 = vmax.f32 %v32_v0, %v34_v1  ;;  %v37_v14 = vld [vmem:[%s184_s2 + $0x8] sm:$0xff]  ;;  %v51_v19 = vmax.f32 %v33_v12, %v35_v13 }
   0x4   :  { %v38_v3 = vld [vmem:[%s185_s3] sm:$0xff]  ;;  %v39_v16 = vld [vmem:[%s185_s3 + $0x8] sm:$0xff] }
   0x5   :  { %v40_v4 = vld [vmem:[%s186_s4] sm:$0xff]  ;;  %v52_v9 = vmax.f32 %v36_v2, %v38_v3  ;;  %v41_v17 = vld [vmem:[%s186_s4 + $0x8] sm:$0xff]  ;;  %v53_v23 = vmax.f32 %v37_v14, %v39_v16 }
   0x6   :  { %v42_v5 = vld [vmem:[%s187_s5] sm:$0xff]  ;;  %v43_v18 = vld [vmem:[%s187_s5 + $0x8] sm:$0xff] }
   0x7   :  { %v44_v7 = vld [vmem:[%s188_s6] sm:$0xff]  ;;  %v54_v10 = vmax.f32 %v40_v4, %v42_v5  ;;  %v58_v15 = vmax.f32 %v50_v6, %v52_v9  ;;  %v45_v21 = vld [vmem:[%s188_s6 + $0x8] sm:$0xff]  ;;  %v55_v24 = vmax.f32 %v41_v17, %v43_v18  ;;  %v59_v28 = vmax.f32 %v51_v19, %v53_v23 }
   0x8   :  { %v46_v8 = vld [vmem:[%s189_s7] sm:$0xff]  ;;  %v47_v22 = vld [vmem:[%s189_s7 + $0x8] sm:$0xff] }
   0x9   :  { %v56_v11 = vmax.f32 %v44_v7, %v46_v8  ;;  %v48_v25 = vld [vmem:[%s190_s8] sm:$0xff]  ;;  %v57_v26 = vmax.f32 %v45_v21, %v47_v22  ;;  %v49_v31 = vld [vmem:[%s190_s8 + $0x8] sm:$0xff] }
   0xb   :  { %v60_v20 = vmax.f32 %v54_v10, %v56_v11  ;;  %v61_v29 = vmax.f32 %v55_v24, %v57_v26 }
   0xd   :  { %v62_v27 = vmax.f32 %v58_v15, %v60_v20  ;;  %v63_v32 = vmax.f32 %v59_v28, %v61_v29 }
   0xf   :  { %v64_v30 = vmax.f32 %v62_v27, %v48_v25  ;;  %v65_v33 = vmax.f32 %v63_v32, %v49_v31 }
  0x11   :  { %66 = vst [vmem:[%s191_s9] sm:$0xff] %v64_v30 }
  0x12   :  { %67 = vst [vmem:[%s191_s9 + $0x8] sm:$0xff] %v65_v33 }

// kernel: dcmconv2_forward.30
= control target key start
LH: loop header
LB: loop body
LE: loop exit
PB: predicated region body
PF: predicated region fallthrough
CT: control target
= control target key end

     0   :  { %vm83_vm0 = vcmask 64512   ;;  %vm18_vm1 = vcmask 15360   ;;  %v470_v8 = vmov 0.0   ;;  %vm362_vm2 = vcmask 8192   ;;  %s841_s1 = inlined_call_operand.vmem [shape: f32[1,8,2], index: 1, kind: input, shape index: {}]   ;;  %s842_s0 = inlined_call_operand.vmem [shape: f32[1,168,8], index: 0, kind: input, shape index: {}]   ;;  %s843_s2 = inlined_call_operand.vmem [shape: f32[168,2], index: 2, kind: output, shape index: {0}]   ;;  %s844_s3 = inlined_call_operand.vmem [shape: f32[1,1,2], index: 3, kind: output, shape index: {1}]   ;;  %s845_s4 = inlined_call_operand.vmem [shape: f32[1,1,2], index: 4, kind: output, shape index: {2}]  }
   0x1   :  { %v82_v0 = vld [vmem:[%s841_s1] sm:$0xff]  ;;  %v67_v2 = vld [vmem:[%s842_s0 + $0x30] sm:$0xff]  ;;  %v62_v4 = vld [vmem:[%s842_s0 + $0x8] sm:$0xff]  ;;  %19 = vst.msk [vmem:[#allocation2] sm:$0xff] %vm18_vm1, %v470_v8 }
   0x2   :  { %v61_v1 = vld [vmem:[%s842_s0] sm:$0xff]  ;;  %162 = vmatpush.msra.mxu0 %v82_v0  ;;  %466 = vmatpush.msra.mxu1 %v82_v0  ;;  %v68_v5 = vld [vmem:[%s842_s0 + $0x38] sm:$0xff]  ;;  %v74_v6 = vld [vmem:[%s842_s0 + $0x68] sm:$0xff]  ;;  %20 = vst.msk [vmem:[#allocation2 + $0x8] sm:$0xff] %vm18_vm1, %v470_v8 }
   0x3   :  { %v73_v3 = vld [vmem:[%s842_s0 + $0x60] sm:$0xff]  ;;  %445 = vmatmul.msk.f32.vlgmr.msra.gmra.mxu0 %vm83_vm0, %v61_v1  ;;  %451 = vmatmul.msk.f32.vlgmr.msra.gmra.mxu1 %vm83_vm0, %v67_v2  ;;  %v79_v7 = vld [vmem:[%s842_s0 + $0x90] sm:$0xff]  ;;  %21 = vst.msk [vmem:[#allocation2 + $0x10] sm:$0xff] %vm18_vm1, %v470_v8  ;;  %v80_v11 = vld [vmem:[%s842_s0 + $0x98] sm:$0xff] }
   0x4   :  { %467 = vmatpush.msra.mxu2 %v82_v0  ;;  %468 = vmatpush.msra.mxu3 %v82_v0  ;;  %v63_v9 = vld [vmem:[%s842_s0 + $0x10] sm:$0xff]  ;;  %v69_v10 = vld [vmem:[%s842_s0 + $0x40] sm:$0xff]  ;;  %22 = vst.msk [vmem:[#allocation2 + $0x18] sm:$0xff] %vm18_vm1, %v470_v8  ;;  %v64_v13 = vld [vmem:[%s842_s0 + $0x18] sm:$0xff] }
   0x5   :  { %457 = vmatmul.msk.f32.vlgmr.msra.gmra.mxu2 %vm83_vm0, %v73_v3  ;;  %463 = vmatmul.msk.f32.vlgmr.msra.gmra.mxu3 %vm83_vm0, %v79_v7  ;;  %v75_v12 = vld [vmem:[%s842_s0 + $0x70] sm:$0xff]  ;;  %23 = vst.msk [vmem:[#allocation2 + $0x20] sm:$0xff] %vm18_vm1, %v470_v8  ;;  %v70_v14 = vld [vmem:[%s842_s0 + $0x48] sm:$0xff]  ;;  %v81_v15 = vld [vmem:[%s842_s0 + $0xa0] sm:$0xff] }
   0x6   :  { %24 = vst.msk [vmem:[#allocation2 + $0x28] sm:$0xff] %vm18_vm1, %v470_v8  ;;  %v76_v16 = vld [vmem:[%s842_s0 + $0x78] sm:$0xff]  ;;  %v65_v17 = vld [vmem:[%s842_s0 + $0x20] sm:$0xff]  ;;  %v71_v18 = vld [vmem:[%s842_s0 + $0x50] sm:$0xff] }
   0x7   :  { %25 = vst.msk [vmem:[#allocation2 + $0x30] sm:$0xff] %vm18_vm1, %v470_v8  ;;  %v77_v19 = vld [vmem:[%s842_s0 + $0x80] sm:$0xff]  ;;  %v66_v20 = vld [vmem:[%s842_s0 + $0x28] sm:$0xff]  ;;  %v72_v21 = vld [vmem:[%s842_s0 + $0x58] sm:$0xff] }
   0x8   :  { %26 = vst.msk [vmem:[#allocation2 + $0x38] sm:$0xff] %vm18_vm1, %v470_v8  ;;  %v78_v22 = vld [vmem:[%s842_s0 + $0x88] sm:$0xff]  ;;  %v40_v23 = vld [vmem:[#allocation2] sm:$0xff] }
   0x9   :  { %27 = vst.msk [vmem:[#allocation2 + $0x40] sm:$0xff] %vm18_vm1, %v470_v8  ;;  %v41_v29 = vld [vmem:[#allocation2 + $0x8] sm:$0xff] }
   0xa   :  { %28 = vst.msk [vmem:[#allocation2 + $0x48] sm:$0xff] %vm18_vm1, %v470_v8  ;;  %v42_v40 = vld [vmem:[#allocation2 + $0x10] sm:$0xff] }
   0xb   :  { %446 = vmatmul.msk.f32.gmra.mxu0 %vm83_vm0, %v62_v4  ;;  %452 = vmatmul.msk.f32.gmra.mxu1 %vm83_vm0, %v68_v5  ;;  %29 = vst.msk [vmem:[#allocation2 + $0x50] sm:$0xff] %vm18_vm1, %v470_v8  ;;  %v43_v51 = vld [vmem:[#allocation2 + $0x18] sm:$0xff] }
   0xc   :  { %30 = vst.msk [vmem:[#allocation2 + $0x58] sm:$0xff] %vm18_vm1, %v470_v8  ;;  %v44_v2 = vld [vmem:[#allocation2 + $0x20] sm:$0xff] }
   0xd   :  { %458 = vmatmul.msk.f32.gmra.mxu2 %vm83_vm0, %v74_v6  ;;  %464 = vmatmul.msk.f32.gmra.mxu3 %vm83_vm0, %v80_v11  ;;  %31 = vst.msk [vmem:[#allocation2 + $0x60] sm:$0xff] %vm18_vm1, %v470_v8 }
   0xe   :  { %32 = vst.msk [vmem:[#allocation2 + $0x68] sm:$0xff] %vm18_vm1, %v470_v8  ;;  %v46_v24 = vld [vmem:[#allocation2 + $0x30] sm:$0xff] }
   0xf   :  { %33 = vst.msk [vmem:[#allocation2 + $0x70] sm:$0xff] %vm18_vm1, %v470_v8  ;;  %v47_v30 = vld [vmem:[#allocation2 + $0x38] sm:$0xff] }
  0x10   :  { %34 = vst.msk [vmem:[#allocation2 + $0x78] sm:$0xff] %vm18_vm1, %v470_v8  ;;  %v48_v41 = vld [vmem:[#allocation2 + $0x40] sm:$0xff] }
  0x11   :  { %35 = vst.msk [vmem:[#allocation2 + $0x80] sm:$0xff] %vm18_vm1, %v470_v8  ;;  %v49_v53 = vld [vmem:[#allocation2 + $0x48] sm:$0xff] }
  0x12   :  { %36 = vst.msk [vmem:[#allocation2 + $0x88] sm:$0xff] %vm18_vm1, %v470_v8  ;;  %v50_v3 = vld [vmem:[#allocation2 + $0x50] sm:$0xff] }
  0x13   :  { %447 = vmatmul.msk.f32.gmra.mxu0 %vm83_vm0, %v63_v9  ;;  %453 = vmatmul.msk.f32.gmra.mxu1 %vm83_vm0, %v69_v10  ;;  %37 = vst.msk [vmem:[#allocation2 + $0x90] sm:$0xff] %vm18_vm1, %v470_v8 }
  0x14   :  { %38 = vst.msk [vmem:[#allocation2 + $0x98] sm:$0xff] %vm18_vm1, %v470_v8  ;;  %v52_v33 = vld [vmem:[#allocation2 + $0x60] sm:$0xff] }
  0x15   :  { %459 = vmatmul.msk.f32.gmra.mxu2 %vm83_vm0, %v75_v12  ;;  %465 = vmatmul.msk.f32.gmra.mxu3 %vm83_vm0, %v81_v15  ;;  %39 = vst.msk [vmem:[#allocation2 + $0xa0] sm:$0xff] %vm18_vm1, %v470_v8  ;;  %v53_v46 = vld [vmem:[#allocation2 + $0x68] sm:$0xff] }
  0x16   :  { %v54_v58 = vld [vmem:[#allocation2 + $0x70] sm:$0xff] }
  0x17   :  { %v55_v10 = vld [vmem:[#allocation2 + $0x78] sm:$0xff] }
  0x1a   :  { %v58_v54 = vld [vmem:[#allocation2 + $0x90] sm:$0xff] }
  0x1b   :  { %448 = vmatmul.msk.f32.gmra.mxu0 %vm83_vm0, %v64_v13  ;;  %454 = vmatmul.msk.f32.gmra.mxu1 %vm83_vm0, %v70_v14  ;;  %v59_v13 = vld [vmem:[#allocation2 + $0x98] sm:$0xff] }
  0x1d   :  { %460 = vmatmul.msk.f32.gmra.mxu2 %vm83_vm0, %v76_v16 }
  0x23   :  { %449 = vmatmul.msk.f32.gmra.mxu0 %vm83_vm0, %v65_v17  ;;  %455 = vmatmul.msk.f32.gmra.mxu1 %vm83_vm0, %v71_v18  ;;  %v45_v18 = vld [vmem:[#allocation2 + $0x28] sm:$0xff] }
  0x25   :  { %461 = vmatmul.msk.f32.gmra.mxu2 %vm83_vm0, %v77_v19 }
  0x2b   :  { %450 = vmatmul.msk.f32.gmra.mxu0 %vm83_vm0, %v66_v20  ;;  %456 = vmatmul.msk.f32.gmra.mxu1 %vm83_vm0, %v72_v21  ;;  %v51_v20 = vld [vmem:[#allocation2 + $0x58] sm:$0xff]  ;;  %v60_v21 = vld [vmem:[#allocation2 + $0xa0] sm:$0xff] }
  0x2d   :  { %462 = vmatmul.msk.f32.gmra.mxu2 %vm83_vm0, %v78_v22 }
  0x80   :  { %v164_v25 = vpop.f32.mrf.mxu0  ;;  %v182_v26 = vpop.f32.mrf.mxu1 }
  0x81   :  { %v227_v27 = vadd.f32 %v164_v25, %v40_v23  ;;  %v233_v28 = vadd.f32 %v182_v26, %v46_v24  ;;  %v56_v26 = vld [vmem:[#allocation2 + $0x80] sm:$0xff] }
  0x83   :  { %249 = vst.msk [vmem:[#allocation2] sm:$0xff] %vm18_vm1, %v227_v27 }
  0x84   :  { %255 = vst.msk [vmem:[#allocation2 + $0x30] sm:$0xff] %vm18_vm1, %v233_v28 }
  0x88   :  { %v167_v31 = vpop.f32.mrf.mxu0  ;;  %v185_v32 = vpop.f32.mrf.mxu1 }
  0x89   :  { %v228_v34 = vadd.f32 %v167_v31, %v41_v29  ;;  %v200_v35 = vpop.f32.mrf.mxu2  ;;  %v234_v37 = vadd.f32 %v185_v32, %v47_v30  ;;  %v218_v55 = vpop.f32.mrf.mxu3 }
  0x8a   :  { %v606_v36 = vld [vmem:[#allocation2] sm:$0xff]  ;;  %v239_v39 = vadd.f32 %v200_v35, %v52_v33  ;;  %v245_v59 = vadd.f32 %v218_v55, %v58_v54 }
  0x8b   :  { %294 = vst.msk [vmem:[%s843_s2] sm:$0xff] %vm18_vm1, %v606_v36  ;;  %v613_v38 = vld [vmem:[#allocation2 + $0x30] sm:$0xff]  ;;  %v364_v30 = vmul.f32 %v606_v36, %v606_v36 }
  0x8c   :  { %250 = vst.msk [vmem:[#allocation2 + $0x8] sm:$0xff] %vm18_vm1, %v228_v34 }
  0x8d   :  { %300 = vst.msk [vmem:[%s843_s2 + $0x30] sm:$0xff] %vm18_vm1, %v613_v38 }
  0x8e   :  { %256 = vst.msk [vmem:[#allocation2 + $0x38] sm:$0xff] %vm18_vm1, %v234_v37  ;;  %v315_v37 = vsel %vm18_vm1, %v606_v36, 0.0 }
  0x8f   :  { %261 = vst.msk [vmem:[#allocation2 + $0x60] sm:$0xff] %vm18_vm1, %v239_v39 }
  0x90   :  { %v170_v42 = vpop.f32.mrf.mxu0  ;;  %v188_v43 = vpop.f32.mrf.mxu1  ;;  %267 = vst.msk [vmem:[#allocation2 + $0x90] sm:$0xff] %vm18_vm1, %v245_v59 }
  0x91   :  { %v229_v44 = vadd.f32 %v170_v42, %v42_v40  ;;  %v235_v45 = vadd.f32 %v188_v43, %v48_v41  ;;  %v203_v47 = vpop.f32.mrf.mxu2  ;;  %v221_v5 = vpop.f32.mrf.mxu3 }
  0x92   :  { %v240_v49 = vadd.f32 %v203_v47, %v53_v46  ;;  %v246_v17 = vadd.f32 %v221_v5, %v59_v13 }
  0x93   :  { %v623_v48 = vld [vmem:[#allocation2 + $0x8] sm:$0xff]  ;;  %251 = vst.msk [vmem:[#allocation2 + $0x10] sm:$0xff] %vm18_vm1, %v229_v44  ;;  %v385_v44 = vsel %vm18_vm1, %v364_v30, 0.0 }
  0x94   :  { %295 = vst.msk [vmem:[%s843_s2 + $0x8] sm:$0xff] %vm18_vm1, %v623_v48  ;;  %v365_v23 = vmul.f32 %v623_v48, %v623_v48  ;;  %v316_v31 = vsel %vm18_vm1, %v623_v48, 0.0 }
  0x95   :  { %v631_v50 = vld [vmem:[#allocation2 + $0x38] sm:$0xff]  ;;  %257 = vst.msk [vmem:[#allocation2 + $0x40] sm:$0xff] %vm18_vm1, %v235_v45  ;;  %v317_v43 = vadd.f32 %v316_v31, %v315_v37 }
  0x96   :  { %301 = vst.msk [vmem:[%s843_s2 + $0x38] sm:$0xff] %vm18_vm1, %v631_v50  ;;  %v639_v52 = vld [vmem:[#allocation2 + $0x60] sm:$0xff]  ;;  %v386_v39 = vsel %vm18_vm1, %v365_v23, 0.0 }
  0x97   :  { %306 = vst.msk [vmem:[%s843_s2 + $0x60] sm:$0xff] %vm18_vm1, %v639_v52  ;;  %v669_v12 = vld [vmem:[#allocation2 + $0x90] sm:$0xff]  ;;  %v387_v47 = vadd.f32 %v386_v39, %v385_v44  ;;  %v376_v37 = vmul.f32 %v639_v52, %v639_v52  ;;  %v338_v44 = vsel %vm18_vm1, %v639_v52, 0.0 }
  0x98   :  { %v173_v56 = vpop.f32.mrf.mxu0  ;;  %262 = vst.msk [vmem:[#allocation2 + $0x68] sm:$0xff] %vm18_vm1, %v240_v49  ;;  %v191_v57 = vpop.f32.mrf.mxu1 }
  0x99   :  { %v230_v60 = vadd.f32 %v173_v56, %v43_v51  ;;  %v206_v61 = vpop.f32.mrf.mxu2  ;;  %v236_v63 = vadd.f32 %v191_v57, %v49_v53  ;;  %312 = vst.msk [vmem:[%s843_s2 + $0x90] sm:$0xff] %vm18_vm1, %v669_v12  ;;  %v224_v22 = vpop.f32.mrf.mxu3  ;;  %v57_v51 = vld [vmem:[#allocation2 + $0x88] sm:$0xff] }
  0x9a   :  { %v275_v62 = vld [vmem:[#allocation2 + $0x10] sm:$0xff]  ;;  %v241_v0 = vadd.f32 %v206_v61, %v54_v58  ;;  %v247_v27 = vadd.f32 %v224_v22, %v60_v21  ;;  %268 = vst.msk [vmem:[#allocation2 + $0x98] sm:$0xff] %vm18_vm1, %v246_v17  ;;  %v328_v17 = vsel %vm18_vm1, %v631_v50, 0.0 }
  0x9b   :  { %296 = vst.msk [vmem:[%s843_s2 + $0x10] sm:$0xff] %vm18_vm1, %v275_v62  ;;  %v366_v32 = vmul.f32 %v275_v62, %v275_v62  ;;  %v318_v40 = vsel %vm18_vm1, %v275_v62, 0.0 }
  0x9c   :  { %252 = vst.msk [vmem:[#allocation2 + $0x18] sm:$0xff] %vm18_vm1, %v230_v60  ;;  %v653_v1 = vld [vmem:[#allocation2 + $0x40] sm:$0xff]  ;;  %v319_v48 = vadd.f32 %v318_v40, %v317_v43 }
  0x9d   :  { %302 = vst.msk [vmem:[%s843_s2 + $0x40] sm:$0xff] %vm18_vm1, %v653_v1  ;;  %v388_v36 = vsel %vm18_vm1, %v366_v32, 0.0  ;;  %v330_v23 = vsel %vm18_vm1, %v653_v1, 0.0 }
  0x9e   :  { %258 = vst.msk [vmem:[#allocation2 + $0x48] sm:$0xff] %vm18_vm1, %v236_v63  ;;  %v389_v56 = vadd.f32 %v388_v36, %v387_v47 }
  0x9f   :  { %v661_v4 = vld [vmem:[#allocation2 + $0x68] sm:$0xff]  ;;  %263 = vst.msk [vmem:[#allocation2 + $0x70] sm:$0xff] %vm18_vm1, %v241_v0 }
  0xa0   :  { %v176_v6 = vpop.f32.mrf.mxu0  ;;  %307 = vst.msk [vmem:[%s843_s2 + $0x68] sm:$0xff] %vm18_vm1, %v661_v4  ;;  %v194_v7 = vpop.f32.mrf.mxu1  ;;  %v377_v36 = vmul.f32 %v661_v4, %v661_v4  ;;  %v340_v47 = vsel %vm18_vm1, %v661_v4, 0.0 }
  0xa1   :  { %v231_v8 = vadd.f32 %v176_v6, %v44_v2  ;;  %v237_v9 = vadd.f32 %v194_v7, %v50_v3  ;;  %v209_v11 = vpop.f32.mrf.mxu2  ;;  %269 = vst.msk [vmem:[#allocation2 + $0xa0] sm:$0xff] %vm18_vm1, %v247_v27  ;;  %v735_v55 = vld [vmem:[#allocation2 + $0x98] sm:$0xff]  ;;  %v370_v2 = vmul.f32 %v613_v38, %v613_v38 }
  0xa2   :  { %v242_v15 = vadd.f32 %v209_v11, %v55_v10  ;;  %313 = vst.msk [vmem:[%s843_s2 + $0x98] sm:$0xff] %vm18_vm1, %v735_v55  ;;  %v371_v10 = vmul.f32 %v631_v50, %v631_v50 }
  0xa3   :  { %v276_v14 = vld [vmem:[#allocation2 + $0x18] sm:$0xff]  ;;  %253 = vst.msk [vmem:[#allocation2 + $0x20] sm:$0xff] %vm18_vm1, %v231_v8 }
  0xa4   :  { %297 = vst.msk [vmem:[%s843_s2 + $0x18] sm:$0xff] %vm18_vm1, %v276_v14  ;;  %v367_v41 = vmul.f32 %v276_v14, %v276_v14  ;;  %v320_v45 = vsel %vm18_vm1, %v276_v14, 0.0  ;;  %v398_v22 = vsel %vm18_vm1, %v371_v10, 0.0 }
  0xa5   :  { %v681_v16 = vld [vmem:[#allocation2 + $0x48] sm:$0xff]  ;;  %259 = vst.msk [vmem:[#allocation2 + $0x50] sm:$0xff] %vm18_vm1, %v237_v9  ;;  %v321_v57 = vadd.f32 %v320_v45, %v319_v48  ;;  %v326_v9 = vsel %vm18_vm1, %v613_v38, 0.0  ;;  %v396_v38 = vsel %vm18_vm1, %v370_v2, 0.0 }
  0xa6   :  { %303 = vst.msk [vmem:[%s843_s2 + $0x48] sm:$0xff] %vm18_vm1, %v681_v16  ;;  %v689_v19 = vld [vmem:[#allocation2 + $0x70] sm:$0xff]  ;;  %v390_v53 = vsel %vm18_vm1, %v367_v41, 0.0  ;;  %v332_v50 = vsel %vm18_vm1, %v681_v16, 0.0 }
  0xa7   :  { %308 = vst.msk [vmem:[%s843_s2 + $0x70] sm:$0xff] %vm18_vm1, %v689_v19  ;;  %v391_v62 = vadd.f32 %v390_v53, %v389_v56  ;;  %v378_v48 = vmul.f32 %v689_v19, %v689_v19  ;;  %v342_v52 = vsel %vm18_vm1, %v689_v19, 0.0 }
  0xa8   :  { %v179_v24 = vpop.f32.mrf.mxu0  ;;  %264 = vst.msk [vmem:[#allocation2 + $0x78] sm:$0xff] %vm18_vm1, %v242_v15  ;;  %v197_v25 = vpop.f32.mrf.mxu1  ;;  %v742_v59 = vld [vmem:[#allocation2 + $0xa0] sm:$0xff] }
  0xa9   :  { %v232_v28 = vadd.f32 %v179_v24, %v45_v18  ;;  %v212_v29 = vpop.f32.mrf.mxu2  ;;  %v238_v34 = vadd.f32 %v197_v25, %v51_v20  ;;  %314 = vst.msk [vmem:[%s843_s2 + $0xa0] sm:$0xff] %vm18_vm1, %v742_v59  ;;  %v372_v18 = vmul.f32 %v653_v1, %v653_v1  ;;  %v373_v24 = vmul.f32 %v681_v16, %v681_v16 }
  0xaa   :  { %v277_v33 = vld [vmem:[#allocation2 + $0x20] sm:$0xff]  ;;  %v243_v35 = vadd.f32 %v212_v29, %v56_v26 }
  0xab   :  { %298 = vst.msk [vmem:[%s843_s2 + $0x20] sm:$0xff] %vm18_vm1, %v277_v33  ;;  %v368_v46 = vmul.f32 %v277_v33, %v277_v33  ;;  %v322_v54 = vsel %vm18_vm1, %v277_v33, 0.0  ;;  %v400_v27 = vsel %vm18_vm1, %v372_v18, 0.0  ;;  %v402_v1 = vsel %vm18_vm1, %v373_v24, 0.0 }
  0xac   :  { %254 = vst.msk [vmem:[#allocation2 + $0x28] sm:$0xff] %vm18_vm1, %v232_v28  ;;  %v714_v42 = vld [vmem:[#allocation2 + $0x50] sm:$0xff]  ;;  %v323_v63 = vadd.f32 %v322_v54, %v321_v57  ;;  %v410_v54 = vsel %vm18_vm1, %v377_v36, 0.0  ;;  %v352_v18 = vsel %vm18_vm1, %v735_v55, 0.0 }
  0xad   :  { %304 = vst.msk [vmem:[%s843_s2 + $0x50] sm:$0xff] %vm18_vm1, %v714_v42  ;;  %v392_v60 = vsel %vm18_vm1, %v368_v46, 0.0  ;;  %v374_v28 = vmul.f32 %v714_v42, %v714_v42  ;;  %v334_v33 = vsel %vm18_vm1, %v714_v42, 0.0  ;;  %v408_v46 = vsel %vm18_vm1, %v376_v37, 0.0 }
  0xae   :  { %260 = vst.msk [vmem:[#allocation2 + $0x58] sm:$0xff] %vm18_vm1, %v238_v34  ;;  %v393_v6 = vadd.f32 %v392_v60, %v391_v62  ;;  %v412_v60 = vsel %vm18_vm1, %v378_v48, 0.0 }
  0xaf   :  { %v725_v49 = vld [vmem:[#allocation2 + $0x78] sm:$0xff]  ;;  %265 = vst.msk [vmem:[#allocation2 + $0x80] sm:$0xff] %vm18_vm1, %v243_v35  ;;  %v404_v39 = vsel %vm18_vm1, %v374_v28, 0.0 }
  0xb0   :  { %309 = vst.msk [vmem:[%s843_s2 + $0x78] sm:$0xff] %vm18_vm1, %v725_v49  ;;  %v379_v56 = vmul.f32 %v725_v49, %v725_v49  ;;  %v344_v4 = vsel %vm18_vm1, %v725_v49, 0.0 }
  0xb1   :  { %v215_v58 = vpop.f32.mrf.mxu2 }
  0xb2   :  { %v244_v61 = vadd.f32 %v215_v58, %v57_v51  ;;  %v414_v2 = vsel %vm18_vm1, %v379_v56, 0.0 }
  0xb3   :  { %v278_v0 = vld [vmem:[#allocation2 + $0x28] sm:$0xff] }
  0xb4   :  { %299 = vst.msk [vmem:[%s843_s2 + $0x28] sm:$0xff] %vm18_vm1, %v278_v0  ;;  %v324_v3 = vsel %vm18_vm1, %v278_v0, 0.0  ;;  %v369_v5 = vmul.f32 %v278_v0, %v278_v0 }
  0xb5   :  { %v325_v7 = vadd.f32 %v324_v3, %v323_v63  ;;  %v284_v8 = vld [vmem:[#allocation2 + $0x58] sm:$0xff]  ;;  %266 = vst.msk [vmem:[#allocation2 + $0x88] sm:$0xff] %vm18_vm1, %v244_v61 }
  0xb6   :  { %v394_v11 = vsel %vm18_vm1, %v369_v5, 0.0  ;;  %305 = vst.msk [vmem:[%s843_s2 + $0x58] sm:$0xff] %vm18_vm1, %v284_v8  ;;  %v289_v13 = vld [vmem:[#allocation2 + $0x80] sm:$0xff]  ;;  %v375_v29 = vmul.f32 %v284_v8, %v284_v8  ;;  %v336_v34 = vsel %vm18_vm1, %v284_v8, 0.0 }
  0xb7   :  { %v327_v14 = vadd.f32 %v326_v9, %v325_v7  ;;  %v395_v15 = vadd.f32 %v394_v11, %v393_v6  ;;  %310 = vst.msk [vmem:[%s843_s2 + $0x80] sm:$0xff] %vm18_vm1, %v289_v13  ;;  %v380_v61 = vmul.f32 %v289_v13, %v289_v13  ;;  %v346_v3 = vsel %vm18_vm1, %v289_v13, 0.0 }
  0xb8   :  { %v406_v40 = vsel %vm18_vm1, %v375_v29, 0.0  ;;  %v382_v7 = vmul.f32 %v669_v12, %v669_v12  ;;  %v350_v11 = vsel %vm18_vm1, %v669_v12, 0.0  ;;  %v384_v13 = vmul.f32 %v742_v59, %v742_v59 }
  0xb9   :  { %v329_v20 = vadd.f32 %v328_v17, %v327_v14  ;;  %v397_v21 = vadd.f32 %v396_v38, %v395_v15  ;;  %v416_v8 = vsel %vm18_vm1, %v380_v61, 0.0  ;;  %v383_v14 = vmul.f32 %v735_v55, %v735_v55 }
  0xba   :  { %v420_v17 = vsel %vm18_vm1, %v382_v7, 0.0 }
  0xbb   :  { %v399_v25 = vadd.f32 %v398_v22, %v397_v21  ;;  %v331_v26 = vadd.f32 %v330_v23, %v329_v20  ;;  %v354_v20 = vsel %vm18_vm1, %v742_v59, 0.0  ;;  %v422_v12 = vsel %vm18_vm1, %v383_v14, 0.0 }
  0xbc   :  { %v290_v30 = vld [vmem:[#allocation2 + $0x88] sm:$0xff]  ;;  %v424_v23 = vsel %vm18_vm1, %v384_v13, 0.0 }
  0xbd   :  { %v333_v31 = vadd.f32 %v332_v50, %v331_v26  ;;  %v401_v32 = vadd.f32 %v400_v27, %v399_v25  ;;  %311 = vst.msk [vmem:[%s843_s2 + $0x88] sm:$0xff] %vm18_vm1, %v290_v30  ;;  %v381_v62 = vmul.f32 %v290_v30, %v290_v30  ;;  %v348_v19 = vsel %vm18_vm1, %v290_v30, 0.0 }
  0xbf   :  { %v335_v16 = vadd.f32 %v334_v33, %v333_v31  ;;  %v403_v35 = vadd.f32 %v402_v1, %v401_v32  ;;  %v418_v9 = vsel %vm18_vm1, %v381_v62, 0.0 }
  0xc1   :  { %v405_v41 = vadd.f32 %v404_v39, %v403_v35  ;;  %v337_v43 = vadd.f32 %v336_v34, %v335_v16 }
  0xc3   :  { %v339_v42 = vadd.f32 %v338_v44, %v337_v43  ;;  %v407_v45 = vadd.f32 %v406_v40, %v405_v41 }
  0xc5   :  { %v341_v51 = vadd.f32 %v340_v47, %v339_v42  ;;  %v409_v53 = vadd.f32 %v408_v46, %v407_v45 }
  0xc7   :  { %v411_v57 = vadd.f32 %v410_v54, %v409_v53  ;;  %v343_v58 = vadd.f32 %v342_v52, %v341_v51 }
  0xc9   :  { %v345_v63 = vadd.f32 %v344_v4, %v343_v58  ;;  %v413_v0 = vadd.f32 %v412_v60, %v411_v57 }
  0xcb   :  { %v347_v5 = vadd.f32 %v346_v3, %v345_v63  ;;  %v415_v6 = vadd.f32 %v414_v2, %v413_v0 }
  0xcd   :  { %v417_v49 = vadd.f32 %v416_v8, %v415_v6  ;;  %v349_v10 = vadd.f32 %v348_v19, %v347_v5 }
  0xcf   :  { %v351_v15 = vadd.f32 %v350_v11, %v349_v10  ;;  %v419_v38 = vadd.f32 %v418_v9, %v417_v49 }
  0xd1   :  { %v421_v21 = vadd.f32 %v420_v17, %v419_v38  ;;  %v353_v22 = vadd.f32 %v352_v18, %v351_v15 }
  0xd3   :  { %v355_v24 = vadd.f32 %v354_v20, %v353_v22  ;;  %v423_v25 = vadd.f32 %v422_v12, %v421_v21 }
  0xd5   :  { %v356_v26 = vrot.slane %v355_v24, 4  ;;  %v425_v27 = vadd.f32 %v424_v23, %v423_v25 }
  0xd7   :  { %v357_v50 = vadd.f32 %v356_v26, %v355_v24  ;;  %v426_v28 = vrot.slane %v425_v27, 4 }
  0xd9   :  { %v358_v29 = vrot.slane %v357_v50, 2  ;;  %v427_v30 = vadd.f32 %v426_v28, %v425_v27 }
  0xdb   :  { %v359_v31 = vadd.f32 %v358_v29, %v357_v50  ;;  %v428_v32 = vrot.slane %v427_v30, 2 }
  0xdd   :  { %v360_v55 = vrot.slane %v359_v31, 1  ;;  %v429_v1 = vadd.f32 %v428_v32, %v427_v30 }
  0xdf   :  { %v361_v59 = vadd.f32 %v360_v55, %v359_v31  ;;  %v430_v33 = vrot.slane %v429_v1, 1 }
  0xe1   :  { %363 = vst.msk [vmem:[%s844_s3] sm:$0x1] %vm362_vm2, %v361_v59  ;;  %v431_v34 = vadd.f32 %v430_v33, %v429_v1 }
  0xe3   :  { %432 = vst.msk [vmem:[%s845_s4] sm:$0x1] %vm362_vm2, %v431_v34 }

// kernel: dcmconv2_forward.31
= control target key start
LH: loop header
LB: loop body
LE: loop exit
PB: predicated region body
PF: predicated region fallthrough
CT: control target
= control target key end

     0   :  { %s65_s0 = inlined_call_operand.vmem [shape: f32[8,128], index: 0, kind: input, shape index: {}]   ;;  %s66_s1 = inlined_call_operand.vmem [shape: f32[1,128], index: 1, kind: input, shape index: {}]   ;;  %s67_s2 = inlined_call_operand.vmem [shape: f32[1,128], index: 2, kind: input, shape index: {}]   ;;  %s68_s3 = inlined_call_operand.vmem [shape: f32[8,128], index: 3, kind: output, shape index: {}]  }
   0x1   :  { %v14_v0 = vld [vmem:[%s65_s0] sm:$0xff] }
   0x2   :  { %v31_v1 = vld [vmem:[%s66_s1] ss:$0 sm:$0xff] }
   0x3   :  { %v32_v2 = vld [vmem:[%s67_s2] ss:$0 sm:$0xff]  ;;  %v19_v3 = vmul.f32 %v31_v1, %v14_v0 }
   0x5   :  { %v24_v4 = vadd.f32 %v32_v2, %v19_v3 }
   0x7   :  { %v25_v5 = vmax.f32 %v24_v4, 0.0 }
   0x9   :  { %26 = vst [vmem:[%s68_s3] sm:$0xff] %v25_v5 }

// kernel: tile.108
= control target key start
LH: loop header
LB: loop body
LE: loop exit
PB: predicated region body
PF: predicated region fallthrough
CT: control target
= control target key end

     0   :  { %s28_s0 = inlined_call_operand.vmem [shape: f32[8], index: 0, kind: input, shape index: {}]   ;;  %s29_s1 = inlined_call_operand.vmem [shape: f32[16,8], index: 1, kind: output, shape index: {}]  }
   0x1   :  { %v4_v0 = vld [vmem:[%s28_s0] ss:$0 sm:$0xff] }
   0x2   :  { %5 = vst [vmem:[%s29_s1] sm:$0xff] %v4_v0 }
   0x3   :  { %8 = vst [vmem:[%s29_s1 + $0x8] sm:$0xff] %v4_v0 }

// kernel: tile.109
= control target key start
LH: loop header
LB: loop body
LE: loop exit
PB: predicated region body
PF: predicated region fallthrough
CT: control target
= control target key end

     0   :  { %s131_s10 = smov 120   ;;  %s132_s11 = smov 104   ;;  %vm3_vm0 = vcmask 64512   ;;  %vm9_vm1 = vcmask 1048512   ;;  %vm15_vm2 = vcmask 982912   ;;  %vm21_vm3 = vcmask 917312   ;;  %s207_s0 = inlined_call_operand.vmem [shape: f32[16,8], index: 0, kind: input, shape index: {}]   ;;  %s208_s1 = inlined_call_operand.vmem [shape: f32[1,128], index: 1, kind: output, shape index: {}]  }
   0x1   :  { %v101_v0 = vld [vmem:[%s207_s0 + $0xf] sm:$0x1]   ;;  %v103_v1 = vld [vmem:[%s207_s0 + $0xd] sm:$0x1]   ;;  %v105_v2 = vld [vmem:[%s207_s0 + $0xb] sm:$0x1]  }
   0x2   :  { %7 = vrot.lane.b32.xlu0 %v101_v0, %s131_s10  ;;  %19 = vrot.lane.b32.xlu1 %v103_v1, %s132_s11  ;;  %s133_s14 = smov 88   ;;  %v102_v3 = vld [vmem:[%s207_s0 + $0xe] sm:$0x1]   ;;  %v104_v4 = vld [vmem:[%s207_s0 + $0xc] sm:$0x1]   ;;  %s134_s19 = smov 112  }
   0x3   :  { %31 = vrot.lane.b32.xlu2 %v105_v2, %s133_s14  ;;  %s135_s20 = smov 96   ;;  %v106_v5 = vld [vmem:[%s207_s0 + $0xa] sm:$0x1]   ;;  %s136_s23 = smov 80   ;;  %v107_v6 = vld [vmem:[%s207_s0 + $0x9] sm:$0x1]  }
   0x4   :  { %v108_v7 = vld [vmem:[%s207_s0 + $0x8] sm:$0x1]   ;;  %s137_s28 = smov 72   ;;  %s138_s29 = smov 64   ;;  %v109_v8 = vld [vmem:[%s207_s0 + $0x7] sm:$0x1]  }
   0x5   :  { %s139_s3 = smov 56   ;;  %v110_v9 = vld [vmem:[%s207_s0 + $0x6] sm:$0x1]   ;;  %v111_v10 = vld [vmem:[%s207_s0 + $0x5] sm:$0x1]   ;;  %s140_s8 = smov 48  }
   0x6   :  { %s141_s9 = smov 40   ;;  %v112_v11 = vld [vmem:[%s207_s0 + $0x4] sm:$0x1]   ;;  %s142_s12 = smov 32   ;;  %v113_v12 = vld [vmem:[%s207_s0 + $0x3] sm:$0x1]  }
   0x7   :  { %v114_v13 = vld [vmem:[%s207_s0 + $0x2] sm:$0x1]   ;;  %s143_s17 = smov 24   ;;  %s144_s18 = smov 16   ;;  %v115_v14 = vld [vmem:[%s207_s0 + $0x1] sm:$0x1]  }
   0x8   :  { %s145_s21 = smov 8   ;;  %v2_v15 = vld [vmem:[%s207_s0] sm:$0x1]   ;;  %vm27_vm4 = vcmask 851712   ;;  %vm33_vm5 = vcmask 786112   ;;  %vm39_vm6 = vcmask 720512  }
   0x9   :  { %4 = vst.msk [vmem:[#allocation0] sm:$0x1] %vm3_vm0, %v2_v15   ;;  %vm45_vm7 = vcmask 654912   ;;  %vm51_vm8 = vcmask 589312   ;;  %vm57_vm9 = vcmask 523712   ;;  %vm63_vm10 = vcmask 458112  }
   0xa   :  { %13 = vrot.lane.b32.xlu0 %v102_v3, %s134_s19  ;;  %25 = vrot.lane.b32.xlu1 %v104_v4, %s135_s20  ;;  %vm69_vm11 = vcmask 392512   ;;  %vm75_vm12 = vcmask 326912   ;;  %vm81_vm13 = vcmask 261312   ;;  %vm87_vm14 = vcmask 195712  }
   0xb   :  { %37 = vrot.lane.b32.xlu2 %v106_v5, %s136_s23  ;;  %vm93_vm15 = vcmask 130112  }
  0x12   :  { %43 = vrot.lane.b32.xlu0 %v107_v6, %s137_s28  ;;  %49 = vrot.lane.b32.xlu1 %v108_v7, %s138_s29 }
  0x13   :  { %55 = vrot.lane.b32.xlu2 %v109_v8, %s139_s3 }
  0x1a   :  { %61 = vrot.lane.b32.xlu0 %v110_v9, %s140_s8  ;;  %67 = vrot.lane.b32.xlu1 %v111_v10, %s141_s9 }
  0x1b   :  { %73 = vrot.lane.b32.xlu2 %v112_v11, %s142_s12 }
  0x22   :  { %79 = vrot.lane.b32.xlu0 %v113_v12, %s143_s17  ;;  %85 = vrot.lane.b32.xlu1 %v114_v13, %s144_s18 }
  0x23   :  { %91 = vrot.lane.b32.xlu2 %v115_v14, %s145_s21 }
  0x5d   :  { %v32_v16 = vpop.permute.xlu2 %31  }
  0x65   :  { %v38_v17 = vpop.permute.xlu2 %37  }
  0x6d   :  { %v56_v18 = vpop.permute.xlu2 %55  }
  0x74   :  { %v8_v19 = vpop.permute.xlu0 %7   ;;  %v20_v20 = vpop.permute.xlu1 %19  }
  0x75   :  { %10 = vst.msk [vmem:[#allocation0] sm:$0x1] %vm9_vm1, %v8_v19   ;;  %v74_v21 = vpop.permute.xlu2 %73  }
  0x7c   :  { %v14_v22 = vpop.permute.xlu0 %13   ;;  %v26_v23 = vpop.permute.xlu1 %25  }
  0x7d   :  { %16 = vst.msk [vmem:[#allocation0] sm:$0x1] %vm15_vm2, %v14_v22   ;;  %v92_v24 = vpop.permute.xlu2 %91  }
  0x7e   :  { %22 = vst.msk [vmem:[#allocation0] sm:$0x1] %vm21_vm3, %v20_v20  }
  0x7f   :  { %28 = vst.msk [vmem:[#allocation0] sm:$0x1] %vm27_vm4, %v26_v23  }
  0x80   :  { %34 = vst.msk [vmem:[#allocation0] sm:$0x1] %vm33_vm5, %v32_v16  }
  0x81   :  { %40 = vst.msk [vmem:[#allocation0] sm:$0x1] %vm39_vm6, %v38_v17  }
  0x84   :  { %v44_v25 = vpop.permute.xlu0 %43   ;;  %v50_v26 = vpop.permute.xlu1 %49  }
  0x85   :  { %46 = vst.msk [vmem:[#allocation0] sm:$0x1] %vm45_vm7, %v44_v25  }
  0x86   :  { %52 = vst.msk [vmem:[#allocation0] sm:$0x1] %vm51_vm8, %v50_v26  }
  0x87   :  { %58 = vst.msk [vmem:[#allocation0] sm:$0x1] %vm57_vm9, %v56_v18  }
  0x8c   :  { %v62_v27 = vpop.permute.xlu0 %61   ;;  %v68_v28 = vpop.permute.xlu1 %67  }
  0x8d   :  { %64 = vst.msk [vmem:[#allocation0] sm:$0x1] %vm63_vm10, %v62_v27  }
  0x8e   :  { %70 = vst.msk [vmem:[#allocation0] sm:$0x1] %vm69_vm11, %v68_v28  }
  0x8f   :  { %76 = vst.msk [vmem:[#allocation0] sm:$0x1] %vm75_vm12, %v74_v21  }
  0x94   :  { %v80_v29 = vpop.permute.xlu0 %79   ;;  %v86_v30 = vpop.permute.xlu1 %85  }
  0x95   :  { %82 = vst.msk [vmem:[#allocation0] sm:$0x1] %vm81_vm13, %v80_v29  }
  0x96   :  { %88 = vst.msk [vmem:[#allocation0] sm:$0x1] %vm87_vm14, %v86_v30  }
  0x97   :  { %94 = vst.msk [vmem:[#allocation0] sm:$0x1] %vm93_vm15, %v92_v24  }
  0x9e   :  { %v97_v31 = vld [vmem:[#allocation0] sm:$0x1] }
  0x9f   :  { %100 = vst [vmem:[%s208_s1] sm:$0x1] %v97_v31 }

// kernel: dcmconv2_forward.20
= control target key start
LH: loop header
LB: loop body
LE: loop exit
PB: predicated region body
PF: predicated region fallthrough
CT: control target
= control target key end

     0   :  { %s919_s15 = smov 0   ;;  %s921_s16 = smov 0   ;;  %s1176_s0 = inlined_call_operand.vmem [shape: f32[9,168,8], index: 0, kind: input, shape index: {}]   ;;  %s1177_s1 = inlined_call_operand.vmem [shape: f32[9,8,10], index: 1, kind: input, shape index: {}]   ;;  %s1178_s2 = inlined_call_operand.vmem [shape: f32[168,10], index: 2, kind: output, shape index: {0}]   ;;  %s1179_s3 = inlined_call_operand.vmem [shape: f32[1,1,10], index: 3, kind: output, shape index: {1}]   ;;  %s1180_s4 = inlined_call_operand.vmem [shape: f32[1,1,10], index: 4, kind: output, shape index: {2}]  }
   0x1   :  { %s923_s17 = smov 0  }
   0x2 LB: > { %s24_s18 = sadd.s32 1, %s887_s16  ;;  %p808_p0 = scmp.ge.s32.totalorder %s891_s17, 1  ;;  %s891_s17 = sphi %s923_s17, %s15_s17   ;;  %s887_s16 = sphi %s921_s16, %s1182_s16   ;;  %s883_s15 = sphi %s919_s15, %s1181_s15  }
   0x3   : > { %p25_p1 = scmp.ge.s32.totalorder %s24_s18, 9  ;;  %p195_p2 = scmp.lt.s32.totalorder %s891_s17, 10 }
   0x5   : > { %s1184_s18 = smov (%p25_p1, %s24_s18), 0  ;;  %p196_p3 = pnand %p808_p0, %p195_p2 }
   0x6   : > { %p236_p4 = scmp.lt.s32.totalorder (!%p196_p3), %s883_s15, 8  ;;  %p811_p5 = scmp.ne.s32.totalorder (!%p196_p3), %s883_s15, 0 }
   0x7   : > { %199 = sbr.rel (%p196_p3) target bundleno = 274 (0x112), region = 28 }
   0xc   : > { %s237_s19 = scalar_select %p236_p4, %s883_s15, 8 }
   0xd   : > { %264 = sbr.rel (%p811_p5) target bundleno = 40 (0x28), region = 32 }
   0xe   : > { %s843_s20 = smul.u32 168, %s237_s19  ;;  %s810_s21 = sshll.u32 %s237_s19, 3 }
   0xf   : > { %s248_s24 = scalar_lea.vmem %s1177_s1, %s810_s21 }
  0x10   : > { %s947_s27 = scalar_lea.vmem %s1176_s0, %s843_s20 }
  0x12   : > { %vm265_vm0 = vcmask 80896   ;;  %v893_v0 = vmov 0.0  }
  0x13   : > { %266 = vst.msk [vmem:[#allocation2] sm:$0xff] %vm265_vm0, %v893_v0 }
  0x14   : > { %267 = vst.msk [vmem:[#allocation2 + $0x8] sm:$0xff] %vm265_vm0, %v893_v0 }
  0x15   : > { %268 = vst.msk [vmem:[#allocation2 + $0x10] sm:$0xff] %vm265_vm0, %v893_v0 }
  0x16   : > { %269 = vst.msk [vmem:[#allocation2 + $0x18] sm:$0xff] %vm265_vm0, %v893_v0 }
  0x17   : > { %270 = vst.msk [vmem:[#allocation2 + $0x20] sm:$0xff] %vm265_vm0, %v893_v0 }
  0x18   : > { %271 = vst.msk [vmem:[#allocation2 + $0x28] sm:$0xff] %vm265_vm0, %v893_v0 }
  0x19   : > { %272 = vst.msk [vmem:[#allocation2 + $0x30] sm:$0xff] %vm265_vm0, %v893_v0 }
  0x1a   : > { %273 = vst.msk [vmem:[#allocation2 + $0x38] sm:$0xff] %vm265_vm0, %v893_v0 }
  0x1b   : > { %274 = vst.msk [vmem:[#allocation2 + $0x40] sm:$0xff] %vm265_vm0, %v893_v0 }
  0x1c   : > { %275 = vst.msk [vmem:[#allocation2 + $0x48] sm:$0xff] %vm265_vm0, %v893_v0 }
  0x1d   : > { %276 = vst.msk [vmem:[#allocation2 + $0x50] sm:$0xff] %vm265_vm0, %v893_v0 }
  0x1e   : > { %277 = vst.msk [vmem:[#allocation2 + $0x58] sm:$0xff] %vm265_vm0, %v893_v0 }
  0x1f   : > { %278 = vst.msk [vmem:[#allocation2 + $0x60] sm:$0xff] %vm265_vm0, %v893_v0 }
  0x20   : > { %279 = vst.msk [vmem:[#allocation2 + $0x68] sm:$0xff] %vm265_vm0, %v893_v0 }
  0x21   : > { %280 = vst.msk [vmem:[#allocation2 + $0x70] sm:$0xff] %vm265_vm0, %v893_v0 }
  0x22   : > { %281 = vst.msk [vmem:[#allocation2 + $0x78] sm:$0xff] %vm265_vm0, %v893_v0 }
  0x23   : > { %282 = vst.msk [vmem:[#allocation2 + $0x80] sm:$0xff] %vm265_vm0, %v893_v0 }
  0x24   : > { %283 = vst.msk [vmem:[#allocation2 + $0x88] sm:$0xff] %vm265_vm0, %v893_v0 }
  0x25   : > { %284 = vst.msk [vmem:[#allocation2 + $0x90] sm:$0xff] %vm265_vm0, %v893_v0 }
  0x26   : > { %285 = vst.msk [vmem:[#allocation2 + $0x98] sm:$0xff] %vm265_vm0, %v893_v0 }
  0x27   : > { %286 = vst.msk [vmem:[#allocation2 + $0xa0] sm:$0xff] %vm265_vm0, %v893_v0 }
  0x28 PF: > { %v329_v1 = vld [vmem:[%s248_s24] sm:$0xff]  ;;  %vm330_vm1 = vcmask 64512   ;;  %v314_v4 = vld [vmem:[%s947_s27 + $0x30] sm:$0xff]  ;;  %v321_v6 = vld [vmem:[%s947_s27 + $0x68] sm:$0xff]  ;;  %vm495_vm2 = vcmask 80896   ;;  %p833_p6 = scmp.ne.s32.totalorder %s883_s15, 8 }
  0x29   : > { %v320_v2 = vld [vmem:[%s947_s27 + $0x60] sm:$0xff]  ;;  %841 = vmatpush.msra.mxu2 %v329_v1  ;;  %409 = vmatpush.msra.mxu0 %v329_v1  ;;  %v326_v5 = vld [vmem:[%s947_s27 + $0x90] sm:$0xff]  ;;  %v309_v7 = vld [vmem:[%s947_s27 + $0x8] sm:$0xff] }
  0x2a   : > { %v308_v3 = vld [vmem:[%s947_s27] sm:$0xff]  ;;  %824 = vmatmul.msk.f32.vlgmr.msra.gmra.mxu2 %vm330_vm1, %v320_v2  ;;  %840 = vmatpush.msra.mxu1 %v329_v1  ;;  %v315_v8 = vld [vmem:[%s947_s27 + $0x38] sm:$0xff]  ;;  %v322_v10 = vld [vmem:[%s947_s27 + $0x70] sm:$0xff] }
  0x2b   : > { %812 = vmatmul.msk.f32.vlgmr.msra.gmra.mxu0 %vm330_vm1, %v308_v3  ;;  %818 = vmatmul.msk.f32.vlgmr.msra.gmra.mxu1 %vm330_vm1, %v314_v4  ;;  %v327_v9 = vld [vmem:[%s947_s27 + $0x98] sm:$0xff]  ;;  %v310_v11 = vld [vmem:[%s947_s27 + $0x10] sm:$0xff]  ;;  %v316_v12 = vld [vmem:[%s947_s27 + $0x40] sm:$0xff] }
  0x2c   : > { %842 = vmatpush.msra.mxu3 %v329_v1  ;;  %v328_v13 = vld [vmem:[%s947_s27 + $0xa0] sm:$0xff]  ;;  %v323_v14 = vld [vmem:[%s947_s27 + $0x78] sm:$0xff]  ;;  %v317_v16 = vld [vmem:[%s947_s27 + $0x48] sm:$0xff] }
  0x2d   : > { %830 = vmatmul.msk.f32.vlgmr.msra.gmra.mxu3 %vm330_vm1, %v326_v5  ;;  %v311_v15 = vld [vmem:[%s947_s27 + $0x18] sm:$0xff]  ;;  %v324_v17 = vld [vmem:[%s947_s27 + $0x80] sm:$0xff]  ;;  %v318_v19 = vld [vmem:[%s947_s27 + $0x50] sm:$0xff] }
  0x2e   : > { %v312_v18 = vld [vmem:[%s947_s27 + $0x20] sm:$0xff]  ;;  %v325_v20 = vld [vmem:[%s947_s27 + $0x88] sm:$0xff]  ;;  %v319_v22 = vld [vmem:[%s947_s27 + $0x58] sm:$0xff] }
  0x2f   : > { %v313_v21 = vld [vmem:[%s947_s27 + $0x28] sm:$0xff]  ;;  %v287_v23 = vld [vmem:[#allocation2] sm:$0xff]  ;;  %v293_v24 = vld [vmem:[#allocation2 + $0x30] sm:$0xff] }
  0x30   : > { %v299_v29 = vld [vmem:[#allocation2 + $0x60] sm:$0xff]  ;;  %v288_v32 = vld [vmem:[#allocation2 + $0x8] sm:$0xff]  ;;  %v294_v33 = vld [vmem:[#allocation2 + $0x38] sm:$0xff] }
  0x31   : > { %v305_v34 = vld [vmem:[#allocation2 + $0x90] sm:$0xff]  ;;  %v300_v41 = vld [vmem:[#allocation2 + $0x68] sm:$0xff]  ;;  %v295_v45 = vld [vmem:[#allocation2 + $0x40] sm:$0xff] }
  0x32   : > { %825 = vmatmul.msk.f32.gmra.mxu2 %vm330_vm1, %v321_v6  ;;  %v289_v44 = vld [vmem:[#allocation2 + $0x10] sm:$0xff]  ;;  %v306_v46 = vld [vmem:[#allocation2 + $0x98] sm:$0xff]  ;;  %v296_v57 = vld [vmem:[#allocation2 + $0x48] sm:$0xff] }
  0x33   : > { %813 = vmatmul.msk.f32.gmra.mxu0 %vm330_vm1, %v309_v7  ;;  %819 = vmatmul.msk.f32.gmra.mxu1 %vm330_vm1, %v315_v8  ;;  %v301_v53 = vld [vmem:[#allocation2 + $0x70] sm:$0xff]  ;;  %v290_v56 = vld [vmem:[#allocation2 + $0x18] sm:$0xff]  ;;  %v307_v58 = vld [vmem:[#allocation2 + $0xa0] sm:$0xff] }
  0x34   : > { %v302_v1 = vld [vmem:[#allocation2 + $0x78] sm:$0xff]  ;;  %v291_v4 = vld [vmem:[#allocation2 + $0x20] sm:$0xff]  ;;  %v297_v5 = vld [vmem:[#allocation2 + $0x50] sm:$0xff] }
  0x35   : > { %831 = vmatmul.msk.f32.gmra.mxu3 %vm330_vm1, %v327_v9 }
  0x3a   : > { %826 = vmatmul.msk.f32.gmra.mxu2 %vm330_vm1, %v322_v10  ;;  %v303_v10 = vld [vmem:[#allocation2 + $0x80] sm:$0xff] }
  0x3b   : > { %814 = vmatmul.msk.f32.gmra.mxu0 %vm330_vm1, %v310_v11  ;;  %820 = vmatmul.msk.f32.gmra.mxu1 %vm330_vm1, %v316_v12 }
  0x3d   : > { %832 = vmatmul.msk.f32.gmra.mxu3 %vm330_vm1, %v328_v13  ;;  %v292_v13 = vld [vmem:[#allocation2 + $0x28] sm:$0xff] }
  0x42   : > { %827 = vmatmul.msk.f32.gmra.mxu2 %vm330_vm1, %v323_v14  ;;  %v298_v14 = vld [vmem:[#allocation2 + $0x58] sm:$0xff] }
  0x43   : > { %815 = vmatmul.msk.f32.gmra.mxu0 %vm330_vm1, %v311_v15  ;;  %821 = vmatmul.msk.f32.gmra.mxu1 %vm330_vm1, %v317_v16 }
  0x4a   : > { %828 = vmatmul.msk.f32.gmra.mxu2 %vm330_vm1, %v324_v17 }
  0x4b   : > { %816 = vmatmul.msk.f32.gmra.mxu0 %vm330_vm1, %v312_v18  ;;  %822 = vmatmul.msk.f32.gmra.mxu1 %vm330_vm1, %v318_v19  ;;  %v304_v19 = vld [vmem:[#allocation2 + $0x88] sm:$0xff] }
  0x52   : > { %829 = vmatmul.msk.f32.gmra.mxu2 %vm330_vm1, %v325_v20 }
  0x53   : > { %817 = vmatmul.msk.f32.gmra.mxu0 %vm330_vm1, %v313_v21  ;;  %823 = vmatmul.msk.f32.gmra.mxu1 %vm330_vm1, %v319_v22 }
  0xa8   : > { %v411_v25 = vpop.f32.mrf.mxu0  ;;  %v429_v26 = vpop.f32.mrf.mxu1 }
  0xa9   : > { %v474_v27 = vadd.f32 %v411_v25, %v287_v23  ;;  %v480_v28 = vadd.f32 %v429_v26, %v293_v24 }
  0xab   : > { %496 = vst.msk [vmem:[#allocation2] sm:$0xff] %vm495_vm2, %v474_v27 }
  0xac   : > { %502 = vst.msk [vmem:[#allocation2 + $0x30] sm:$0xff] %vm495_vm2, %v480_v28 }
  0xad   : > { %v447_v30 = vpop.f32.mrf.mxu2 }
  0xae   : > { %v486_v31 = vadd.f32 %v447_v30, %v299_v29 }
  0xb0   : > { %508 = vst.msk [vmem:[#allocation2 + $0x60] sm:$0xff] %vm495_vm2, %v486_v31  ;;  %v414_v35 = vpop.f32.mrf.mxu0  ;;  %v432_v36 = vpop.f32.mrf.mxu1 }
  0xb1   : > { %v475_v37 = vadd.f32 %v414_v35, %v288_v32  ;;  %v481_v38 = vadd.f32 %v432_v36, %v294_v33  ;;  %v465_v39 = vpop.f32.mrf.mxu3 }
  0xb2   : > { %v492_v40 = vadd.f32 %v465_v39, %v305_v34 }
  0xb3   : > { %497 = vst.msk [vmem:[#allocation2 + $0x8] sm:$0xff] %vm495_vm2, %v475_v37 }
  0xb4   : > { %503 = vst.msk [vmem:[#allocation2 + $0x38] sm:$0xff] %vm495_vm2, %v481_v38 }
  0xb5   : > { %v450_v42 = vpop.f32.mrf.mxu2  ;;  %514 = vst.msk [vmem:[#allocation2 + $0x90] sm:$0xff] %vm495_vm2, %v492_v40 }
  0xb6   : > { %v487_v43 = vadd.f32 %v450_v42, %v300_v41 }
  0xb8   : > { %509 = vst.msk [vmem:[#allocation2 + $0x68] sm:$0xff] %vm495_vm2, %v487_v43  ;;  %v417_v47 = vpop.f32.mrf.mxu0  ;;  %v435_v48 = vpop.f32.mrf.mxu1 }
  0xb9   : > { %v476_v49 = vadd.f32 %v417_v47, %v289_v44  ;;  %v482_v50 = vadd.f32 %v435_v48, %v295_v45  ;;  %v468_v51 = vpop.f32.mrf.mxu3 }
  0xba   : > { %v493_v52 = vadd.f32 %v468_v51, %v306_v46 }
  0xbb   : > { %498 = vst.msk [vmem:[#allocation2 + $0x10] sm:$0xff] %vm495_vm2, %v476_v49 }
  0xbc   : > { %504 = vst.msk [vmem:[#allocation2 + $0x40] sm:$0xff] %vm495_vm2, %v482_v50 }
  0xbd   : > { %v453_v54 = vpop.f32.mrf.mxu2  ;;  %515 = vst.msk [vmem:[#allocation2 + $0x98] sm:$0xff] %vm495_vm2, %v493_v52 }
  0xbe   : > { %v488_v55 = vadd.f32 %v453_v54, %v301_v53 }
  0xc0   : > { %510 = vst.msk [vmem:[#allocation2 + $0x70] sm:$0xff] %vm495_vm2, %v488_v55  ;;  %v420_v59 = vpop.f32.mrf.mxu0  ;;  %v438_v60 = vpop.f32.mrf.mxu1 }
  0xc1   : > { %v477_v61 = vadd.f32 %v420_v59, %v290_v56  ;;  %v483_v62 = vadd.f32 %v438_v60, %v296_v57  ;;  %v471_v63 = vpop.f32.mrf.mxu3 }
  0xc2   : > { %v494_v0 = vadd.f32 %v471_v63, %v307_v58 }
  0xc3   : > { %499 = vst.msk [vmem:[#allocation2 + $0x18] sm:$0xff] %vm495_vm2, %v477_v61 }
  0xc4   : > { %505 = vst.msk [vmem:[#allocation2 + $0x48] sm:$0xff] %vm495_vm2, %v483_v62 }
  0xc5   : > { %v456_v2 = vpop.f32.mrf.mxu2  ;;  %516 = vst.msk [vmem:[#allocation2 + $0xa0] sm:$0xff] %vm495_vm2, %v494_v0 }
  0xc6   : > { %v489_v3 = vadd.f32 %v456_v2, %v302_v1 }
  0xc8   : > { %511 = vst.msk [vmem:[#allocation2 + $0x78] sm:$0xff] %vm495_vm2, %v489_v3  ;;  %v423_v6 = vpop.f32.mrf.mxu0  ;;  %v441_v7 = vpop.f32.mrf.mxu1 }
  0xc9   : > { %v478_v8 = vadd.f32 %v423_v6, %v291_v4  ;;  %v484_v9 = vadd.f32 %v441_v7, %v297_v5 }
  0xcb   : > { %500 = vst.msk [vmem:[#allocation2 + $0x20] sm:$0xff] %vm495_vm2, %v478_v8 }
  0xcc   : > { %506 = vst.msk [vmem:[#allocation2 + $0x50] sm:$0xff] %vm495_vm2, %v484_v9 }
  0xcd   : > { %v459_v11 = vpop.f32.mrf.mxu2 }
  0xce   : > { %v490_v12 = vadd.f32 %v459_v11, %v303_v10 }
  0xd0   : > { %512 = vst.msk [vmem:[#allocation2 + $0x80] sm:$0xff] %vm495_vm2, %v490_v12  ;;  %v426_v15 = vpop.f32.mrf.mxu0  ;;  %v444_v16 = vpop.f32.mrf.mxu1 }
  0xd1   : > { %v479_v17 = vadd.f32 %v426_v15, %v292_v13  ;;  %v485_v18 = vadd.f32 %v444_v16, %v298_v14 }
  0xd3   : > { %501 = vst.msk [vmem:[#allocation2 + $0x28] sm:$0xff] %vm495_vm2, %v479_v17 }
  0xd4   : > { %507 = vst.msk [vmem:[#allocation2 + $0x58] sm:$0xff] %vm495_vm2, %v485_v18  ;;  %520 = sbr.rel (%p833_p6) target bundleno = 274 (0x112), region = 36 }
  0xd5   : > { %v462_v20 = vpop.f32.mrf.mxu2 }
  0xd6   : > { %v491_v21 = vadd.f32 %v462_v20, %v304_v19 }
  0xd8   : > { %513 = vst.msk [vmem:[#allocation2 + $0x88] sm:$0xff] %vm495_vm2, %v491_v21 }
  0xd9   : > { %v521_v22 = vld [vmem:[#allocation2] sm:$0xff]  ;;  %v522_v23 = vld [vmem:[#allocation2 + $0x8] sm:$0xff]  ;;  %v523_v24 = vld [vmem:[#allocation2 + $0x10] sm:$0xff]  ;;  %vm610_vm3 = vcmask 73728  }
  0xda   : > { %542 = vst.msk [vmem:[%s1178_s2] sm:$0xff] %vm495_vm2, %v521_v22  ;;  %v563_v25 = vsel %vm495_vm2, %v521_v22, 0.0  ;;  %v612_v26 = vmul.f32 %v521_v22, %v521_v22  ;;  %v564_v27 = vsel %vm495_vm2, %v522_v23, 0.0  ;;  %v613_v28 = vmul.f32 %v522_v23, %v522_v23  ;;  %v524_v29 = vld [vmem:[#allocation2 + $0x18] sm:$0xff]  ;;  %v525_v30 = vld [vmem:[#allocation2 + $0x20] sm:$0xff]  ;;  %v526_v34 = vld [vmem:[#allocation2 + $0x28] sm:$0xff] }
  0xdb   : > { %543 = vst.msk [vmem:[%s1178_s2 + $0x8] sm:$0xff] %vm495_vm2, %v522_v23  ;;  %v565_v31 = vadd.f32 %v564_v27, %v563_v25  ;;  %v566_v32 = vsel %vm495_vm2, %v523_v24, 0.0  ;;  %v614_v33 = vmul.f32 %v523_v24, %v523_v24  ;;  %v568_v37 = vsel %vm495_vm2, %v524_v29, 0.0  ;;  %v527_v43 = vld [vmem:[#allocation2 + $0x30] sm:$0xff]  ;;  %v528_v49 = vld [vmem:[#allocation2 + $0x38] sm:$0xff]  ;;  %v529_v55 = vld [vmem:[#allocation2 + $0x40] sm:$0xff] }
  0xdc   : > { %v633_v35 = vsel %vm495_vm2, %v612_v26, 0.0  ;;  %v634_v36 = vsel %vm495_vm2, %v613_v28, 0.0  ;;  %544 = vst.msk [vmem:[%s1178_s2 + $0x10] sm:$0xff] %vm495_vm2, %v523_v24  ;;  %v615_v38 = vmul.f32 %v524_v29, %v524_v29  ;;  %v616_v42 = vmul.f32 %v525_v30, %v525_v30  ;;  %v530_v59 = vld [vmem:[#allocation2 + $0x48] sm:$0xff]  ;;  %v531_v62 = vld [vmem:[#allocation2 + $0x50] sm:$0xff]  ;;  %v532_v2 = vld [vmem:[#allocation2 + $0x58] sm:$0xff] }
  0xdd   : > { %v635_v39 = vadd.f32 %v634_v36, %v633_v35  ;;  %v567_v40 = vadd.f32 %v566_v32, %v565_v31  ;;  %v636_v41 = vsel %vm495_vm2, %v614_v33, 0.0  ;;  %545 = vst.msk [vmem:[%s1178_s2 + $0x18] sm:$0xff] %vm495_vm2, %v524_v29  ;;  %v570_v45 = vsel %vm495_vm2, %v525_v30, 0.0  ;;  %v533_v5 = vld [vmem:[#allocation2 + $0x60] sm:$0xff]  ;;  %v534_v9 = vld [vmem:[#allocation2 + $0x68] sm:$0xff]  ;;  %v535_v12 = vld [vmem:[#allocation2 + $0x70] sm:$0xff] }
  0xde   : > { %v638_v44 = vsel %vm495_vm2, %v615_v38, 0.0  ;;  %546 = vst.msk [vmem:[%s1178_s2 + $0x20] sm:$0xff] %vm495_vm2, %v525_v30  ;;  %v617_v46 = vmul.f32 %v526_v34, %v526_v34  ;;  %v640_v50 = vsel %vm495_vm2, %v616_v42, 0.0  ;;  %v572_v51 = vsel %vm495_vm2, %v526_v34, 0.0  ;;  %v536_v16 = vld [vmem:[#allocation2 + $0x78] sm:$0xff]  ;;  %v537_v19 = vld [vmem:[#allocation2 + $0x80] sm:$0xff] }
  0xdf   : > { %v637_v47 = vadd.f32 %v636_v41, %v635_v39  ;;  %v569_v48 = vadd.f32 %v568_v37, %v567_v40  ;;  %547 = vst.msk [vmem:[%s1178_s2 + $0x28] sm:$0xff] %vm495_vm2, %v526_v34  ;;  %v618_v52 = vmul.f32 %v527_v43, %v527_v43  ;;  %v574_v57 = vsel %vm495_vm2, %v527_v43, 0.0  ;;  %v538_v23 = vld [vmem:[#allocation2 + $0x88] sm:$0xff]  ;;  %v539_v26 = vld [vmem:[#allocation2 + $0x90] sm:$0xff]  ;;  %v540_v30 = vld [vmem:[#allocation2 + $0x98] sm:$0xff] }
  0xe0   : > { %548 = vst.msk [vmem:[%s1178_s2 + $0x30] sm:$0xff] %vm495_vm2, %v527_v43  ;;  %v642_v56 = vsel %vm495_vm2, %v617_v46, 0.0  ;;  %v619_v58 = vmul.f32 %v528_v49, %v528_v49  ;;  %v576_v0 = vsel %vm495_vm2, %v528_v49, 0.0  ;;  %v620_v1 = vmul.f32 %v529_v55, %v529_v55  ;;  %v541_v33 = vld [vmem:[#allocation2 + $0xa0] sm:$0xff] }
  0xe1   : > { %v639_v53 = vadd.f32 %v638_v44, %v637_v47  ;;  %v571_v54 = vadd.f32 %v570_v45, %v569_v48  ;;  %549 = vst.msk [vmem:[%s1178_s2 + $0x38] sm:$0xff] %vm495_vm2, %v528_v49  ;;  %v644_v63 = vsel %vm495_vm2, %v618_v52, 0.0  ;;  %v578_v7 = vsel %vm495_vm2, %v529_v55, 0.0 }
  0xe2   : > { %550 = vst.msk [vmem:[%s1178_s2 + $0x40] sm:$0xff] %vm495_vm2, %v529_v55  ;;  %v646_v6 = vsel %vm495_vm2, %v619_v58, 0.0  ;;  %v621_v8 = vmul.f32 %v530_v59, %v530_v59  ;;  %v648_v13 = vsel %vm495_vm2, %v620_v1, 0.0  ;;  %v580_v14 = vsel %vm495_vm2, %v530_v59, 0.0 }
  0xe3   : > { %v641_v60 = vadd.f32 %v640_v50, %v639_v53  ;;  %v573_v61 = vadd.f32 %v572_v51, %v571_v54  ;;  %551 = vst.msk [vmem:[%s1178_s2 + $0x48] sm:$0xff] %vm495_vm2, %v530_v59  ;;  %v622_v15 = vmul.f32 %v531_v62, %v531_v62  ;;  %v582_v21 = vsel %vm495_vm2, %v531_v62, 0.0 }
  0xe4   : > { %552 = vst.msk [vmem:[%s1178_s2 + $0x50] sm:$0xff] %vm495_vm2, %v531_v62  ;;  %v650_v20 = vsel %vm495_vm2, %v621_v8, 0.0  ;;  %v623_v22 = vmul.f32 %v532_v2, %v532_v2  ;;  %v584_v28 = vsel %vm495_vm2, %v532_v2, 0.0  ;;  %v624_v29 = vmul.f32 %v533_v5, %v533_v5 }
  0xe5   : > { %v643_v3 = vadd.f32 %v642_v56, %v641_v60  ;;  %v575_v4 = vadd.f32 %v574_v57, %v573_v61  ;;  %553 = vst.msk [vmem:[%s1178_s2 + $0x58] sm:$0xff] %vm495_vm2, %v532_v2  ;;  %v652_v27 = vsel %vm495_vm2, %v622_v15, 0.0  ;;  %v586_v35 = vsel %vm495_vm2, %v533_v5, 0.0 }
  0xe6   : > { %554 = vst.msk [vmem:[%s1178_s2 + $0x60] sm:$0xff] %vm495_vm2, %v533_v5  ;;  %v654_v34 = vsel %vm495_vm2, %v623_v22, 0.0  ;;  %v625_v36 = vmul.f32 %v534_v9, %v534_v9  ;;  %v656_v39 = vsel %vm495_vm2, %v624_v29, 0.0  ;;  %v588_v40 = vsel %vm495_vm2, %v534_v9, 0.0 }
  0xe7   : > { %v645_v10 = vadd.f32 %v644_v63, %v643_v3  ;;  %v577_v11 = vadd.f32 %v576_v0, %v575_v4  ;;  %555 = vst.msk [vmem:[%s1178_s2 + $0x68] sm:$0xff] %vm495_vm2, %v534_v9  ;;  %v626_v41 = vmul.f32 %v535_v12, %v535_v12  ;;  %v590_v45 = vsel %vm495_vm2, %v535_v12, 0.0 }
  0xe8   : > { %556 = vst.msk [vmem:[%s1178_s2 + $0x70] sm:$0xff] %vm495_vm2, %v535_v12  ;;  %v658_v44 = vsel %vm495_vm2, %v625_v36, 0.0  ;;  %v627_v46 = vmul.f32 %v536_v16, %v536_v16  ;;  %v592_v50 = vsel %vm495_vm2, %v536_v16, 0.0  ;;  %v628_v51 = vmul.f32 %v537_v19, %v537_v19 }
  0xe9   : > { %v647_v17 = vadd.f32 %v646_v6, %v645_v10  ;;  %v579_v18 = vadd.f32 %v578_v7, %v577_v11  ;;  %557 = vst.msk [vmem:[%s1178_s2 + $0x78] sm:$0xff] %vm495_vm2, %v536_v16  ;;  %v660_v49 = vsel %vm495_vm2, %v626_v41, 0.0  ;;  %v594_v55 = vsel %vm495_vm2, %v537_v19, 0.0 }
  0xea   : > { %558 = vst.msk [vmem:[%s1178_s2 + $0x80] sm:$0xff] %vm495_vm2, %v537_v19  ;;  %v662_v54 = vsel %vm495_vm2, %v627_v46, 0.0  ;;  %v629_v56 = vmul.f32 %v538_v23, %v538_v23  ;;  %v664_v59 = vsel %vm495_vm2, %v628_v51, 0.0  ;;  %v596_v60 = vsel %vm495_vm2, %v538_v23, 0.0 }
  0xeb   : > { %v649_v24 = vadd.f32 %v648_v13, %v647_v17  ;;  %v581_v25 = vadd.f32 %v580_v14, %v579_v18  ;;  %559 = vst.msk [vmem:[%s1178_s2 + $0x88] sm:$0xff] %vm495_vm2, %v538_v23  ;;  %v630_v61 = vmul.f32 %v539_v26, %v539_v26  ;;  %v598_v1 = vsel %vm495_vm2, %v539_v26, 0.0 }
  0xec   : > { %560 = vst.msk [vmem:[%s1178_s2 + $0x90] sm:$0xff] %vm495_vm2, %v539_v26  ;;  %v666_v0 = vsel %vm495_vm2, %v629_v56, 0.0  ;;  %v631_v2 = vmul.f32 %v540_v30, %v540_v30  ;;  %v600_v6 = vsel %vm495_vm2, %v540_v30, 0.0  ;;  %v632_v7 = vmul.f32 %v541_v33, %v541_v33 }
  0xed   : > { %v651_v31 = vadd.f32 %v650_v20, %v649_v24  ;;  %v583_v32 = vadd.f32 %v582_v21, %v581_v25  ;;  %561 = vst.msk [vmem:[%s1178_s2 + $0x98] sm:$0xff] %vm495_vm2, %v540_v30  ;;  %v668_v5 = vsel %vm495_vm2, %v630_v61, 0.0  ;;  %v602_v11 = vsel %vm495_vm2, %v541_v33, 0.0 }
  0xee   : > { %562 = vst.msk [vmem:[%s1178_s2 + $0xa0] sm:$0xff] %vm495_vm2, %v541_v33  ;;  %v670_v10 = vsel %vm495_vm2, %v631_v2, 0.0  ;;  %v672_v14 = vsel %vm495_vm2, %v632_v7, 0.0 }
  0xef   : > { %v653_v37 = vadd.f32 %v652_v27, %v651_v31  ;;  %v585_v38 = vadd.f32 %v584_v28, %v583_v32 }
  0xf1   : > { %v655_v42 = vadd.f32 %v654_v34, %v653_v37  ;;  %v587_v43 = vadd.f32 %v586_v35, %v585_v38 }
  0xf3   : > { %v657_v47 = vadd.f32 %v656_v39, %v655_v42  ;;  %v589_v48 = vadd.f32 %v588_v40, %v587_v43 }
  0xf5   : > { %v659_v52 = vadd.f32 %v658_v44, %v657_v47  ;;  %v591_v53 = vadd.f32 %v590_v45, %v589_v48 }
  0xf7   : > { %v661_v57 = vadd.f32 %v660_v49, %v659_v52  ;;  %v593_v58 = vadd.f32 %v592_v50, %v591_v53 }
  0xf9   : > { %v663_v62 = vadd.f32 %v662_v54, %v661_v57  ;;  %v595_v63 = vadd.f32 %v594_v55, %v593_v58 }
  0xfb   : > { %v665_v3 = vadd.f32 %v664_v59, %v663_v62  ;;  %v597_v4 = vadd.f32 %v596_v60, %v595_v63 }
  0xfd   : > { %v667_v8 = vadd.f32 %v666_v0, %v665_v3  ;;  %v599_v9 = vadd.f32 %v598_v1, %v597_v4 }
  0xff   : > { %v669_v12 = vadd.f32 %v668_v5, %v667_v8  ;;  %v601_v13 = vadd.f32 %v600_v6, %v599_v9 }
 0x101   : > { %v671_v15 = vadd.f32 %v670_v10, %v669_v12  ;;  %v603_v16 = vadd.f32 %v602_v11, %v601_v13 }
 0x103   : > { %v604_v17 = vrot.slane %v603_v16, 4  ;;  %v673_v18 = vadd.f32 %v672_v14, %v671_v15 }
 0x105   : > { %v605_v19 = vadd.f32 %v604_v17, %v603_v16  ;;  %v674_v20 = vrot.slane %v673_v18, 4 }
 0x107   : > { %v606_v21 = vrot.slane %v605_v19, 2  ;;  %v675_v22 = vadd.f32 %v674_v20, %v673_v18 }
 0x109   : > { %v607_v23 = vadd.f32 %v606_v21, %v605_v19  ;;  %v676_v24 = vrot.slane %v675_v22, 2 }
 0x10b   : > { %v608_v25 = vrot.slane %v607_v23, 1  ;;  %v677_v26 = vadd.f32 %v676_v24, %v675_v22 }
 0x10d   : > { %v609_v27 = vadd.f32 %v608_v25, %v607_v23  ;;  %v678_v28 = vrot.slane %v677_v26, 1 }
 0x10f   : > { %611 = vst.msk [vmem:[%s1179_s3] sm:$0x1] %vm610_vm3, %v609_v27  ;;  %v679_v29 = vadd.f32 %v678_v28, %v677_v26 }
 0x111   : > { %680 = vst.msk [vmem:[%s1180_s4] sm:$0x1] %vm610_vm3, %v679_v29 }
 0x112 PF: > { %s15_s17 = sadd.s32 1, %s891_s17   ;;  %s1181_s15 = smov %s887_s16 }
 0x113   : > { %p12_p7 = scmp.ge.s32.totalorder %s15_s17, 11   ;;  %s1182_s16 = smov %s1184_s18 }
 0x115   :  { %14 = sbr.rel (!%p12_p7) target bundleno = 2 (0x2), region = 93 }

// kernel: dcmconv2_forward.22
= control target key start
LH: loop header
LB: loop body
LE: loop exit
PB: predicated region body
PF: predicated region fallthrough
CT: control target
= control target key end

     0   :  { %s124_s0 = inlined_call_operand.vmem [shape: f32[16,128], index: 0, kind: input, shape index: {}]   ;;  %s125_s1 = inlined_call_operand.vmem [shape: f32[1,128], index: 1, kind: input, shape index: {}]   ;;  %s126_s2 = inlined_call_operand.vmem [shape: f32[1,128], index: 2, kind: input, shape index: {}]   ;;  %s127_s3 = inlined_call_operand.vmem [shape: f32[16,128], index: 3, kind: output, shape index: {}]  }
   0x1   :  { %v14_v0 = vld [vmem:[%s124_s0] sm:$0xff]  ;;  %v15_v3 = vld [vmem:[%s124_s0 + $0x8] sm:$0xff] }
   0x2   :  { %v76_v1 = vld [vmem:[%s125_s1] ss:$0 sm:$0xff] }
   0x3   :  { %v77_v2 = vld [vmem:[%s126_s2] ss:$0 sm:$0xff]  ;;  %v20_v4 = vmul.f32 %v76_v1, %v14_v0  ;;  %v21_v5 = vmul.f32 %v76_v1, %v15_v3 }
   0x5   :  { %v26_v6 = vadd.f32 %v77_v2, %v20_v4  ;;  %v27_v7 = vadd.f32 %v77_v2, %v21_v5 }
   0x7   :  { %v74_v8 = vmul.f32 -1.442695, %v26_v6  ;;  %v75_v9 = vmul.f32 -1.442695, %v27_v7 }
   0x9   :  { %78 = vpow2.f32 %v74_v8 }
   0xa   :  { %80 = vpow2.f32 %v75_v9 }
   0xf   :  { %v79_v10 = vpop.eup %78 }
  0x10   :  { %v81_v11 = vpop.eup %80  ;;  %v34_v12 = vadd.f32 1.0, %v79_v10 }
  0x11   :  { %v35_v13 = vadd.f32 1.0, %v81_v11 }
  0x12   :  { %82 = vrcp.f32 %v34_v12  ;;  %vm41_vm0 = vweird.f32 %v34_v12  ;;  %v47_v17 = vand.u32 2147483648, %v34_v12  ;;  %v45_v20 = vand.u32 2147483647, %v34_v12 }
  0x13   :  { %84 = vrcp.f32 %v35_v13  ;;  %v62_v21 = vand.u32 2147483648, %v35_v13  ;;  %vm56_vm2 = vweird.f32 %v35_v13  ;;  %v60_v23 = vand.u32 2147483647, %v35_v13 }
  0x14   :  { %v48_v25 = vor.u32 1.1754944e-38, %v47_v17  ;;  %vm46_vm5 = vcmp.eq.f32.partialorder %v45_v20, 8.507059e+37 }
  0x15   :  { %v63_v28 = vor.u32 1.1754944e-38, %v62_v21  ;;  %vm61_vm7 = vcmp.eq.f32.partialorder %v60_v23, 8.507059e+37 }
  0x18   :  { %v83_v14 = vpop.eup %82 }
  0x19   :  { %v85_v15 = vpop.eup %84  ;;  %v37_v16 = vmul.f32 %v83_v14, %v34_v12  ;;  %vm42_vm1 = vweird.f32 %v83_v14 }
  0x1a   :  { %v52_v18 = vmul.f32 %v85_v15, %v35_v13  ;;  %vm57_vm3 = vweird.f32 %v85_v15  ;;  %vm43_vm4 = vmor %vm41_vm0, %vm42_vm1 }
  0x1b   :  { %v38_v19 = vsub.f32 1.0, %v37_v16  ;;  %vm58_vm6 = vmor %vm56_vm2, %vm57_vm3 }
  0x1c   :  { %v53_v22 = vsub.f32 1.0, %v52_v18 }
  0x1d   :  { %v39_v24 = vmul.f32 %v83_v14, %v38_v19 }
  0x1e   :  { %v54_v26 = vmul.f32 %v85_v15, %v53_v22 }
  0x1f   :  { %v40_v27 = vadd.f32 %v83_v14, %v39_v24 }
  0x20   :  { %v55_v29 = vadd.f32 %v85_v15, %v54_v26 }
  0x21   :  { %v44_v30 = vsel %vm43_vm4, %v83_v14, %v40_v27 }
  0x22   :  { %v49_v31 = vsel %vm46_vm5, %v48_v25, %v44_v30  ;;  %v59_v32 = vsel %vm58_vm6, %v85_v15, %v55_v29 }
  0x23   :  { %v66_v33 = vmul.f32 %v49_v31, %v26_v6  ;;  %v64_v34 = vsel %vm61_vm7, %v63_v28, %v59_v32 }
  0x24   :  { %v67_v35 = vmul.f32 %v64_v34, %v27_v7 }
  0x25   :  { %68 = vst [vmem:[%s127_s3] sm:$0xff] %v66_v33 }
  0x26   :  { %69 = vst [vmem:[%s127_s3 + $0x8] sm:$0xff] %v67_v35 }

// kernel: dcmconv2_forward.23
= control target key start
LH: loop header
LB: loop body
LE: loop exit
PB: predicated region body
PF: predicated region fallthrough
CT: control target
= control target key end

     0   :  { %s923_s15 = smov 0   ;;  %s925_s16 = smov 0   ;;  %s1180_s0 = inlined_call_operand.vmem [shape: f32[9,168,2], index: 0, kind: input, shape index: {}]   ;;  %s1181_s1 = inlined_call_operand.vmem [shape: f32[9,2,2], index: 1, kind: input, shape index: {}]   ;;  %s1182_s2 = inlined_call_operand.vmem [shape: f32[168,2], index: 2, kind: output, shape index: {0}]   ;;  %s1183_s3 = inlined_call_operand.vmem [shape: f32[1,1,2], index: 3, kind: output, shape index: {1}]   ;;  %s1184_s4 = inlined_call_operand.vmem [shape: f32[1,1,2], index: 4, kind: output, shape index: {2}]  }
   0x1   :  { %s927_s17 = smov 0  }
   0x2 LB: > { %s24_s18 = sadd.s32 1, %s891_s16  ;;  %p811_p0 = scmp.ge.s32.totalorder %s895_s17, 1  ;;  %s895_s17 = sphi %s927_s17, %s15_s17   ;;  %s891_s16 = sphi %s925_s16, %s1186_s16   ;;  %s887_s15 = sphi %s923_s15, %s1185_s15  }
   0x3   : > { %p25_p1 = scmp.ge.s32.totalorder %s24_s18, 9  ;;  %p195_p2 = scmp.lt.s32.totalorder %s895_s17, 10 }
   0x5   : > { %s1188_s18 = smov (%p25_p1, %s24_s18), 0  ;;  %p196_p3 = pnand %p811_p0, %p195_p2 }
   0x6   : > { %p236_p4 = scmp.lt.s32.totalorder (!%p196_p3), %s887_s15, 8  ;;  %p814_p5 = scmp.ne.s32.totalorder (!%p196_p3), %s887_s15, 0 }
   0x7   : > { %199 = sbr.rel (%p196_p3) target bundleno = 274 (0x112), region = 28 }
   0xc   : > { %s237_s19 = scalar_select %p236_p4, %s887_s15, 8 }
   0xd   : > { %264 = sbr.rel (%p814_p5) target bundleno = 40 (0x28), region = 32 }
   0xe   : > { %s847_s20 = smul.u32 168, %s237_s19  ;;  %s813_s21 = sshll.u32 %s237_s19, 1 }
   0xf   : > { %s248_s24 = scalar_lea.vmem %s1181_s1, %s813_s21 }
  0x10   : > { %s951_s27 = scalar_lea.vmem %s1180_s0, %s847_s20 }
  0x12   : > { %vm265_vm0 = vcmask 15360   ;;  %v897_v0 = vmov 0.0  }
  0x13   : > { %266 = vst.msk [vmem:[#allocation2] sm:$0xff] %vm265_vm0, %v897_v0 }
  0x14   : > { %267 = vst.msk [vmem:[#allocation2 + $0x8] sm:$0xff] %vm265_vm0, %v897_v0 }
  0x15   : > { %268 = vst.msk [vmem:[#allocation2 + $0x10] sm:$0xff] %vm265_vm0, %v897_v0 }
  0x16   : > { %269 = vst.msk [vmem:[#allocation2 + $0x18] sm:$0xff] %vm265_vm0, %v897_v0 }
  0x17   : > { %270 = vst.msk [vmem:[#allocation2 + $0x20] sm:$0xff] %vm265_vm0, %v897_v0 }
  0x18   : > { %271 = vst.msk [vmem:[#allocation2 + $0x28] sm:$0xff] %vm265_vm0, %v897_v0 }
  0x19   : > { %272 = vst.msk [vmem:[#allocation2 + $0x30] sm:$0xff] %vm265_vm0, %v897_v0 }
  0x1a   : > { %273 = vst.msk [vmem:[#allocation2 + $0x38] sm:$0xff] %vm265_vm0, %v897_v0 }
  0x1b   : > { %274 = vst.msk [vmem:[#allocation2 + $0x40] sm:$0xff] %vm265_vm0, %v897_v0 }
  0x1c   : > { %275 = vst.msk [vmem:[#allocation2 + $0x48] sm:$0xff] %vm265_vm0, %v897_v0 }
  0x1d   : > { %276 = vst.msk [vmem:[#allocation2 + $0x50] sm:$0xff] %vm265_vm0, %v897_v0 }
  0x1e   : > { %277 = vst.msk [vmem:[#allocation2 + $0x58] sm:$0xff] %vm265_vm0, %v897_v0 }
  0x1f   : > { %278 = vst.msk [vmem:[#allocation2 + $0x60] sm:$0xff] %vm265_vm0, %v897_v0 }
  0x20   : > { %279 = vst.msk [vmem:[#allocation2 + $0x68] sm:$0xff] %vm265_vm0, %v897_v0 }
  0x21   : > { %280 = vst.msk [vmem:[#allocation2 + $0x70] sm:$0xff] %vm265_vm0, %v897_v0 }
  0x22   : > { %281 = vst.msk [vmem:[#allocation2 + $0x78] sm:$0xff] %vm265_vm0, %v897_v0 }
  0x23   : > { %282 = vst.msk [vmem:[#allocation2 + $0x80] sm:$0xff] %vm265_vm0, %v897_v0 }
  0x24   : > { %283 = vst.msk [vmem:[#allocation2 + $0x88] sm:$0xff] %vm265_vm0, %v897_v0 }
  0x25   : > { %284 = vst.msk [vmem:[#allocation2 + $0x90] sm:$0xff] %vm265_vm0, %v897_v0 }
  0x26   : > { %285 = vst.msk [vmem:[#allocation2 + $0x98] sm:$0xff] %vm265_vm0, %v897_v0 }
  0x27   : > { %286 = vst.msk [vmem:[#allocation2 + $0xa0] sm:$0xff] %vm265_vm0, %v897_v0 }
  0x28 PF: > { %v329_v1 = vld [vmem:[%s248_s24] sm:$0x3]  ;;  %vm394_vm1 = vcmask 1041408   ;;  %vm330_vm2 = vcmask 15360   ;;  %v314_v4 = vld [vmem:[%s951_s27 + $0x30] sm:$0xff]  ;;  %v321_v6 = vld [vmem:[%s951_s27 + $0x68] sm:$0xff] }
  0x29   : > { %v320_v2 = vld [vmem:[%s951_s27 + $0x60] sm:$0xff]  ;;  %845 = vmatpush.msk.msra.mxu2 %vm394_vm1, %v329_v1  ;;  %815 = vmatpush.msk.msra.mxu0 %vm394_vm1, %v329_v1  ;;  %v326_v5 = vld [vmem:[%s951_s27 + $0x90] sm:$0xff]  ;;  %v309_v7 = vld [vmem:[%s951_s27 + $0x8] sm:$0xff]  ;;  %p837_p6 = scmp.ne.s32.totalorder %s887_s15, 8 }
  0x2a   : > { %v308_v3 = vld [vmem:[%s951_s27] sm:$0xff]  ;;  %828 = vmatmul.msk.f32.vlgmr.msra.gmra.mxu2 %vm330_vm2, %v320_v2  ;;  %844 = vmatpush.msk.msra.mxu1 %vm394_vm1, %v329_v1  ;;  %v315_v8 = vld [vmem:[%s951_s27 + $0x38] sm:$0xff]  ;;  %v322_v10 = vld [vmem:[%s951_s27 + $0x70] sm:$0xff] }
  0x2b   : > { %816 = vmatmul.msk.f32.vlgmr.msra.gmra.mxu0 %vm330_vm2, %v308_v3  ;;  %822 = vmatmul.msk.f32.vlgmr.msra.gmra.mxu1 %vm330_vm2, %v314_v4  ;;  %v327_v9 = vld [vmem:[%s951_s27 + $0x98] sm:$0xff]  ;;  %v310_v11 = vld [vmem:[%s951_s27 + $0x10] sm:$0xff]  ;;  %v316_v12 = vld [vmem:[%s951_s27 + $0x40] sm:$0xff] }
  0x2c   : > { %846 = vmatpush.msk.msra.mxu3 %vm394_vm1, %v329_v1  ;;  %v328_v13 = vld [vmem:[%s951_s27 + $0xa0] sm:$0xff]  ;;  %v323_v14 = vld [vmem:[%s951_s27 + $0x78] sm:$0xff]  ;;  %v317_v16 = vld [vmem:[%s951_s27 + $0x48] sm:$0xff] }
  0x2d   : > { %834 = vmatmul.msk.f32.vlgmr.msra.gmra.mxu3 %vm330_vm2, %v326_v5  ;;  %v311_v15 = vld [vmem:[%s951_s27 + $0x18] sm:$0xff]  ;;  %v324_v17 = vld [vmem:[%s951_s27 + $0x80] sm:$0xff]  ;;  %v318_v19 = vld [vmem:[%s951_s27 + $0x50] sm:$0xff] }
  0x2e   : > { %v312_v18 = vld [vmem:[%s951_s27 + $0x20] sm:$0xff]  ;;  %v325_v20 = vld [vmem:[%s951_s27 + $0x88] sm:$0xff]  ;;  %v319_v22 = vld [vmem:[%s951_s27 + $0x58] sm:$0xff] }
  0x2f   : > { %v313_v21 = vld [vmem:[%s951_s27 + $0x28] sm:$0xff]  ;;  %v287_v23 = vld [vmem:[#allocation2] sm:$0xff]  ;;  %v293_v24 = vld [vmem:[#allocation2 + $0x30] sm:$0xff] }
  0x30   : > { %v299_v29 = vld [vmem:[#allocation2 + $0x60] sm:$0xff]  ;;  %v288_v32 = vld [vmem:[#allocation2 + $0x8] sm:$0xff]  ;;  %v294_v33 = vld [vmem:[#allocation2 + $0x38] sm:$0xff] }
  0x31   : > { %v305_v34 = vld [vmem:[#allocation2 + $0x90] sm:$0xff]  ;;  %v300_v41 = vld [vmem:[#allocation2 + $0x68] sm:$0xff]  ;;  %v295_v45 = vld [vmem:[#allocation2 + $0x40] sm:$0xff] }
  0x32   : > { %829 = vmatmul.msk.f32.gmra.mxu2 %vm330_vm2, %v321_v6  ;;  %v289_v44 = vld [vmem:[#allocation2 + $0x10] sm:$0xff]  ;;  %v306_v46 = vld [vmem:[#allocation2 + $0x98] sm:$0xff]  ;;  %v296_v57 = vld [vmem:[#allocation2 + $0x48] sm:$0xff] }
  0x33   : > { %817 = vmatmul.msk.f32.gmra.mxu0 %vm330_vm2, %v309_v7  ;;  %823 = vmatmul.msk.f32.gmra.mxu1 %vm330_vm2, %v315_v8  ;;  %v301_v53 = vld [vmem:[#allocation2 + $0x70] sm:$0xff]  ;;  %v290_v56 = vld [vmem:[#allocation2 + $0x18] sm:$0xff]  ;;  %v307_v58 = vld [vmem:[#allocation2 + $0xa0] sm:$0xff] }
  0x34   : > { %v302_v1 = vld [vmem:[#allocation2 + $0x78] sm:$0xff]  ;;  %v291_v4 = vld [vmem:[#allocation2 + $0x20] sm:$0xff]  ;;  %v297_v5 = vld [vmem:[#allocation2 + $0x50] sm:$0xff] }
  0x35   : > { %835 = vmatmul.msk.f32.gmra.mxu3 %vm330_vm2, %v327_v9 }
  0x3a   : > { %830 = vmatmul.msk.f32.gmra.mxu2 %vm330_vm2, %v322_v10  ;;  %v303_v10 = vld [vmem:[#allocation2 + $0x80] sm:$0xff] }
  0x3b   : > { %818 = vmatmul.msk.f32.gmra.mxu0 %vm330_vm2, %v310_v11  ;;  %824 = vmatmul.msk.f32.gmra.mxu1 %vm330_vm2, %v316_v12 }
  0x3d   : > { %836 = vmatmul.msk.f32.gmra.mxu3 %vm330_vm2, %v328_v13  ;;  %v292_v13 = vld [vmem:[#allocation2 + $0x28] sm:$0xff] }
  0x42   : > { %831 = vmatmul.msk.f32.gmra.mxu2 %vm330_vm2, %v323_v14  ;;  %v298_v14 = vld [vmem:[#allocation2 + $0x58] sm:$0xff] }
  0x43   : > { %819 = vmatmul.msk.f32.gmra.mxu0 %vm330_vm2, %v311_v15  ;;  %825 = vmatmul.msk.f32.gmra.mxu1 %vm330_vm2, %v317_v16 }
  0x4a   : > { %832 = vmatmul.msk.f32.gmra.mxu2 %vm330_vm2, %v324_v17 }
  0x4b   : > { %820 = vmatmul.msk.f32.gmra.mxu0 %vm330_vm2, %v312_v18  ;;  %826 = vmatmul.msk.f32.gmra.mxu1 %vm330_vm2, %v318_v19  ;;  %v304_v19 = vld [vmem:[#allocation2 + $0x88] sm:$0xff] }
  0x52   : > { %833 = vmatmul.msk.f32.gmra.mxu2 %vm330_vm2, %v325_v20 }
  0x53   : > { %821 = vmatmul.msk.f32.gmra.mxu0 %vm330_vm2, %v313_v21  ;;  %827 = vmatmul.msk.f32.gmra.mxu1 %vm330_vm2, %v319_v22 }
  0xa8   : > { %v415_v25 = vpop.f32.mrf.mxu0  ;;  %v433_v26 = vpop.f32.mrf.mxu1 }
  0xa9   : > { %v478_v27 = vadd.f32 %v415_v25, %v287_v23  ;;  %v484_v28 = vadd.f32 %v433_v26, %v293_v24 }
  0xab   : > { %499 = vst.msk [vmem:[#allocation2] sm:$0xff] %vm330_vm2, %v478_v27 }
  0xac   : > { %505 = vst.msk [vmem:[#allocation2 + $0x30] sm:$0xff] %vm330_vm2, %v484_v28 }
  0xad   : > { %v451_v30 = vpop.f32.mrf.mxu2 }
  0xae   : > { %v490_v31 = vadd.f32 %v451_v30, %v299_v29 }
  0xb0   : > { %511 = vst.msk [vmem:[#allocation2 + $0x60] sm:$0xff] %vm330_vm2, %v490_v31  ;;  %v418_v35 = vpop.f32.mrf.mxu0  ;;  %v436_v36 = vpop.f32.mrf.mxu1 }
  0xb1   : > { %v479_v37 = vadd.f32 %v418_v35, %v288_v32  ;;  %v485_v38 = vadd.f32 %v436_v36, %v294_v33  ;;  %v469_v39 = vpop.f32.mrf.mxu3 }
  0xb2   : > { %v496_v40 = vadd.f32 %v469_v39, %v305_v34 }
  0xb3   : > { %500 = vst.msk [vmem:[#allocation2 + $0x8] sm:$0xff] %vm330_vm2, %v479_v37 }
  0xb4   : > { %506 = vst.msk [vmem:[#allocation2 + $0x38] sm:$0xff] %vm330_vm2, %v485_v38 }
  0xb5   : > { %v454_v42 = vpop.f32.mrf.mxu2  ;;  %517 = vst.msk [vmem:[#allocation2 + $0x90] sm:$0xff] %vm330_vm2, %v496_v40 }
  0xb6   : > { %v491_v43 = vadd.f32 %v454_v42, %v300_v41 }
  0xb8   : > { %512 = vst.msk [vmem:[#allocation2 + $0x68] sm:$0xff] %vm330_vm2, %v491_v43  ;;  %v421_v47 = vpop.f32.mrf.mxu0  ;;  %v439_v48 = vpop.f32.mrf.mxu1 }
  0xb9   : > { %v480_v49 = vadd.f32 %v421_v47, %v289_v44  ;;  %v486_v50 = vadd.f32 %v439_v48, %v295_v45  ;;  %v472_v51 = vpop.f32.mrf.mxu3 }
  0xba   : > { %v497_v52 = vadd.f32 %v472_v51, %v306_v46 }
  0xbb   : > { %501 = vst.msk [vmem:[#allocation2 + $0x10] sm:$0xff] %vm330_vm2, %v480_v49 }
  0xbc   : > { %507 = vst.msk [vmem:[#allocation2 + $0x40] sm:$0xff] %vm330_vm2, %v486_v50 }
  0xbd   : > { %v457_v54 = vpop.f32.mrf.mxu2  ;;  %518 = vst.msk [vmem:[#allocation2 + $0x98] sm:$0xff] %vm330_vm2, %v497_v52 }
  0xbe   : > { %v492_v55 = vadd.f32 %v457_v54, %v301_v53 }
  0xc0   : > { %513 = vst.msk [vmem:[#allocation2 + $0x70] sm:$0xff] %vm330_vm2, %v492_v55  ;;  %v424_v59 = vpop.f32.mrf.mxu0  ;;  %v442_v60 = vpop.f32.mrf.mxu1 }
  0xc1   : > { %v481_v61 = vadd.f32 %v424_v59, %v290_v56  ;;  %v487_v62 = vadd.f32 %v442_v60, %v296_v57  ;;  %v475_v63 = vpop.f32.mrf.mxu3 }
  0xc2   : > { %v498_v0 = vadd.f32 %v475_v63, %v307_v58 }
  0xc3   : > { %502 = vst.msk [vmem:[#allocation2 + $0x18] sm:$0xff] %vm330_vm2, %v481_v61 }
  0xc4   : > { %508 = vst.msk [vmem:[#allocation2 + $0x48] sm:$0xff] %vm330_vm2, %v487_v62 }
  0xc5   : > { %v460_v2 = vpop.f32.mrf.mxu2  ;;  %519 = vst.msk [vmem:[#allocation2 + $0xa0] sm:$0xff] %vm330_vm2, %v498_v0 }
  0xc6   : > { %v493_v3 = vadd.f32 %v460_v2, %v302_v1 }
  0xc8   : > { %514 = vst.msk [vmem:[#allocation2 + $0x78] sm:$0xff] %vm330_vm2, %v493_v3  ;;  %v427_v6 = vpop.f32.mrf.mxu0  ;;  %v445_v7 = vpop.f32.mrf.mxu1 }
  0xc9   : > { %v482_v8 = vadd.f32 %v427_v6, %v291_v4  ;;  %v488_v9 = vadd.f32 %v445_v7, %v297_v5 }
  0xcb   : > { %503 = vst.msk [vmem:[#allocation2 + $0x20] sm:$0xff] %vm330_vm2, %v482_v8 }
  0xcc   : > { %509 = vst.msk [vmem:[#allocation2 + $0x50] sm:$0xff] %vm330_vm2, %v488_v9 }
  0xcd   : > { %v463_v11 = vpop.f32.mrf.mxu2 }
  0xce   : > { %v494_v12 = vadd.f32 %v463_v11, %v303_v10 }
  0xd0   : > { %515 = vst.msk [vmem:[#allocation2 + $0x80] sm:$0xff] %vm330_vm2, %v494_v12  ;;  %v430_v15 = vpop.f32.mrf.mxu0  ;;  %v448_v16 = vpop.f32.mrf.mxu1 }
  0xd1   : > { %v483_v17 = vadd.f32 %v430_v15, %v292_v13  ;;  %v489_v18 = vadd.f32 %v448_v16, %v298_v14 }
  0xd3   : > { %504 = vst.msk [vmem:[#allocation2 + $0x28] sm:$0xff] %vm330_vm2, %v483_v17 }
  0xd4   : > { %510 = vst.msk [vmem:[#allocation2 + $0x58] sm:$0xff] %vm330_vm2, %v489_v18  ;;  %523 = sbr.rel (%p837_p6) target bundleno = 274 (0x112), region = 36 }
  0xd5   : > { %v466_v20 = vpop.f32.mrf.mxu2 }
  0xd6   : > { %v495_v21 = vadd.f32 %v466_v20, %v304_v19 }
  0xd8   : > { %516 = vst.msk [vmem:[#allocation2 + $0x88] sm:$0xff] %vm330_vm2, %v495_v21 }
  0xd9   : > { %v524_v22 = vld [vmem:[#allocation2] sm:$0xff]  ;;  %v525_v23 = vld [vmem:[#allocation2 + $0x8] sm:$0xff]  ;;  %v526_v24 = vld [vmem:[#allocation2 + $0x10] sm:$0xff]  ;;  %vm613_vm3 = vcmask 8192  }
  0xda   : > { %545 = vst.msk [vmem:[%s1182_s2] sm:$0xff] %vm330_vm2, %v524_v22  ;;  %v566_v25 = vsel %vm330_vm2, %v524_v22, 0.0  ;;  %v615_v26 = vmul.f32 %v524_v22, %v524_v22  ;;  %v567_v27 = vsel %vm330_vm2, %v525_v23, 0.0  ;;  %v616_v28 = vmul.f32 %v525_v23, %v525_v23  ;;  %v527_v29 = vld [vmem:[#allocation2 + $0x18] sm:$0xff]  ;;  %v528_v30 = vld [vmem:[#allocation2 + $0x20] sm:$0xff]  ;;  %v529_v34 = vld [vmem:[#allocation2 + $0x28] sm:$0xff] }
  0xdb   : > { %546 = vst.msk [vmem:[%s1182_s2 + $0x8] sm:$0xff] %vm330_vm2, %v525_v23  ;;  %v568_v31 = vadd.f32 %v567_v27, %v566_v25  ;;  %v569_v32 = vsel %vm330_vm2, %v526_v24, 0.0  ;;  %v617_v33 = vmul.f32 %v526_v24, %v526_v24  ;;  %v571_v37 = vsel %vm330_vm2, %v527_v29, 0.0  ;;  %v530_v43 = vld [vmem:[#allocation2 + $0x30] sm:$0xff]  ;;  %v531_v49 = vld [vmem:[#allocation2 + $0x38] sm:$0xff]  ;;  %v532_v55 = vld [vmem:[#allocation2 + $0x40] sm:$0xff] }
  0xdc   : > { %v636_v35 = vsel %vm330_vm2, %v615_v26, 0.0  ;;  %v637_v36 = vsel %vm330_vm2, %v616_v28, 0.0  ;;  %547 = vst.msk [vmem:[%s1182_s2 + $0x10] sm:$0xff] %vm330_vm2, %v526_v24  ;;  %v618_v38 = vmul.f32 %v527_v29, %v527_v29  ;;  %v619_v42 = vmul.f32 %v528_v30, %v528_v30  ;;  %v533_v59 = vld [vmem:[#allocation2 + $0x48] sm:$0xff]  ;;  %v534_v62 = vld [vmem:[#allocation2 + $0x50] sm:$0xff]  ;;  %v535_v2 = vld [vmem:[#allocation2 + $0x58] sm:$0xff] }
  0xdd   : > { %v638_v39 = vadd.f32 %v637_v36, %v636_v35  ;;  %v570_v40 = vadd.f32 %v569_v32, %v568_v31  ;;  %v639_v41 = vsel %vm330_vm2, %v617_v33, 0.0  ;;  %548 = vst.msk [vmem:[%s1182_s2 + $0x18] sm:$0xff] %vm330_vm2, %v527_v29  ;;  %v573_v45 = vsel %vm330_vm2, %v528_v30, 0.0  ;;  %v536_v5 = vld [vmem:[#allocation2 + $0x60] sm:$0xff]  ;;  %v537_v9 = vld [vmem:[#allocation2 + $0x68] sm:$0xff]  ;;  %v538_v12 = vld [vmem:[#allocation2 + $0x70] sm:$0xff] }
  0xde   : > { %v641_v44 = vsel %vm330_vm2, %v618_v38, 0.0  ;;  %549 = vst.msk [vmem:[%s1182_s2 + $0x20] sm:$0xff] %vm330_vm2, %v528_v30  ;;  %v620_v46 = vmul.f32 %v529_v34, %v529_v34  ;;  %v643_v50 = vsel %vm330_vm2, %v619_v42, 0.0  ;;  %v575_v51 = vsel %vm330_vm2, %v529_v34, 0.0  ;;  %v539_v16 = vld [vmem:[#allocation2 + $0x78] sm:$0xff]  ;;  %v540_v19 = vld [vmem:[#allocation2 + $0x80] sm:$0xff] }
  0xdf   : > { %v640_v47 = vadd.f32 %v639_v41, %v638_v39  ;;  %v572_v48 = vadd.f32 %v571_v37, %v570_v40  ;;  %550 = vst.msk [vmem:[%s1182_s2 + $0x28] sm:$0xff] %vm330_vm2, %v529_v34  ;;  %v621_v52 = vmul.f32 %v530_v43, %v530_v43  ;;  %v577_v57 = vsel %vm330_vm2, %v530_v43, 0.0  ;;  %v541_v23 = vld [vmem:[#allocation2 + $0x88] sm:$0xff]  ;;  %v542_v26 = vld [vmem:[#allocation2 + $0x90] sm:$0xff]  ;;  %v543_v30 = vld [vmem:[#allocation2 + $0x98] sm:$0xff] }
  0xe0   : > { %551 = vst.msk [vmem:[%s1182_s2 + $0x30] sm:$0xff] %vm330_vm2, %v530_v43  ;;  %v645_v56 = vsel %vm330_vm2, %v620_v46, 0.0  ;;  %v622_v58 = vmul.f32 %v531_v49, %v531_v49  ;;  %v579_v0 = vsel %vm330_vm2, %v531_v49, 0.0  ;;  %v623_v1 = vmul.f32 %v532_v55, %v532_v55  ;;  %v544_v33 = vld [vmem:[#allocation2 + $0xa0] sm:$0xff] }
  0xe1   : > { %v642_v53 = vadd.f32 %v641_v44, %v640_v47  ;;  %v574_v54 = vadd.f32 %v573_v45, %v572_v48  ;;  %552 = vst.msk [vmem:[%s1182_s2 + $0x38] sm:$0xff] %vm330_vm2, %v531_v49  ;;  %v647_v63 = vsel %vm330_vm2, %v621_v52, 0.0  ;;  %v581_v7 = vsel %vm330_vm2, %v532_v55, 0.0 }
  0xe2   : > { %553 = vst.msk [vmem:[%s1182_s2 + $0x40] sm:$0xff] %vm330_vm2, %v532_v55  ;;  %v649_v6 = vsel %vm330_vm2, %v622_v58, 0.0  ;;  %v624_v8 = vmul.f32 %v533_v59, %v533_v59  ;;  %v651_v13 = vsel %vm330_vm2, %v623_v1, 0.0  ;;  %v583_v14 = vsel %vm330_vm2, %v533_v59, 0.0 }
  0xe3   : > { %v644_v60 = vadd.f32 %v643_v50, %v642_v53  ;;  %v576_v61 = vadd.f32 %v575_v51, %v574_v54  ;;  %554 = vst.msk [vmem:[%s1182_s2 + $0x48] sm:$0xff] %vm330_vm2, %v533_v59  ;;  %v625_v15 = vmul.f32 %v534_v62, %v534_v62  ;;  %v585_v21 = vsel %vm330_vm2, %v534_v62, 0.0 }
  0xe4   : > { %555 = vst.msk [vmem:[%s1182_s2 + $0x50] sm:$0xff] %vm330_vm2, %v534_v62  ;;  %v653_v20 = vsel %vm330_vm2, %v624_v8, 0.0  ;;  %v626_v22 = vmul.f32 %v535_v2, %v535_v2  ;;  %v587_v28 = vsel %vm330_vm2, %v535_v2, 0.0  ;;  %v627_v29 = vmul.f32 %v536_v5, %v536_v5 }
  0xe5   : > { %v646_v3 = vadd.f32 %v645_v56, %v644_v60  ;;  %v578_v4 = vadd.f32 %v577_v57, %v576_v61  ;;  %556 = vst.msk [vmem:[%s1182_s2 + $0x58] sm:$0xff] %vm330_vm2, %v535_v2  ;;  %v655_v27 = vsel %vm330_vm2, %v625_v15, 0.0  ;;  %v589_v35 = vsel %vm330_vm2, %v536_v5, 0.0 }
  0xe6   : > { %557 = vst.msk [vmem:[%s1182_s2 + $0x60] sm:$0xff] %vm330_vm2, %v536_v5  ;;  %v657_v34 = vsel %vm330_vm2, %v626_v22, 0.0  ;;  %v628_v36 = vmul.f32 %v537_v9, %v537_v9  ;;  %v659_v39 = vsel %vm330_vm2, %v627_v29, 0.0  ;;  %v591_v40 = vsel %vm330_vm2, %v537_v9, 0.0 }
  0xe7   : > { %v648_v10 = vadd.f32 %v647_v63, %v646_v3  ;;  %v580_v11 = vadd.f32 %v579_v0, %v578_v4  ;;  %558 = vst.msk [vmem:[%s1182_s2 + $0x68] sm:$0xff] %vm330_vm2, %v537_v9  ;;  %v629_v41 = vmul.f32 %v538_v12, %v538_v12  ;;  %v593_v45 = vsel %vm330_vm2, %v538_v12, 0.0 }
  0xe8   : > { %559 = vst.msk [vmem:[%s1182_s2 + $0x70] sm:$0xff] %vm330_vm2, %v538_v12  ;;  %v661_v44 = vsel %vm330_vm2, %v628_v36, 0.0  ;;  %v630_v46 = vmul.f32 %v539_v16, %v539_v16  ;;  %v595_v50 = vsel %vm330_vm2, %v539_v16, 0.0  ;;  %v631_v51 = vmul.f32 %v540_v19, %v540_v19 }
  0xe9   : > { %v650_v17 = vadd.f32 %v649_v6, %v648_v10  ;;  %v582_v18 = vadd.f32 %v581_v7, %v580_v11  ;;  %560 = vst.msk [vmem:[%s1182_s2 + $0x78] sm:$0xff] %vm330_vm2, %v539_v16  ;;  %v663_v49 = vsel %vm330_vm2, %v629_v41, 0.0  ;;  %v597_v55 = vsel %vm330_vm2, %v540_v19, 0.0 }
  0xea   : > { %561 = vst.msk [vmem:[%s1182_s2 + $0x80] sm:$0xff] %vm330_vm2, %v540_v19  ;;  %v665_v54 = vsel %vm330_vm2, %v630_v46, 0.0  ;;  %v632_v56 = vmul.f32 %v541_v23, %v541_v23  ;;  %v667_v59 = vsel %vm330_vm2, %v631_v51, 0.0  ;;  %v599_v60 = vsel %vm330_vm2, %v541_v23, 0.0 }
  0xeb   : > { %v652_v24 = vadd.f32 %v651_v13, %v650_v17  ;;  %v584_v25 = vadd.f32 %v583_v14, %v582_v18  ;;  %562 = vst.msk [vmem:[%s1182_s2 + $0x88] sm:$0xff] %vm330_vm2, %v541_v23  ;;  %v633_v61 = vmul.f32 %v542_v26, %v542_v26  ;;  %v601_v1 = vsel %vm330_vm2, %v542_v26, 0.0 }
  0xec   : > { %563 = vst.msk [vmem:[%s1182_s2 + $0x90] sm:$0xff] %vm330_vm2, %v542_v26  ;;  %v669_v0 = vsel %vm330_vm2, %v632_v56, 0.0  ;;  %v634_v2 = vmul.f32 %v543_v30, %v543_v30  ;;  %v603_v6 = vsel %vm330_vm2, %v543_v30, 0.0  ;;  %v635_v7 = vmul.f32 %v544_v33, %v544_v33 }
  0xed   : > { %v654_v31 = vadd.f32 %v653_v20, %v652_v24  ;;  %v586_v32 = vadd.f32 %v585_v21, %v584_v25  ;;  %564 = vst.msk [vmem:[%s1182_s2 + $0x98] sm:$0xff] %vm330_vm2, %v543_v30  ;;  %v671_v5 = vsel %vm330_vm2, %v633_v61, 0.0  ;;  %v605_v11 = vsel %vm330_vm2, %v544_v33, 0.0 }
  0xee   : > { %565 = vst.msk [vmem:[%s1182_s2 + $0xa0] sm:$0xff] %vm330_vm2, %v544_v33  ;;  %v673_v10 = vsel %vm330_vm2, %v634_v2, 0.0  ;;  %v675_v14 = vsel %vm330_vm2, %v635_v7, 0.0 }
  0xef   : > { %v656_v37 = vadd.f32 %v655_v27, %v654_v31  ;;  %v588_v38 = vadd.f32 %v587_v28, %v586_v32 }
  0xf1   : > { %v658_v42 = vadd.f32 %v657_v34, %v656_v37  ;;  %v590_v43 = vadd.f32 %v589_v35, %v588_v38 }
  0xf3   : > { %v660_v47 = vadd.f32 %v659_v39, %v658_v42  ;;  %v592_v48 = vadd.f32 %v591_v40, %v590_v43 }
  0xf5   : > { %v662_v52 = vadd.f32 %v661_v44, %v660_v47  ;;  %v594_v53 = vadd.f32 %v593_v45, %v592_v48 }
  0xf7   : > { %v664_v57 = vadd.f32 %v663_v49, %v662_v52  ;;  %v596_v58 = vadd.f32 %v595_v50, %v594_v53 }
  0xf9   : > { %v666_v62 = vadd.f32 %v665_v54, %v664_v57  ;;  %v598_v63 = vadd.f32 %v597_v55, %v596_v58 }
  0xfb   : > { %v668_v3 = vadd.f32 %v667_v59, %v666_v62  ;;  %v600_v4 = vadd.f32 %v599_v60, %v598_v63 }
  0xfd   : > { %v670_v8 = vadd.f32 %v669_v0, %v668_v3  ;;  %v602_v9 = vadd.f32 %v601_v1, %v600_v4 }
  0xff   : > { %v672_v12 = vadd.f32 %v671_v5, %v670_v8  ;;  %v604_v13 = vadd.f32 %v603_v6, %v602_v9 }
 0x101   : > { %v674_v15 = vadd.f32 %v673_v10, %v672_v12  ;;  %v606_v16 = vadd.f32 %v605_v11, %v604_v13 }
 0x103   : > { %v607_v17 = vrot.slane %v606_v16, 4  ;;  %v676_v18 = vadd.f32 %v675_v14, %v674_v15 }
 0x105   : > { %v608_v19 = vadd.f32 %v607_v17, %v606_v16  ;;  %v677_v20 = vrot.slane %v676_v18, 4 }
 0x107   : > { %v609_v21 = vrot.slane %v608_v19, 2  ;;  %v678_v22 = vadd.f32 %v677_v20, %v676_v18 }
 0x109   : > { %v610_v23 = vadd.f32 %v609_v21, %v608_v19  ;;  %v679_v24 = vrot.slane %v678_v22, 2 }
 0x10b   : > { %v611_v25 = vrot.slane %v610_v23, 1  ;;  %v680_v26 = vadd.f32 %v679_v24, %v678_v22 }
 0x10d   : > { %v612_v27 = vadd.f32 %v611_v25, %v610_v23  ;;  %v681_v28 = vrot.slane %v680_v26, 1 }
 0x10f   : > { %614 = vst.msk [vmem:[%s1183_s3] sm:$0x1] %vm613_vm3, %v612_v27  ;;  %v682_v29 = vadd.f32 %v681_v28, %v680_v26 }
 0x111   : > { %683 = vst.msk [vmem:[%s1184_s4] sm:$0x1] %vm613_vm3, %v682_v29 }
 0x112 PF: > { %s15_s17 = sadd.s32 1, %s895_s17   ;;  %s1185_s15 = smov %s891_s16 }
 0x113   : > { %p12_p7 = scmp.ge.s32.totalorder %s15_s17, 11   ;;  %s1186_s16 = smov %s1188_s18 }
 0x115   :  { %14 = sbr.rel (!%p12_p7) target bundleno = 2 (0x2), region = 93 }

// kernel: dcmconv2_forward.25
= control target key start
LH: loop header
LB: loop body
LE: loop exit
PB: predicated region body
PF: predicated region fallthrough
CT: control target
= control target key end

     0   :  { %s1176_s15 = smov 0   ;;  %s1178_s16 = smov 0   ;;  %s1608_s0 = inlined_call_operand.vmem [shape: f32[9,768,2], index: 0, kind: input, shape index: {}]   ;;  %s1609_s1 = inlined_call_operand.vmem [shape: f32[9,2,2], index: 1, kind: input, shape index: {}]   ;;  %s1610_s2 = inlined_call_operand.vmem [shape: f32[768,2], index: 2, kind: output, shape index: {0}]   ;;  %s1611_s3 = inlined_call_operand.vmem [shape: f32[3,1,2], index: 3, kind: output, shape index: {1}]   ;;  %s1612_s4 = inlined_call_operand.vmem [shape: f32[3,1,2], index: 4, kind: output, shape index: {2}]  }
   0x1   :  { %s1180_s17 = smov 0   ;;  %s1182_s18 = smov 0  }
   0x2   :  { %s1184_s19 = smov 0  }
   0x3 LB: > { %s24_s20 = sadd.s32 1, %s1140_s17  ;;  %s27_s21 = sadd.s32 1, %s1144_s18  ;;  %s1148_s19 = sphi %s1184_s19, %s15_s19   ;;  %s1144_s18 = sphi %s1182_s18, %s1616_s18   ;;  %s1140_s17 = sphi %s1180_s17, %s1615_s17   ;;  %s1136_s16 = sphi %s1178_s16, %s1614_s16   ;;  %s1132_s15 = sphi %s1176_s15, %s1613_s15  }
   0x4   : > { %p25_p0 = scmp.ge.s32.totalorder %s24_s20, 9  ;;  %p1022_p1 = scmp.ge.s32.totalorder %s1148_s19, 1 }
   0x5   : > { %p195_p2 = scmp.lt.s32.totalorder %s1148_s19, 28 }
   0x6   : > { %s1618_s20 = smov (%p25_p0, %s24_s20), 0  ;;  %s1620_s21 = smov (!%p25_p0, %s27_s21), %s1144_s18 }
   0x7   : > { %p196_p3 = pnand %p1022_p1, %p195_p2  ;;  %p29_p4 = scmp.ge.s32.totalorder %s1620_s21, 3 }
   0x8   : > { %s1023_s22 = sshll.u32 (!%p196_p3), %s1136_s16, 5  ;;  %p236_p5 = scmp.lt.s32.totalorder (!%p196_p3), %s1132_s15, 8 }
   0x9   : > { %s1622_s21 = smov (%p29_p4, %s1620_s21), 0  ;;  %199 = sbr.rel (%p196_p3) target bundleno = 332 (0x14c), region = 28 }
   0xa   : > { %p238_p6 = scmp.lt.s32.totalorder (!%p196_p3), %s1023_s22, 95  ;;  %p255_p7 = scmp.lt.s32.totalorder (!%p196_p3), %s1136_s16, 2 }
   0xb   : > { %p1028_p8 = scmp.ne.s32.totalorder (!%p196_p3), %s1132_s15, 0 }
   0xe   : > { %s237_s23 = scalar_select %p236_p5, %s1132_s15, 8 }
   0xf   : > { %s1624_s22 = smov (!%p238_p6, %s1023_s22), 95  ;;  %s1626_s16 = smov (!%p255_p7, %s1136_s16), 2 }
  0x10   : > { %s1068_s24 = smul.u32 96, %s237_s23  ;;  %s1025_s25 = sshll.u32 %s237_s23, 1 }
  0x11   : > { %s1217_s28 = scalar_lea.vmem %s1609_s1, %s1025_s25  ;;  %s1027_s29 = sshll.u32 %s1624_s22, 3 }
  0x12   : > { %s241_s30 = sadd.s32 %s1068_s24, %s1624_s22  ;;  %s1222_s7 = scalar_lea.vmem %s1610_s2, %s1027_s29 }
  0x13   : > { %s1024_s8 = sshll.u32 %s241_s30, 3  ;;  %s257_s14 = scalar_lea.vmem %s1611_s3, %s1626_s16 }
  0x14   : > { %s1227_s11 = scalar_lea.vmem %s1608_s0, %s1024_s8  ;;  %s260_s24 = scalar_lea.vmem %s1612_s4, %s1626_s16 }
  0x15   : > { %264 = sbr.rel (%p1028_p8) target bundleno = 59 (0x3b), region = 32 }
  0x1a   : > { %vm265_vm0 = vcmask 15360   ;;  %v1150_v0 = vmov 0.0  }
  0x1b   : > { %266 = vst.msk [vmem:[#allocation2] sm:$0xff] %vm265_vm0, %v1150_v0 }
  0x1c   : > { %267 = vst.msk [vmem:[#allocation2 + $0x8] sm:$0xff] %vm265_vm0, %v1150_v0 }
  0x1d   : > { %268 = vst.msk [vmem:[#allocation2 + $0x10] sm:$0xff] %vm265_vm0, %v1150_v0 }
  0x1e   : > { %269 = vst.msk [vmem:[#allocation2 + $0x18] sm:$0xff] %vm265_vm0, %v1150_v0 }
  0x1f   : > { %270 = vst.msk [vmem:[#allocation2 + $0x20] sm:$0xff] %vm265_vm0, %v1150_v0 }
  0x20   : > { %271 = vst.msk [vmem:[#allocation2 + $0x28] sm:$0xff] %vm265_vm0, %v1150_v0 }
  0x21   : > { %272 = vst.msk [vmem:[#allocation2 + $0x30] sm:$0xff] %vm265_vm0, %v1150_v0 }
  0x22   : > { %273 = vst.msk [vmem:[#allocation2 + $0x38] sm:$0xff] %vm265_vm0, %v1150_v0 }
  0x23   : > { %274 = vst.msk [vmem:[#allocation2 + $0x40] sm:$0xff] %vm265_vm0, %v1150_v0 }
  0x24   : > { %275 = vst.msk [vmem:[#allocation2 + $0x48] sm:$0xff] %vm265_vm0, %v1150_v0 }
  0x25   : > { %276 = vst.msk [vmem:[#allocation2 + $0x50] sm:$0xff] %vm265_vm0, %v1150_v0 }
  0x26   : > { %277 = vst.msk [vmem:[#allocation2 + $0x58] sm:$0xff] %vm265_vm0, %v1150_v0 }
  0x27   : > { %278 = vst.msk [vmem:[#allocation2 + $0x60] sm:$0xff] %vm265_vm0, %v1150_v0 }
  0x28   : > { %279 = vst.msk [vmem:[#allocation2 + $0x68] sm:$0xff] %vm265_vm0, %v1150_v0 }
  0x29   : > { %280 = vst.msk [vmem:[#allocation2 + $0x70] sm:$0xff] %vm265_vm0, %v1150_v0 }
  0x2a   : > { %281 = vst.msk [vmem:[#allocation2 + $0x78] sm:$0xff] %vm265_vm0, %v1150_v0 }
  0x2b   : > { %282 = vst.msk [vmem:[#allocation2 + $0x80] sm:$0xff] %vm265_vm0, %v1150_v0 }
  0x2c   : > { %283 = vst.msk [vmem:[#allocation2 + $0x88] sm:$0xff] %vm265_vm0, %v1150_v0 }
  0x2d   : > { %284 = vst.msk [vmem:[#allocation2 + $0x90] sm:$0xff] %vm265_vm0, %v1150_v0 }
  0x2e   : > { %285 = vst.msk [vmem:[#allocation2 + $0x98] sm:$0xff] %vm265_vm0, %v1150_v0 }
  0x2f   : > { %286 = vst.msk [vmem:[#allocation2 + $0xa0] sm:$0xff] %vm265_vm0, %v1150_v0 }
  0x30   : > { %287 = vst.msk [vmem:[#allocation2 + $0xa8] sm:$0xff] %vm265_vm0, %v1150_v0 }
  0x31   : > { %288 = vst.msk [vmem:[#allocation2 + $0xb0] sm:$0xff] %vm265_vm0, %v1150_v0 }
  0x32   : > { %289 = vst.msk [vmem:[#allocation2 + $0xb8] sm:$0xff] %vm265_vm0, %v1150_v0 }
  0x33   : > { %290 = vst.msk [vmem:[#allocation2 + $0xc0] sm:$0xff] %vm265_vm0, %v1150_v0 }
  0x34   : > { %291 = vst.msk [vmem:[#allocation2 + $0xc8] sm:$0xff] %vm265_vm0, %v1150_v0 }
  0x35   : > { %292 = vst.msk [vmem:[#allocation2 + $0xd0] sm:$0xff] %vm265_vm0, %v1150_v0 }
  0x36   : > { %293 = vst.msk [vmem:[#allocation2 + $0xd8] sm:$0xff] %vm265_vm0, %v1150_v0 }
  0x37   : > { %294 = vst.msk [vmem:[#allocation2 + $0xe0] sm:$0xff] %vm265_vm0, %v1150_v0 }
  0x38   : > { %295 = vst.msk [vmem:[#allocation2 + $0xe8] sm:$0xff] %vm265_vm0, %v1150_v0 }
  0x39   : > { %296 = vst.msk [vmem:[#allocation2 + $0xf0] sm:$0xff] %vm265_vm0, %v1150_v0 }
  0x3a   : > { %297 = vst.msk [vmem:[#allocation2 + $0xf8] sm:$0xff] %vm265_vm0, %v1150_v0 }
  0x3b PF: > { %v362_v1 = vld [vmem:[%s1217_s28] sm:$0x3]  ;;  %vm460_vm1 = vcmask 1041408   ;;  %vm363_vm2 = vcmask 15360   ;;  %v347_v6 = vld [vmem:[%s1227_s11 + $0x88] sm:$0xff]  ;;  %v348_v10 = vld [vmem:[%s1227_s11 + $0x90] sm:$0xff] }
  0x3c   : > { %v346_v2 = vld [vmem:[%s1227_s11 + $0x80] sm:$0xff]  ;;  %1066 = vmatpush.msk.msra.mxu2 %vm460_vm1, %v362_v1  ;;  %1067 = vmatpush.msk.msra.mxu3 %vm460_vm1, %v362_v1  ;;  %v355_v7 = vld [vmem:[%s1227_s11 + $0xc8] sm:$0xff]  ;;  %v356_v11 = vld [vmem:[%s1227_s11 + $0xd0] sm:$0xff]  ;;  %p1062_p9 = scmp.ne.s32.totalorder %s1132_s15, 8 }
  0x3d   : > { %v354_v3 = vld [vmem:[%s1227_s11 + $0xc0] sm:$0xff]  ;;  %1046 = vmatmul.msk.f32.vlgmr.msra.gmra.mxu2 %vm363_vm2, %v346_v2  ;;  %1029 = vmatpush.msk.msra.mxu0 %vm460_vm1, %v362_v1  ;;  %v331_v8 = vld [vmem:[%s1227_s11 + $0x8] sm:$0xff]  ;;  %v332_v12 = vld [vmem:[%s1227_s11 + $0x10] sm:$0xff] }
  0x3e   : > { %v330_v4 = vld [vmem:[%s1227_s11] sm:$0xff]  ;;  %1054 = vmatmul.msk.f32.vlgmr.msra.gmra.mxu3 %vm363_vm2, %v354_v3  ;;  %1065 = vmatpush.msk.msra.mxu1 %vm460_vm1, %v362_v1  ;;  %v339_v9 = vld [vmem:[%s1227_s11 + $0x48] sm:$0xff]  ;;  %v340_v13 = vld [vmem:[%s1227_s11 + $0x50] sm:$0xff] }
  0x3f   : > { %v338_v5 = vld [vmem:[%s1227_s11 + $0x40] sm:$0xff]  ;;  %1030 = vmatmul.msk.f32.vlgmr.msra.gmra.mxu0 %vm363_vm2, %v330_v4  ;;  %v349_v14 = vld [vmem:[%s1227_s11 + $0x98] sm:$0xff]  ;;  %v351_v22 = vld [vmem:[%s1227_s11 + $0xa8] sm:$0xff] }
  0x40   : > { %1038 = vmatmul.msk.f32.vlgmr.msra.gmra.mxu1 %vm363_vm2, %v338_v5  ;;  %v357_v15 = vld [vmem:[%s1227_s11 + $0xd8] sm:$0xff]  ;;  %v350_v18 = vld [vmem:[%s1227_s11 + $0xa0] sm:$0xff]  ;;  %v359_v23 = vld [vmem:[%s1227_s11 + $0xe8] sm:$0xff] }
  0x41   : > { %v333_v16 = vld [vmem:[%s1227_s11 + $0x18] sm:$0xff]  ;;  %v358_v19 = vld [vmem:[%s1227_s11 + $0xe0] sm:$0xff]  ;;  %v335_v24 = vld [vmem:[%s1227_s11 + $0x28] sm:$0xff] }
  0x42   : > { %v341_v17 = vld [vmem:[%s1227_s11 + $0x58] sm:$0xff]  ;;  %v334_v20 = vld [vmem:[%s1227_s11 + $0x20] sm:$0xff]  ;;  %v343_v25 = vld [vmem:[%s1227_s11 + $0x68] sm:$0xff] }
  0x43   : > { %v342_v21 = vld [vmem:[%s1227_s11 + $0x60] sm:$0xff]  ;;  %v352_v26 = vld [vmem:[%s1227_s11 + $0xb0] sm:$0xff]  ;;  %v353_v30 = vld [vmem:[%s1227_s11 + $0xb8] sm:$0xff] }
  0x44   : > { %v360_v27 = vld [vmem:[%s1227_s11 + $0xf0] sm:$0xff]  ;;  %v361_v31 = vld [vmem:[%s1227_s11 + $0xf8] sm:$0xff]  ;;  %v298_v34 = vld [vmem:[#allocation2] sm:$0xff] }
  0x45   : > { %1047 = vmatmul.msk.f32.gmra.mxu2 %vm363_vm2, %v347_v6  ;;  %v336_v28 = vld [vmem:[%s1227_s11 + $0x30] sm:$0xff]  ;;  %v337_v32 = vld [vmem:[%s1227_s11 + $0x38] sm:$0xff]  ;;  %v306_v35 = vld [vmem:[#allocation2 + $0x40] sm:$0xff] }
  0x46   : > { %1055 = vmatmul.msk.f32.gmra.mxu3 %vm363_vm2, %v355_v7  ;;  %v344_v29 = vld [vmem:[%s1227_s11 + $0x70] sm:$0xff]  ;;  %v345_v33 = vld [vmem:[%s1227_s11 + $0x78] sm:$0xff]  ;;  %v314_v40 = vld [vmem:[#allocation2 + $0x80] sm:$0xff] }
  0x47   : > { %1031 = vmatmul.msk.f32.gmra.mxu0 %vm363_vm2, %v331_v8  ;;  %v322_v41 = vld [vmem:[#allocation2 + $0xc0] sm:$0xff]  ;;  %v299_v46 = vld [vmem:[#allocation2 + $0x8] sm:$0xff]  ;;  %v300_v58 = vld [vmem:[#allocation2 + $0x10] sm:$0xff] }
  0x48   : > { %1039 = vmatmul.msk.f32.gmra.mxu1 %vm363_vm2, %v339_v9  ;;  %v307_v47 = vld [vmem:[#allocation2 + $0x48] sm:$0xff]  ;;  %v308_v59 = vld [vmem:[#allocation2 + $0x50] sm:$0xff]  ;;  %v301_v6 = vld [vmem:[#allocation2 + $0x18] sm:$0xff] }
  0x49   : > { %v315_v52 = vld [vmem:[#allocation2 + $0x88] sm:$0xff]  ;;  %v316_v0 = vld [vmem:[#allocation2 + $0x90] sm:$0xff]  ;;  %v309_v7 = vld [vmem:[#allocation2 + $0x58] sm:$0xff] }
  0x4a   : > { %v323_v53 = vld [vmem:[#allocation2 + $0xc8] sm:$0xff]  ;;  %v324_v1 = vld [vmem:[#allocation2 + $0xd0] sm:$0xff] }
  0x4d   : > { %1048 = vmatmul.msk.f32.gmra.mxu2 %vm363_vm2, %v348_v10 }
  0x4e   : > { %1056 = vmatmul.msk.f32.gmra.mxu3 %vm363_vm2, %v356_v11 }
  0x4f   : > { %1032 = vmatmul.msk.f32.gmra.mxu0 %vm363_vm2, %v332_v12  ;;  %v317_v12 = vld [vmem:[#allocation2 + $0x98] sm:$0xff] }
  0x50   : > { %1040 = vmatmul.msk.f32.gmra.mxu1 %vm363_vm2, %v340_v13  ;;  %v325_v13 = vld [vmem:[#allocation2 + $0xd8] sm:$0xff] }
  0x55   : > { %1049 = vmatmul.msk.f32.gmra.mxu2 %vm363_vm2, %v349_v14 }
  0x56   : > { %1057 = vmatmul.msk.f32.gmra.mxu3 %vm363_vm2, %v357_v15 }
  0x57   : > { %1033 = vmatmul.msk.f32.gmra.mxu0 %vm363_vm2, %v333_v16 }
  0x58   : > { %1041 = vmatmul.msk.f32.gmra.mxu1 %vm363_vm2, %v341_v17 }
  0x5d   : > { %1050 = vmatmul.msk.f32.gmra.mxu2 %vm363_vm2, %v350_v18  ;;  %v302_v18 = vld [vmem:[#allocation2 + $0x20] sm:$0xff] }
  0x5e   : > { %1058 = vmatmul.msk.f32.gmra.mxu3 %vm363_vm2, %v358_v19  ;;  %v310_v19 = vld [vmem:[#allocation2 + $0x60] sm:$0xff] }
  0x5f   : > { %1034 = vmatmul.msk.f32.gmra.mxu0 %vm363_vm2, %v334_v20 }
  0x60   : > { %1042 = vmatmul.msk.f32.gmra.mxu1 %vm363_vm2, %v342_v21 }
  0x65   : > { %1051 = vmatmul.msk.f32.gmra.mxu2 %vm363_vm2, %v351_v22 }
  0x66   : > { %1059 = vmatmul.msk.f32.gmra.mxu3 %vm363_vm2, %v359_v23 }
  0x67   : > { %1035 = vmatmul.msk.f32.gmra.mxu0 %vm363_vm2, %v335_v24  ;;  %v318_v24 = vld [vmem:[#allocation2 + $0xa0] sm:$0xff] }
  0x68   : > { %1043 = vmatmul.msk.f32.gmra.mxu1 %vm363_vm2, %v343_v25  ;;  %v326_v25 = vld [vmem:[#allocation2 + $0xe0] sm:$0xff] }
  0x6d   : > { %1052 = vmatmul.msk.f32.gmra.mxu2 %vm363_vm2, %v352_v26 }
  0x6e   : > { %1060 = vmatmul.msk.f32.gmra.mxu3 %vm363_vm2, %v360_v27 }
  0x6f   : > { %1036 = vmatmul.msk.f32.gmra.mxu0 %vm363_vm2, %v336_v28 }
  0x70   : > { %1044 = vmatmul.msk.f32.gmra.mxu1 %vm363_vm2, %v344_v29 }
  0x75   : > { %1053 = vmatmul.msk.f32.gmra.mxu2 %vm363_vm2, %v353_v30  ;;  %v303_v30 = vld [vmem:[#allocation2 + $0x28] sm:$0xff] }
  0x76   : > { %1061 = vmatmul.msk.f32.gmra.mxu3 %vm363_vm2, %v361_v31  ;;  %v311_v31 = vld [vmem:[#allocation2 + $0x68] sm:$0xff] }
  0x77   : > { %1037 = vmatmul.msk.f32.gmra.mxu0 %vm363_vm2, %v337_v32 }
  0x78   : > { %1045 = vmatmul.msk.f32.gmra.mxu1 %vm363_vm2, %v345_v33 }
  0xbc   : > { %v481_v36 = vpop.f32.mrf.mxu0 }
  0xbd   : > { %v505_v37 = vpop.f32.mrf.mxu1  ;;  %v577_v38 = vadd.f32 %v481_v36, %v298_v34  ;;  %v319_v36 = vld [vmem:[#allocation2 + $0xa8] sm:$0xff] }
  0xbe   : > { %v585_v39 = vadd.f32 %v505_v37, %v306_v35  ;;  %v327_v37 = vld [vmem:[#allocation2 + $0xe8] sm:$0xff] }
  0xbf   : > { %609 = vst.msk [vmem:[#allocation2] sm:$0xff] %vm363_vm2, %v577_v38 }
  0xc0   : > { %617 = vst.msk [vmem:[#allocation2 + $0x40] sm:$0xff] %vm363_vm2, %v585_v39  ;;  %v529_v42 = vpop.f32.mrf.mxu2 }
  0xc1   : > { %v553_v43 = vpop.f32.mrf.mxu3  ;;  %v593_v44 = vadd.f32 %v529_v42, %v314_v40  ;;  %v304_v42 = vld [vmem:[#allocation2 + $0x30] sm:$0xff] }
  0xc2   : > { %v601_v45 = vadd.f32 %v553_v43, %v322_v41  ;;  %v312_v43 = vld [vmem:[#allocation2 + $0x70] sm:$0xff] }
  0xc3   : > { %625 = vst.msk [vmem:[#allocation2 + $0x80] sm:$0xff] %vm363_vm2, %v593_v44 }
  0xc4   : > { %633 = vst.msk [vmem:[#allocation2 + $0xc0] sm:$0xff] %vm363_vm2, %v601_v45  ;;  %v484_v48 = vpop.f32.mrf.mxu0 }
  0xc5   : > { %v508_v49 = vpop.f32.mrf.mxu1  ;;  %v578_v50 = vadd.f32 %v484_v48, %v299_v46  ;;  %v320_v48 = vld [vmem:[#allocation2 + $0xb0] sm:$0xff] }
  0xc6   : > { %v586_v51 = vadd.f32 %v508_v49, %v307_v47  ;;  %v328_v49 = vld [vmem:[#allocation2 + $0xf0] sm:$0xff] }
  0xc7   : > { %610 = vst.msk [vmem:[#allocation2 + $0x8] sm:$0xff] %vm363_vm2, %v578_v50 }
  0xc8   : > { %618 = vst.msk [vmem:[#allocation2 + $0x48] sm:$0xff] %vm363_vm2, %v586_v51  ;;  %v532_v54 = vpop.f32.mrf.mxu2 }
  0xc9   : > { %v556_v55 = vpop.f32.mrf.mxu3  ;;  %v594_v56 = vadd.f32 %v532_v54, %v315_v52  ;;  %v305_v54 = vld [vmem:[#allocation2 + $0x38] sm:$0xff] }
  0xca   : > { %v602_v57 = vadd.f32 %v556_v55, %v323_v53  ;;  %v313_v55 = vld [vmem:[#allocation2 + $0x78] sm:$0xff] }
  0xcb   : > { %626 = vst.msk [vmem:[#allocation2 + $0x88] sm:$0xff] %vm363_vm2, %v594_v56 }
  0xcc   : > { %634 = vst.msk [vmem:[#allocation2 + $0xc8] sm:$0xff] %vm363_vm2, %v602_v57  ;;  %v487_v60 = vpop.f32.mrf.mxu0 }
  0xcd   : > { %v511_v61 = vpop.f32.mrf.mxu1  ;;  %v579_v62 = vadd.f32 %v487_v60, %v300_v58  ;;  %v321_v60 = vld [vmem:[#allocation2 + $0xb8] sm:$0xff] }
  0xce   : > { %v587_v63 = vadd.f32 %v511_v61, %v308_v59  ;;  %v329_v61 = vld [vmem:[#allocation2 + $0xf8] sm:$0xff] }
  0xcf   : > { %611 = vst.msk [vmem:[#allocation2 + $0x10] sm:$0xff] %vm363_vm2, %v579_v62 }
  0xd0   : > { %619 = vst.msk [vmem:[#allocation2 + $0x50] sm:$0xff] %vm363_vm2, %v587_v63  ;;  %v535_v2 = vpop.f32.mrf.mxu2 }
  0xd1   : > { %v559_v3 = vpop.f32.mrf.mxu3  ;;  %v595_v4 = vadd.f32 %v535_v2, %v316_v0 }
  0xd2   : > { %v603_v5 = vadd.f32 %v559_v3, %v324_v1 }
  0xd3   : > { %627 = vst.msk [vmem:[#allocation2 + $0x90] sm:$0xff] %vm363_vm2, %v595_v4 }
  0xd4   : > { %635 = vst.msk [vmem:[#allocation2 + $0xd0] sm:$0xff] %vm363_vm2, %v603_v5  ;;  %v490_v8 = vpop.f32.mrf.mxu0 }
  0xd5   : > { %v514_v9 = vpop.f32.mrf.mxu1  ;;  %v580_v10 = vadd.f32 %v490_v8, %v301_v6 }
  0xd6   : > { %v588_v11 = vadd.f32 %v514_v9, %v309_v7 }
  0xd7   : > { %612 = vst.msk [vmem:[#allocation2 + $0x18] sm:$0xff] %vm363_vm2, %v580_v10 }
  0xd8   : > { %620 = vst.msk [vmem:[#allocation2 + $0x58] sm:$0xff] %vm363_vm2, %v588_v11  ;;  %v538_v14 = vpop.f32.mrf.mxu2 }
  0xd9   : > { %v562_v15 = vpop.f32.mrf.mxu3  ;;  %v596_v16 = vadd.f32 %v538_v14, %v317_v12 }
  0xda   : > { %v604_v17 = vadd.f32 %v562_v15, %v325_v13 }
  0xdb   : > { %628 = vst.msk [vmem:[#allocation2 + $0x98] sm:$0xff] %vm363_vm2, %v596_v16 }
  0xdc   : > { %636 = vst.msk [vmem:[#allocation2 + $0xd8] sm:$0xff] %vm363_vm2, %v604_v17  ;;  %v493_v20 = vpop.f32.mrf.mxu0 }
  0xdd   : > { %v517_v21 = vpop.f32.mrf.mxu1  ;;  %v581_v22 = vadd.f32 %v493_v20, %v302_v18 }
  0xde   : > { %v589_v23 = vadd.f32 %v517_v21, %v310_v19 }
  0xdf   : > { %613 = vst.msk [vmem:[#allocation2 + $0x20] sm:$0xff] %vm363_vm2, %v581_v22 }
  0xe0   : > { %621 = vst.msk [vmem:[#allocation2 + $0x60] sm:$0xff] %vm363_vm2, %v589_v23  ;;  %v541_v26 = vpop.f32.mrf.mxu2 }
  0xe1   : > { %v565_v27 = vpop.f32.mrf.mxu3  ;;  %v597_v28 = vadd.f32 %v541_v26, %v318_v24 }
  0xe2   : > { %v605_v29 = vadd.f32 %v565_v27, %v326_v25 }
  0xe3   : > { %629 = vst.msk [vmem:[#allocation2 + $0xa0] sm:$0xff] %vm363_vm2, %v597_v28 }
  0xe4   : > { %637 = vst.msk [vmem:[#allocation2 + $0xe0] sm:$0xff] %vm363_vm2, %v605_v29  ;;  %v496_v32 = vpop.f32.mrf.mxu0 }
  0xe5   : > { %v520_v33 = vpop.f32.mrf.mxu1  ;;  %v582_v34 = vadd.f32 %v496_v32, %v303_v30 }
  0xe6   : > { %v590_v35 = vadd.f32 %v520_v33, %v311_v31 }
  0xe7   : > { %614 = vst.msk [vmem:[#allocation2 + $0x28] sm:$0xff] %vm363_vm2, %v582_v34 }
  0xe8   : > { %622 = vst.msk [vmem:[#allocation2 + $0x68] sm:$0xff] %vm363_vm2, %v590_v35  ;;  %v544_v38 = vpop.f32.mrf.mxu2 }
  0xe9   : > { %v568_v39 = vpop.f32.mrf.mxu3  ;;  %v598_v40 = vadd.f32 %v544_v38, %v319_v36 }
  0xea   : > { %v606_v41 = vadd.f32 %v568_v39, %v327_v37 }
  0xeb   : > { %630 = vst.msk [vmem:[#allocation2 + $0xa8] sm:$0xff] %vm363_vm2, %v598_v40 }
  0xec   : > { %638 = vst.msk [vmem:[#allocation2 + $0xe8] sm:$0xff] %vm363_vm2, %v606_v41  ;;  %v499_v44 = vpop.f32.mrf.mxu0 }
  0xed   : > { %v523_v45 = vpop.f32.mrf.mxu1  ;;  %v583_v46 = vadd.f32 %v499_v44, %v304_v42 }
  0xee   : > { %v591_v47 = vadd.f32 %v523_v45, %v312_v43 }
  0xef   : > { %615 = vst.msk [vmem:[#allocation2 + $0x30] sm:$0xff] %vm363_vm2, %v583_v46 }
  0xf0   : > { %623 = vst.msk [vmem:[#allocation2 + $0x70] sm:$0xff] %vm363_vm2, %v591_v47  ;;  %v547_v50 = vpop.f32.mrf.mxu2 }
  0xf1   : > { %v571_v51 = vpop.f32.mrf.mxu3  ;;  %v599_v52 = vadd.f32 %v547_v50, %v320_v48 }
  0xf2   : > { %v607_v53 = vadd.f32 %v571_v51, %v328_v49 }
  0xf3   : > { %631 = vst.msk [vmem:[#allocation2 + $0xb0] sm:$0xff] %vm363_vm2, %v599_v52 }
  0xf4   : > { %639 = vst.msk [vmem:[#allocation2 + $0xf0] sm:$0xff] %vm363_vm2, %v607_v53  ;;  %v502_v56 = vpop.f32.mrf.mxu0 }
  0xf5   : > { %v526_v57 = vpop.f32.mrf.mxu1  ;;  %v584_v58 = vadd.f32 %v502_v56, %v305_v54 }
  0xf6   : > { %v592_v59 = vadd.f32 %v526_v57, %v313_v55 }
  0xf7   : > { %616 = vst.msk [vmem:[#allocation2 + $0x38] sm:$0xff] %vm363_vm2, %v584_v58 }
  0xf8   : > { %624 = vst.msk [vmem:[#allocation2 + $0x78] sm:$0xff] %vm363_vm2, %v592_v59  ;;  %v550_v62 = vpop.f32.mrf.mxu2  ;;  %644 = sbr.rel (%p1062_p9) target bundleno = 332 (0x14c), region = 36 }
  0xf9   : > { %v574_v63 = vpop.f32.mrf.mxu3  ;;  %v600_v0 = vadd.f32 %v550_v62, %v321_v60 }
  0xfa   : > { %v608_v1 = vadd.f32 %v574_v63, %v329_v61 }
  0xfb   : > { %632 = vst.msk [vmem:[#allocation2 + $0xb8] sm:$0xff] %vm363_vm2, %v600_v0 }
  0xfc   : > { %640 = vst.msk [vmem:[#allocation2 + $0xf8] sm:$0xff] %vm363_vm2, %v608_v1 }
  0xfd   : > { %v645_v2 = vld [vmem:[#allocation2] sm:$0xff]  ;;  %v646_v3 = vld [vmem:[#allocation2 + $0x8] sm:$0xff]  ;;  %v647_v4 = vld [vmem:[#allocation2 + $0x10] sm:$0xff]  ;;  %vm778_vm3 = vcmask 8192  }
  0xfe   : > { %677 = vst.msk [vmem:[%s1222_s7] sm:$0xff] %vm363_vm2, %v645_v2  ;;  %v709_v5 = vsel %vm363_vm2, %v645_v2, 0.0  ;;  %v780_v6 = vmul.f32 %v645_v2, %v645_v2  ;;  %v710_v7 = vsel %vm363_vm2, %v646_v3, 0.0  ;;  %v781_v8 = vmul.f32 %v646_v3, %v646_v3  ;;  %v648_v9 = vld [vmem:[#allocation2 + $0x18] sm:$0xff]  ;;  %v649_v10 = vld [vmem:[#allocation2 + $0x20] sm:$0xff]  ;;  %v650_v14 = vld [vmem:[#allocation2 + $0x28] sm:$0xff] }
  0xff   : > { %678 = vst.msk [vmem:[%s1222_s7 + $0x8] sm:$0xff] %vm363_vm2, %v646_v3  ;;  %v711_v11 = vadd.f32 %v710_v7, %v709_v5  ;;  %v712_v12 = vsel %vm363_vm2, %v647_v4, 0.0  ;;  %v782_v13 = vmul.f32 %v647_v4, %v647_v4  ;;  %v714_v17 = vsel %vm363_vm2, %v648_v9, 0.0  ;;  %v651_v23 = vld [vmem:[#allocation2 + $0x30] sm:$0xff]  ;;  %v652_v29 = vld [vmem:[#allocation2 + $0x38] sm:$0xff]  ;;  %v653_v35 = vld [vmem:[#allocation2 + $0x40] sm:$0xff] }
 0x100   : > { %v812_v15 = vsel %vm363_vm2, %v780_v6, 0.0  ;;  %v813_v16 = vsel %vm363_vm2, %v781_v8, 0.0  ;;  %679 = vst.msk [vmem:[%s1222_s7 + $0x10] sm:$0xff] %vm363_vm2, %v647_v4  ;;  %v783_v18 = vmul.f32 %v648_v9, %v648_v9  ;;  %v784_v22 = vmul.f32 %v649_v10, %v649_v10  ;;  %v654_v39 = vld [vmem:[#allocation2 + $0x48] sm:$0xff]  ;;  %v655_v42 = vld [vmem:[#allocation2 + $0x50] sm:$0xff]  ;;  %v656_v46 = vld [vmem:[#allocation2 + $0x58] sm:$0xff] }
 0x101   : > { %v814_v19 = vadd.f32 %v813_v16, %v812_v15  ;;  %v713_v20 = vadd.f32 %v712_v12, %v711_v11  ;;  %v815_v21 = vsel %vm363_vm2, %v782_v13, 0.0  ;;  %680 = vst.msk [vmem:[%s1222_s7 + $0x18] sm:$0xff] %vm363_vm2, %v648_v9  ;;  %v716_v25 = vsel %vm363_vm2, %v649_v10, 0.0  ;;  %v657_v49 = vld [vmem:[#allocation2 + $0x60] sm:$0xff]  ;;  %v658_v53 = vld [vmem:[#allocation2 + $0x68] sm:$0xff]  ;;  %v659_v56 = vld [vmem:[#allocation2 + $0x70] sm:$0xff] }
 0x102   : > { %v817_v24 = vsel %vm363_vm2, %v783_v18, 0.0  ;;  %681 = vst.msk [vmem:[%s1222_s7 + $0x20] sm:$0xff] %vm363_vm2, %v649_v10  ;;  %v785_v26 = vmul.f32 %v650_v14, %v650_v14  ;;  %v819_v30 = vsel %vm363_vm2, %v784_v22, 0.0  ;;  %v718_v31 = vsel %vm363_vm2, %v650_v14, 0.0  ;;  %v660_v60 = vld [vmem:[#allocation2 + $0x78] sm:$0xff]  ;;  %v661_v63 = vld [vmem:[#allocation2 + $0x80] sm:$0xff] }
 0x103   : > { %v816_v27 = vadd.f32 %v815_v21, %v814_v19  ;;  %v715_v28 = vadd.f32 %v714_v17, %v713_v20  ;;  %682 = vst.msk [vmem:[%s1222_s7 + $0x28] sm:$0xff] %vm363_vm2, %v650_v14  ;;  %v786_v32 = vmul.f32 %v651_v23, %v651_v23  ;;  %v720_v37 = vsel %vm363_vm2, %v651_v23, 0.0  ;;  %v662_v3 = vld [vmem:[#allocation2 + $0x88] sm:$0xff]  ;;  %v1428_v6 = vld [vmem:[#allocation2 + $0x90] sm:$0xff]  ;;  %v1435_v10 = vld [vmem:[#allocation2 + $0x98] sm:$0xff] }
 0x104   : > { %683 = vst.msk [vmem:[%s1222_s7 + $0x30] sm:$0xff] %vm363_vm2, %v651_v23  ;;  %v821_v36 = vsel %vm363_vm2, %v785_v26, 0.0  ;;  %v787_v38 = vmul.f32 %v652_v29, %v652_v29  ;;  %v722_v44 = vsel %vm363_vm2, %v652_v29, 0.0  ;;  %v788_v45 = vmul.f32 %v653_v35, %v653_v35  ;;  %v1440_v13 = vld [vmem:[#allocation2 + $0xa0] sm:$0xff]  ;;  %v1447_v17 = vld [vmem:[#allocation2 + $0xa8] sm:$0xff]  ;;  %v1452_v20 = vld [vmem:[#allocation2 + $0xb0] sm:$0xff] }
 0x105   : > { %v818_v33 = vadd.f32 %v817_v24, %v816_v27  ;;  %v717_v34 = vadd.f32 %v716_v25, %v715_v28  ;;  %684 = vst.msk [vmem:[%s1222_s7 + $0x38] sm:$0xff] %vm363_vm2, %v652_v29  ;;  %v823_v43 = vsel %vm363_vm2, %v786_v32, 0.0  ;;  %v724_v51 = vsel %vm363_vm2, %v653_v35, 0.0  ;;  %v1459_v24 = vld [vmem:[#allocation2 + $0xb8] sm:$0xff]  ;;  %v1464_v27 = vld [vmem:[#allocation2 + $0xc0] sm:$0xff] }
 0x106   : > { %685 = vst.msk [vmem:[%s1222_s7 + $0x40] sm:$0xff] %vm363_vm2, %v653_v35  ;;  %v825_v50 = vsel %vm363_vm2, %v787_v38, 0.0  ;;  %v789_v52 = vmul.f32 %v654_v39, %v654_v39  ;;  %v827_v57 = vsel %vm363_vm2, %v788_v45, 0.0  ;;  %v726_v58 = vsel %vm363_vm2, %v654_v39, 0.0  ;;  %v1483_v38 = vld [vmem:[#allocation2 + $0xd8] sm:$0xff]  ;;  %v1495_v45 = vld [vmem:[#allocation2 + $0xe8] sm:$0xff] }
 0x107   : > { %v820_v40 = vadd.f32 %v819_v30, %v818_v33  ;;  %v719_v41 = vadd.f32 %v718_v31, %v717_v34  ;;  %686 = vst.msk [vmem:[%s1222_s7 + $0x48] sm:$0xff] %vm363_vm2, %v654_v39  ;;  %v790_v59 = vmul.f32 %v655_v42, %v655_v42  ;;  %v728_v1 = vsel %vm363_vm2, %v655_v42, 0.0  ;;  %v1471_v31 = vld [vmem:[#allocation2 + $0xc8] sm:$0xff]  ;;  %v1476_v34 = vld [vmem:[#allocation2 + $0xd0] sm:$0xff] }
 0x108   : > { %687 = vst.msk [vmem:[%s1222_s7 + $0x50] sm:$0xff] %vm363_vm2, %v655_v42  ;;  %v829_v0 = vsel %vm363_vm2, %v789_v52, 0.0  ;;  %v791_v2 = vmul.f32 %v656_v46, %v656_v46  ;;  %v730_v8 = vsel %vm363_vm2, %v656_v46, 0.0  ;;  %v792_v9 = vmul.f32 %v657_v49, %v657_v49  ;;  %v1509_v52 = vld [vmem:[#allocation2 + $0xf8] sm:$0xff] }
 0x109   : > { %v822_v47 = vadd.f32 %v821_v36, %v820_v40  ;;  %v721_v48 = vadd.f32 %v720_v37, %v719_v41  ;;  %688 = vst.msk [vmem:[%s1222_s7 + $0x58] sm:$0xff] %vm363_vm2, %v656_v46  ;;  %v831_v7 = vsel %vm363_vm2, %v790_v59, 0.0  ;;  %v732_v15 = vsel %vm363_vm2, %v657_v49, 0.0  ;;  %v1488_v41 = vld [vmem:[#allocation2 + $0xe0] sm:$0xff] }
 0x10a   : > { %689 = vst.msk [vmem:[%s1222_s7 + $0x60] sm:$0xff] %vm363_vm2, %v657_v49  ;;  %v833_v14 = vsel %vm363_vm2, %v791_v2, 0.0  ;;  %v793_v16 = vmul.f32 %v658_v53, %v658_v53  ;;  %v835_v21 = vsel %vm363_vm2, %v792_v9, 0.0  ;;  %v734_v22 = vsel %vm363_vm2, %v658_v53, 0.0 }
 0x10b   : > { %v824_v54 = vadd.f32 %v823_v43, %v822_v47  ;;  %v723_v55 = vadd.f32 %v722_v44, %v721_v48  ;;  %690 = vst.msk [vmem:[%s1222_s7 + $0x68] sm:$0xff] %vm363_vm2, %v658_v53  ;;  %v794_v23 = vmul.f32 %v659_v56, %v659_v56  ;;  %v736_v29 = vsel %vm363_vm2, %v659_v56, 0.0  ;;  %v1500_v48 = vld [vmem:[#allocation2 + $0xf0] sm:$0xff] }
 0x10c   : > { %691 = vst.msk [vmem:[%s1222_s7 + $0x70] sm:$0xff] %vm363_vm2, %v659_v56  ;;  %v837_v28 = vsel %vm363_vm2, %v793_v16, 0.0  ;;  %v795_v30 = vmul.f32 %v660_v60, %v660_v60  ;;  %v738_v36 = vsel %vm363_vm2, %v660_v60, 0.0  ;;  %v796_v37 = vmul.f32 %v661_v63, %v661_v63 }
 0x10d   : > { %v826_v61 = vadd.f32 %v825_v50, %v824_v54  ;;  %v725_v62 = vadd.f32 %v724_v51, %v723_v55  ;;  %692 = vst.msk [vmem:[%s1222_s7 + $0x78] sm:$0xff] %vm363_vm2, %v660_v60  ;;  %v839_v35 = vsel %vm363_vm2, %v794_v23, 0.0  ;;  %v740_v43 = vsel %vm363_vm2, %v661_v63, 0.0 }
 0x10e   : > { %693 = vst.msk [vmem:[%s1222_s7 + $0x80] sm:$0xff] %vm363_vm2, %v661_v63  ;;  %v841_v42 = vsel %vm363_vm2, %v795_v30, 0.0  ;;  %v797_v44 = vmul.f32 %v662_v3, %v662_v3  ;;  %v843_v49 = vsel %vm363_vm2, %v796_v37, 0.0  ;;  %v742_v50 = vsel %vm363_vm2, %v662_v3, 0.0 }
 0x10f   : > { %v828_v4 = vadd.f32 %v827_v57, %v826_v61  ;;  %v727_v5 = vadd.f32 %v726_v58, %v725_v62  ;;  %694 = vst.msk [vmem:[%s1222_s7 + $0x88] sm:$0xff] %vm363_vm2, %v662_v3  ;;  %v798_v51 = vmul.f32 %v1428_v6, %v1428_v6  ;;  %v744_v56 = vsel %vm363_vm2, %v1428_v6, 0.0 }
 0x110   : > { %695 = vst.msk [vmem:[%s1222_s7 + $0x90] sm:$0xff] %vm363_vm2, %v1428_v6  ;;  %v845_v55 = vsel %vm363_vm2, %v797_v44, 0.0  ;;  %v799_v57 = vmul.f32 %v1435_v10, %v1435_v10  ;;  %v746_v61 = vsel %vm363_vm2, %v1435_v10, 0.0  ;;  %v800_v62 = vmul.f32 %v1440_v13, %v1440_v13 }
 0x111   : > { %v830_v11 = vadd.f32 %v829_v0, %v828_v4  ;;  %v729_v12 = vadd.f32 %v728_v1, %v727_v5  ;;  %696 = vst.msk [vmem:[%s1222_s7 + $0x98] sm:$0xff] %vm363_vm2, %v1435_v10  ;;  %v847_v60 = vsel %vm363_vm2, %v798_v51, 0.0  ;;  %v748_v2 = vsel %vm363_vm2, %v1440_v13, 0.0 }
 0x112   : > { %697 = vst.msk [vmem:[%s1222_s7 + $0xa0] sm:$0xff] %vm363_vm2, %v1440_v13  ;;  %v849_v1 = vsel %vm363_vm2, %v799_v57, 0.0  ;;  %v801_v3 = vmul.f32 %v1447_v17, %v1447_v17  ;;  %v851_v6 = vsel %vm363_vm2, %v800_v62, 0.0  ;;  %v803_v13 = vmul.f32 %v1459_v24, %v1459_v24 }
 0x113   : > { %v832_v18 = vadd.f32 %v831_v7, %v830_v11  ;;  %v731_v19 = vadd.f32 %v730_v8, %v729_v12  ;;  %698 = vst.msk [vmem:[%s1222_s7 + $0xa8] sm:$0xff] %vm363_vm2, %v1447_v17  ;;  %v750_v7 = vsel %vm363_vm2, %v1447_v17, 0.0  ;;  %v802_v8 = vmul.f32 %v1452_v20, %v1452_v20 }
 0x114   : > { %699 = vst.msk [vmem:[%s1222_s7 + $0xb0] sm:$0xff] %vm363_vm2, %v1452_v20  ;;  %v853_v11 = vsel %vm363_vm2, %v801_v3, 0.0  ;;  %v752_v12 = vsel %vm363_vm2, %v1452_v20, 0.0  ;;  %v754_v17 = vsel %vm363_vm2, %v1459_v24, 0.0  ;;  %v756_v20 = vsel %vm363_vm2, %v1464_v27, 0.0 }
 0x115   : > { %v834_v25 = vadd.f32 %v833_v14, %v832_v18  ;;  %v733_v26 = vadd.f32 %v732_v15, %v731_v19  ;;  %700 = vst.msk [vmem:[%s1222_s7 + $0xb8] sm:$0xff] %vm363_vm2, %v1459_v24  ;;  %v855_v16 = vsel %vm363_vm2, %v802_v8, 0.0  ;;  %v804_v18 = vmul.f32 %v1464_v27, %v1464_v27 }
 0x116   : > { %701 = vst.msk [vmem:[%s1222_s7 + $0xc0] sm:$0xff] %vm363_vm2, %v1464_v27  ;;  %v805_v23 = vmul.f32 %v1471_v31, %v1471_v31  ;;  %v758_v24 = vsel %vm363_vm2, %v1471_v31, 0.0  ;;  %v760_v27 = vsel %vm363_vm2, %v1476_v34, 0.0  ;;  %v810_v51 = vmul.f32 %v1500_v48, %v1500_v48 }
 0x117   : > { %v836_v32 = vadd.f32 %v835_v21, %v834_v25  ;;  %v735_v33 = vadd.f32 %v734_v22, %v733_v26  ;;  %702 = vst.msk [vmem:[%s1222_s7 + $0xc8] sm:$0xff] %vm363_vm2, %v1471_v31  ;;  %v857_v22 = vsel %vm363_vm2, %v803_v13, 0.0  ;;  %v762_v31 = vsel %vm363_vm2, %v1483_v38, 0.0 }
 0x118   : > { %703 = vst.msk [vmem:[%s1222_s7 + $0xd0] sm:$0xff] %vm363_vm2, %v1476_v34 }
 0x119   : > { %v838_v39 = vadd.f32 %v837_v28, %v836_v32  ;;  %v737_v40 = vadd.f32 %v736_v29, %v735_v33  ;;  %704 = vst.msk [vmem:[%s1222_s7 + $0xd8] sm:$0xff] %vm363_vm2, %v1483_v38  ;;  %v859_v28 = vsel %vm363_vm2, %v804_v18, 0.0  ;;  %v806_v29 = vmul.f32 %v1476_v34, %v1476_v34 }
 0x11a   : > { %705 = vst.msk [vmem:[%s1222_s7 + $0xe0] sm:$0xff] %vm363_vm2, %v1488_v41  ;;  %v861_v33 = vsel %vm363_vm2, %v805_v23, 0.0  ;;  %v764_v34 = vsel %vm363_vm2, %v1488_v41, 0.0 }
 0x11b   : > { %v840_v46 = vadd.f32 %v839_v35, %v838_v39  ;;  %v739_v47 = vadd.f32 %v738_v36, %v737_v40  ;;  %706 = vst.msk [vmem:[%s1222_s7 + $0xe8] sm:$0xff] %vm363_vm2, %v1495_v45  ;;  %v807_v35 = vmul.f32 %v1483_v38, %v1483_v38  ;;  %v863_v39 = vsel %vm363_vm2, %v806_v29, 0.0 }
 0x11c   : > { %707 = vst.msk [vmem:[%s1222_s7 + $0xf0] sm:$0xff] %vm363_vm2, %v1500_v48  ;;  %v808_v40 = vmul.f32 %v1488_v41, %v1488_v41  ;;  %v766_v38 = vsel %vm363_vm2, %v1495_v45, 0.0  ;;  %v768_v41 = vsel %vm363_vm2, %v1500_v48, 0.0 }
 0x11d   : > { %v842_v53 = vadd.f32 %v841_v42, %v840_v46  ;;  %v741_v54 = vadd.f32 %v740_v43, %v739_v47  ;;  %708 = vst.msk [vmem:[%s1222_s7 + $0xf8] sm:$0xff] %vm363_vm2, %v1509_v52  ;;  %v865_v44 = vsel %vm363_vm2, %v807_v35, 0.0  ;;  %v809_v46 = vmul.f32 %v1495_v45, %v1495_v45 }
 0x11e   : > { %v770_v45 = vsel %vm363_vm2, %v1509_v52, 0.0 }
 0x11f   : > { %v844_v58 = vadd.f32 %v843_v49, %v842_v53  ;;  %v743_v59 = vadd.f32 %v742_v50, %v741_v54  ;;  %v867_v50 = vsel %vm363_vm2, %v808_v40, 0.0 }
 0x121   : > { %v846_v63 = vadd.f32 %v845_v55, %v844_v58  ;;  %v745_v0 = vadd.f32 %v744_v56, %v743_v59  ;;  %v869_v55 = vsel %vm363_vm2, %v809_v46, 0.0  ;;  %v811_v56 = vmul.f32 %v1509_v52, %v1509_v52 }
 0x122   : > { %v871_v59 = vsel %vm363_vm2, %v810_v51, 0.0 }
 0x123   : > { %v848_v4 = vadd.f32 %v847_v60, %v846_v63  ;;  %v747_v5 = vadd.f32 %v746_v61, %v745_v0  ;;  %v873_v62 = vsel %vm363_vm2, %v811_v56, 0.0 }
 0x125   : > { %v850_v9 = vadd.f32 %v849_v1, %v848_v4  ;;  %v749_v10 = vadd.f32 %v748_v2, %v747_v5 }
 0x127   : > { %v852_v14 = vadd.f32 %v851_v6, %v850_v9  ;;  %v751_v15 = vadd.f32 %v750_v7, %v749_v10 }
 0x129   : > { %v854_v19 = vadd.f32 %v853_v11, %v852_v14  ;;  %v753_v21 = vadd.f32 %v752_v12, %v751_v15 }
 0x12b   : > { %v856_v25 = vadd.f32 %v855_v16, %v854_v19  ;;  %v755_v26 = vadd.f32 %v754_v17, %v753_v21 }
 0x12d   : > { %v858_v30 = vadd.f32 %v857_v22, %v856_v25  ;;  %v757_v32 = vadd.f32 %v756_v20, %v755_v26 }
 0x12f   : > { %v860_v36 = vadd.f32 %v859_v28, %v858_v30  ;;  %v759_v37 = vadd.f32 %v758_v24, %v757_v32 }
 0x131   : > { %v862_v42 = vadd.f32 %v861_v33, %v860_v36  ;;  %v761_v43 = vadd.f32 %v760_v27, %v759_v37 }
 0x133   : > { %v864_v47 = vadd.f32 %v863_v39, %v862_v42  ;;  %v763_v49 = vadd.f32 %v762_v31, %v761_v43 }
 0x135   : > { %v866_v53 = vadd.f32 %v865_v44, %v864_v47  ;;  %v765_v54 = vadd.f32 %v764_v34, %v763_v49 }
 0x137   : > { %v868_v57 = vadd.f32 %v867_v50, %v866_v53  ;;  %v767_v58 = vadd.f32 %v766_v38, %v765_v54 }
 0x139   : > { %v870_v60 = vadd.f32 %v869_v55, %v868_v57  ;;  %v769_v61 = vadd.f32 %v768_v41, %v767_v58 }
 0x13b   : > { %v872_v63 = vadd.f32 %v871_v59, %v870_v60  ;;  %v771_v0 = vadd.f32 %v770_v45, %v769_v61 }
 0x13d   : > { %v772_v1 = vrot.slane %v771_v0, 4  ;;  %v874_v48 = vadd.f32 %v873_v62, %v872_v63 }
 0x13f   : > { %v773_v2 = vadd.f32 %v772_v1, %v771_v0  ;;  %v875_v3 = vrot.slane %v874_v48, 4 }
 0x141   : > { %v774_v4 = vrot.slane %v773_v2, 2  ;;  %v876_v5 = vadd.f32 %v875_v3, %v874_v48 }
 0x143   : > { %v775_v6 = vadd.f32 %v774_v4, %v773_v2  ;;  %v877_v7 = vrot.slane %v876_v5, 2 }
 0x145   : > { %v776_v8 = vrot.slane %v775_v6, 1  ;;  %v878_v9 = vadd.f32 %v877_v7, %v876_v5 }
 0x147   : > { %v777_v52 = vadd.f32 %v776_v8, %v775_v6  ;;  %v879_v10 = vrot.slane %v878_v9, 1 }
 0x149   : > { %779 = vst.msk [vmem:[%s257_s14] sm:$0x1] %vm778_vm3, %v777_v52  ;;  %v880_v11 = vadd.f32 %v879_v10, %v878_v9 }
 0x14b   : > { %881 = vst.msk [vmem:[%s260_s24] sm:$0x1] %vm778_vm3, %v880_v11 }
 0x14c PF: > { %s15_s19 = sadd.s32 1, %s1148_s19   ;;  %s1613_s15 = smov %s1140_s17 }
 0x14d   : > { %p12_p10 = scmp.ge.s32.totalorder %s15_s19, 29   ;;  %s1614_s16 = smov %s1144_s18 }
 0x14e   : > { %s1615_s17 = smov %s1618_s20  ;;  %s1616_s18 = smov %s1622_s21 }
 0x14f   :  { %14 = sbr.rel (!%p12_p10) target bundleno = 3 (0x3), region = 93 }

// kernel: tile.158
= control target key start
LH: loop header
LB: loop body
LE: loop exit
PB: predicated region body
PF: predicated region fallthrough
CT: control target
= control target key end

     0   :  { %s22_s0 = inlined_call_operand.vmem [shape: f32[16], index: 0, kind: input, shape index: {}]   ;;  %s23_s1 = inlined_call_operand.vmem [shape: f32[8,16], index: 1, kind: output, shape index: {}]  }
   0x1   :  { %v4_v0 = vld [vmem:[%s22_s0] ss:$0 sm:$0xff] }
   0x2   :  { %5 = vst [vmem:[%s23_s1] sm:$0xff] %v4_v0 }

// kernel: tile.159
= control target key start
LH: loop header
LB: loop body
LE: loop exit
PB: predicated region body
PF: predicated region fallthrough
CT: control target
= control target key end

     0   :  { %s67_s10 = smov 112   ;;  %s68_s11 = smov 80   ;;  %vm3_vm0 = vcmask 130048   ;;  %vm9_vm1 = vcmask 1048448   ;;  %vm15_vm2 = vcmask 917248   ;;  %vm21_vm3 = vcmask 786048   ;;  %s111_s0 = inlined_call_operand.vmem [shape: f32[8,16], index: 0, kind: input, shape index: {}]   ;;  %s112_s1 = inlined_call_operand.vmem [shape: f32[1,128], index: 1, kind: output, shape index: {}]  }
   0x1   :  { %v53_v0 = vld [vmem:[%s111_s0 + $0x7] sm:$0x1]   ;;  %v55_v1 = vld [vmem:[%s111_s0 + $0x5] sm:$0x1]   ;;  %v57_v2 = vld [vmem:[%s111_s0 + $0x3] sm:$0x1]  }
   0x2   :  { %7 = vrot.lane.b32.xlu0 %v53_v0, %s67_s10  ;;  %19 = vrot.lane.b32.xlu1 %v55_v1, %s68_s11  ;;  %s69_s14 = smov 48   ;;  %v54_v3 = vld [vmem:[%s111_s0 + $0x6] sm:$0x1]   ;;  %v56_v4 = vld [vmem:[%s111_s0 + $0x4] sm:$0x1]   ;;  %s70_s21 = smov 96  }
   0x3   :  { %31 = vrot.lane.b32.xlu2 %v57_v2, %s69_s14  ;;  %v58_v5 = vld [vmem:[%s111_s0 + $0x2] sm:$0x1]   ;;  %s71_s22 = smov 64   ;;  %s72_s23 = smov 32   ;;  %v59_v6 = vld [vmem:[%s111_s0 + $0x1] sm:$0x1]  }
   0x4   :  { %s73_s26 = smov 16   ;;  %v2_v7 = vld [vmem:[%s111_s0] sm:$0x1]   ;;  %vm27_vm4 = vcmask 654848   ;;  %vm33_vm5 = vcmask 523648   ;;  %vm39_vm6 = vcmask 392448  }
   0x5   :  { %4 = vst.msk [vmem:[#allocation0] sm:$0x1] %vm3_vm0, %v2_v7   ;;  %vm45_vm7 = vcmask 261248  }
   0xa   :  { %13 = vrot.lane.b32.xlu0 %v54_v3, %s70_s21  ;;  %25 = vrot.lane.b32.xlu1 %v56_v4, %s71_s22 }
   0xb   :  { %37 = vrot.lane.b32.xlu2 %v58_v5, %s72_s23 }
  0x12   :  { %43 = vrot.lane.b32.xlu0 %v59_v6, %s73_s26 }
  0x5d   :  { %v32_v8 = vpop.permute.xlu2 %31  }
  0x65   :  { %v38_v9 = vpop.permute.xlu2 %37  }
  0x74   :  { %v8_v10 = vpop.permute.xlu0 %7   ;;  %v20_v11 = vpop.permute.xlu1 %19  }
  0x75   :  { %10 = vst.msk [vmem:[#allocation0] sm:$0x1] %vm9_vm1, %v8_v10  }
  0x7c   :  { %v14_v12 = vpop.permute.xlu0 %13   ;;  %v26_v13 = vpop.permute.xlu1 %25  }
  0x7d   :  { %16 = vst.msk [vmem:[#allocation0] sm:$0x1] %vm15_vm2, %v14_v12  }
  0x7e   :  { %22 = vst.msk [vmem:[#allocation0] sm:$0x1] %vm21_vm3, %v20_v11  }
  0x7f   :  { %28 = vst.msk [vmem:[#allocation0] sm:$0x1] %vm27_vm4, %v26_v13  }
  0x80   :  { %34 = vst.msk [vmem:[#allocation0] sm:$0x1] %vm33_vm5, %v32_v8  }
  0x81   :  { %40 = vst.msk [vmem:[#allocation0] sm:$0x1] %vm39_vm6, %v38_v9  }
  0x84   :  { %v44_v14 = vpop.permute.xlu0 %43  }
  0x85   :  { %46 = vst.msk [vmem:[#allocation0] sm:$0x1] %vm45_vm7, %v44_v14  }
  0x8c   :  { %v49_v15 = vld [vmem:[#allocation0] sm:$0x1] }
  0x8d   :  { %52 = vst [vmem:[%s112_s1] sm:$0x1] %v49_v15 }

// kernel: dcmconv2_forward.33
= control target key start
LH: loop header
LB: loop body
LE: loop exit
PB: predicated region body
PF: predicated region fallthrough
CT: control target
= control target key end

     0   :  { %s175_s0 = inlined_call_operand.vmem [shape: f32[24,128], index: 0, kind: input, shape index: {}]   ;;  %s176_s1 = inlined_call_operand.vmem [shape: f32[1,128], index: 1, kind: input, shape index: {}]   ;;  %s177_s2 = inlined_call_operand.vmem [shape: f32[1,128], index: 2, kind: input, shape index: {}]   ;;  %s178_s3 = inlined_call_operand.vmem [shape: f32[24,128], index: 3, kind: output, shape index: {}]  }
   0x1   :  { %v14_v0 = vld [vmem:[%s175_s0] sm:$0xff]  ;;  %v15_v3 = vld [vmem:[%s175_s0 + $0x8] sm:$0xff]  ;;  %v16_v6 = vld [vmem:[%s175_s0 + $0x10] sm:$0xff] }
   0x2   :  { %v101_v1 = vld [vmem:[%s176_s1] ss:$0 sm:$0xff] }
   0x3   :  { %v102_v2 = vld [vmem:[%s177_s2] ss:$0 sm:$0xff]  ;;  %v21_v4 = vmul.f32 %v101_v1, %v14_v0  ;;  %v22_v5 = vmul.f32 %v101_v1, %v15_v3  ;;  %v23_v7 = vmul.f32 %v101_v1, %v16_v6 }
   0x5   :  { %v28_v8 = vadd.f32 %v102_v2, %v21_v4  ;;  %v29_v9 = vadd.f32 %v102_v2, %v22_v5  ;;  %v150_v10 = vadd.f32 %v102_v2, %v23_v7 }
   0x7   :  { %v98_v11 = vmul.f32 -1.442695, %v28_v8  ;;  %v99_v12 = vmul.f32 -1.442695, %v29_v9  ;;  %v100_v13 = vmul.f32 -1.442695, %v150_v10 }
   0x9   :  { %103 = vpow2.f32 %v98_v11 }
   0xa   :  { %105 = vpow2.f32 %v99_v12 }
   0xb   :  { %107 = vpow2.f32 %v100_v13 }
   0xf   :  { %v104_v14 = vpop.eup %103 }
  0x10   :  { %v106_v15 = vpop.eup %105  ;;  %v40_v16 = vadd.f32 1.0, %v104_v14 }
  0x11   :  { %v108_v17 = vpop.eup %107  ;;  %v41_v18 = vadd.f32 1.0, %v106_v15 }
  0x12   :  { %109 = vrcp.f32 %v40_v16  ;;  %v42_v19 = vadd.f32 1.0, %v108_v17  ;;  %v52_v23 = vand.u32 2147483647, %v40_v16  ;;  %v54_v24 = vand.u32 2147483648, %v40_v16 }
  0x13   :  { %111 = vrcp.f32 %v41_v18  ;;  %v69_v26 = vand.u32 2147483648, %v41_v18  ;;  %vm48_vm0 = vweird.f32 %v40_v16  ;;  %vm63_vm2 = vweird.f32 %v41_v18 }
  0x14   :  { %113 = vrcp.f32 %v42_v19  ;;  %v67_v30 = vand.u32 2147483647, %v41_v18  ;;  %vm153_vm4 = vcmp.eq.f32.partialorder %v52_v23, 8.507059e+37  ;;  %v55_v33 = vor.u32 1.1754944e-38, %v54_v24 }
  0x15   :  { %v70_v37 = vor.u32 1.1754944e-38, %v69_v26  ;;  %vm78_vm6 = vweird.f32 %v42_v19  ;;  %v84_v38 = vand.u32 2147483648, %v42_v19  ;;  %v82_v41 = vand.u32 2147483647, %v42_v19 }
  0x16   :  { %vm68_vm9 = vcmp.eq.f32.partialorder %v67_v30, 8.507059e+37 }
  0x17   :  { %v85_v47 = vor.u32 1.1754944e-38, %v84_v38  ;;  %vm83_vm11 = vcmp.eq.f32.partialorder %v82_v41, 8.507059e+37 }
  0x18   :  { %v110_v20 = vpop.eup %109 }
  0x19   :  { %v112_v21 = vpop.eup %111  ;;  %v44_v22 = vmul.f32 %v110_v20, %v40_v16  ;;  %vm49_vm1 = vweird.f32 %v110_v20 }
  0x1a   :  { %v59_v25 = vmul.f32 %v112_v21, %v41_v18  ;;  %v114_v28 = vpop.eup %113  ;;  %vm64_vm3 = vweird.f32 %v112_v21  ;;  %vm157_vm5 = vmor %vm48_vm0, %vm49_vm1 }
  0x1b   :  { %v45_v27 = vsub.f32 1.0, %v44_v22  ;;  %v74_v34 = vmul.f32 %v114_v28, %v42_v19  ;;  %vm65_vm7 = vmor %vm63_vm2, %vm64_vm3  ;;  %vm79_vm8 = vweird.f32 %v114_v28 }
  0x1c   :  { %v60_v29 = vsub.f32 1.0, %v59_v25  ;;  %vm80_vm10 = vmor %vm78_vm6, %vm79_vm8 }
  0x1d   :  { %v46_v31 = vmul.f32 %v110_v20, %v45_v27  ;;  %v75_v40 = vsub.f32 1.0, %v74_v34 }
  0x1e   :  { %v61_v36 = vmul.f32 %v112_v21, %v60_v29 }
  0x1f   :  { %v47_v39 = vadd.f32 %v110_v20, %v46_v31  ;;  %v76_v44 = vmul.f32 %v114_v28, %v75_v40 }
  0x20   :  { %v62_v42 = vadd.f32 %v112_v21, %v61_v36 }
  0x21   :  { %v51_v43 = vsel %vm157_vm5, %v110_v20, %v47_v39  ;;  %v77_v50 = vadd.f32 %v114_v28, %v76_v44 }
  0x22   :  { %v56_v45 = vsel %vm153_vm4, %v55_v33, %v51_v43  ;;  %v66_v46 = vsel %vm65_vm7, %v112_v21, %v62_v42 }
  0x23   :  { %v88_v48 = vmul.f32 %v56_v45, %v28_v8  ;;  %v71_v49 = vsel %vm68_vm9, %v70_v37, %v66_v46  ;;  %v81_v52 = vsel %vm80_vm10, %v114_v28, %v77_v50 }
  0x24   :  { %v89_v51 = vmul.f32 %v71_v49, %v29_v9  ;;  %v86_v53 = vsel %vm83_vm11, %v85_v47, %v81_v52 }
  0x25   :  { %91 = vst [vmem:[%s178_s3] sm:$0xff] %v88_v48  ;;  %v90_v54 = vmul.f32 %v86_v53, %v150_v10 }
  0x26   :  { %92 = vst [vmem:[%s178_s3 + $0x8] sm:$0xff] %v89_v51 }
  0x27   :  { %93 = vst [vmem:[%s178_s3 + $0x10] sm:$0xff] %v90_v54 }

// kernel: dcmconv2_forward.32
= control target key start
LH: loop header
LB: loop body
LE: loop exit
PB: predicated region body
PF: predicated region fallthrough
CT: control target
= control target key end

     0   :  { %vm18_vm0 = vcmask 130048   ;;  %v473_v10 = vmov 0.0   ;;  %vm362_vm1 = vcmask 122880   ;;  %s829_s1 = inlined_call_operand.vmem [shape: f32[1,16,16], index: 1, kind: input, shape index: {}]   ;;  %s830_s0 = inlined_call_operand.vmem [shape: f32[1,168,16], index: 0, kind: input, shape index: {}]   ;;  %s831_s2 = inlined_call_operand.vmem [shape: f32[168,16], index: 2, kind: output, shape index: {0}]   ;;  %s832_s3 = inlined_call_operand.vmem [shape: f32[1,1,16], index: 3, kind: output, shape index: {1}]   ;;  %s833_s4 = inlined_call_operand.vmem [shape: f32[1,1,16], index: 4, kind: output, shape index: {2}]  }
   0x1   :  { %v83_v0 = vld [vmem:[%s829_s1 + $0x8] sm:$0xff]  ;;  %v82_v1 = vld [vmem:[%s829_s1] sm:$0xff]  ;;  %v72_v4 = vld [vmem:[%s830_s0 + $0x58] sm:$0xff]  ;;  %19 = vst.msk [vmem:[#allocation2] sm:$0xff] %vm18_vm0, %v473_v10 }
   0x2   :  { %162 = vmatpush.msra.mxu0 %v83_v0  ;;  %v61_v2 = vld [vmem:[%s830_s0] sm:$0xff]  ;;  %466 = vmatpush.msra.mxu1 %v83_v0  ;;  %v66_v3 = vld [vmem:[%s830_s0 + $0x28] sm:$0xff]  ;;  %v67_v7 = vld [vmem:[%s830_s0 + $0x30] sm:$0xff]  ;;  %20 = vst.msk [vmem:[#allocation2 + $0x8] sm:$0xff] %vm18_vm0, %v473_v10 }
   0x3   :  { %467 = vmatpush.msra.mxu2 %v83_v0  ;;  %468 = vmatpush.msra.mxu3 %v83_v0  ;;  %v78_v5 = vld [vmem:[%s830_s0 + $0x88] sm:$0xff]  ;;  %v73_v8 = vld [vmem:[%s830_s0 + $0x60] sm:$0xff]  ;;  %v79_v9 = vld [vmem:[%s830_s0 + $0x90] sm:$0xff]  ;;  %21 = vst.msk [vmem:[#allocation2 + $0x10] sm:$0xff] %vm18_vm0, %v473_v10 }
   0x4   :  { %163 = vmatpush.msra.mxu0 %v82_v1  ;;  %469 = vmatpush.msra.mxu1 %v82_v1  ;;  %v62_v6 = vld [vmem:[%s830_s0 + $0x8] sm:$0xff]  ;;  %v63_v11 = vld [vmem:[%s830_s0 + $0x10] sm:$0xff]  ;;  %v68_v12 = vld [vmem:[%s830_s0 + $0x38] sm:$0xff]  ;;  %22 = vst.msk [vmem:[#allocation2 + $0x18] sm:$0xff] %vm18_vm0, %v473_v10 }
   0x5   :  { %445 = vmatmul.msk.f32.vlgmr.msra.gmra.mxu0 %vm18_vm0, %v61_v2  ;;  %450 = vmatmul.msk.f32.vlgmr.msra.gmra.mxu1 %vm18_vm0, %v66_v3  ;;  %v74_v13 = vld [vmem:[%s830_s0 + $0x68] sm:$0xff]  ;;  %v80_v14 = vld [vmem:[%s830_s0 + $0x98] sm:$0xff]  ;;  %23 = vst.msk [vmem:[#allocation2 + $0x20] sm:$0xff] %vm18_vm0, %v473_v10  ;;  %v69_v16 = vld [vmem:[%s830_s0 + $0x40] sm:$0xff] }
   0x6   :  { %470 = vmatpush.msra.mxu2 %v82_v1  ;;  %471 = vmatpush.msra.mxu3 %v82_v1  ;;  %24 = vst.msk [vmem:[#allocation2 + $0x28] sm:$0xff] %vm18_vm0, %v473_v10  ;;  %v64_v15 = vld [vmem:[%s830_s0 + $0x18] sm:$0xff]  ;;  %v75_v17 = vld [vmem:[%s830_s0 + $0x70] sm:$0xff]  ;;  %v81_v18 = vld [vmem:[%s830_s0 + $0xa0] sm:$0xff] }
   0x7   :  { %456 = vmatmul.msk.f32.vlgmr.msra.gmra.mxu2 %vm18_vm0, %v72_v4  ;;  %462 = vmatmul.msk.f32.vlgmr.msra.gmra.mxu3 %vm18_vm0, %v78_v5  ;;  %25 = vst.msk [vmem:[#allocation2 + $0x30] sm:$0xff] %vm18_vm0, %v473_v10  ;;  %v65_v19 = vld [vmem:[%s830_s0 + $0x20] sm:$0xff]  ;;  %v70_v20 = vld [vmem:[%s830_s0 + $0x48] sm:$0xff]  ;;  %v76_v21 = vld [vmem:[%s830_s0 + $0x78] sm:$0xff] }
   0x8   :  { %26 = vst.msk [vmem:[#allocation2 + $0x38] sm:$0xff] %vm18_vm0, %v473_v10  ;;  %v71_v22 = vld [vmem:[%s830_s0 + $0x50] sm:$0xff]  ;;  %v77_v23 = vld [vmem:[%s830_s0 + $0x80] sm:$0xff] }
   0x9   :  { %27 = vst.msk [vmem:[#allocation2 + $0x40] sm:$0xff] %vm18_vm0, %v473_v10  ;;  %v40_v24 = vld [vmem:[#allocation2] sm:$0xff]  ;;  %v41_v30 = vld [vmem:[#allocation2 + $0x8] sm:$0xff] }
   0xa   :  { %28 = vst.msk [vmem:[#allocation2 + $0x48] sm:$0xff] %vm18_vm0, %v473_v10  ;;  %v42_v44 = vld [vmem:[#allocation2 + $0x10] sm:$0xff] }
   0xb   :  { %29 = vst.msk [vmem:[#allocation2 + $0x50] sm:$0xff] %vm18_vm0, %v473_v10  ;;  %v43_v58 = vld [vmem:[#allocation2 + $0x18] sm:$0xff] }
   0xc   :  { %30 = vst.msk [vmem:[#allocation2 + $0x58] sm:$0xff] %vm18_vm0, %v473_v10 }
   0xd   :  { %446 = vmatmul.msk.f32.gmra.mxu0 %vm18_vm0, %v62_v6  ;;  %451 = vmatmul.msk.f32.gmra.mxu1 %vm18_vm0, %v67_v7  ;;  %31 = vst.msk [vmem:[#allocation2 + $0x60] sm:$0xff] %vm18_vm0, %v473_v10  ;;  %v45_v25 = vld [vmem:[#allocation2 + $0x28] sm:$0xff] }
   0xe   :  { %32 = vst.msk [vmem:[#allocation2 + $0x68] sm:$0xff] %vm18_vm0, %v473_v10  ;;  %v46_v31 = vld [vmem:[#allocation2 + $0x30] sm:$0xff] }
   0xf   :  { %457 = vmatmul.msk.f32.gmra.mxu2 %vm18_vm0, %v73_v8  ;;  %463 = vmatmul.msk.f32.gmra.mxu3 %vm18_vm0, %v79_v9  ;;  %33 = vst.msk [vmem:[#allocation2 + $0x70] sm:$0xff] %vm18_vm0, %v473_v10  ;;  %v47_v45 = vld [vmem:[#allocation2 + $0x38] sm:$0xff] }
  0x10   :  { %34 = vst.msk [vmem:[#allocation2 + $0x78] sm:$0xff] %vm18_vm0, %v473_v10  ;;  %v48_v60 = vld [vmem:[#allocation2 + $0x40] sm:$0xff] }
  0x11   :  { %35 = vst.msk [vmem:[#allocation2 + $0x80] sm:$0xff] %vm18_vm0, %v473_v10 }
  0x12   :  { %36 = vst.msk [vmem:[#allocation2 + $0x88] sm:$0xff] %vm18_vm0, %v473_v10 }
  0x13   :  { %37 = vst.msk [vmem:[#allocation2 + $0x90] sm:$0xff] %vm18_vm0, %v473_v10  ;;  %v51_v34 = vld [vmem:[#allocation2 + $0x58] sm:$0xff] }
  0x14   :  { %38 = vst.msk [vmem:[#allocation2 + $0x98] sm:$0xff] %vm18_vm0, %v473_v10  ;;  %v52_v50 = vld [vmem:[#allocation2 + $0x60] sm:$0xff] }
  0x15   :  { %447 = vmatmul.msk.f32.gmra.mxu0 %vm18_vm0, %v63_v11  ;;  %452 = vmatmul.msk.f32.gmra.mxu1 %vm18_vm0, %v68_v12  ;;  %39 = vst.msk [vmem:[#allocation2 + $0xa0] sm:$0xff] %vm18_vm0, %v473_v10  ;;  %v53_v0 = vld [vmem:[#allocation2 + $0x68] sm:$0xff]  ;;  %v44_v10 = vld [vmem:[#allocation2 + $0x20] sm:$0xff] }
  0x16   :  { %v49_v11 = vld [vmem:[#allocation2 + $0x48] sm:$0xff] }
  0x17   :  { %458 = vmatmul.msk.f32.gmra.mxu2 %vm18_vm0, %v74_v13  ;;  %464 = vmatmul.msk.f32.gmra.mxu3 %vm18_vm0, %v80_v14 }
  0x19   :  { %v57_v39 = vld [vmem:[#allocation2 + $0x88] sm:$0xff] }
  0x1a   :  { %v58_v53 = vld [vmem:[#allocation2 + $0x90] sm:$0xff] }
  0x1b   :  { %v59_v5 = vld [vmem:[#allocation2 + $0x98] sm:$0xff] }
  0x1d   :  { %448 = vmatmul.msk.f32.gmra.mxu0 %vm18_vm0, %v64_v15  ;;  %453 = vmatmul.msk.f32.gmra.mxu1 %vm18_vm0, %v69_v16 }
  0x1f   :  { %459 = vmatmul.msk.f32.gmra.mxu2 %vm18_vm0, %v75_v17  ;;  %465 = vmatmul.msk.f32.gmra.mxu3 %vm18_vm0, %v81_v18  ;;  %v54_v18 = vld [vmem:[#allocation2 + $0x70] sm:$0xff] }
  0x25   :  { %449 = vmatmul.msk.f32.gmra.mxu0 %vm18_vm0, %v65_v19  ;;  %454 = vmatmul.msk.f32.gmra.mxu1 %vm18_vm0, %v70_v20 }
  0x27   :  { %460 = vmatmul.msk.f32.gmra.mxu2 %vm18_vm0, %v76_v21 }
  0x2d   :  { %455 = vmatmul.msk.f32.gmra.mxu1 %vm18_vm0, %v71_v22 }
  0x2f   :  { %461 = vmatmul.msk.f32.gmra.mxu2 %vm18_vm0, %v77_v23 }
  0x82   :  { %v165_v26 = vpop.f32.mrf.mxu0  ;;  %v180_v27 = vpop.f32.mrf.mxu1 }
  0x83   :  { %v228_v28 = vadd.f32 %v165_v26, %v40_v24  ;;  %v233_v29 = vadd.f32 %v180_v27, %v45_v25  ;;  %v60_v24 = vld [vmem:[#allocation2 + $0xa0] sm:$0xff] }
  0x85   :  { %249 = vst.msk [vmem:[#allocation2] sm:$0xff] %vm18_vm0, %v228_v28 }
  0x86   :  { %254 = vst.msk [vmem:[#allocation2 + $0x28] sm:$0xff] %vm18_vm0, %v233_v29 }
  0x8a   :  { %v168_v32 = vpop.f32.mrf.mxu0  ;;  %v183_v33 = vpop.f32.mrf.mxu1 }
  0x8b   :  { %v229_v35 = vadd.f32 %v168_v32, %v41_v30  ;;  %v198_v36 = vpop.f32.mrf.mxu2  ;;  %v234_v38 = vadd.f32 %v183_v33, %v46_v31  ;;  %v216_v40 = vpop.f32.mrf.mxu3 }
  0x8c   :  { %v612_v37 = vld [vmem:[#allocation2] sm:$0xff]  ;;  %v239_v42 = vadd.f32 %v198_v36, %v51_v34  ;;  %v245_v43 = vadd.f32 %v216_v40, %v57_v39  ;;  %v55_v40 = vld [vmem:[#allocation2 + $0x78] sm:$0xff] }
  0x8d   :  { %294 = vst.msk [vmem:[%s831_s2] sm:$0xff] %vm18_vm0, %v612_v37  ;;  %v619_v41 = vld [vmem:[#allocation2 + $0x28] sm:$0xff]  ;;  %v364_v21 = vmul.f32 %v612_v37, %v612_v37  ;;  %v315_v28 = vsel %vm18_vm0, %v612_v37, 0.0 }
  0x8e   :  { %299 = vst.msk [vmem:[%s831_s2 + $0x28] sm:$0xff] %vm18_vm0, %v619_v41 }
  0x8f   :  { %250 = vst.msk [vmem:[#allocation2 + $0x8] sm:$0xff] %vm18_vm0, %v229_v35  ;;  %v50_v35 = vld [vmem:[#allocation2 + $0x50] sm:$0xff]  ;;  %v385_v37 = vsel %vm18_vm0, %v364_v21, 0.0 }
  0x90   :  { %255 = vst.msk [vmem:[#allocation2 + $0x30] sm:$0xff] %vm18_vm0, %v234_v38 }
  0x91   :  { %260 = vst.msk [vmem:[#allocation2 + $0x58] sm:$0xff] %vm18_vm0, %v239_v42 }
  0x92   :  { %v171_v46 = vpop.f32.mrf.mxu0  ;;  %v186_v47 = vpop.f32.mrf.mxu1  ;;  %266 = vst.msk [vmem:[#allocation2 + $0x88] sm:$0xff] %vm18_vm0, %v245_v43 }
  0x93   :  { %v230_v48 = vadd.f32 %v171_v46, %v42_v44  ;;  %v235_v49 = vadd.f32 %v186_v47, %v47_v45  ;;  %v201_v51 = vpop.f32.mrf.mxu2  ;;  %v219_v52 = vpop.f32.mrf.mxu3 }
  0x94   :  { %v240_v55 = vadd.f32 %v201_v51, %v52_v50  ;;  %v246_v59 = vadd.f32 %v219_v52, %v58_v53  ;;  %v369_v53 = vmul.f32 %v619_v41, %v619_v41 }
  0x95   :  { %251 = vst.msk [vmem:[#allocation2 + $0x10] sm:$0xff] %vm18_vm0, %v230_v48 }
  0x96   :  { %v274_v54 = vld [vmem:[#allocation2 + $0x8] sm:$0xff]  ;;  %256 = vst.msk [vmem:[#allocation2 + $0x38] sm:$0xff] %vm18_vm0, %v235_v49 }
  0x97   :  { %295 = vst.msk [vmem:[%s831_s2 + $0x8] sm:$0xff] %vm18_vm0, %v274_v54  ;;  %v636_v56 = vld [vmem:[#allocation2 + $0x30] sm:$0xff]  ;;  %v365_v15 = vmul.f32 %v274_v54, %v274_v54  ;;  %v316_v22 = vsel %vm18_vm0, %v274_v54, 0.0 }
  0x98   :  { %300 = vst.msk [vmem:[%s831_s2 + $0x30] sm:$0xff] %vm18_vm0, %v636_v56  ;;  %v643_v57 = vld [vmem:[#allocation2 + $0x58] sm:$0xff]  ;;  %v317_v33 = vadd.f32 %v316_v22, %v315_v28 }
  0x99   :  { %305 = vst.msk [vmem:[%s831_s2 + $0x58] sm:$0xff] %vm18_vm0, %v643_v57  ;;  %v650_v61 = vld [vmem:[#allocation2 + $0x88] sm:$0xff]  ;;  %v386_v29 = vsel %vm18_vm0, %v365_v15, 0.0 }
  0x9a   :  { %v174_v62 = vpop.f32.mrf.mxu0  ;;  %261 = vst.msk [vmem:[#allocation2 + $0x60] sm:$0xff] %vm18_vm0, %v240_v55  ;;  %v189_v63 = vpop.f32.mrf.mxu1  ;;  %v387_v42 = vadd.f32 %v386_v29, %v385_v37  ;;  %v336_v37 = vsel %vm18_vm0, %v643_v57, 0.0 }
  0x9b   :  { %v231_v1 = vadd.f32 %v174_v62, %v43_v58  ;;  %v204_v2 = vpop.f32.mrf.mxu2  ;;  %311 = vst.msk [vmem:[%s831_s2 + $0x88] sm:$0xff] %vm18_vm0, %v650_v61  ;;  %v236_v4 = vadd.f32 %v189_v63, %v48_v60  ;;  %v222_v6 = vpop.f32.mrf.mxu3  ;;  %v324_v62 = vsel %vm18_vm0, %v619_v41, 0.0  ;;  %v370_v63 = vmul.f32 %v636_v56, %v636_v56 }
  0x9c   :  { %v275_v3 = vld [vmem:[#allocation2 + $0x10] sm:$0xff]  ;;  %267 = vst.msk [vmem:[#allocation2 + $0x90] sm:$0xff] %vm18_vm0, %v246_v59  ;;  %v241_v8 = vadd.f32 %v204_v2, %v53_v0  ;;  %v247_v9 = vadd.f32 %v222_v6, %v59_v5  ;;  %v56_v6 = vld [vmem:[#allocation2 + $0x80] sm:$0xff] }
  0x9d   :  { %296 = vst.msk [vmem:[%s831_s2 + $0x10] sm:$0xff] %vm18_vm0, %v275_v3  ;;  %v663_v7 = vld [vmem:[#allocation2 + $0x38] sm:$0xff]  ;;  %v366_v23 = vmul.f32 %v275_v3, %v275_v3  ;;  %v318_v30 = vsel %vm18_vm0, %v275_v3, 0.0  ;;  %v394_v3 = vsel %vm18_vm0, %v369_v53, 0.0 }
  0x9e   :  { %301 = vst.msk [vmem:[%s831_s2 + $0x38] sm:$0xff] %vm18_vm0, %v663_v7  ;;  %v319_v43 = vadd.f32 %v318_v30, %v317_v33  ;;  %v371_v5 = vmul.f32 %v663_v7, %v663_v7 }
  0x9f   :  { %252 = vst.msk [vmem:[#allocation2 + $0x18] sm:$0xff] %vm18_vm0, %v231_v1  ;;  %v388_v38 = vsel %vm18_vm0, %v366_v23, 0.0 }
  0xa0   :  { %257 = vst.msk [vmem:[#allocation2 + $0x40] sm:$0xff] %vm18_vm0, %v236_v4  ;;  %v389_v49 = vadd.f32 %v388_v38, %v387_v42  ;;  %v326_v4 = vsel %vm18_vm0, %v636_v56, 0.0 }
  0xa1   :  { %v672_v12 = vld [vmem:[#allocation2 + $0x60] sm:$0xff]  ;;  %262 = vst.msk [vmem:[#allocation2 + $0x68] sm:$0xff] %vm18_vm0, %v241_v8 }
  0xa2   :  { %306 = vst.msk [vmem:[%s831_s2 + $0x60] sm:$0xff] %vm18_vm0, %v672_v12  ;;  %v177_v13 = vpop.f32.mrf.mxu0  ;;  %v192_v14 = vpop.f32.mrf.mxu1  ;;  %v376_v38 = vmul.f32 %v672_v12, %v672_v12 }
  0xa3   :  { %v232_v16 = vadd.f32 %v177_v13, %v44_v10  ;;  %v237_v17 = vadd.f32 %v192_v14, %v49_v11  ;;  %v207_v19 = vpop.f32.mrf.mxu2  ;;  %v680_v20 = vld [vmem:[#allocation2 + $0x90] sm:$0xff]  ;;  %268 = vst.msk [vmem:[#allocation2 + $0x98] sm:$0xff] %vm18_vm0, %v247_v9  ;;  %v225_v25 = vpop.f32.mrf.mxu3  ;;  %v396_v10 = vsel %vm18_vm0, %v370_v63, 0.0  ;;  %v328_v11 = vsel %vm18_vm0, %v663_v7, 0.0 }
  0xa4   :  { %312 = vst.msk [vmem:[%s831_s2 + $0x90] sm:$0xff] %vm18_vm0, %v680_v20  ;;  %v242_v27 = vadd.f32 %v207_v19, %v54_v18  ;;  %v248_v36 = vadd.f32 %v225_v25, %v60_v24  ;;  %v398_v18 = vsel %vm18_vm0, %v371_v5, 0.0 }
  0xa5   :  { %253 = vst.msk [vmem:[#allocation2 + $0x20] sm:$0xff] %vm18_vm0, %v232_v16 }
  0xa6   :  { %v276_v26 = vld [vmem:[#allocation2 + $0x18] sm:$0xff]  ;;  %258 = vst.msk [vmem:[#allocation2 + $0x48] sm:$0xff] %vm18_vm0, %v237_v17 }
  0xa7   :  { %297 = vst.msk [vmem:[%s831_s2 + $0x18] sm:$0xff] %vm18_vm0, %v276_v26  ;;  %v367_v31 = vmul.f32 %v276_v26, %v276_v26  ;;  %v281_v32 = vld [vmem:[#allocation2 + $0x40] sm:$0xff]  ;;  %v320_v39 = vsel %vm18_vm0, %v276_v26, 0.0 }
  0xa8   :  { %302 = vst.msk [vmem:[%s831_s2 + $0x40] sm:$0xff] %vm18_vm0, %v281_v32  ;;  %v705_v34 = vld [vmem:[#allocation2 + $0x68] sm:$0xff]  ;;  %v321_v50 = vadd.f32 %v320_v39, %v319_v43  ;;  %v372_v13 = vmul.f32 %v281_v32, %v281_v32  ;;  %v330_v19 = vsel %vm18_vm0, %v281_v32, 0.0  ;;  %v338_v43 = vsel %vm18_vm0, %v672_v12, 0.0 }
  0xa9   :  { %307 = vst.msk [vmem:[%s831_s2 + $0x68] sm:$0xff] %vm18_vm0, %v705_v34  ;;  %v390_v46 = vsel %vm18_vm0, %v367_v31, 0.0  ;;  %v375_v31 = vmul.f32 %v643_v57, %v643_v57  ;;  %v408_v57 = vsel %vm18_vm0, %v376_v38, 0.0 }
  0xaa   :  { %263 = vst.msk [vmem:[#allocation2 + $0x70] sm:$0xff] %vm18_vm0, %v242_v27  ;;  %v195_v44 = vpop.f32.mrf.mxu1  ;;  %v716_v45 = vld [vmem:[#allocation2 + $0x98] sm:$0xff]  ;;  %v391_v59 = vadd.f32 %v390_v46, %v389_v49  ;;  %v400_v24 = vsel %vm18_vm0, %v372_v13, 0.0  ;;  %v340_v49 = vsel %vm18_vm0, %v705_v34, 0.0 }
  0xab   :  { %v238_v47 = vadd.f32 %v195_v44, %v50_v35  ;;  %v210_v48 = vpop.f32.mrf.mxu2  ;;  %313 = vst.msk [vmem:[%s831_s2 + $0x98] sm:$0xff] %vm18_vm0, %v716_v45  ;;  %v406_v42 = vsel %vm18_vm0, %v375_v31, 0.0  ;;  %v377_v44 = vmul.f32 %v705_v34, %v705_v34  ;;  %v381_v34 = vmul.f32 %v650_v61, %v650_v61 }
  0xac   :  { %v277_v51 = vld [vmem:[#allocation2 + $0x20] sm:$0xff]  ;;  %v243_v52 = vadd.f32 %v210_v48, %v55_v40  ;;  %269 = vst.msk [vmem:[#allocation2 + $0xa0] sm:$0xff] %vm18_vm0, %v248_v36  ;;  %v383_v13 = vmul.f32 %v716_v45, %v716_v45 }
  0xad   :  { %298 = vst.msk [vmem:[%s831_s2 + $0x20] sm:$0xff] %vm18_vm0, %v277_v51  ;;  %v322_v54 = vsel %vm18_vm0, %v277_v51, 0.0  ;;  %v368_v55 = vmul.f32 %v277_v51, %v277_v51  ;;  %v282_v58 = vld [vmem:[#allocation2 + $0x48] sm:$0xff]  ;;  %v410_v12 = vsel %vm18_vm0, %v377_v44, 0.0 }
  0xae   :  { %v323_v60 = vadd.f32 %v322_v54, %v321_v50  ;;  %303 = vst.msk [vmem:[%s831_s2 + $0x48] sm:$0xff] %vm18_vm0, %v282_v58  ;;  %v373_v21 = vmul.f32 %v282_v58, %v282_v58  ;;  %v332_v25 = vsel %vm18_vm0, %v282_v58, 0.0 }
  0xaf   :  { %v392_v0 = vsel %vm18_vm0, %v368_v55, 0.0  ;;  %259 = vst.msk [vmem:[#allocation2 + $0x50] sm:$0xff] %vm18_vm0, %v238_v47 }
  0xb0   :  { %v325_v1 = vadd.f32 %v324_v62, %v323_v60  ;;  %v393_v2 = vadd.f32 %v392_v0, %v391_v59  ;;  %264 = vst.msk [vmem:[#allocation2 + $0x78] sm:$0xff] %vm18_vm0, %v243_v52  ;;  %v402_v32 = vsel %vm18_vm0, %v373_v21, 0.0 }
  0xb1   :  { %v287_v41 = vld [vmem:[#allocation2 + $0x70] sm:$0xff] }
  0xb2   :  { %v327_v8 = vadd.f32 %v326_v4, %v325_v1  ;;  %v395_v9 = vadd.f32 %v394_v3, %v393_v2  ;;  %308 = vst.msk [vmem:[%s831_s2 + $0x70] sm:$0xff] %vm18_vm0, %v287_v41  ;;  %v378_v50 = vmul.f32 %v287_v41, %v287_v41  ;;  %v342_v53 = vsel %vm18_vm0, %v287_v41, 0.0 }
  0xb3   :  { %v213_v14 = vpop.f32.mrf.mxu2  ;;  %v755_v56 = vld [vmem:[#allocation2 + $0xa0] sm:$0xff]  ;;  %v348_v41 = vsel %vm18_vm0, %v650_v61, 0.0 }
  0xb4   :  { %v397_v15 = vadd.f32 %v396_v10, %v395_v9  ;;  %v329_v16 = vadd.f32 %v328_v11, %v327_v8  ;;  %v244_v17 = vadd.f32 %v213_v14, %v56_v6  ;;  %314 = vst.msk [vmem:[%s831_s2 + $0xa0] sm:$0xff] %vm18_vm0, %v755_v56  ;;  %v412_v60 = vsel %vm18_vm0, %v378_v50, 0.0 }
  0xb5   :  { %v382_v6 = vmul.f32 %v680_v20, %v680_v20  ;;  %v418_v10 = vsel %vm18_vm0, %v381_v34, 0.0  ;;  %v350_v11 = vsel %vm18_vm0, %v680_v20, 0.0  ;;  %v384_v14 = vmul.f32 %v755_v56, %v755_v56 }
  0xb6   :  { %v331_v22 = vadd.f32 %v330_v19, %v329_v16  ;;  %v399_v7 = vadd.f32 %v398_v18, %v397_v15  ;;  %v283_v23 = vld [vmem:[#allocation2 + $0x50] sm:$0xff]  ;;  %265 = vst.msk [vmem:[#allocation2 + $0x80] sm:$0xff] %vm18_vm0, %v244_v17  ;;  %v352_v17 = vsel %vm18_vm0, %v716_v45, 0.0  ;;  %v354_v18 = vsel %vm18_vm0, %v755_v56, 0.0 }
  0xb7   :  { %304 = vst.msk [vmem:[%s831_s2 + $0x50] sm:$0xff] %vm18_vm0, %v283_v23  ;;  %v334_v26 = vsel %vm18_vm0, %v283_v23, 0.0  ;;  %v374_v27 = vmul.f32 %v283_v23, %v283_v23  ;;  %v288_v28 = vld [vmem:[#allocation2 + $0x78] sm:$0xff]  ;;  %v420_v61 = vsel %vm18_vm0, %v382_v6, 0.0  ;;  %v422_v20 = vsel %vm18_vm0, %v383_v13, 0.0 }
  0xb8   :  { %v333_v29 = vadd.f32 %v332_v25, %v331_v22  ;;  %v401_v30 = vadd.f32 %v400_v24, %v399_v7  ;;  %309 = vst.msk [vmem:[%s831_s2 + $0x78] sm:$0xff] %vm18_vm0, %v288_v28  ;;  %v379_v54 = vmul.f32 %v288_v28, %v288_v28  ;;  %v344_v62 = vsel %vm18_vm0, %v288_v28, 0.0 }
  0xb9   :  { %v404_v33 = vsel %vm18_vm0, %v374_v27, 0.0  ;;  %v424_v22 = vsel %vm18_vm0, %v384_v14, 0.0 }
  0xba   :  { %v403_v35 = vadd.f32 %v402_v32, %v401_v30  ;;  %v335_v36 = vadd.f32 %v334_v26, %v333_v29  ;;  %v414_v2 = vsel %vm18_vm0, %v379_v54, 0.0 }
  0xbc   :  { %v337_v39 = vadd.f32 %v336_v37, %v335_v36  ;;  %v405_v40 = vadd.f32 %v404_v33, %v403_v35 }
  0xbd   :  { %v289_v46 = vld [vmem:[#allocation2 + $0x80] sm:$0xff] }
  0xbe   :  { %v339_v47 = vadd.f32 %v338_v43, %v337_v39  ;;  %v407_v48 = vadd.f32 %v406_v42, %v405_v40  ;;  %310 = vst.msk [vmem:[%s831_s2 + $0x80] sm:$0xff] %vm18_vm0, %v289_v46  ;;  %v380_v55 = vmul.f32 %v289_v46, %v289_v46  ;;  %v346_v63 = vsel %vm18_vm0, %v289_v46, 0.0 }
  0xc0   :  { %v409_v51 = vadd.f32 %v408_v57, %v407_v48  ;;  %v341_v52 = vadd.f32 %v340_v49, %v339_v47  ;;  %v416_v3 = vsel %vm18_vm0, %v380_v55, 0.0 }
  0xc2   :  { %v343_v58 = vadd.f32 %v342_v53, %v341_v52  ;;  %v411_v59 = vadd.f32 %v410_v12, %v409_v51 }
  0xc4   :  { %v345_v0 = vadd.f32 %v344_v62, %v343_v58  ;;  %v413_v1 = vadd.f32 %v412_v60, %v411_v59 }
  0xc6   :  { %v415_v4 = vadd.f32 %v414_v2, %v413_v1  ;;  %v347_v5 = vadd.f32 %v346_v63, %v345_v0 }
  0xc8   :  { %v349_v8 = vadd.f32 %v348_v41, %v347_v5  ;;  %v417_v9 = vadd.f32 %v416_v3, %v415_v4 }
  0xca   :  { %v419_v15 = vadd.f32 %v418_v10, %v417_v9  ;;  %v351_v16 = vadd.f32 %v350_v11, %v349_v8 }
  0xcc   :  { %v353_v19 = vadd.f32 %v352_v17, %v351_v16  ;;  %v421_v21 = vadd.f32 %v420_v61, %v419_v15 }
  0xce   :  { %v423_v7 = vadd.f32 %v422_v20, %v421_v21  ;;  %v355_v23 = vadd.f32 %v354_v18, %v353_v19 }
  0xd0   :  { %v356_v24 = vrot.slane %v355_v23, 4  ;;  %v425_v25 = vadd.f32 %v424_v22, %v423_v7 }
  0xd2   :  { %v357_v26 = vadd.f32 %v356_v24, %v355_v23  ;;  %v426_v27 = vrot.slane %v425_v25, 4 }
  0xd4   :  { %v358_v28 = vrot.slane %v357_v26, 2  ;;  %v427_v29 = vadd.f32 %v426_v27, %v425_v25 }
  0xd6   :  { %v359_v30 = vadd.f32 %v358_v28, %v357_v26  ;;  %v428_v31 = vrot.slane %v427_v29, 2 }
  0xd8   :  { %v360_v45 = vrot.slane %v359_v30, 1  ;;  %v429_v32 = vadd.f32 %v428_v31, %v427_v29 }
  0xda   :  { %v361_v56 = vadd.f32 %v360_v45, %v359_v30  ;;  %v430_v33 = vrot.slane %v429_v32, 1 }
  0xdc   :  { %363 = vst.msk [vmem:[%s832_s3] sm:$0x1] %vm362_vm1, %v361_v56  ;;  %v431_v35 = vadd.f32 %v430_v33, %v429_v32 }
  0xde   :  { %432 = vst.msk [vmem:[%s833_s4] sm:$0x1] %vm362_vm1, %v431_v35 }

</bundles_post_ra>
